<compile_context>
chip_gen: v7x
topology: tpu7x:2x2x1
jax: 0.10.0
libtpu: 0.0.40
codegen_flags: <defaults>
</compile_context>

<pallas_src>
import functools

import jax
import jax.numpy as jnp
import numpy as np
from jax import lax
from jax.experimental import pallas as pl
from jax.experimental.pallas import tpu as pltpu

EPS = 1e-5                                  # PyTorch BatchNorm default
C_IN, DEPTH, HEIGHT, WIDTH = 3, 4, 16, 16   # state_size = (3, 4, 16, 16)
F1, F2, F3, FC1 = 128, 256, 256, 1024       # n_filter_1/2/3, fc1 width
OUT_PAD = 128                               # fc2 output lane-padded width


# ----------------------------- fused Pallas kernel -----------------------------

def _fused_forward_kernel(
        cols_ref, w1_ref, b1_ref, g1_ref, be1_ref,
        b2_ref, g2_ref, be2_ref,
        b3_ref, g3_ref, be3_ref,
        fc1b_ref, fc2b_ref,
        w2_hbm, w3_hbm, fc1w_hbm, fc2w_hbm,
        out_ref,
        w2_v, w3_v, fc1_v, fc2_v, sems, a2_scr, hi_scr, lo_scr,
        *, n_batch):
    """Whole QNetworkFull forward on a single VMEM-resident activation set."""
    f32, bf16 = jnp.float32, jnp.bfloat16
    n = n_batch

    # ---- start ALL weight prefetches (consumption order) at kernel entry --------------
    # Only ~150 KiB of small operands go through the blocking gridless prologue; the
    # ~3 MiB of matmul weights stream behind conv1 / pool / bn1 / conv2 compute.
    cp_w2 = pltpu.make_async_copy(w2_hbm, w2_v, sems.at[0]); cp_w2.start()
    cp_w3 = pltpu.make_async_copy(w3_hbm, w3_v, sems.at[1]); cp_w3.start()
    cp_f1 = pltpu.make_async_copy(fc1w_hbm, fc1_v, sems.at[2]); cp_f1.start()
    cp_f2 = pltpu.make_async_copy(fc2w_hbm, fc2_v, sems.at[3]); cp_f2.start()

    # ---- conv1 (block-diagonal weight -> columns (dy2,dx2,c1)) + maxpool(1,2,2) -------
    # Processed per pool-offset slab so the (64n,512) conv1 map never lives in regs;
    # bias + ReLU are applied after the max (monotone, bias constant per window).
    rows = 16 * n                                      # rows per pool slab / conv2 row
    pooled = None
    for q in range(4):                                 # q = (dh, dw) pool offset
        part = jnp.dot(cols_ref[q * rows:(q + 1) * rows, :], w1_ref[...],
                       preferred_element_type=f32)     # (16n, 512) bf16 x bf16 MXU
        pooled = part if pooled is None else jnp.maximum(pooled, part)
    pooled = jnp.maximum(pooled + b1_ref[...], 0.0)    # (16n, 512)

    # ---- bn1: per-channel batch stats over rows x 4 (dy2,dx2) lane groups -------------
    cnt = 4.0 * rows                                   # 64n position samples / channel
    ssum = jnp.sum(pooled, axis=0, keepdims=True)                  # (1, 512)
    sqsum = jnp.sum(pooled * pooled, axis=0, keepdims=True)        # (1, 512)
    mu = (ssum[:, 0:F1] + ssum[:, F1:2 * F1]
          + ssum[:, 2 * F1:3 * F1] + ssum[:, 3 * F1:4 * F1]) * (1.0 / cnt)
    ex2 = (sqsum[:, 0:F1] + sqsum[:, F1:2 * F1]
           + sqsum[:, 2 * F1:3 * F1] + sqsum[:, 3 * F1:4 * F1]) * (1.0 / cnt)
    inv = lax.rsqrt(ex2 - mu * mu + EPS)                           # (1, 128)
    mu4 = jnp.concatenate([mu, mu, mu, mu], axis=1)                # (1, 512)
    inv4 = jnp.concatenate([inv, inv, inv, inv], axis=1)
    x1 = (pooled - mu4) * (inv4 * g1_ref[...]) + be1_ref[...]      # (16n, 512)

    # ---- conv2: single K=512 contraction, hi+lo bf16 split (f32-exact) + ReLU + bn2 ---
    xh = x1.astype(bf16)
    xl = (x1 - xh.astype(f32)).astype(bf16)
    cp_w2.wait()
    w2 = w2_v[...]
    acc2 = (jnp.dot(xh, w2, preferred_element_type=f32)
            + jnp.dot(xl, w2, preferred_element_type=f32))         # (16n, 256)
    a2 = jnp.maximum(acc2 + b2_ref[...], 0.0)
    mu2 = jnp.mean(a2, axis=0, keepdims=True)
    var2 = jnp.mean(jnp.square(a2 - mu2), axis=0, keepdims=True)
    a2 = (a2 - mu2) * (lax.rsqrt(var2 + EPS) * g2_ref[...]) + be2_ref[...]

    # ---- conv3: repack 16 tap slabs -> one (n, 4096) im2col row per sample, then ------
    # ---- ONE fused K=4096 contraction per bf16 split half + ReLU + bn3 ----------------
    a2_scr[...] = a2                                   # (16n, 256), rows (d,h2,w2 | n)
    for p in range(16):                                # p = (kd, kh, kw) conv3 tap
        piece = a2_scr[p * n:(p + 1) * n, :]           # (n, 256) f32
        ph = piece.astype(bf16)
        hi_scr[:, p * F2:(p + 1) * F2] = ph
        lo_scr[:, p * F2:(p + 1) * F2] = (piece - ph.astype(f32)).astype(bf16)
    cp_w3.wait()                                       # prefetched 2 MiB w3 now needed
    acc3 = (jnp.dot(hi_scr[...], w3_v[...], preferred_element_type=f32)
            + jnp.dot(lo_scr[...], w3_v[...], preferred_element_type=f32))   # (n, 256)
    a3 = jnp.maximum(acc3 + b3_ref[...], 0.0)
    mu3 = jnp.mean(a3, axis=0, keepdims=True)
    var3 = jnp.mean(jnp.square(a3 - mu3), axis=0, keepdims=True)
    a3 = (a3 - mu3) * (lax.rsqrt(var3 + EPS) * g3_ref[...]) + be3_ref[...]

    # ---- fc1 + ReLU, fc2 (plain bf16 LHS; lane-dense 128-wide unmasked store) ---------
    cp_f1.wait()
    h = jnp.maximum(jnp.dot(a3.astype(bf16), fc1_v[...],
                            preferred_element_type=f32) + fc1b_ref[...], 0.0)  # (n,1024)
    cp_f2.wait()
    out_ref[...] = (jnp.dot(h.astype(bf16), fc2_v[...],
                            preferred_element_type=f32) + fc2b_ref[...])       # (n,128)


# ----------------------------- wrapper / layout plumbing -----------------------------

def _im2col_conv1(x_ncdhw):
    """conv1 im2col as a pure reshape+transpose (no gather).

    H (and W) decompose as h = 8*h2 + 4*dy2 + 2*dh + dy1 where h2 = conv2/conv3 output
    row, dy2 = conv2 kernel tap, dh = maxpool window offset, dy1 = conv1 kernel tap.
    Rows are ordered (dh, dw, d, h2, w2, n) so the max-pool is an elementwise max of 4
    contiguous row slabs and the conv3 repack slabs are contiguous; columns are ordered
    (dy2, dx2, dy1, dx1, c) so a block-diagonal conv1 weight makes conv2 a single
    K=512 contraction.
    """
    n = x_ncdhw.shape[0]
    xa = x_ncdhw.reshape(n, C_IN, DEPTH, 2, 2, 2, 2, 2, 2, 2, 2)
    # axes: 0 n | 1 c | 2 d | 3 h2, 4 dy2, 5 dh, 6 dy1 | 7 w2, 8 dx2, 9 dw, 10 dx1
    xa = xa.transpose(5, 9, 2, 3, 7, 0, 4, 8, 6, 10, 1)
    return xa.reshape(16 * DEPTH * n, 16 * C_IN)       # (64n, 48)


@functools.partial(jax.jit, static_argnames=("action_size",))
def qnetwork_forward(prep, state_ncdhw, *, action_size):
    n = state_ncdhw.shape[0]
    cols = _im2col_conv1(state_ncdhw.astype(jnp.float32))          # (64n, 48) f32
    hi = cols.astype(jnp.bfloat16)                                 # hi+lo bf16 split of
    lo = (cols - hi.astype(jnp.float32)).astype(jnp.bfloat16)      # the input columns
    cols_in = jnp.concatenate([hi, lo], axis=1)                    # (64n, 96) bf16

    vmem = pl.BlockSpec(memory_space=pltpu.MemorySpace.VMEM)
    hbm = pl.BlockSpec(memory_space=pl.ANY)    # big weights: manual prefetch DMA

    out_pad = pl.pallas_call(
        functools.partial(_fused_forward_kernel, n_batch=n),
        out_shape=jax.ShapeDtypeStruct((n, OUT_PAD), jnp.float32),
        in_specs=[vmem] * 13 + [hbm] * 4,
        out_specs=vmem,
        scratch_shapes=[
            pltpu.VMEM((4 * F1, F2), jnp.bfloat16),      # w2 landing buffer (256 KiB)
            pltpu.VMEM((16 * F2, F3), jnp.bfloat16),     # w3 landing buffer (2 MiB)
            pltpu.VMEM((F3, FC1), jnp.bfloat16),         # fc1_w landing buffer (512 KiB)
            pltpu.VMEM((FC1, OUT_PAD), jnp.bfloat16),    # fc2_w landing buffer (256 KiB)
            pltpu.SemaphoreType.DMA((4,)),
            pltpu.VMEM((16 * n, F2), jnp.float32),       # conv2 output staging
            pltpu.VMEM((n, 16 * F2), jnp.bfloat16),      # conv3 im2col LHS (hi)
            pltpu.VMEM((n, 16 * F2), jnp.bfloat16),      # conv3 im2col LHS (lo)
        ],
    )(cols_in,
      prep["w1s"], prep["b1t"], prep["g1t"], prep["be1t"],
      prep["b2"], prep["g2"], prep["be2"],
      prep["b3"], prep["g3"], prep["be3"],
      prep["fc1_b"], prep["fc2_b"],
      prep["w2"], prep["w3"], prep["fc1_w"], prep["fc2_w"])
    return out_pad[:, :action_size]


# ----------------------------- parameters -----------------------------

def init_params(key, action_size):
    """Synthetic init matching QNetworkFull shapes (state_size=(3,4,16,16),
    n_filter_1=128, n_filter_2=256, n_filter_3=256).  Conv weights use DHWIO layout
    (kd, kh, kw, Cin, Cout); weight values are snapped to bf16-representable values so
    the kernel can store/stream them as bf16 losslessly.  BatchNorm gamma/beta are
    randomized so the affine path is actually exercised by the test."""
    ks = jax.random.split(key, 16)
    s = 0.05
    snap = lambda a: a.astype(jnp.bfloat16).astype(jnp.float32)
    return {
        "w1": snap(s * jax.random.normal(ks[0], (1, 2, 2, C_IN, F1), jnp.float32)),
        "b1": s * jax.random.normal(ks[1], (1, F1), jnp.float32),
        "g1": 1.0 + 0.1 * jax.random.normal(ks[2], (1, F1), jnp.float32),
        "be1": 0.1 * jax.random.normal(ks[3], (1, F1), jnp.float32),
        "w2": snap(s * jax.random.normal(ks[4], (1, 2, 2, F1, F2), jnp.float32)),
        "b2": s * jax.random.normal(ks[5], (1, F2), jnp.float32),
        "g2": 1.0 + 0.1 * jax.random.normal(ks[6], (1, F2), jnp.float32),
        "be2": 0.1 * jax.random.normal(ks[7], (1, F2), jnp.float32),
        "w3": snap(s * jax.random.normal(ks[8], (DEPTH, 2, 2, F2, F3), jnp.float32)),
        "b3": s * jax.random.normal(ks[9], (1, F3), jnp.float32),
        "g3": 1.0 + 0.1 * jax.random.normal(ks[10], (1, F3), jnp.float32),
        "be3": 0.1 * jax.random.normal(ks[11], (1, F3), jnp.float32),
        # conv tower output for (3,4,16,16): 256*1*1*1 = 256 features
        "fc1_w": snap(s * jax.random.normal(ks[12], (F3, FC1), jnp.float32)),
        "fc1_b": s * jax.random.normal(ks[13], (1, FC1), jnp.float32),
        "fc2_w": snap(s * jax.random.normal(ks[14], (FC1, action_size), jnp.float32)),
        "fc2_b": s * jax.random.normal(ks[15], (1, action_size), jnp.float32),
    }


def prepare_params(p):
    """One-time reshape / tile / pad / cast into the matmul-ready, bf16-stored form the
    fused kernel consumes (lossless: weight values are already bf16-representable)."""
    bf16 = jnp.bfloat16
    action_size = p["fc2_w"].shape[1]
    assert action_size <= OUT_PAD
    # conv1: block-diagonal over the 4 conv2 taps (columns become (dy2,dx2,c1)),
    # then stacked twice along K for the hi|lo bf16 split of the input columns.
    w1flat = p["w1"].reshape(4 * C_IN, F1)                          # rows (dy1, dx1, c)
    w1blk = jnp.kron(jnp.eye(4, dtype=jnp.float32), w1flat)         # (48, 512)
    w1s = jnp.concatenate([w1blk, w1blk], axis=0).astype(bf16)      # (96, 512)
    tile4 = lambda v: jnp.tile(v, (1, 4))                           # (1,128) -> (1,512)
    return {
        "w1s": w1s,
        "b1t": tile4(p["b1"]), "g1t": tile4(p["g1"]), "be1t": tile4(p["be1"]),
        "b2": p["b2"], "g2": p["g2"], "be2": p["be2"],
        "b3": p["b3"], "g3": p["g3"], "be3": p["be3"],
        "fc1_b": p["fc1_b"],
        "fc2_b": jnp.pad(p["fc2_b"], ((0, 0), (0, OUT_PAD - action_size))),
        "w2": p["w2"].reshape(4 * F1, F2).astype(bf16),             # rows (kh, kw, cin)
        "w3": p["w3"].reshape(16 * F2, F3).astype(bf16),            # rows (kd,kh,kw,cin)
        "fc1_w": p["fc1_w"].astype(bf16),
        "fc2_w": jnp.pad(p["fc2_w"], ((0, 0), (0, OUT_PAD - action_size))).astype(bf16),
    }


# ----------------------------- pure-JAX reference (spec) -----------------------------

def reference_forward(p, state_ncdhw):
    x = jnp.transpose(state_ncdhw, (0, 2, 3, 4, 1)).astype(jnp.float32)

    def conv(x, w, b, stride):
        out = lax.conv_general_dilated(
            x, w, window_strides=stride, padding="VALID",
            dimension_numbers=("NDHWC", "DHWIO", "NDHWC"))
        return jax.nn.relu(out + b.reshape(1, 1, 1, 1, -1))

    def bn(x, g, be):
        mean = jnp.mean(x, axis=(0, 1, 2, 3), keepdims=True)
        var = jnp.mean(jnp.square(x - mean), axis=(0, 1, 2, 3), keepdims=True)
        return ((x - mean) * lax.rsqrt(var + EPS) * g.reshape(1, 1, 1, 1, -1)
                + be.reshape(1, 1, 1, 1, -1))

    x = conv(x, p["w1"], p["b1"], (1, 2, 2))
    x = lax.reduce_window(x, -jnp.inf, lax.max,
                          (1, 1, 2, 2, 1), (1, 1, 2, 2, 1), "VALID")
    x = bn(x, p["g1"], p["be1"])
    x = conv(x, p["w2"], p["b2"], (1, 2, 2))
    x = bn(x, p["g2"], p["be2"])
    x = conv(x, p["w3"], p["b3"], (1, 2, 2))
    x = bn(x, p["g3"], p["be3"])
    n = x.shape[0]
    x = jnp.transpose(x, (0, 4, 1, 2, 3)).reshape(n, -1)   # torch x.view(N, -1)
    x = jax.nn.relu(x @ p["fc1_w"] + p["fc1_b"])
    x = x @ p["fc2_w"] + p["fc2_b"]
    return x


if __name__ == "__main__":
    key = jax.random.PRNGKey(0)
    pkey, xkey = jax.random.split(key)
    action_size = 4
    params = init_params(pkey, action_size)
    prep = prepare_params(params)

    # state_size = (3, 4, 16, 16) per sample; batch = 2 -> NCDHW [2, 3, 4, 16, 16]
    state = jax.random.normal(xkey, (2, C_IN, DEPTH, HEIGHT, WIDTH), jnp.float32)

    out = qnetwork_forward(prep, state, action_size=action_size)
    out = jax.block_until_ready(out)
    assert out.shape == (2, action_size), out.shape

    ref = reference_forward(params, state)
    np.testing.assert_allclose(np.asarray(out), np.asarray(ref), rtol=2e-2, atol=2e-2)

    print("KERNEL_OK")
</pallas_src>

<mosaic_0001>
module attributes {stable_mosaic.version = 11 : i64} {
  func.func @_fused_forward_kernel(%arg0: memref<128x96xbf16, #tpu.memory_space<vmem>>, %arg1: memref<96x512xbf16, #tpu.memory_space<vmem>>, %arg2: memref<1x512xf32, #tpu.memory_space<vmem>>, %arg3: memref<1x512xf32, #tpu.memory_space<vmem>>, %arg4: memref<1x512xf32, #tpu.memory_space<vmem>>, %arg5: memref<1x256xf32, #tpu.memory_space<vmem>>, %arg6: memref<1x256xf32, #tpu.memory_space<vmem>>, %arg7: memref<1x256xf32, #tpu.memory_space<vmem>>, %arg8: memref<1x256xf32, #tpu.memory_space<vmem>>, %arg9: memref<1x256xf32, #tpu.memory_space<vmem>>, %arg10: memref<1x256xf32, #tpu.memory_space<vmem>>, %arg11: memref<1x1024xf32, #tpu.memory_space<vmem>>, %arg12: memref<1x128xf32, #tpu.memory_space<vmem>>, %arg13: memref<512x256xbf16, #tpu.memory_space<any>>, %arg14: memref<4096x256xbf16, #tpu.memory_space<any>>, %arg15: memref<256x1024xbf16, #tpu.memory_space<any>>, %arg16: memref<1024x128xbf16, #tpu.memory_space<any>>, %arg17: memref<2x128xf32, #tpu.memory_space<vmem>>, %arg18: memref<512x256xbf16, #tpu.memory_space<vmem>>, %arg19: memref<4096x256xbf16, #tpu.memory_space<vmem>>, %arg20: memref<256x1024xbf16, #tpu.memory_space<vmem>>, %arg21: memref<1024x128xbf16, #tpu.memory_space<vmem>>, %arg22: memref<4x!tpu.dma_semaphore, #tpu.memory_space<semaphore_mem>>, %arg23: memref<32x256xf32, #tpu.memory_space<vmem>>, %arg24: memref<2x4096xbf16, #tpu.memory_space<vmem>>, %arg25: memref<2x4096xbf16, #tpu.memory_space<vmem>>) attributes {dimension_semantics = [], scalar_prefetch = 0 : i64, scratch_operands = 8 : i64, tpu.core_type = #tpu.core_type<tc>} {
    %c0_i32 = arith.constant 0 : i32
    %0 = tpu.memref_slice %arg22[%c0_i32] : memref<4x!tpu.dma_semaphore, #tpu.memory_space<semaphore_mem>> -> memref<1x!tpu.dma_semaphore, #tpu.memory_space<semaphore_mem>>
    %1 = tpu.memref_squeeze %0 : memref<1x!tpu.dma_semaphore, #tpu.memory_space<semaphore_mem>> -> memref<!tpu.dma_semaphore, #tpu.memory_space<semaphore_mem>>
    tpu.enqueue_dma source(%arg13 : memref<512x256xbf16, #tpu.memory_space<any>>) target(%arg18 : memref<512x256xbf16, #tpu.memory_space<vmem>>) target_semaphore(%1 : memref<!tpu.dma_semaphore, #tpu.memory_space<semaphore_mem>>)
    %c1_i32 = arith.constant 1 : i32
    %2 = tpu.memref_slice %arg22[%c1_i32] : memref<4x!tpu.dma_semaphore, #tpu.memory_space<semaphore_mem>> -> memref<1x!tpu.dma_semaphore, #tpu.memory_space<semaphore_mem>>
    %3 = tpu.memref_squeeze %2 : memref<1x!tpu.dma_semaphore, #tpu.memory_space<semaphore_mem>> -> memref<!tpu.dma_semaphore, #tpu.memory_space<semaphore_mem>>
    tpu.enqueue_dma source(%arg14 : memref<4096x256xbf16, #tpu.memory_space<any>>) target(%arg19 : memref<4096x256xbf16, #tpu.memory_space<vmem>>) target_semaphore(%3 : memref<!tpu.dma_semaphore, #tpu.memory_space<semaphore_mem>>)
    %c2_i32 = arith.constant 2 : i32
    %4 = tpu.memref_slice %arg22[%c2_i32] : memref<4x!tpu.dma_semaphore, #tpu.memory_space<semaphore_mem>> -> memref<1x!tpu.dma_semaphore, #tpu.memory_space<semaphore_mem>>
    %5 = tpu.memref_squeeze %4 : memref<1x!tpu.dma_semaphore, #tpu.memory_space<semaphore_mem>> -> memref<!tpu.dma_semaphore, #tpu.memory_space<semaphore_mem>>
    tpu.enqueue_dma source(%arg15 : memref<256x1024xbf16, #tpu.memory_space<any>>) target(%arg20 : memref<256x1024xbf16, #tpu.memory_space<vmem>>) target_semaphore(%5 : memref<!tpu.dma_semaphore, #tpu.memory_space<semaphore_mem>>)
    %c3_i32 = arith.constant 3 : i32
    %6 = tpu.memref_slice %arg22[%c3_i32] : memref<4x!tpu.dma_semaphore, #tpu.memory_space<semaphore_mem>> -> memref<1x!tpu.dma_semaphore, #tpu.memory_space<semaphore_mem>>
    %7 = tpu.memref_squeeze %6 : memref<1x!tpu.dma_semaphore, #tpu.memory_space<semaphore_mem>> -> memref<!tpu.dma_semaphore, #tpu.memory_space<semaphore_mem>>
    tpu.enqueue_dma source(%arg16 : memref<1024x128xbf16, #tpu.memory_space<any>>) target(%arg21 : memref<1024x128xbf16, #tpu.memory_space<vmem>>) target_semaphore(%7 : memref<!tpu.dma_semaphore, #tpu.memory_space<semaphore_mem>>)
    %c0 = arith.constant 0 : index
    %c0_0 = arith.constant 0 : index
    %8 = vector.load %arg0[%c0, %c0_0] : memref<128x96xbf16, #tpu.memory_space<vmem>>, vector<32x96xbf16>
    %c0_1 = arith.constant 0 : index
    %c0_2 = arith.constant 0 : index
    %9 = vector.load %arg1[%c0_1, %c0_2] : memref<96x512xbf16, #tpu.memory_space<vmem>>, vector<96x512xbf16>
    %cst = arith.constant dense<0.000000e+00> : vector<32x512xf32>
    %10 = tpu.matmul %8, %9, %cst {dimension_numbers = #tpu.dot_dimension_numbers<[1], [0], [0], [1], [0, 0, 1, 1], [], []>} : vector<32x96xbf16>, vector<96x512xbf16>, vector<32x512xf32> -> vector<32x512xf32>
    %c32 = arith.constant 32 : index
    %c0_3 = arith.constant 0 : index
    %11 = vector.load %arg0[%c32, %c0_3] : memref<128x96xbf16, #tpu.memory_space<vmem>>, vector<32x96xbf16>
    %c0_4 = arith.constant 0 : index
    %c0_5 = arith.constant 0 : index
    %12 = vector.load %arg1[%c0_4, %c0_5] : memref<96x512xbf16, #tpu.memory_space<vmem>>, vector<96x512xbf16>
    %cst_6 = arith.constant dense<0.000000e+00> : vector<32x512xf32>
    %13 = tpu.matmul %11, %12, %cst_6 {dimension_numbers = #tpu.dot_dimension_numbers<[1], [0], [0], [1], [0, 0, 1, 1], [], []>} : vector<32x96xbf16>, vector<96x512xbf16>, vector<32x512xf32> -> vector<32x512xf32>
    %14 = arith.maximumf %10, %13 : vector<32x512xf32>
    %c64 = arith.constant 64 : index
    %c0_7 = arith.constant 0 : index
    %15 = vector.load %arg0[%c64, %c0_7] : memref<128x96xbf16, #tpu.memory_space<vmem>>, vector<32x96xbf16>
    %c0_8 = arith.constant 0 : index
    %c0_9 = arith.constant 0 : index
    %16 = vector.load %arg1[%c0_8, %c0_9] : memref<96x512xbf16, #tpu.memory_space<vmem>>, vector<96x512xbf16>
    %cst_10 = arith.constant dense<0.000000e+00> : vector<32x512xf32>
    %17 = tpu.matmul %15, %16, %cst_10 {dimension_numbers = #tpu.dot_dimension_numbers<[1], [0], [0], [1], [0, 0, 1, 1], [], []>} : vector<32x96xbf16>, vector<96x512xbf16>, vector<32x512xf32> -> vector<32x512xf32>
    %18 = arith.maximumf %14, %17 : vector<32x512xf32>
    %c96 = arith.constant 96 : index
    %c0_11 = arith.constant 0 : index
    %19 = vector.load %arg0[%c96, %c0_11] : memref<128x96xbf16, #tpu.memory_space<vmem>>, vector<32x96xbf16>
    %c0_12 = arith.constant 0 : index
    %c0_13 = arith.constant 0 : index
    %20 = vector.load %arg1[%c0_12, %c0_13] : memref<96x512xbf16, #tpu.memory_space<vmem>>, vector<96x512xbf16>
    %cst_14 = arith.constant dense<0.000000e+00> : vector<32x512xf32>
    %21 = tpu.matmul %19, %20, %cst_14 {dimension_numbers = #tpu.dot_dimension_numbers<[1], [0], [0], [1], [0, 0, 1, 1], [], []>} : vector<32x96xbf16>, vector<96x512xbf16>, vector<32x512xf32> -> vector<32x512xf32>
    %22 = arith.maximumf %18, %21 : vector<32x512xf32>
    %c0_15 = arith.constant 0 : index
    %c0_16 = arith.constant 0 : index
    %23 = vector.load %arg2[%c0_15, %c0_16] : memref<1x512xf32, #tpu.memory_space<vmem>>, vector<1x512xf32>
    %24 = vector.broadcast %23 : vector<1x512xf32> to vector<32x512xf32>
    %25 = arith.addf %22, %24 : vector<32x512xf32>
    %cst_17 = arith.constant 0.000000e+00 : f32
    %26 = vector.broadcast %cst_17 : f32 to vector<32x512xf32>
    %27 = arith.maximumf %25, %26 : vector<32x512xf32>
    %cst_18 = arith.constant dense<0.000000e+00> : vector<512xf32>
    %28 = vector.multi_reduction <add>, %27, %cst_18 [0] : vector<32x512xf32> to vector<512xf32>
    %29 = vector.shape_cast %28 : vector<512xf32> to vector<1x512xf32>
    %30 = arith.mulf %27, %27 : vector<32x512xf32>
    %cst_19 = arith.constant dense<0.000000e+00> : vector<512xf32>
    %31 = vector.multi_reduction <add>, %30, %cst_19 [0] : vector<32x512xf32> to vector<512xf32>
    %32 = vector.shape_cast %31 : vector<512xf32> to vector<1x512xf32>
    %33 = vector.extract_strided_slice %29 {offsets = [0, 0], sizes = [1, 128], strides = [1, 1]} : vector<1x512xf32> to vector<1x128xf32>
    %34 = vector.extract_strided_slice %29 {offsets = [0, 128], sizes = [1, 128], strides = [1, 1]} : vector<1x512xf32> to vector<1x128xf32>
    %35 = arith.addf %33, %34 : vector<1x128xf32>
    %36 = vector.extract_strided_slice %29 {offsets = [0, 256], sizes = [1, 128], strides = [1, 1]} : vector<1x512xf32> to vector<1x128xf32>
    %37 = arith.addf %35, %36 : vector<1x128xf32>
    %38 = vector.extract_strided_slice %29 {offsets = [0, 384], sizes = [1, 128], strides = [1, 1]} : vector<1x512xf32> to vector<1x128xf32>
    %39 = arith.addf %37, %38 : vector<1x128xf32>
    %cst_20 = arith.constant 7.812500e-03 : f32
    %40 = vector.broadcast %cst_20 : f32 to vector<1x128xf32>
    %41 = arith.mulf %39, %40 : vector<1x128xf32>
    %42 = vector.extract_strided_slice %32 {offsets = [0, 0], sizes = [1, 128], strides = [1, 1]} : vector<1x512xf32> to vector<1x128xf32>
    %43 = vector.extract_strided_slice %32 {offsets = [0, 128], sizes = [1, 128], strides = [1, 1]} : vector<1x512xf32> to vector<1x128xf32>
    %44 = arith.addf %42, %43 : vector<1x128xf32>
    %45 = vector.extract_strided_slice %32 {offsets = [0, 256], sizes = [1, 128], strides = [1, 1]} : vector<1x512xf32> to vector<1x128xf32>
    %46 = arith.addf %44, %45 : vector<1x128xf32>
    %47 = vector.extract_strided_slice %32 {offsets = [0, 384], sizes = [1, 128], strides = [1, 1]} : vector<1x512xf32> to vector<1x128xf32>
    %48 = arith.addf %46, %47 : vector<1x128xf32>
    %cst_21 = arith.constant 7.812500e-03 : f32
    %49 = vector.broadcast %cst_21 : f32 to vector<1x128xf32>
    %50 = arith.mulf %48, %49 : vector<1x128xf32>
    %51 = arith.mulf %41, %41 : vector<1x128xf32>
    %52 = arith.subf %50, %51 : vector<1x128xf32>
    %cst_22 = arith.constant 9.99999974E-6 : f32
    %53 = vector.broadcast %cst_22 : f32 to vector<1x128xf32>
    %54 = arith.addf %52, %53 : vector<1x128xf32>
    %55 = math.rsqrt %54 : vector<1x128xf32>
    %56 = tpu.concatenate %41, %41, %41, %41 in 1 : vector<1x128xf32>, vector<1x128xf32>, vector<1x128xf32>, vector<1x128xf32> -> vector<1x512xf32>
    %57 = tpu.concatenate %55, %55, %55, %55 in 1 : vector<1x128xf32>, vector<1x128xf32>, vector<1x128xf32>, vector<1x128xf32> -> vector<1x512xf32>
    %58 = vector.broadcast %56 : vector<1x512xf32> to vector<32x512xf32>
    %59 = arith.subf %27, %58 : vector<32x512xf32>
    %c0_23 = arith.constant 0 : index
    %c0_24 = arith.constant 0 : index
    %60 = vector.load %arg3[%c0_23, %c0_24] : memref<1x512xf32, #tpu.memory_space<vmem>>, vector<1x512xf32>
    %61 = arith.mulf %57, %60 : vector<1x512xf32>
    %62 = vector.broadcast %61 : vector<1x512xf32> to vector<32x512xf32>
    %63 = arith.mulf %59, %62 : vector<32x512xf32>
    %c0_25 = arith.constant 0 : index
    %c0_26 = arith.constant 0 : index
    %64 = vector.load %arg4[%c0_25, %c0_26] : memref<1x512xf32, #tpu.memory_space<vmem>>, vector<1x512xf32>
    %65 = vector.broadcast %64 : vector<1x512xf32> to vector<32x512xf32>
    %66 = arith.addf %63, %65 : vector<32x512xf32>
    %67 = arith.truncf %66 : vector<32x512xf32> to vector<32x512xbf16>
    %68 = arith.extf %67 : vector<32x512xbf16> to vector<32x512xf32>
    %69 = arith.subf %66, %68 : vector<32x512xf32>
    %70 = arith.truncf %69 : vector<32x512xf32> to vector<32x512xbf16>
    %c0_i32_27 = arith.constant 0 : i32
    %71 = tpu.memref_slice %arg22[%c0_i32_27] : memref<4x!tpu.dma_semaphore, #tpu.memory_space<semaphore_mem>> -> memref<1x!tpu.dma_semaphore, #tpu.memory_space<semaphore_mem>>
    %72 = tpu.memref_squeeze %71 : memref<1x!tpu.dma_semaphore, #tpu.memory_space<semaphore_mem>> -> memref<!tpu.dma_semaphore, #tpu.memory_space<semaphore_mem>>
    tpu.wait_dma2 semaphore(%72 : memref<!tpu.dma_semaphore, #tpu.memory_space<semaphore_mem>>) src(%arg13 : memref<512x256xbf16, #tpu.memory_space<any>>) dst(%arg18 : memref<512x256xbf16, #tpu.memory_space<vmem>>)
    %c0_28 = arith.constant 0 : index
    %c0_29 = arith.constant 0 : index
    %73 = vector.load %arg18[%c0_28, %c0_29] : memref<512x256xbf16, #tpu.memory_space<vmem>>, vector<512x256xbf16>
    %cst_30 = arith.constant dense<0.000000e+00> : vector<32x256xf32>
    %74 = tpu.matmul %67, %73, %cst_30 {dimension_numbers = #tpu.dot_dimension_numbers<[1], [0], [0], [1], [0, 0, 1, 1], [], []>} : vector<32x512xbf16>, vector<512x256xbf16>, vector<32x256xf32> -> vector<32x256xf32>
    %cst_31 = arith.constant dense<0.000000e+00> : vector<32x256xf32>
    %75 = tpu.matmul %70, %73, %cst_31 {dimension_numbers = #tpu.dot_dimension_numbers<[1], [0], [0], [1], [0, 0, 1, 1], [], []>} : vector<32x512xbf16>, vector<512x256xbf16>, vector<32x256xf32> -> vector<32x256xf32>
    %76 = arith.addf %74, %75 : vector<32x256xf32>
    %c0_32 = arith.constant 0 : index
    %c0_33 = arith.constant 0 : index
    %77 = vector.load %arg5[%c0_32, %c0_33] : memref<1x256xf32, #tpu.memory_space<vmem>>, vector<1x256xf32>
    %78 = vector.broadcast %77 : vector<1x256xf32> to vector<32x256xf32>
    %79 = arith.addf %76, %78 : vector<32x256xf32>
    %cst_34 = arith.constant 0.000000e+00 : f32
    %80 = vector.broadcast %cst_34 : f32 to vector<32x256xf32>
    %81 = arith.maximumf %79, %80 : vector<32x256xf32>
    %cst_35 = arith.constant dense<0.000000e+00> : vector<256xf32>
    %82 = vector.multi_reduction <add>, %81, %cst_35 [0] : vector<32x256xf32> to vector<256xf32>
    %83 = vector.shape_cast %82 : vector<256xf32> to vector<1x256xf32>
    %cst_36 = arith.constant 3.200000e+01 : f32
    %84 = vector.broadcast %cst_36 : f32 to vector<1x256xf32>
    %85 = arith.divf %83, %84 : vector<1x256xf32>
    %86 = vector.broadcast %85 : vector<1x256xf32> to vector<32x256xf32>
    %87 = arith.subf %81, %86 : vector<32x256xf32>
    %88 = arith.mulf %87, %87 : vector<32x256xf32>
    %cst_37 = arith.constant dense<0.000000e+00> : vector<256xf32>
    %89 = vector.multi_reduction <add>, %88, %cst_37 [0] : vector<32x256xf32> to vector<256xf32>
    %90 = vector.shape_cast %89 : vector<256xf32> to vector<1x256xf32>
    %cst_38 = arith.constant 3.200000e+01 : f32
    %91 = vector.broadcast %cst_38 : f32 to vector<1x256xf32>
    %92 = arith.divf %90, %91 : vector<1x256xf32>
    %93 = vector.broadcast %85 : vector<1x256xf32> to vector<32x256xf32>
    %94 = arith.subf %81, %93 : vector<32x256xf32>
    %cst_39 = arith.constant 9.99999974E-6 : f32
    %95 = vector.broadcast %cst_39 : f32 to vector<1x256xf32>
    %96 = arith.addf %92, %95 : vector<1x256xf32>
    %97 = math.rsqrt %96 : vector<1x256xf32>
    %c0_40 = arith.constant 0 : index
    %c0_41 = arith.constant 0 : index
    %98 = vector.load %arg6[%c0_40, %c0_41] : memref<1x256xf32, #tpu.memory_space<vmem>>, vector<1x256xf32>
    %99 = arith.mulf %97, %98 : vector<1x256xf32>
    %100 = vector.broadcast %99 : vector<1x256xf32> to vector<32x256xf32>
    %101 = arith.mulf %94, %100 : vector<32x256xf32>
    %c0_42 = arith.constant 0 : index
    %c0_43 = arith.constant 0 : index
    %102 = vector.load %arg7[%c0_42, %c0_43] : memref<1x256xf32, #tpu.memory_space<vmem>>, vector<1x256xf32>
    %103 = vector.broadcast %102 : vector<1x256xf32> to vector<32x256xf32>
    %104 = arith.addf %101, %103 : vector<32x256xf32>
    %c0_44 = arith.constant 0 : index
    %c0_45 = arith.constant 0 : index
    %105 = vector.load %arg23[%c0_44, %c0_45] : memref<32x256xf32, #tpu.memory_space<vmem>>, vector<32x256xf32>
    tpu.vector_store %arg23[%c0_44, %c0_45], %104 {strides = array<i32>} : memref<32x256xf32, #tpu.memory_space<vmem>>, vector<32x256xf32>,
    %c0_46 = arith.constant 0 : index
    %c0_47 = arith.constant 0 : index
    %106 = vector.load %arg23[%c0_46, %c0_47] : memref<32x256xf32, #tpu.memory_space<vmem>>, vector<2x256xf32>
    %107 = arith.truncf %106 : vector<2x256xf32> to vector<2x256xbf16>
    %c0_48 = arith.constant 0 : index
    %c0_49 = arith.constant 0 : index
    %108 = vector.load %arg24[%c0_48, %c0_49] : memref<2x4096xbf16, #tpu.memory_space<vmem>>, vector<2x256xbf16>
    tpu.vector_store %arg24[%c0_48, %c0_49], %107 {strides = array<i32>} : memref<2x4096xbf16, #tpu.memory_space<vmem>>, vector<2x256xbf16>,
    %109 = arith.extf %107 : vector<2x256xbf16> to vector<2x256xf32>
    %110 = arith.subf %106, %109 : vector<2x256xf32>
    %111 = arith.truncf %110 : vector<2x256xf32> to vector<2x256xbf16>
    %c0_50 = arith.constant 0 : index
    %c0_51 = arith.constant 0 : index
    %112 = vector.load %arg25[%c0_50, %c0_51] : memref<2x4096xbf16, #tpu.memory_space<vmem>>, vector<2x256xbf16>
    tpu.vector_store %arg25[%c0_50, %c0_51], %111 {strides = array<i32>} : memref<2x4096xbf16, #tpu.memory_space<vmem>>, vector<2x256xbf16>,
    %c2 = arith.constant 2 : index
    %c0_52 = arith.constant 0 : index
    %113 = vector.load %arg23[%c2, %c0_52] : memref<32x256xf32, #tpu.memory_space<vmem>>, vector<2x256xf32>
    %114 = arith.truncf %113 : vector<2x256xf32> to vector<2x256xbf16>
    %c0_53 = arith.constant 0 : index
    %c256 = arith.constant 256 : index
    %115 = vector.load %arg24[%c0_53, %c256] : memref<2x4096xbf16, #tpu.memory_space<vmem>>, vector<2x256xbf16>
    tpu.vector_store %arg24[%c0_53, %c256], %114 {strides = array<i32>} : memref<2x4096xbf16, #tpu.memory_space<vmem>>, vector<2x256xbf16>,
    %116 = arith.extf %114 : vector<2x256xbf16> to vector<2x256xf32>
    %117 = arith.subf %113, %116 : vector<2x256xf32>
    %118 = arith.truncf %117 : vector<2x256xf32> to vector<2x256xbf16>
    %c0_54 = arith.constant 0 : index
    %c256_55 = arith.constant 256 : index
    %119 = vector.load %arg25[%c0_54, %c256_55] : memref<2x4096xbf16, #tpu.memory_space<vmem>>, vector<2x256xbf16>
    tpu.vector_store %arg25[%c0_54, %c256_55], %118 {strides = array<i32>} : memref<2x4096xbf16, #tpu.memory_space<vmem>>, vector<2x256xbf16>,
    %c4 = arith.constant 4 : index
    %c0_56 = arith.constant 0 : index
    %120 = vector.load %arg23[%c4, %c0_56] : memref<32x256xf32, #tpu.memory_space<vmem>>, vector<2x256xf32>
    %121 = arith.truncf %120 : vector<2x256xf32> to vector<2x256xbf16>
    %c0_57 = arith.constant 0 : index
    %c512 = arith.constant 512 : index
    %122 = vector.load %arg24[%c0_57, %c512] : memref<2x4096xbf16, #tpu.memory_space<vmem>>, vector<2x256xbf16>
    tpu.vector_store %arg24[%c0_57, %c512], %121 {strides = array<i32>} : memref<2x4096xbf16, #tpu.memory_space<vmem>>, vector<2x256xbf16>,
    %123 = arith.extf %121 : vector<2x256xbf16> to vector<2x256xf32>
    %124 = arith.subf %120, %123 : vector<2x256xf32>
    %125 = arith.truncf %124 : vector<2x256xf32> to vector<2x256xbf16>
    %c0_58 = arith.constant 0 : index
    %c512_59 = arith.constant 512 : index
    %126 = vector.load %arg25[%c0_58, %c512_59] : memref<2x4096xbf16, #tpu.memory_space<vmem>>, vector<2x256xbf16>
    tpu.vector_store %arg25[%c0_58, %c512_59], %125 {strides = array<i32>} : memref<2x4096xbf16, #tpu.memory_space<vmem>>, vector<2x256xbf16>,
    %c6 = arith.constant 6 : index
    %c0_60 = arith.constant 0 : index
    %127 = vector.load %arg23[%c6, %c0_60] : memref<32x256xf32, #tpu.memory_space<vmem>>, vector<2x256xf32>
    %128 = arith.truncf %127 : vector<2x256xf32> to vector<2x256xbf16>
    %c0_61 = arith.constant 0 : index
    %c768 = arith.constant 768 : index
    %129 = vector.load %arg24[%c0_61, %c768] : memref<2x4096xbf16, #tpu.memory_space<vmem>>, vector<2x256xbf16>
    tpu.vector_store %arg24[%c0_61, %c768], %128 {strides = array<i32>} : memref<2x4096xbf16, #tpu.memory_space<vmem>>, vector<2x256xbf16>,
    %130 = arith.extf %128 : vector<2x256xbf16> to vector<2x256xf32>
    %131 = arith.subf %127, %130 : vector<2x256xf32>
    %132 = arith.truncf %131 : vector<2x256xf32> to vector<2x256xbf16>
    %c0_62 = arith.constant 0 : index
    %c768_63 = arith.constant 768 : index
    %133 = vector.load %arg25[%c0_62, %c768_63] : memref<2x4096xbf16, #tpu.memory_space<vmem>>, vector<2x256xbf16>
    tpu.vector_store %arg25[%c0_62, %c768_63], %132 {strides = array<i32>} : memref<2x4096xbf16, #tpu.memory_space<vmem>>, vector<2x256xbf16>,
    %c8 = arith.constant 8 : index
    %c0_64 = arith.constant 0 : index
    %134 = vector.load %arg23[%c8, %c0_64] : memref<32x256xf32, #tpu.memory_space<vmem>>, vector<2x256xf32>
    %135 = arith.truncf %134 : vector<2x256xf32> to vector<2x256xbf16>
    %c0_65 = arith.constant 0 : index
    %c1024 = arith.constant 1024 : index
    %136 = vector.load %arg24[%c0_65, %c1024] : memref<2x4096xbf16, #tpu.memory_space<vmem>>, vector<2x256xbf16>
    tpu.vector_store %arg24[%c0_65, %c1024], %135 {strides = array<i32>} : memref<2x4096xbf16, #tpu.memory_space<vmem>>, vector<2x256xbf16>,
    %137 = arith.extf %135 : vector<2x256xbf16> to vector<2x256xf32>
    %138 = arith.subf %134, %137 : vector<2x256xf32>
    %139 = arith.truncf %138 : vector<2x256xf32> to vector<2x256xbf16>
    %c0_66 = arith.constant 0 : index
    %c1024_67 = arith.constant 1024 : index
    %140 = vector.load %arg25[%c0_66, %c1024_67] : memref<2x4096xbf16, #tpu.memory_space<vmem>>, vector<2x256xbf16>
    tpu.vector_store %arg25[%c0_66, %c1024_67], %139 {strides = array<i32>} : memref<2x4096xbf16, #tpu.memory_space<vmem>>, vector<2x256xbf16>,
    %c10 = arith.constant 10 : index
    %c0_68 = arith.constant 0 : index
    %141 = vector.load %arg23[%c10, %c0_68] : memref<32x256xf32, #tpu.memory_space<vmem>>, vector<2x256xf32>
    %142 = arith.truncf %141 : vector<2x256xf32> to vector<2x256xbf16>
    %c0_69 = arith.constant 0 : index
    %c1280 = arith.constant 1280 : index
    %143 = vector.load %arg24[%c0_69, %c1280] : memref<2x4096xbf16, #tpu.memory_space<vmem>>, vector<2x256xbf16>
    tpu.vector_store %arg24[%c0_69, %c1280], %142 {strides = array<i32>} : memref<2x4096xbf16, #tpu.memory_space<vmem>>, vector<2x256xbf16>,
    %144 = arith.extf %142 : vector<2x256xbf16> to vector<2x256xf32>
    %145 = arith.subf %141, %144 : vector<2x256xf32>
    %146 = arith.truncf %145 : vector<2x256xf32> to vector<2x256xbf16>
    %c0_70 = arith.constant 0 : index
    %c1280_71 = arith.constant 1280 : index
    %147 = vector.load %arg25[%c0_70, %c1280_71] : memref<2x4096xbf16, #tpu.memory_space<vmem>>, vector<2x256xbf16>
    tpu.vector_store %arg25[%c0_70, %c1280_71], %146 {strides = array<i32>} : memref<2x4096xbf16, #tpu.memory_space<vmem>>, vector<2x256xbf16>,
    %c12 = arith.constant 12 : index
    %c0_72 = arith.constant 0 : index
    %148 = vector.load %arg23[%c12, %c0_72] : memref<32x256xf32, #tpu.memory_space<vmem>>, vector<2x256xf32>
    %149 = arith.truncf %148 : vector<2x256xf32> to vector<2x256xbf16>
    %c0_73 = arith.constant 0 : index
    %c1536 = arith.constant 1536 : index
    %150 = vector.load %arg24[%c0_73, %c1536] : memref<2x4096xbf16, #tpu.memory_space<vmem>>, vector<2x256xbf16>
    tpu.vector_store %arg24[%c0_73, %c1536], %149 {strides = array<i32>} : memref<2x4096xbf16, #tpu.memory_space<vmem>>, vector<2x256xbf16>,
    %151 = arith.extf %149 : vector<2x256xbf16> to vector<2x256xf32>
    %152 = arith.subf %148, %151 : vector<2x256xf32>
    %153 = arith.truncf %152 : vector<2x256xf32> to vector<2x256xbf16>
    %c0_74 = arith.constant 0 : index
    %c1536_75 = arith.constant 1536 : index
    %154 = vector.load %arg25[%c0_74, %c1536_75] : memref<2x4096xbf16, #tpu.memory_space<vmem>>, vector<2x256xbf16>
    tpu.vector_store %arg25[%c0_74, %c1536_75], %153 {strides = array<i32>} : memref<2x4096xbf16, #tpu.memory_space<vmem>>, vector<2x256xbf16>,
    %c14 = arith.constant 14 : index
    %c0_76 = arith.constant 0 : index
    %155 = vector.load %arg23[%c14, %c0_76] : memref<32x256xf32, #tpu.memory_space<vmem>>, vector<2x256xf32>
    %156 = arith.truncf %155 : vector<2x256xf32> to vector<2x256xbf16>
    %c0_77 = arith.constant 0 : index
    %c1792 = arith.constant 1792 : index
    %157 = vector.load %arg24[%c0_77, %c1792] : memref<2x4096xbf16, #tpu.memory_space<vmem>>, vector<2x256xbf16>
    tpu.vector_store %arg24[%c0_77, %c1792], %156 {strides = array<i32>} : memref<2x4096xbf16, #tpu.memory_space<vmem>>, vector<2x256xbf16>,
    %158 = arith.extf %156 : vector<2x256xbf16> to vector<2x256xf32>
    %159 = arith.subf %155, %158 : vector<2x256xf32>
    %160 = arith.truncf %159 : vector<2x256xf32> to vector<2x256xbf16>
    %c0_78 = arith.constant 0 : index
    %c1792_79 = arith.constant 1792 : index
    %161 = vector.load %arg25[%c0_78, %c1792_79] : memref<2x4096xbf16, #tpu.memory_space<vmem>>, vector<2x256xbf16>
    tpu.vector_store %arg25[%c0_78, %c1792_79], %160 {strides = array<i32>} : memref<2x4096xbf16, #tpu.memory_space<vmem>>, vector<2x256xbf16>,
    %c16 = arith.constant 16 : index
    %c0_80 = arith.constant 0 : index
    %162 = vector.load %arg23[%c16, %c0_80] : memref<32x256xf32, #tpu.memory_space<vmem>>, vector<2x256xf32>
    %163 = arith.truncf %162 : vector<2x256xf32> to vector<2x256xbf16>
    %c0_81 = arith.constant 0 : index
    %c2048 = arith.constant 2048 : index
    %164 = vector.load %arg24[%c0_81, %c2048] : memref<2x4096xbf16, #tpu.memory_space<vmem>>, vector<2x256xbf16>
    tpu.vector_store %arg24[%c0_81, %c2048], %163 {strides = array<i32>} : memref<2x4096xbf16, #tpu.memory_space<vmem>>, vector<2x256xbf16>,
    %165 = arith.extf %163 : vector<2x256xbf16> to vector<2x256xf32>
    %166 = arith.subf %162, %165 : vector<2x256xf32>
    %167 = arith.truncf %166 : vector<2x256xf32> to vector<2x256xbf16>
    %c0_82 = arith.constant 0 : index
    %c2048_83 = arith.constant 2048 : index
    %168 = vector.load %arg25[%c0_82, %c2048_83] : memref<2x4096xbf16, #tpu.memory_space<vmem>>, vector<2x256xbf16>
    tpu.vector_store %arg25[%c0_82, %c2048_83], %167 {strides = array<i32>} : memref<2x4096xbf16, #tpu.memory_space<vmem>>, vector<2x256xbf16>,
    %c18 = arith.constant 18 : index
    %c0_84 = arith.constant 0 : index
    %169 = vector.load %arg23[%c18, %c0_84] : memref<32x256xf32, #tpu.memory_space<vmem>>, vector<2x256xf32>
    %170 = arith.truncf %169 : vector<2x256xf32> to vector<2x256xbf16>
    %c0_85 = arith.constant 0 : index
    %c2304 = arith.constant 2304 : index
    %171 = vector.load %arg24[%c0_85, %c2304] : memref<2x4096xbf16, #tpu.memory_space<vmem>>, vector<2x256xbf16>
    tpu.vector_store %arg24[%c0_85, %c2304], %170 {strides = array<i32>} : memref<2x4096xbf16, #tpu.memory_space<vmem>>, vector<2x256xbf16>,
    %172 = arith.extf %170 : vector<2x256xbf16> to vector<2x256xf32>
    %173 = arith.subf %169, %172 : vector<2x256xf32>
    %174 = arith.truncf %173 : vector<2x256xf32> to vector<2x256xbf16>
    %c0_86 = arith.constant 0 : index
    %c2304_87 = arith.constant 2304 : index
    %175 = vector.load %arg25[%c0_86, %c2304_87] : memref<2x4096xbf16, #tpu.memory_space<vmem>>, vector<2x256xbf16>
    tpu.vector_store %arg25[%c0_86, %c2304_87], %174 {strides = array<i32>} : memref<2x4096xbf16, #tpu.memory_space<vmem>>, vector<2x256xbf16>,
    %c20 = arith.constant 20 : index
    %c0_88 = arith.constant 0 : index
    %176 = vector.load %arg23[%c20, %c0_88] : memref<32x256xf32, #tpu.memory_space<vmem>>, vector<2x256xf32>
    %177 = arith.truncf %176 : vector<2x256xf32> to vector<2x256xbf16>
    %c0_89 = arith.constant 0 : index
    %c2560 = arith.constant 2560 : index
    %178 = vector.load %arg24[%c0_89, %c2560] : memref<2x4096xbf16, #tpu.memory_space<vmem>>, vector<2x256xbf16>
    tpu.vector_store %arg24[%c0_89, %c2560], %177 {strides = array<i32>} : memref<2x4096xbf16, #tpu.memory_space<vmem>>, vector<2x256xbf16>,
    %179 = arith.extf %177 : vector<2x256xbf16> to vector<2x256xf32>
    %180 = arith.subf %176, %179 : vector<2x256xf32>
    %181 = arith.truncf %180 : vector<2x256xf32> to vector<2x256xbf16>
    %c0_90 = arith.constant 0 : index
    %c2560_91 = arith.constant 2560 : index
    %182 = vector.load %arg25[%c0_90, %c2560_91] : memref<2x4096xbf16, #tpu.memory_space<vmem>>, vector<2x256xbf16>
    tpu.vector_store %arg25[%c0_90, %c2560_91], %181 {strides = array<i32>} : memref<2x4096xbf16, #tpu.memory_space<vmem>>, vector<2x256xbf16>,
    %c22 = arith.constant 22 : index
    %c0_92 = arith.constant 0 : index
    %183 = vector.load %arg23[%c22, %c0_92] : memref<32x256xf32, #tpu.memory_space<vmem>>, vector<2x256xf32>
    %184 = arith.truncf %183 : vector<2x256xf32> to vector<2x256xbf16>
    %c0_93 = arith.constant 0 : index
    %c2816 = arith.constant 2816 : index
    %185 = vector.load %arg24[%c0_93, %c2816] : memref<2x4096xbf16, #tpu.memory_space<vmem>>, vector<2x256xbf16>
    tpu.vector_store %arg24[%c0_93, %c2816], %184 {strides = array<i32>} : memref<2x4096xbf16, #tpu.memory_space<vmem>>, vector<2x256xbf16>,
    %186 = arith.extf %184 : vector<2x256xbf16> to vector<2x256xf32>
    %187 = arith.subf %183, %186 : vector<2x256xf32>
    %188 = arith.truncf %187 : vector<2x256xf32> to vector<2x256xbf16>
    %c0_94 = arith.constant 0 : index
    %c2816_95 = arith.constant 2816 : index
    %189 = vector.load %arg25[%c0_94, %c2816_95] : memref<2x4096xbf16, #tpu.memory_space<vmem>>, vector<2x256xbf16>
    tpu.vector_store %arg25[%c0_94, %c2816_95], %188 {strides = array<i32>} : memref<2x4096xbf16, #tpu.memory_space<vmem>>, vector<2x256xbf16>,
    %c24 = arith.constant 24 : index
    %c0_96 = arith.constant 0 : index
    %190 = vector.load %arg23[%c24, %c0_96] : memref<32x256xf32, #tpu.memory_space<vmem>>, vector<2x256xf32>
    %191 = arith.truncf %190 : vector<2x256xf32> to vector<2x256xbf16>
    %c0_97 = arith.constant 0 : index
    %c3072 = arith.constant 3072 : index
    %192 = vector.load %arg24[%c0_97, %c3072] : memref<2x4096xbf16, #tpu.memory_space<vmem>>, vector<2x256xbf16>
    tpu.vector_store %arg24[%c0_97, %c3072], %191 {strides = array<i32>} : memref<2x4096xbf16, #tpu.memory_space<vmem>>, vector<2x256xbf16>,
    %193 = arith.extf %191 : vector<2x256xbf16> to vector<2x256xf32>
    %194 = arith.subf %190, %193 : vector<2x256xf32>
    %195 = arith.truncf %194 : vector<2x256xf32> to vector<2x256xbf16>
    %c0_98 = arith.constant 0 : index
    %c3072_99 = arith.constant 3072 : index
    %196 = vector.load %arg25[%c0_98, %c3072_99] : memref<2x4096xbf16, #tpu.memory_space<vmem>>, vector<2x256xbf16>
    tpu.vector_store %arg25[%c0_98, %c3072_99], %195 {strides = array<i32>} : memref<2x4096xbf16, #tpu.memory_space<vmem>>, vector<2x256xbf16>,
    %c26 = arith.constant 26 : index
    %c0_100 = arith.constant 0 : index
    %197 = vector.load %arg23[%c26, %c0_100] : memref<32x256xf32, #tpu.memory_space<vmem>>, vector<2x256xf32>
    %198 = arith.truncf %197 : vector<2x256xf32> to vector<2x256xbf16>
    %c0_101 = arith.constant 0 : index
    %c3328 = arith.constant 3328 : index
    %199 = vector.load %arg24[%c0_101, %c3328] : memref<2x4096xbf16, #tpu.memory_space<vmem>>, vector<2x256xbf16>
    tpu.vector_store %arg24[%c0_101, %c3328], %198 {strides = array<i32>} : memref<2x4096xbf16, #tpu.memory_space<vmem>>, vector<2x256xbf16>,
    %200 = arith.extf %198 : vector<2x256xbf16> to vector<2x256xf32>
    %201 = arith.subf %197, %200 : vector<2x256xf32>
    %202 = arith.truncf %201 : vector<2x256xf32> to vector<2x256xbf16>
    %c0_102 = arith.constant 0 : index
    %c3328_103 = arith.constant 3328 : index
    %203 = vector.load %arg25[%c0_102, %c3328_103] : memref<2x4096xbf16, #tpu.memory_space<vmem>>, vector<2x256xbf16>
    tpu.vector_store %arg25[%c0_102, %c3328_103], %202 {strides = array<i32>} : memref<2x4096xbf16, #tpu.memory_space<vmem>>, vector<2x256xbf16>,
    %c28 = arith.constant 28 : index
    %c0_104 = arith.constant 0 : index
    %204 = vector.load %arg23[%c28, %c0_104] : memref<32x256xf32, #tpu.memory_space<vmem>>, vector<2x256xf32>
    %205 = arith.truncf %204 : vector<2x256xf32> to vector<2x256xbf16>
    %c0_105 = arith.constant 0 : index
    %c3584 = arith.constant 3584 : index
    %206 = vector.load %arg24[%c0_105, %c3584] : memref<2x4096xbf16, #tpu.memory_space<vmem>>, vector<2x256xbf16>
    tpu.vector_store %arg24[%c0_105, %c3584], %205 {strides = array<i32>} : memref<2x4096xbf16, #tpu.memory_space<vmem>>, vector<2x256xbf16>,
    %207 = arith.extf %205 : vector<2x256xbf16> to vector<2x256xf32>
    %208 = arith.subf %204, %207 : vector<2x256xf32>
    %209 = arith.truncf %208 : vector<2x256xf32> to vector<2x256xbf16>
    %c0_106 = arith.constant 0 : index
    %c3584_107 = arith.constant 3584 : index
    %210 = vector.load %arg25[%c0_106, %c3584_107] : memref<2x4096xbf16, #tpu.memory_space<vmem>>, vector<2x256xbf16>
    tpu.vector_store %arg25[%c0_106, %c3584_107], %209 {strides = array<i32>} : memref<2x4096xbf16, #tpu.memory_space<vmem>>, vector<2x256xbf16>,
    %c30 = arith.constant 30 : index
    %c0_108 = arith.constant 0 : index
    %211 = vector.load %arg23[%c30, %c0_108] : memref<32x256xf32, #tpu.memory_space<vmem>>, vector<2x256xf32>
    %212 = arith.truncf %211 : vector<2x256xf32> to vector<2x256xbf16>
    %c0_109 = arith.constant 0 : index
    %c3840 = arith.constant 3840 : index
    %213 = vector.load %arg24[%c0_109, %c3840] : memref<2x4096xbf16, #tpu.memory_space<vmem>>, vector<2x256xbf16>
    tpu.vector_store %arg24[%c0_109, %c3840], %212 {strides = array<i32>} : memref<2x4096xbf16, #tpu.memory_space<vmem>>, vector<2x256xbf16>,
    %214 = arith.extf %212 : vector<2x256xbf16> to vector<2x256xf32>
    %215 = arith.subf %211, %214 : vector<2x256xf32>
    %216 = arith.truncf %215 : vector<2x256xf32> to vector<2x256xbf16>
    %c0_110 = arith.constant 0 : index
    %c3840_111 = arith.constant 3840 : index
    %217 = vector.load %arg25[%c0_110, %c3840_111] : memref<2x4096xbf16, #tpu.memory_space<vmem>>, vector<2x256xbf16>
    tpu.vector_store %arg25[%c0_110, %c3840_111], %216 {strides = array<i32>} : memref<2x4096xbf16, #tpu.memory_space<vmem>>, vector<2x256xbf16>,
    %c1_i32_112 = arith.constant 1 : i32
    %218 = tpu.memref_slice %arg22[%c1_i32_112] : memref<4x!tpu.dma_semaphore, #tpu.memory_space<semaphore_mem>> -> memref<1x!tpu.dma_semaphore, #tpu.memory_space<semaphore_mem>>
    %219 = tpu.memref_squeeze %218 : memref<1x!tpu.dma_semaphore, #tpu.memory_space<semaphore_mem>> -> memref<!tpu.dma_semaphore, #tpu.memory_space<semaphore_mem>>
    tpu.wait_dma2 semaphore(%219 : memref<!tpu.dma_semaphore, #tpu.memory_space<semaphore_mem>>) src(%arg14 : memref<4096x256xbf16, #tpu.memory_space<any>>) dst(%arg19 : memref<4096x256xbf16, #tpu.memory_space<vmem>>)
    %c0_113 = arith.constant 0 : index
    %c0_114 = arith.constant 0 : index
    %220 = vector.load %arg24[%c0_113, %c0_114] : memref<2x4096xbf16, #tpu.memory_space<vmem>>, vector<2x4096xbf16>
    %c0_115 = arith.constant 0 : index
    %c0_116 = arith.constant 0 : index
    %221 = vector.load %arg19[%c0_115, %c0_116] : memref<4096x256xbf16, #tpu.memory_space<vmem>>, vector<4096x256xbf16>
    %cst_117 = arith.constant dense<0.000000e+00> : vector<2x256xf32>
    %222 = tpu.matmul %220, %221, %cst_117 {dimension_numbers = #tpu.dot_dimension_numbers<[1], [0], [0], [1], [0, 0, 1, 1], [], []>} : vector<2x4096xbf16>, vector<4096x256xbf16>, vector<2x256xf32> -> vector<2x256xf32>
    %c0_118 = arith.constant 0 : index
    %c0_119 = arith.constant 0 : index
    %223 = vector.load %arg25[%c0_118, %c0_119] : memref<2x4096xbf16, #tpu.memory_space<vmem>>, vector<2x4096xbf16>
    %c0_120 = arith.constant 0 : index
    %c0_121 = arith.constant 0 : index
    %224 = vector.load %arg19[%c0_120, %c0_121] : memref<4096x256xbf16, #tpu.memory_space<vmem>>, vector<4096x256xbf16>
    %cst_122 = arith.constant dense<0.000000e+00> : vector<2x256xf32>
    %225 = tpu.matmul %223, %224, %cst_122 {dimension_numbers = #tpu.dot_dimension_numbers<[1], [0], [0], [1], [0, 0, 1, 1], [], []>} : vector<2x4096xbf16>, vector<4096x256xbf16>, vector<2x256xf32> -> vector<2x256xf32>
    %226 = arith.addf %222, %225 : vector<2x256xf32>
    %c0_123 = arith.constant 0 : index
    %c0_124 = arith.constant 0 : index
    %227 = vector.load %arg8[%c0_123, %c0_124] : memref<1x256xf32, #tpu.memory_space<vmem>>, vector<1x256xf32>
    %228 = vector.broadcast %227 : vector<1x256xf32> to vector<2x256xf32>
    %229 = arith.addf %226, %228 : vector<2x256xf32>
    %cst_125 = arith.constant 0.000000e+00 : f32
    %230 = vector.broadcast %cst_125 : f32 to vector<2x256xf32>
    %231 = arith.maximumf %229, %230 : vector<2x256xf32>
    %cst_126 = arith.constant dense<0.000000e+00> : vector<256xf32>
    %232 = vector.multi_reduction <add>, %231, %cst_126 [0] : vector<2x256xf32> to vector<256xf32>
    %233 = vector.shape_cast %232 : vector<256xf32> to vector<1x256xf32>
    %cst_127 = arith.constant 2.000000e+00 : f32
    %234 = vector.broadcast %cst_127 : f32 to vector<1x256xf32>
    %235 = arith.divf %233, %234 : vector<1x256xf32>
    %236 = vector.broadcast %235 : vector<1x256xf32> to vector<2x256xf32>
    %237 = arith.subf %231, %236 : vector<2x256xf32>
    %238 = arith.mulf %237, %237 : vector<2x256xf32>
    %cst_128 = arith.constant dense<0.000000e+00> : vector<256xf32>
    %239 = vector.multi_reduction <add>, %238, %cst_128 [0] : vector<2x256xf32> to vector<256xf32>
    %240 = vector.shape_cast %239 : vector<256xf32> to vector<1x256xf32>
    %cst_129 = arith.constant 2.000000e+00 : f32
    %241 = vector.broadcast %cst_129 : f32 to vector<1x256xf32>
    %242 = arith.divf %240, %241 : vector<1x256xf32>
    %243 = vector.broadcast %235 : vector<1x256xf32> to vector<2x256xf32>
    %244 = arith.subf %231, %243 : vector<2x256xf32>
    %cst_130 = arith.constant 9.99999974E-6 : f32
    %245 = vector.broadcast %cst_130 : f32 to vector<1x256xf32>
    %246 = arith.addf %242, %245 : vector<1x256xf32>
    %247 = math.rsqrt %246 : vector<1x256xf32>
    %c0_131 = arith.constant 0 : index
    %c0_132 = arith.constant 0 : index
    %248 = vector.load %arg9[%c0_131, %c0_132] : memref<1x256xf32, #tpu.memory_space<vmem>>, vector<1x256xf32>
    %249 = arith.mulf %247, %248 : vector<1x256xf32>
    %250 = vector.broadcast %249 : vector<1x256xf32> to vector<2x256xf32>
    %251 = arith.mulf %244, %250 : vector<2x256xf32>
    %c0_133 = arith.constant 0 : index
    %c0_134 = arith.constant 0 : index
    %252 = vector.load %arg10[%c0_133, %c0_134] : memref<1x256xf32, #tpu.memory_space<vmem>>, vector<1x256xf32>
    %253 = vector.broadcast %252 : vector<1x256xf32> to vector<2x256xf32>
    %254 = arith.addf %251, %253 : vector<2x256xf32>
    %c2_i32_135 = arith.constant 2 : i32
    %255 = tpu.memref_slice %arg22[%c2_i32_135] : memref<4x!tpu.dma_semaphore, #tpu.memory_space<semaphore_mem>> -> memref<1x!tpu.dma_semaphore, #tpu.memory_space<semaphore_mem>>
    %256 = tpu.memref_squeeze %255 : memref<1x!tpu.dma_semaphore, #tpu.memory_space<semaphore_mem>> -> memref<!tpu.dma_semaphore, #tpu.memory_space<semaphore_mem>>
    tpu.wait_dma2 semaphore(%256 : memref<!tpu.dma_semaphore, #tpu.memory_space<semaphore_mem>>) src(%arg15 : memref<256x1024xbf16, #tpu.memory_space<any>>) dst(%arg20 : memref<256x1024xbf16, #tpu.memory_space<vmem>>)
    %257 = arith.truncf %254 : vector<2x256xf32> to vector<2x256xbf16>
    %c0_136 = arith.constant 0 : index
    %c0_137 = arith.constant 0 : index
    %258 = vector.load %arg20[%c0_136, %c0_137] : memref<256x1024xbf16, #tpu.memory_space<vmem>>, vector<256x1024xbf16>
    %cst_138 = arith.constant dense<0.000000e+00> : vector<2x1024xf32>
    %259 = tpu.matmul %257, %258, %cst_138 {dimension_numbers = #tpu.dot_dimension_numbers<[1], [0], [0], [1], [0, 0, 1, 1], [], []>} : vector<2x256xbf16>, vector<256x1024xbf16>, vector<2x1024xf32> -> vector<2x1024xf32>
    %c0_139 = arith.constant 0 : index
    %c0_140 = arith.constant 0 : index
    %260 = vector.load %arg11[%c0_139, %c0_140] : memref<1x1024xf32, #tpu.memory_space<vmem>>, vector<1x1024xf32>
    %261 = vector.broadcast %260 : vector<1x1024xf32> to vector<2x1024xf32>
    %262 = arith.addf %259, %261 : vector<2x1024xf32>
    %cst_141 = arith.constant 0.000000e+00 : f32
    %263 = vector.broadcast %cst_141 : f32 to vector<2x1024xf32>
    %264 = arith.maximumf %262, %263 : vector<2x1024xf32>
    %c3_i32_142 = arith.constant 3 : i32
    %265 = tpu.memref_slice %arg22[%c3_i32_142] : memref<4x!tpu.dma_semaphore, #tpu.memory_space<semaphore_mem>> -> memref<1x!tpu.dma_semaphore, #tpu.memory_space<semaphore_mem>>
    %266 = tpu.memref_squeeze %265 : memref<1x!tpu.dma_semaphore, #tpu.memory_space<semaphore_mem>> -> memref<!tpu.dma_semaphore, #tpu.memory_space<semaphore_mem>>
    tpu.wait_dma2 semaphore(%266 : memref<!tpu.dma_semaphore, #tpu.memory_space<semaphore_mem>>) src(%arg16 : memref<1024x128xbf16, #tpu.memory_space<any>>) dst(%arg21 : memref<1024x128xbf16, #tpu.memory_space<vmem>>)
    %267 = arith.truncf %264 : vector<2x1024xf32> to vector<2x1024xbf16>
    %c0_143 = arith.constant 0 : index
    %c0_144 = arith.constant 0 : index
    %268 = vector.load %arg21[%c0_143, %c0_144] : memref<1024x128xbf16, #tpu.memory_space<vmem>>, vector<1024x128xbf16>
    %cst_145 = arith.constant dense<0.000000e+00> : vector<2x128xf32>
    %269 = tpu.matmul %267, %268, %cst_145 {dimension_numbers = #tpu.dot_dimension_numbers<[1], [0], [0], [1], [0, 0, 1, 1], [], []>} : vector<2x1024xbf16>, vector<1024x128xbf16>, vector<2x128xf32> -> vector<2x128xf32>
    %c0_146 = arith.constant 0 : index
    %c0_147 = arith.constant 0 : index
    %270 = vector.load %arg12[%c0_146, %c0_147] : memref<1x128xf32, #tpu.memory_space<vmem>>, vector<1x128xf32>
    %271 = vector.broadcast %270 : vector<1x128xf32> to vector<2x128xf32>
    %272 = arith.addf %269, %271 : vector<2x128xf32>
    %c0_148 = arith.constant 0 : index
    %c0_149 = arith.constant 0 : index
    %273 = vector.load %arg17[%c0_148, %c0_149] : memref<2x128xf32, #tpu.memory_space<vmem>>, vector<2x128xf32>
    tpu.vector_store %arg17[%c0_148, %c0_149], %272 {strides = array<i32>} : memref<2x128xf32, #tpu.memory_space<vmem>>, vector<2x128xf32>,
    return
  }
}

</mosaic_0001>

<bundles_post_ra>
// kernel: qnetwork_forward.1
= control target key start
LH: loop header
LB: loop body
LE: loop exit
PB: predicated region body
PF: predicated region fallthrough
CT: control target
= control target key end

     0   :  { %s16487_s0 = inlined_call_operand.vmem [shape: bf16[128,96], index: 0, kind: input, shape index: {}]   ;;  %s16488_s1 = inlined_call_operand.vmem [shape: bf16[96,512], index: 1, kind: input, shape index: {}]   ;;  %s16489_s2 = inlined_call_operand.vmem [shape: f32[1,512], index: 2, kind: input, shape index: {}]   ;;  %s16490_s3 = inlined_call_operand.vmem [shape: f32[1,512], index: 3, kind: input, shape index: {}]   ;;  %s16491_s4 = inlined_call_operand.vmem [shape: f32[1,512], index: 4, kind: input, shape index: {}]   ;;  %s16492_s5 = inlined_call_operand.vmem [shape: f32[1,256], index: 5, kind: input, shape index: {}]   ;;  %s16493_s6 = inlined_call_operand.vmem [shape: f32[1,256], index: 6, kind: input, shape index: {}]   ;;  %s16494_s7 = inlined_call_operand.vmem [shape: f32[1,256], index: 7, kind: input, shape index: {}]   ;;  %s16495_s8 = inlined_call_operand.vmem [shape: f32[1,256], index: 8, kind: input, shape index: {}]   ;;  %s16496_s9 = inlined_call_operand.vmem [shape: f32[1,256], index: 9, kind: input, shape index: {}]   ;;  %s16497_s10 = inlined_call_operand.vmem [shape: f32[1,256], index: 10, kind: input, shape index: {}]   ;;  %s16498_s11 = inlined_call_operand.vmem [shape: f32[1,1024], index: 11, kind: input, shape index: {}]   ;;  %s16499_s12 = inlined_call_operand.vmem [shape: f32[1,128], index: 12, kind: input, shape index: {}]   ;;  %s16500_s13 = inlined_call_operand.vmem [shape: bf16[512,256], index: 13, kind: input, shape index: {}]   ;;  %s16501_s14 = inlined_call_operand.vmem [shape: bf16[4096,256], index: 14, kind: input, shape index: {}]   ;;  %s16502_s15 = inlined_call_operand.vmem [shape: bf16[256,1024], index: 15, kind: input, shape index: {}]   ;;  %s16503_s16 = inlined_call_operand.vmem [shape: bf16[1024,128], index: 16, kind: input, shape index: {}]   ;;  %s16504_s17 = inlined_call_operand.hbm [shape: f32[2,128], index: 17, kind: output, shape index: {}]  }
   0x1   :  { %16534 = sst [smem:[#allocation107_spill]] %s16487_s0 }
   0x2   :  { %16535 = sst [smem:[#allocation108_spill]] %s16488_s1 }
   0x3   :  { %22 = vsyncpa [#allocation11], 0  ;;  %v67_v0 = vld [vmem:[%s16500_s13] sm:$0xf]  ;;  %v69_v1 = vld [vmem:[%s16500_s13 + $0x8] sm:$0xf] }
   0x4   :  { %68 = vst [vmem:[#allocation2] sm:$0xf] %v67_v0  ;;  %70 = vst [vmem:[#allocation2 + $0x4] sm:$0xf] %v69_v1  ;;  %v71_v2 = vld [vmem:[%s16500_s13 + $0x4] sm:$0xf] }
   0x5   :  { %v73_v3 = vld [vmem:[%s16500_s13 + $0xc] sm:$0xff]   ;;  %v77_v4 = vld [vmem:[%s16500_s13 + $0x18] sm:$0xf]  ;;  %72 = vst [vmem:[#allocation2 + $0x8] sm:$0xf] %v71_v2  ;;  %v81_v6 = vld [vmem:[%s16500_s13 + $0x1c] sm:$0xff]  }
   0x6   :  { %74 = vst [vmem:[#allocation2 + $0xc] sm:$0xff] %v73_v3   ;;  %78 = vst [vmem:[#allocation2 + $0x14] sm:$0xf] %v77_v4  ;;  %v79_v5 = vld [vmem:[%s16500_s13 + $0x14] sm:$0xf]  ;;  %v89_v9 = vld [vmem:[%s16500_s13 + $0x2c] sm:$0xff]  }
   0x7   :  { %v85_v7 = vld [vmem:[%s16500_s13 + $0x28] sm:$0xf]  ;;  %80 = vst [vmem:[#allocation2 + $0x18] sm:$0xf] %v79_v5  ;;  %82 = vst [vmem:[#allocation2 + $0x1c] sm:$0xff] %v81_v6   ;;  %v97_v12 = vld [vmem:[%s16500_s13 + $0x3c] sm:$0xff]  }
   0x8   :  { %86 = vst [vmem:[#allocation2 + $0x24] sm:$0xf] %v85_v7  ;;  %v87_v8 = vld [vmem:[%s16500_s13 + $0x24] sm:$0xf]  ;;  %v93_v10 = vld [vmem:[%s16500_s13 + $0x38] sm:$0xf] }
   0x9   :  { %88 = vst [vmem:[#allocation2 + $0x28] sm:$0xf] %v87_v8  ;;  %90 = vst [vmem:[#allocation2 + $0x2c] sm:$0xff] %v89_v9   ;;  %v95_v11 = vld [vmem:[%s16500_s13 + $0x34] sm:$0xf]  ;;  %v105_v15 = vld [vmem:[%s16500_s13 + $0x4c] sm:$0xff]  }
   0xa   :  { %94 = vst [vmem:[#allocation2 + $0x34] sm:$0xf] %v93_v10  ;;  %v101_v13 = vld [vmem:[%s16500_s13 + $0x48] sm:$0xf]  ;;  %96 = vst [vmem:[#allocation2 + $0x38] sm:$0xf] %v95_v11 }
   0xb   :  { %98 = vst [vmem:[#allocation2 + $0x3c] sm:$0xff] %v97_v12   ;;  %102 = vst [vmem:[#allocation2 + $0x44] sm:$0xf] %v101_v13  ;;  %v103_v14 = vld [vmem:[%s16500_s13 + $0x44] sm:$0xf]  ;;  %v113_v18 = vld [vmem:[%s16500_s13 + $0x5c] sm:$0xff]  }
   0xc   :  { %v109_v16 = vld [vmem:[%s16500_s13 + $0x58] sm:$0xf]  ;;  %104 = vst [vmem:[#allocation2 + $0x48] sm:$0xf] %v103_v14  ;;  %106 = vst [vmem:[#allocation2 + $0x4c] sm:$0xff] %v105_v15   ;;  %v121_v21 = vld [vmem:[%s16500_s13 + $0x6c] sm:$0xff]  }
   0xd   :  { %110 = vst [vmem:[#allocation2 + $0x54] sm:$0xf] %v109_v16  ;;  %v111_v17 = vld [vmem:[%s16500_s13 + $0x54] sm:$0xf]  ;;  %v117_v19 = vld [vmem:[%s16500_s13 + $0x68] sm:$0xf] }
   0xe   :  { %112 = vst [vmem:[#allocation2 + $0x58] sm:$0xf] %v111_v17  ;;  %114 = vst [vmem:[#allocation2 + $0x5c] sm:$0xff] %v113_v18   ;;  %v119_v20 = vld [vmem:[%s16500_s13 + $0x64] sm:$0xf]  ;;  %v129_v24 = vld [vmem:[%s16500_s13 + $0x7c] sm:$0xff]  }
   0xf   :  { %118 = vst [vmem:[#allocation2 + $0x64] sm:$0xf] %v117_v19  ;;  %v125_v22 = vld [vmem:[%s16500_s13 + $0x78] sm:$0xf]  ;;  %120 = vst [vmem:[#allocation2 + $0x68] sm:$0xf] %v119_v20 }
  0x10   :  { %122 = vst [vmem:[#allocation2 + $0x6c] sm:$0xff] %v121_v21   ;;  %126 = vst [vmem:[#allocation2 + $0x74] sm:$0xf] %v125_v22  ;;  %v127_v23 = vld [vmem:[%s16500_s13 + $0x74] sm:$0xf]  ;;  %v137_v27 = vld [vmem:[%s16500_s13 + $0x8c] sm:$0xff]  }
  0x11   :  { %v133_v25 = vld [vmem:[%s16500_s13 + $0x88] sm:$0xf]  ;;  %128 = vst [vmem:[#allocation2 + $0x78] sm:$0xf] %v127_v23  ;;  %130 = vst [vmem:[#allocation2 + $0x7c] sm:$0xff] %v129_v24   ;;  %v145_v30 = vld [vmem:[%s16500_s13 + $0x9c] sm:$0xff]  }
  0x12   :  { %134 = vst [vmem:[#allocation2 + $0x84] sm:$0xf] %v133_v25  ;;  %v135_v26 = vld [vmem:[%s16500_s13 + $0x84] sm:$0xf]  ;;  %v141_v28 = vld [vmem:[%s16500_s13 + $0x98] sm:$0xf] }
  0x13   :  { %136 = vst [vmem:[#allocation2 + $0x88] sm:$0xf] %v135_v26  ;;  %138 = vst [vmem:[#allocation2 + $0x8c] sm:$0xff] %v137_v27   ;;  %v143_v29 = vld [vmem:[%s16500_s13 + $0x94] sm:$0xf]  ;;  %v153_v33 = vld [vmem:[%s16500_s13 + $0xac] sm:$0xff]  }
  0x14   :  { %142 = vst [vmem:[#allocation2 + $0x94] sm:$0xf] %v141_v28  ;;  %v149_v31 = vld [vmem:[%s16500_s13 + $0xa8] sm:$0xf]  ;;  %144 = vst [vmem:[#allocation2 + $0x98] sm:$0xf] %v143_v29 }
  0x15   :  { %146 = vst [vmem:[#allocation2 + $0x9c] sm:$0xff] %v145_v30   ;;  %150 = vst [vmem:[#allocation2 + $0xa4] sm:$0xf] %v149_v31  ;;  %v151_v32 = vld [vmem:[%s16500_s13 + $0xa4] sm:$0xf]  ;;  %v161_v36 = vld [vmem:[%s16500_s13 + $0xbc] sm:$0xff]  }
  0x16   :  { %v157_v34 = vld [vmem:[%s16500_s13 + $0xb8] sm:$0xf]  ;;  %152 = vst [vmem:[#allocation2 + $0xa8] sm:$0xf] %v151_v32  ;;  %154 = vst [vmem:[#allocation2 + $0xac] sm:$0xff] %v153_v33   ;;  %v169_v39 = vld [vmem:[%s16500_s13 + $0xcc] sm:$0xff]  }
  0x17   :  { %158 = vst [vmem:[#allocation2 + $0xb4] sm:$0xf] %v157_v34  ;;  %v159_v35 = vld [vmem:[%s16500_s13 + $0xb4] sm:$0xf]  ;;  %v165_v37 = vld [vmem:[%s16500_s13 + $0xc8] sm:$0xf] }
  0x18   :  { %160 = vst [vmem:[#allocation2 + $0xb8] sm:$0xf] %v159_v35  ;;  %162 = vst [vmem:[#allocation2 + $0xbc] sm:$0xff] %v161_v36   ;;  %v167_v38 = vld [vmem:[%s16500_s13 + $0xc4] sm:$0xf]  ;;  %v177_v42 = vld [vmem:[%s16500_s13 + $0xdc] sm:$0xff]  }
  0x19   :  { %166 = vst [vmem:[#allocation2 + $0xc4] sm:$0xf] %v165_v37  ;;  %v173_v40 = vld [vmem:[%s16500_s13 + $0xd8] sm:$0xf]  ;;  %168 = vst [vmem:[#allocation2 + $0xc8] sm:$0xf] %v167_v38 }
  0x1a   :  { %170 = vst [vmem:[#allocation2 + $0xcc] sm:$0xff] %v169_v39   ;;  %174 = vst [vmem:[#allocation2 + $0xd4] sm:$0xf] %v173_v40  ;;  %v175_v41 = vld [vmem:[%s16500_s13 + $0xd4] sm:$0xf]  ;;  %v185_v45 = vld [vmem:[%s16500_s13 + $0xec] sm:$0xff]  }
  0x1b   :  { %v181_v43 = vld [vmem:[%s16500_s13 + $0xe8] sm:$0xf]  ;;  %176 = vst [vmem:[#allocation2 + $0xd8] sm:$0xf] %v175_v41  ;;  %178 = vst [vmem:[#allocation2 + $0xdc] sm:$0xff] %v177_v42   ;;  %v193_v48 = vld [vmem:[%s16500_s13 + $0xfc] sm:$0xff]  }
  0x1c   :  { %182 = vst [vmem:[#allocation2 + $0xe4] sm:$0xf] %v181_v43  ;;  %v183_v44 = vld [vmem:[%s16500_s13 + $0xe4] sm:$0xf]  ;;  %v189_v46 = vld [vmem:[%s16500_s13 + $0xf8] sm:$0xf] }
  0x1d   :  { %184 = vst [vmem:[#allocation2 + $0xe8] sm:$0xf] %v183_v44  ;;  %186 = vst [vmem:[#allocation2 + $0xec] sm:$0xff] %v185_v45   ;;  %v191_v47 = vld [vmem:[%s16500_s13 + $0xf4] sm:$0xf]  ;;  %v201_v51 = vld [vmem:[%s16500_s13 + $0x10c] sm:$0xff]  }
  0x1e   :  { %190 = vst [vmem:[#allocation2 + $0xf4] sm:$0xf] %v189_v46  ;;  %v197_v49 = vld [vmem:[%s16500_s13 + $0x108] sm:$0xf]  ;;  %192 = vst [vmem:[#allocation2 + $0xf8] sm:$0xf] %v191_v47 }
  0x1f   :  { %194 = vst [vmem:[#allocation2 + $0xfc] sm:$0xff] %v193_v48   ;;  %198 = vst [vmem:[#allocation2 + $0x104] sm:$0xf] %v197_v49  ;;  %v199_v50 = vld [vmem:[%s16500_s13 + $0x104] sm:$0xf]  ;;  %v209_v54 = vld [vmem:[%s16500_s13 + $0x11c] sm:$0xff]  }
  0x20   :  { %v205_v52 = vld [vmem:[%s16500_s13 + $0x118] sm:$0xf]  ;;  %200 = vst [vmem:[#allocation2 + $0x108] sm:$0xf] %v199_v50  ;;  %202 = vst [vmem:[#allocation2 + $0x10c] sm:$0xff] %v201_v51   ;;  %v217_v57 = vld [vmem:[%s16500_s13 + $0x12c] sm:$0xff]  }
  0x21   :  { %206 = vst [vmem:[#allocation2 + $0x114] sm:$0xf] %v205_v52  ;;  %v207_v53 = vld [vmem:[%s16500_s13 + $0x114] sm:$0xf]  ;;  %v213_v55 = vld [vmem:[%s16500_s13 + $0x128] sm:$0xf] }
  0x22   :  { %208 = vst [vmem:[#allocation2 + $0x118] sm:$0xf] %v207_v53  ;;  %210 = vst [vmem:[#allocation2 + $0x11c] sm:$0xff] %v209_v54   ;;  %v215_v56 = vld [vmem:[%s16500_s13 + $0x124] sm:$0xf]  ;;  %v225_v60 = vld [vmem:[%s16500_s13 + $0x13c] sm:$0xff]  }
  0x23   :  { %214 = vst [vmem:[#allocation2 + $0x124] sm:$0xf] %v213_v55  ;;  %v221_v58 = vld [vmem:[%s16500_s13 + $0x138] sm:$0xf]  ;;  %216 = vst [vmem:[#allocation2 + $0x128] sm:$0xf] %v215_v56 }
  0x24   :  { %218 = vst [vmem:[#allocation2 + $0x12c] sm:$0xff] %v217_v57   ;;  %222 = vst [vmem:[#allocation2 + $0x134] sm:$0xf] %v221_v58  ;;  %v223_v59 = vld [vmem:[%s16500_s13 + $0x134] sm:$0xf]  ;;  %v233_v63 = vld [vmem:[%s16500_s13 + $0x14c] sm:$0xff]  }
  0x25   :  { %v229_v61 = vld [vmem:[%s16500_s13 + $0x148] sm:$0xf]  ;;  %224 = vst [vmem:[#allocation2 + $0x138] sm:$0xf] %v223_v59  ;;  %226 = vst [vmem:[#allocation2 + $0x13c] sm:$0xff] %v225_v60   ;;  %v241_v2 = vld [vmem:[%s16500_s13 + $0x15c] sm:$0xff]  }
  0x26   :  { %230 = vst [vmem:[#allocation2 + $0x144] sm:$0xf] %v229_v61  ;;  %v231_v62 = vld [vmem:[%s16500_s13 + $0x144] sm:$0xf]  ;;  %v237_v0 = vld [vmem:[%s16500_s13 + $0x158] sm:$0xf] }
  0x27   :  { %232 = vst [vmem:[#allocation2 + $0x148] sm:$0xf] %v231_v62  ;;  %234 = vst [vmem:[#allocation2 + $0x14c] sm:$0xff] %v233_v63   ;;  %v239_v1 = vld [vmem:[%s16500_s13 + $0x154] sm:$0xf]  ;;  %v249_v5 = vld [vmem:[%s16500_s13 + $0x16c] sm:$0xff]  }
  0x28   :  { %238 = vst [vmem:[#allocation2 + $0x154] sm:$0xf] %v237_v0  ;;  %v245_v3 = vld [vmem:[%s16500_s13 + $0x168] sm:$0xf]  ;;  %240 = vst [vmem:[#allocation2 + $0x158] sm:$0xf] %v239_v1 }
  0x29   :  { %242 = vst [vmem:[#allocation2 + $0x15c] sm:$0xff] %v241_v2   ;;  %246 = vst [vmem:[#allocation2 + $0x164] sm:$0xf] %v245_v3  ;;  %v247_v4 = vld [vmem:[%s16500_s13 + $0x164] sm:$0xf]  ;;  %v257_v8 = vld [vmem:[%s16500_s13 + $0x17c] sm:$0xff]  }
  0x2a   :  { %v253_v6 = vld [vmem:[%s16500_s13 + $0x178] sm:$0xf]  ;;  %248 = vst [vmem:[#allocation2 + $0x168] sm:$0xf] %v247_v4  ;;  %250 = vst [vmem:[#allocation2 + $0x16c] sm:$0xff] %v249_v5   ;;  %v265_v11 = vld [vmem:[%s16500_s13 + $0x18c] sm:$0xff]  }
  0x2b   :  { %254 = vst [vmem:[#allocation2 + $0x174] sm:$0xf] %v253_v6  ;;  %v255_v7 = vld [vmem:[%s16500_s13 + $0x174] sm:$0xf]  ;;  %v261_v9 = vld [vmem:[%s16500_s13 + $0x188] sm:$0xf] }
  0x2c   :  { %256 = vst [vmem:[#allocation2 + $0x178] sm:$0xf] %v255_v7  ;;  %258 = vst [vmem:[#allocation2 + $0x17c] sm:$0xff] %v257_v8   ;;  %v263_v10 = vld [vmem:[%s16500_s13 + $0x184] sm:$0xf]  ;;  %v273_v14 = vld [vmem:[%s16500_s13 + $0x19c] sm:$0xff]  }
  0x2d   :  { %262 = vst [vmem:[#allocation2 + $0x184] sm:$0xf] %v261_v9  ;;  %v269_v12 = vld [vmem:[%s16500_s13 + $0x198] sm:$0xf]  ;;  %264 = vst [vmem:[#allocation2 + $0x188] sm:$0xf] %v263_v10 }
  0x2e   :  { %266 = vst [vmem:[#allocation2 + $0x18c] sm:$0xff] %v265_v11   ;;  %270 = vst [vmem:[#allocation2 + $0x194] sm:$0xf] %v269_v12  ;;  %v271_v13 = vld [vmem:[%s16500_s13 + $0x194] sm:$0xf]  ;;  %v281_v17 = vld [vmem:[%s16500_s13 + $0x1ac] sm:$0xff]  }
  0x2f   :  { %v277_v15 = vld [vmem:[%s16500_s13 + $0x1a8] sm:$0xf]  ;;  %272 = vst [vmem:[#allocation2 + $0x198] sm:$0xf] %v271_v13  ;;  %274 = vst [vmem:[#allocation2 + $0x19c] sm:$0xff] %v273_v14   ;;  %v289_v20 = vld [vmem:[%s16500_s13 + $0x1bc] sm:$0xff]  }
  0x30   :  { %278 = vst [vmem:[#allocation2 + $0x1a4] sm:$0xf] %v277_v15  ;;  %v279_v16 = vld [vmem:[%s16500_s13 + $0x1a4] sm:$0xf]  ;;  %v285_v18 = vld [vmem:[%s16500_s13 + $0x1b8] sm:$0xf] }
  0x31   :  { %280 = vst [vmem:[#allocation2 + $0x1a8] sm:$0xf] %v279_v16  ;;  %282 = vst [vmem:[#allocation2 + $0x1ac] sm:$0xff] %v281_v17   ;;  %v287_v19 = vld [vmem:[%s16500_s13 + $0x1b4] sm:$0xf]  ;;  %v297_v23 = vld [vmem:[%s16500_s13 + $0x1cc] sm:$0xff]  }
  0x32   :  { %286 = vst [vmem:[#allocation2 + $0x1b4] sm:$0xf] %v285_v18  ;;  %v293_v21 = vld [vmem:[%s16500_s13 + $0x1c8] sm:$0xf]  ;;  %288 = vst [vmem:[#allocation2 + $0x1b8] sm:$0xf] %v287_v19 }
  0x33   :  { %290 = vst [vmem:[#allocation2 + $0x1bc] sm:$0xff] %v289_v20   ;;  %294 = vst [vmem:[#allocation2 + $0x1c4] sm:$0xf] %v293_v21  ;;  %v295_v22 = vld [vmem:[%s16500_s13 + $0x1c4] sm:$0xf]  ;;  %v305_v26 = vld [vmem:[%s16500_s13 + $0x1dc] sm:$0xff]  }
  0x34   :  { %v301_v24 = vld [vmem:[%s16500_s13 + $0x1d8] sm:$0xf]  ;;  %296 = vst [vmem:[#allocation2 + $0x1c8] sm:$0xf] %v295_v22  ;;  %298 = vst [vmem:[#allocation2 + $0x1cc] sm:$0xff] %v297_v23   ;;  %v313_v29 = vld [vmem:[%s16500_s13 + $0x1ec] sm:$0xff]  }
  0x35   :  { %302 = vst [vmem:[#allocation2 + $0x1d4] sm:$0xf] %v301_v24  ;;  %v303_v25 = vld [vmem:[%s16500_s13 + $0x1d4] sm:$0xf]  ;;  %v309_v27 = vld [vmem:[%s16500_s13 + $0x1e8] sm:$0xf] }
  0x36   :  { %304 = vst [vmem:[#allocation2 + $0x1d8] sm:$0xf] %v303_v25  ;;  %306 = vst [vmem:[#allocation2 + $0x1dc] sm:$0xff] %v305_v26   ;;  %v311_v28 = vld [vmem:[%s16500_s13 + $0x1e4] sm:$0xf] }
  0x37   :  { %310 = vst [vmem:[#allocation2 + $0x1e4] sm:$0xf] %v309_v27  ;;  %v317_v30 = vld [vmem:[%s16500_s13 + $0x1f8] sm:$0xf]  ;;  %312 = vst [vmem:[#allocation2 + $0x1e8] sm:$0xf] %v311_v28 }
  0x38   :  { %314 = vst [vmem:[#allocation2 + $0x1ec] sm:$0xff] %v313_v29   ;;  %318 = vst [vmem:[#allocation2 + $0x1f4] sm:$0xf] %v317_v30  ;;  %v319_v31 = vld [vmem:[%s16500_s13 + $0x1f4] sm:$0xf] }
  0x39   :  { %v321_v32 = vld [vmem:[%s16500_s13 + $0x1fc] sm:$0xf]  ;;  %320 = vst [vmem:[#allocation2 + $0x1f8] sm:$0xf] %v319_v31 }
  0x3a   :  { %322 = vst [vmem:[#allocation2 + $0x1fc] sm:$0xf] %v321_v32 }
  0x3b   :  { %609 = vsyncadd [#allocation6], 8192  ;;  %s12751_s23 = smov [#allocation3]   ;;  %s16536_s26 = smov %s16501_s14 }
  0x3c   :  { %s12758_s27 = smov 0   ;;  %s12760_s28 = smov 0  }
  0x3d LB: > { %v631_v33 = vld [vmem:[%s12357_s26] sm:$0xf]  ;;  %v633_v34 = vld [vmem:[%s12357_s26 + $0x4] sm:$0xf]  ;;  %v635_v35 = vld [vmem:[%s12357_s26 + $0x10] sm:$0xf]  ;;  %s12365_s28 = sphi %s12760_s28, %s627_s28   ;;  %s12361_s27 = sphi %s12758_s27, %s16537_s27   ;;  %s12357_s26 = sphi %s16536_s26, %s1660_s26   ;;  %s12353_s23 = sphi %s12751_s23, %s1661_s23  }
  0x3e   : > { %632 = vst [vmem:[%s12353_s23] sm:$0xf] %v631_v33  ;;  %634 = vst [vmem:[%s12353_s23 + $0x8] sm:$0xf] %v633_v34  ;;  %v637_v36 = vld [vmem:[%s12357_s26 + $0x14] sm:$0xf]  ;;  %s1655_s13 = sadd.s32 1, %s12361_s27 }
  0x3f   : > { %636 = vst [vmem:[%s12353_s23 + $0x10] sm:$0xf] %v635_v35  ;;  %v639_v37 = vld [vmem:[%s12357_s26 + $0x20] sm:$0xf]  ;;  %v641_v38 = vld [vmem:[%s12357_s26 + $0x24] sm:$0xf] }
  0x40   : > { %638 = vst [vmem:[%s12353_s23 + $0x18] sm:$0xf] %v637_v36  ;;  %640 = vst [vmem:[%s12353_s23 + $0x20] sm:$0xf] %v639_v37  ;;  %v643_v39 = vld [vmem:[%s12357_s26 + $0x30] sm:$0xf] }
  0x41   : > { %642 = vst [vmem:[%s12353_s23 + $0x28] sm:$0xf] %v641_v38  ;;  %v645_v40 = vld [vmem:[%s12357_s26 + $0x34] sm:$0xf]  ;;  %v647_v41 = vld [vmem:[%s12357_s26 + $0x40] sm:$0xf] }
  0x42   : > { %644 = vst [vmem:[%s12353_s23 + $0x30] sm:$0xf] %v643_v39  ;;  %646 = vst [vmem:[%s12353_s23 + $0x38] sm:$0xf] %v645_v40  ;;  %v649_v42 = vld [vmem:[%s12357_s26 + $0x44] sm:$0xf] }
  0x43   : > { %648 = vst [vmem:[%s12353_s23 + $0x40] sm:$0xf] %v647_v41  ;;  %v651_v43 = vld [vmem:[%s12357_s26 + $0x50] sm:$0xf]  ;;  %v653_v44 = vld [vmem:[%s12357_s26 + $0x54] sm:$0xf] }
  0x44   : > { %650 = vst [vmem:[%s12353_s23 + $0x48] sm:$0xf] %v649_v42  ;;  %652 = vst [vmem:[%s12353_s23 + $0x50] sm:$0xf] %v651_v43  ;;  %v655_v45 = vld [vmem:[%s12357_s26 + $0x60] sm:$0xf] }
  0x45   : > { %654 = vst [vmem:[%s12353_s23 + $0x58] sm:$0xf] %v653_v44  ;;  %v657_v46 = vld [vmem:[%s12357_s26 + $0x64] sm:$0xf]  ;;  %v659_v47 = vld [vmem:[%s12357_s26 + $0x70] sm:$0xf] }
  0x46   : > { %656 = vst [vmem:[%s12353_s23 + $0x60] sm:$0xf] %v655_v45  ;;  %658 = vst [vmem:[%s12353_s23 + $0x68] sm:$0xf] %v657_v46  ;;  %v661_v48 = vld [vmem:[%s12357_s26 + $0x74] sm:$0xf] }
  0x47   : > { %660 = vst [vmem:[%s12353_s23 + $0x70] sm:$0xf] %v659_v47  ;;  %v663_v49 = vld [vmem:[%s12357_s26 + $0x80] sm:$0xf]  ;;  %v665_v50 = vld [vmem:[%s12357_s26 + $0x84] sm:$0xf] }
  0x48   : > { %662 = vst [vmem:[%s12353_s23 + $0x78] sm:$0xf] %v661_v48  ;;  %664 = vst [vmem:[%s12353_s23 + $0x80] sm:$0xf] %v663_v49  ;;  %v667_v51 = vld [vmem:[%s12357_s26 + $0x90] sm:$0xf] }
  0x49   : > { %666 = vst [vmem:[%s12353_s23 + $0x88] sm:$0xf] %v665_v50  ;;  %v669_v52 = vld [vmem:[%s12357_s26 + $0x94] sm:$0xf]  ;;  %v671_v53 = vld [vmem:[%s12357_s26 + $0xa0] sm:$0xf] }
  0x4a   : > { %668 = vst [vmem:[%s12353_s23 + $0x90] sm:$0xf] %v667_v51  ;;  %670 = vst [vmem:[%s12353_s23 + $0x98] sm:$0xf] %v669_v52  ;;  %v673_v54 = vld [vmem:[%s12357_s26 + $0xa4] sm:$0xf] }
  0x4b   : > { %672 = vst [vmem:[%s12353_s23 + $0xa0] sm:$0xf] %v671_v53  ;;  %v675_v55 = vld [vmem:[%s12357_s26 + $0xb0] sm:$0xf]  ;;  %v677_v56 = vld [vmem:[%s12357_s26 + $0xb4] sm:$0xf] }
  0x4c   : > { %674 = vst [vmem:[%s12353_s23 + $0xa8] sm:$0xf] %v673_v54  ;;  %676 = vst [vmem:[%s12353_s23 + $0xb0] sm:$0xf] %v675_v55  ;;  %v679_v57 = vld [vmem:[%s12357_s26 + $0xc0] sm:$0xf] }
  0x4d   : > { %678 = vst [vmem:[%s12353_s23 + $0xb8] sm:$0xf] %v677_v56  ;;  %v681_v58 = vld [vmem:[%s12357_s26 + $0xc4] sm:$0xf]  ;;  %v683_v59 = vld [vmem:[%s12357_s26 + $0xd0] sm:$0xf] }
  0x4e   : > { %680 = vst [vmem:[%s12353_s23 + $0xc0] sm:$0xf] %v679_v57  ;;  %682 = vst [vmem:[%s12353_s23 + $0xc8] sm:$0xf] %v681_v58  ;;  %v685_v60 = vld [vmem:[%s12357_s26 + $0xd4] sm:$0xf] }
  0x4f   : > { %684 = vst [vmem:[%s12353_s23 + $0xd0] sm:$0xf] %v683_v59  ;;  %v687_v61 = vld [vmem:[%s12357_s26 + $0xe0] sm:$0xf]  ;;  %v689_v62 = vld [vmem:[%s12357_s26 + $0xe4] sm:$0xf] }
  0x50   : > { %686 = vst [vmem:[%s12353_s23 + $0xd8] sm:$0xf] %v685_v60  ;;  %688 = vst [vmem:[%s12353_s23 + $0xe0] sm:$0xf] %v687_v61  ;;  %v691_v63 = vld [vmem:[%s12357_s26 + $0xf0] sm:$0xf] }
  0x51   : > { %690 = vst [vmem:[%s12353_s23 + $0xe8] sm:$0xf] %v689_v62  ;;  %v693_v0 = vld [vmem:[%s12357_s26 + $0xf4] sm:$0xf]  ;;  %v695_v1 = vld [vmem:[%s12357_s26 + $0x100] sm:$0xf] }
  0x52   : > { %692 = vst [vmem:[%s12353_s23 + $0xf0] sm:$0xf] %v691_v63  ;;  %694 = vst [vmem:[%s12353_s23 + $0xf8] sm:$0xf] %v693_v0  ;;  %v697_v2 = vld [vmem:[%s12357_s26 + $0x104] sm:$0xf] }
  0x53   : > { %696 = vst [vmem:[%s12353_s23 + $0x100] sm:$0xf] %v695_v1  ;;  %v699_v3 = vld [vmem:[%s12357_s26 + $0x110] sm:$0xf]  ;;  %v701_v4 = vld [vmem:[%s12357_s26 + $0x114] sm:$0xf] }
  0x54   : > { %698 = vst [vmem:[%s12353_s23 + $0x108] sm:$0xf] %v697_v2  ;;  %700 = vst [vmem:[%s12353_s23 + $0x110] sm:$0xf] %v699_v3  ;;  %v703_v5 = vld [vmem:[%s12357_s26 + $0x120] sm:$0xf] }
  0x55   : > { %702 = vst [vmem:[%s12353_s23 + $0x118] sm:$0xf] %v701_v4  ;;  %v705_v6 = vld [vmem:[%s12357_s26 + $0x124] sm:$0xf]  ;;  %v707_v7 = vld [vmem:[%s12357_s26 + $0x130] sm:$0xf] }
  0x56   : > { %704 = vst [vmem:[%s12353_s23 + $0x120] sm:$0xf] %v703_v5  ;;  %706 = vst [vmem:[%s12353_s23 + $0x128] sm:$0xf] %v705_v6  ;;  %v709_v8 = vld [vmem:[%s12357_s26 + $0x134] sm:$0xf] }
  0x57   : > { %708 = vst [vmem:[%s12353_s23 + $0x130] sm:$0xf] %v707_v7  ;;  %v711_v9 = vld [vmem:[%s12357_s26 + $0x140] sm:$0xf]  ;;  %v713_v10 = vld [vmem:[%s12357_s26 + $0x144] sm:$0xf] }
  0x58   : > { %710 = vst [vmem:[%s12353_s23 + $0x138] sm:$0xf] %v709_v8  ;;  %712 = vst [vmem:[%s12353_s23 + $0x140] sm:$0xf] %v711_v9  ;;  %v715_v11 = vld [vmem:[%s12357_s26 + $0x150] sm:$0xf] }
  0x59   : > { %714 = vst [vmem:[%s12353_s23 + $0x148] sm:$0xf] %v713_v10  ;;  %v717_v12 = vld [vmem:[%s12357_s26 + $0x154] sm:$0xf]  ;;  %v719_v13 = vld [vmem:[%s12357_s26 + $0x160] sm:$0xf] }
  0x5a   : > { %716 = vst [vmem:[%s12353_s23 + $0x150] sm:$0xf] %v715_v11  ;;  %718 = vst [vmem:[%s12353_s23 + $0x158] sm:$0xf] %v717_v12  ;;  %v721_v14 = vld [vmem:[%s12357_s26 + $0x164] sm:$0xf] }
  0x5b   : > { %720 = vst [vmem:[%s12353_s23 + $0x160] sm:$0xf] %v719_v13  ;;  %v723_v15 = vld [vmem:[%s12357_s26 + $0x170] sm:$0xf]  ;;  %v725_v16 = vld [vmem:[%s12357_s26 + $0x174] sm:$0xf] }
  0x5c   : > { %722 = vst [vmem:[%s12353_s23 + $0x168] sm:$0xf] %v721_v14  ;;  %724 = vst [vmem:[%s12353_s23 + $0x170] sm:$0xf] %v723_v15  ;;  %v727_v17 = vld [vmem:[%s12357_s26 + $0x180] sm:$0xf] }
  0x5d   : > { %726 = vst [vmem:[%s12353_s23 + $0x178] sm:$0xf] %v725_v16  ;;  %v729_v18 = vld [vmem:[%s12357_s26 + $0x184] sm:$0xf]  ;;  %v731_v19 = vld [vmem:[%s12357_s26 + $0x190] sm:$0xf] }
  0x5e   : > { %728 = vst [vmem:[%s12353_s23 + $0x180] sm:$0xf] %v727_v17  ;;  %730 = vst [vmem:[%s12353_s23 + $0x188] sm:$0xf] %v729_v18  ;;  %v733_v20 = vld [vmem:[%s12357_s26 + $0x194] sm:$0xf] }
  0x5f   : > { %732 = vst [vmem:[%s12353_s23 + $0x190] sm:$0xf] %v731_v19  ;;  %v735_v21 = vld [vmem:[%s12357_s26 + $0x1a0] sm:$0xf]  ;;  %v737_v22 = vld [vmem:[%s12357_s26 + $0x1a4] sm:$0xf] }
  0x60   : > { %734 = vst [vmem:[%s12353_s23 + $0x198] sm:$0xf] %v733_v20  ;;  %736 = vst [vmem:[%s12353_s23 + $0x1a0] sm:$0xf] %v735_v21  ;;  %v739_v23 = vld [vmem:[%s12357_s26 + $0x1b0] sm:$0xf] }
  0x61   : > { %738 = vst [vmem:[%s12353_s23 + $0x1a8] sm:$0xf] %v737_v22  ;;  %v741_v24 = vld [vmem:[%s12357_s26 + $0x1b4] sm:$0xf]  ;;  %v743_v25 = vld [vmem:[%s12357_s26 + $0x1c0] sm:$0xf] }
  0x62   : > { %740 = vst [vmem:[%s12353_s23 + $0x1b0] sm:$0xf] %v739_v23  ;;  %742 = vst [vmem:[%s12353_s23 + $0x1b8] sm:$0xf] %v741_v24  ;;  %v745_v26 = vld [vmem:[%s12357_s26 + $0x1c4] sm:$0xf] }
  0x63   : > { %744 = vst [vmem:[%s12353_s23 + $0x1c0] sm:$0xf] %v743_v25  ;;  %v747_v27 = vld [vmem:[%s12357_s26 + $0x1d0] sm:$0xf]  ;;  %v749_v28 = vld [vmem:[%s12357_s26 + $0x1d4] sm:$0xf] }
  0x64   : > { %746 = vst [vmem:[%s12353_s23 + $0x1c8] sm:$0xf] %v745_v26  ;;  %748 = vst [vmem:[%s12353_s23 + $0x1d0] sm:$0xf] %v747_v27  ;;  %v751_v29 = vld [vmem:[%s12357_s26 + $0x1e0] sm:$0xf] }
  0x65   : > { %750 = vst [vmem:[%s12353_s23 + $0x1d8] sm:$0xf] %v749_v28  ;;  %v753_v30 = vld [vmem:[%s12357_s26 + $0x1e4] sm:$0xf]  ;;  %v755_v31 = vld [vmem:[%s12357_s26 + $0x1f0] sm:$0xf] }
  0x66   : > { %752 = vst [vmem:[%s12353_s23 + $0x1e0] sm:$0xf] %v751_v29  ;;  %754 = vst [vmem:[%s12353_s23 + $0x1e8] sm:$0xf] %v753_v30  ;;  %v757_v32 = vld [vmem:[%s12357_s26 + $0x1f4] sm:$0xf] }
  0x67   : > { %756 = vst [vmem:[%s12353_s23 + $0x1f0] sm:$0xf] %v755_v31  ;;  %v759_v33 = vld [vmem:[%s12357_s26 + $0x200] sm:$0xf]  ;;  %v761_v34 = vld [vmem:[%s12357_s26 + $0x204] sm:$0xf] }
  0x68   : > { %758 = vst [vmem:[%s12353_s23 + $0x1f8] sm:$0xf] %v757_v32  ;;  %760 = vst [vmem:[%s12353_s23 + $0x200] sm:$0xf] %v759_v33  ;;  %v763_v35 = vld [vmem:[%s12357_s26 + $0x210] sm:$0xf] }
  0x69   : > { %762 = vst [vmem:[%s12353_s23 + $0x208] sm:$0xf] %v761_v34  ;;  %v765_v36 = vld [vmem:[%s12357_s26 + $0x214] sm:$0xf]  ;;  %v767_v37 = vld [vmem:[%s12357_s26 + $0x220] sm:$0xf] }
  0x6a   : > { %764 = vst [vmem:[%s12353_s23 + $0x210] sm:$0xf] %v763_v35  ;;  %766 = vst [vmem:[%s12353_s23 + $0x218] sm:$0xf] %v765_v36  ;;  %v769_v38 = vld [vmem:[%s12357_s26 + $0x224] sm:$0xf] }
  0x6b   : > { %768 = vst [vmem:[%s12353_s23 + $0x220] sm:$0xf] %v767_v37  ;;  %v771_v39 = vld [vmem:[%s12357_s26 + $0x230] sm:$0xf]  ;;  %v773_v40 = vld [vmem:[%s12357_s26 + $0x234] sm:$0xf] }
  0x6c   : > { %770 = vst [vmem:[%s12353_s23 + $0x228] sm:$0xf] %v769_v38  ;;  %772 = vst [vmem:[%s12353_s23 + $0x230] sm:$0xf] %v771_v39  ;;  %v775_v41 = vld [vmem:[%s12357_s26 + $0x240] sm:$0xf] }
  0x6d   : > { %774 = vst [vmem:[%s12353_s23 + $0x238] sm:$0xf] %v773_v40  ;;  %v777_v42 = vld [vmem:[%s12357_s26 + $0x244] sm:$0xf]  ;;  %v779_v43 = vld [vmem:[%s12357_s26 + $0x250] sm:$0xf] }
  0x6e   : > { %776 = vst [vmem:[%s12353_s23 + $0x240] sm:$0xf] %v775_v41  ;;  %778 = vst [vmem:[%s12353_s23 + $0x248] sm:$0xf] %v777_v42  ;;  %v781_v44 = vld [vmem:[%s12357_s26 + $0x254] sm:$0xf] }
  0x6f   : > { %780 = vst [vmem:[%s12353_s23 + $0x250] sm:$0xf] %v779_v43  ;;  %v783_v45 = vld [vmem:[%s12357_s26 + $0x260] sm:$0xf]  ;;  %v785_v46 = vld [vmem:[%s12357_s26 + $0x264] sm:$0xf] }
  0x70   : > { %782 = vst [vmem:[%s12353_s23 + $0x258] sm:$0xf] %v781_v44  ;;  %784 = vst [vmem:[%s12353_s23 + $0x260] sm:$0xf] %v783_v45  ;;  %v787_v47 = vld [vmem:[%s12357_s26 + $0x270] sm:$0xf] }
  0x71   : > { %786 = vst [vmem:[%s12353_s23 + $0x268] sm:$0xf] %v785_v46  ;;  %v789_v48 = vld [vmem:[%s12357_s26 + $0x274] sm:$0xf]  ;;  %v791_v49 = vld [vmem:[%s12357_s26 + $0x280] sm:$0xf] }
  0x72   : > { %788 = vst [vmem:[%s12353_s23 + $0x270] sm:$0xf] %v787_v47  ;;  %790 = vst [vmem:[%s12353_s23 + $0x278] sm:$0xf] %v789_v48  ;;  %v793_v50 = vld [vmem:[%s12357_s26 + $0x284] sm:$0xf] }
  0x73   : > { %792 = vst [vmem:[%s12353_s23 + $0x280] sm:$0xf] %v791_v49  ;;  %v795_v51 = vld [vmem:[%s12357_s26 + $0x290] sm:$0xf]  ;;  %v797_v52 = vld [vmem:[%s12357_s26 + $0x294] sm:$0xf] }
  0x74   : > { %794 = vst [vmem:[%s12353_s23 + $0x288] sm:$0xf] %v793_v50  ;;  %796 = vst [vmem:[%s12353_s23 + $0x290] sm:$0xf] %v795_v51  ;;  %v799_v53 = vld [vmem:[%s12357_s26 + $0x2a0] sm:$0xf] }
  0x75   : > { %798 = vst [vmem:[%s12353_s23 + $0x298] sm:$0xf] %v797_v52  ;;  %v801_v54 = vld [vmem:[%s12357_s26 + $0x2a4] sm:$0xf]  ;;  %v803_v55 = vld [vmem:[%s12357_s26 + $0x2b0] sm:$0xf] }
  0x76   : > { %800 = vst [vmem:[%s12353_s23 + $0x2a0] sm:$0xf] %v799_v53  ;;  %802 = vst [vmem:[%s12353_s23 + $0x2a8] sm:$0xf] %v801_v54  ;;  %v805_v56 = vld [vmem:[%s12357_s26 + $0x2b4] sm:$0xf] }
  0x77   : > { %804 = vst [vmem:[%s12353_s23 + $0x2b0] sm:$0xf] %v803_v55  ;;  %v807_v57 = vld [vmem:[%s12357_s26 + $0x2c0] sm:$0xf]  ;;  %v809_v58 = vld [vmem:[%s12357_s26 + $0x2c4] sm:$0xf] }
  0x78   : > { %806 = vst [vmem:[%s12353_s23 + $0x2b8] sm:$0xf] %v805_v56  ;;  %808 = vst [vmem:[%s12353_s23 + $0x2c0] sm:$0xf] %v807_v57  ;;  %v811_v59 = vld [vmem:[%s12357_s26 + $0x2d0] sm:$0xf] }
  0x79   : > { %810 = vst [vmem:[%s12353_s23 + $0x2c8] sm:$0xf] %v809_v58  ;;  %v813_v60 = vld [vmem:[%s12357_s26 + $0x2d4] sm:$0xf]  ;;  %v815_v61 = vld [vmem:[%s12357_s26 + $0x2e0] sm:$0xf] }
  0x7a   : > { %812 = vst [vmem:[%s12353_s23 + $0x2d0] sm:$0xf] %v811_v59  ;;  %814 = vst [vmem:[%s12353_s23 + $0x2d8] sm:$0xf] %v813_v60  ;;  %v817_v62 = vld [vmem:[%s12357_s26 + $0x2e4] sm:$0xf] }
  0x7b   : > { %816 = vst [vmem:[%s12353_s23 + $0x2e0] sm:$0xf] %v815_v61  ;;  %v819_v63 = vld [vmem:[%s12357_s26 + $0x2f0] sm:$0xf]  ;;  %v821_v0 = vld [vmem:[%s12357_s26 + $0x2f4] sm:$0xf] }
  0x7c   : > { %818 = vst [vmem:[%s12353_s23 + $0x2e8] sm:$0xf] %v817_v62  ;;  %820 = vst [vmem:[%s12353_s23 + $0x2f0] sm:$0xf] %v819_v63  ;;  %v823_v1 = vld [vmem:[%s12357_s26 + $0x300] sm:$0xf] }
  0x7d   : > { %822 = vst [vmem:[%s12353_s23 + $0x2f8] sm:$0xf] %v821_v0  ;;  %v825_v2 = vld [vmem:[%s12357_s26 + $0x304] sm:$0xf]  ;;  %v827_v3 = vld [vmem:[%s12357_s26 + $0x310] sm:$0xf] }
  0x7e   : > { %824 = vst [vmem:[%s12353_s23 + $0x300] sm:$0xf] %v823_v1  ;;  %826 = vst [vmem:[%s12353_s23 + $0x308] sm:$0xf] %v825_v2  ;;  %v829_v4 = vld [vmem:[%s12357_s26 + $0x314] sm:$0xf] }
  0x7f   : > { %828 = vst [vmem:[%s12353_s23 + $0x310] sm:$0xf] %v827_v3  ;;  %v831_v5 = vld [vmem:[%s12357_s26 + $0x320] sm:$0xf]  ;;  %v833_v6 = vld [vmem:[%s12357_s26 + $0x324] sm:$0xf] }
  0x80   : > { %830 = vst [vmem:[%s12353_s23 + $0x318] sm:$0xf] %v829_v4  ;;  %832 = vst [vmem:[%s12353_s23 + $0x320] sm:$0xf] %v831_v5  ;;  %v835_v7 = vld [vmem:[%s12357_s26 + $0x330] sm:$0xf] }
  0x81   : > { %834 = vst [vmem:[%s12353_s23 + $0x328] sm:$0xf] %v833_v6  ;;  %v837_v8 = vld [vmem:[%s12357_s26 + $0x334] sm:$0xf]  ;;  %v839_v9 = vld [vmem:[%s12357_s26 + $0x340] sm:$0xf] }
  0x82   : > { %836 = vst [vmem:[%s12353_s23 + $0x330] sm:$0xf] %v835_v7  ;;  %838 = vst [vmem:[%s12353_s23 + $0x338] sm:$0xf] %v837_v8  ;;  %v841_v10 = vld [vmem:[%s12357_s26 + $0x344] sm:$0xf] }
  0x83   : > { %840 = vst [vmem:[%s12353_s23 + $0x340] sm:$0xf] %v839_v9  ;;  %v843_v11 = vld [vmem:[%s12357_s26 + $0x350] sm:$0xf]  ;;  %v845_v12 = vld [vmem:[%s12357_s26 + $0x354] sm:$0xf] }
  0x84   : > { %842 = vst [vmem:[%s12353_s23 + $0x348] sm:$0xf] %v841_v10  ;;  %844 = vst [vmem:[%s12353_s23 + $0x350] sm:$0xf] %v843_v11  ;;  %v847_v13 = vld [vmem:[%s12357_s26 + $0x360] sm:$0xf] }
  0x85   : > { %846 = vst [vmem:[%s12353_s23 + $0x358] sm:$0xf] %v845_v12  ;;  %v849_v14 = vld [vmem:[%s12357_s26 + $0x364] sm:$0xf]  ;;  %v851_v15 = vld [vmem:[%s12357_s26 + $0x370] sm:$0xf] }
  0x86   : > { %848 = vst [vmem:[%s12353_s23 + $0x360] sm:$0xf] %v847_v13  ;;  %850 = vst [vmem:[%s12353_s23 + $0x368] sm:$0xf] %v849_v14  ;;  %v853_v16 = vld [vmem:[%s12357_s26 + $0x374] sm:$0xf] }
  0x87   : > { %852 = vst [vmem:[%s12353_s23 + $0x370] sm:$0xf] %v851_v15  ;;  %v855_v17 = vld [vmem:[%s12357_s26 + $0x380] sm:$0xf]  ;;  %v857_v18 = vld [vmem:[%s12357_s26 + $0x384] sm:$0xf] }
  0x88   : > { %854 = vst [vmem:[%s12353_s23 + $0x378] sm:$0xf] %v853_v16  ;;  %856 = vst [vmem:[%s12353_s23 + $0x380] sm:$0xf] %v855_v17  ;;  %v859_v19 = vld [vmem:[%s12357_s26 + $0x390] sm:$0xf] }
  0x89   : > { %858 = vst [vmem:[%s12353_s23 + $0x388] sm:$0xf] %v857_v18  ;;  %v861_v20 = vld [vmem:[%s12357_s26 + $0x394] sm:$0xf]  ;;  %v863_v21 = vld [vmem:[%s12357_s26 + $0x3a0] sm:$0xf] }
  0x8a   : > { %860 = vst [vmem:[%s12353_s23 + $0x390] sm:$0xf] %v859_v19  ;;  %862 = vst [vmem:[%s12353_s23 + $0x398] sm:$0xf] %v861_v20  ;;  %v865_v22 = vld [vmem:[%s12357_s26 + $0x3a4] sm:$0xf] }
  0x8b   : > { %864 = vst [vmem:[%s12353_s23 + $0x3a0] sm:$0xf] %v863_v21  ;;  %v867_v23 = vld [vmem:[%s12357_s26 + $0x3b0] sm:$0xf]  ;;  %v869_v24 = vld [vmem:[%s12357_s26 + $0x3b4] sm:$0xf] }
  0x8c   : > { %866 = vst [vmem:[%s12353_s23 + $0x3a8] sm:$0xf] %v865_v22  ;;  %868 = vst [vmem:[%s12353_s23 + $0x3b0] sm:$0xf] %v867_v23  ;;  %v871_v25 = vld [vmem:[%s12357_s26 + $0x3c0] sm:$0xf] }
  0x8d   : > { %870 = vst [vmem:[%s12353_s23 + $0x3b8] sm:$0xf] %v869_v24  ;;  %v873_v26 = vld [vmem:[%s12357_s26 + $0x3c4] sm:$0xf]  ;;  %v875_v27 = vld [vmem:[%s12357_s26 + $0x3d0] sm:$0xf] }
  0x8e   : > { %872 = vst [vmem:[%s12353_s23 + $0x3c0] sm:$0xf] %v871_v25  ;;  %874 = vst [vmem:[%s12353_s23 + $0x3c8] sm:$0xf] %v873_v26  ;;  %v877_v28 = vld [vmem:[%s12357_s26 + $0x3d4] sm:$0xf] }
  0x8f   : > { %876 = vst [vmem:[%s12353_s23 + $0x3d0] sm:$0xf] %v875_v27  ;;  %v879_v29 = vld [vmem:[%s12357_s26 + $0x3e0] sm:$0xf]  ;;  %v881_v30 = vld [vmem:[%s12357_s26 + $0x3e4] sm:$0xf] }
  0x90   : > { %878 = vst [vmem:[%s12353_s23 + $0x3d8] sm:$0xf] %v877_v28  ;;  %880 = vst [vmem:[%s12353_s23 + $0x3e0] sm:$0xf] %v879_v29  ;;  %v883_v31 = vld [vmem:[%s12357_s26 + $0x3f0] sm:$0xf] }
  0x91   : > { %882 = vst [vmem:[%s12353_s23 + $0x3e8] sm:$0xf] %v881_v30  ;;  %v885_v32 = vld [vmem:[%s12357_s26 + $0x3f4] sm:$0xf]  ;;  %v887_v33 = vld [vmem:[%s12357_s26 + $0x400] sm:$0xf] }
  0x92   : > { %884 = vst [vmem:[%s12353_s23 + $0x3f0] sm:$0xf] %v883_v31  ;;  %886 = vst [vmem:[%s12353_s23 + $0x3f8] sm:$0xf] %v885_v32  ;;  %v889_v34 = vld [vmem:[%s12357_s26 + $0x404] sm:$0xf] }
  0x93   : > { %888 = vst [vmem:[%s12353_s23 + $0x400] sm:$0xf] %v887_v33  ;;  %v891_v35 = vld [vmem:[%s12357_s26 + $0x410] sm:$0xf]  ;;  %v893_v36 = vld [vmem:[%s12357_s26 + $0x414] sm:$0xf] }
  0x94   : > { %890 = vst [vmem:[%s12353_s23 + $0x408] sm:$0xf] %v889_v34  ;;  %892 = vst [vmem:[%s12353_s23 + $0x410] sm:$0xf] %v891_v35  ;;  %v895_v37 = vld [vmem:[%s12357_s26 + $0x420] sm:$0xf] }
  0x95   : > { %894 = vst [vmem:[%s12353_s23 + $0x418] sm:$0xf] %v893_v36  ;;  %v897_v38 = vld [vmem:[%s12357_s26 + $0x424] sm:$0xf]  ;;  %v899_v39 = vld [vmem:[%s12357_s26 + $0x430] sm:$0xf] }
  0x96   : > { %896 = vst [vmem:[%s12353_s23 + $0x420] sm:$0xf] %v895_v37  ;;  %898 = vst [vmem:[%s12353_s23 + $0x428] sm:$0xf] %v897_v38  ;;  %v901_v40 = vld [vmem:[%s12357_s26 + $0x434] sm:$0xf] }
  0x97   : > { %900 = vst [vmem:[%s12353_s23 + $0x430] sm:$0xf] %v899_v39  ;;  %v903_v41 = vld [vmem:[%s12357_s26 + $0x440] sm:$0xf]  ;;  %v905_v42 = vld [vmem:[%s12357_s26 + $0x444] sm:$0xf] }
  0x98   : > { %902 = vst [vmem:[%s12353_s23 + $0x438] sm:$0xf] %v901_v40  ;;  %904 = vst [vmem:[%s12353_s23 + $0x440] sm:$0xf] %v903_v41  ;;  %v907_v43 = vld [vmem:[%s12357_s26 + $0x450] sm:$0xf] }
  0x99   : > { %906 = vst [vmem:[%s12353_s23 + $0x448] sm:$0xf] %v905_v42  ;;  %v909_v44 = vld [vmem:[%s12357_s26 + $0x454] sm:$0xf]  ;;  %v911_v45 = vld [vmem:[%s12357_s26 + $0x460] sm:$0xf] }
  0x9a   : > { %908 = vst [vmem:[%s12353_s23 + $0x450] sm:$0xf] %v907_v43  ;;  %910 = vst [vmem:[%s12353_s23 + $0x458] sm:$0xf] %v909_v44  ;;  %v913_v46 = vld [vmem:[%s12357_s26 + $0x464] sm:$0xf] }
  0x9b   : > { %912 = vst [vmem:[%s12353_s23 + $0x460] sm:$0xf] %v911_v45  ;;  %v915_v47 = vld [vmem:[%s12357_s26 + $0x470] sm:$0xf]  ;;  %v917_v48 = vld [vmem:[%s12357_s26 + $0x474] sm:$0xf] }
  0x9c   : > { %914 = vst [vmem:[%s12353_s23 + $0x468] sm:$0xf] %v913_v46  ;;  %916 = vst [vmem:[%s12353_s23 + $0x470] sm:$0xf] %v915_v47  ;;  %v919_v49 = vld [vmem:[%s12357_s26 + $0x480] sm:$0xf] }
  0x9d   : > { %918 = vst [vmem:[%s12353_s23 + $0x478] sm:$0xf] %v917_v48  ;;  %v921_v50 = vld [vmem:[%s12357_s26 + $0x484] sm:$0xf]  ;;  %v923_v51 = vld [vmem:[%s12357_s26 + $0x490] sm:$0xf] }
  0x9e   : > { %920 = vst [vmem:[%s12353_s23 + $0x480] sm:$0xf] %v919_v49  ;;  %922 = vst [vmem:[%s12353_s23 + $0x488] sm:$0xf] %v921_v50  ;;  %v925_v52 = vld [vmem:[%s12357_s26 + $0x494] sm:$0xf] }
  0x9f   : > { %924 = vst [vmem:[%s12353_s23 + $0x490] sm:$0xf] %v923_v51  ;;  %v927_v53 = vld [vmem:[%s12357_s26 + $0x4a0] sm:$0xf]  ;;  %v929_v54 = vld [vmem:[%s12357_s26 + $0x4a4] sm:$0xf] }
  0xa0   : > { %926 = vst [vmem:[%s12353_s23 + $0x498] sm:$0xf] %v925_v52  ;;  %928 = vst [vmem:[%s12353_s23 + $0x4a0] sm:$0xf] %v927_v53  ;;  %v931_v55 = vld [vmem:[%s12357_s26 + $0x4b0] sm:$0xf] }
  0xa1   : > { %930 = vst [vmem:[%s12353_s23 + $0x4a8] sm:$0xf] %v929_v54  ;;  %v933_v56 = vld [vmem:[%s12357_s26 + $0x4b4] sm:$0xf]  ;;  %v935_v57 = vld [vmem:[%s12357_s26 + $0x4c0] sm:$0xf] }
  0xa2   : > { %932 = vst [vmem:[%s12353_s23 + $0x4b0] sm:$0xf] %v931_v55  ;;  %934 = vst [vmem:[%s12353_s23 + $0x4b8] sm:$0xf] %v933_v56  ;;  %v937_v58 = vld [vmem:[%s12357_s26 + $0x4c4] sm:$0xf] }
  0xa3   : > { %936 = vst [vmem:[%s12353_s23 + $0x4c0] sm:$0xf] %v935_v57  ;;  %v939_v59 = vld [vmem:[%s12357_s26 + $0x4d0] sm:$0xf]  ;;  %v941_v60 = vld [vmem:[%s12357_s26 + $0x4d4] sm:$0xf] }
  0xa4   : > { %938 = vst [vmem:[%s12353_s23 + $0x4c8] sm:$0xf] %v937_v58  ;;  %940 = vst [vmem:[%s12353_s23 + $0x4d0] sm:$0xf] %v939_v59  ;;  %v943_v61 = vld [vmem:[%s12357_s26 + $0x4e0] sm:$0xf] }
  0xa5   : > { %942 = vst [vmem:[%s12353_s23 + $0x4d8] sm:$0xf] %v941_v60  ;;  %v945_v62 = vld [vmem:[%s12357_s26 + $0x4e4] sm:$0xf]  ;;  %v947_v63 = vld [vmem:[%s12357_s26 + $0x4f0] sm:$0xf] }
  0xa6   : > { %944 = vst [vmem:[%s12353_s23 + $0x4e0] sm:$0xf] %v943_v61  ;;  %946 = vst [vmem:[%s12353_s23 + $0x4e8] sm:$0xf] %v945_v62  ;;  %v949_v0 = vld [vmem:[%s12357_s26 + $0x4f4] sm:$0xf] }
  0xa7   : > { %948 = vst [vmem:[%s12353_s23 + $0x4f0] sm:$0xf] %v947_v63  ;;  %v951_v1 = vld [vmem:[%s12357_s26 + $0x500] sm:$0xf]  ;;  %v953_v2 = vld [vmem:[%s12357_s26 + $0x504] sm:$0xf] }
  0xa8   : > { %950 = vst [vmem:[%s12353_s23 + $0x4f8] sm:$0xf] %v949_v0  ;;  %952 = vst [vmem:[%s12353_s23 + $0x500] sm:$0xf] %v951_v1  ;;  %v955_v3 = vld [vmem:[%s12357_s26 + $0x510] sm:$0xf] }
  0xa9   : > { %954 = vst [vmem:[%s12353_s23 + $0x508] sm:$0xf] %v953_v2  ;;  %v957_v4 = vld [vmem:[%s12357_s26 + $0x514] sm:$0xf]  ;;  %v959_v5 = vld [vmem:[%s12357_s26 + $0x520] sm:$0xf] }
  0xaa   : > { %956 = vst [vmem:[%s12353_s23 + $0x510] sm:$0xf] %v955_v3  ;;  %958 = vst [vmem:[%s12353_s23 + $0x518] sm:$0xf] %v957_v4  ;;  %v961_v6 = vld [vmem:[%s12357_s26 + $0x524] sm:$0xf] }
  0xab   : > { %960 = vst [vmem:[%s12353_s23 + $0x520] sm:$0xf] %v959_v5  ;;  %v963_v7 = vld [vmem:[%s12357_s26 + $0x530] sm:$0xf]  ;;  %v965_v8 = vld [vmem:[%s12357_s26 + $0x534] sm:$0xf] }
  0xac   : > { %962 = vst [vmem:[%s12353_s23 + $0x528] sm:$0xf] %v961_v6  ;;  %964 = vst [vmem:[%s12353_s23 + $0x530] sm:$0xf] %v963_v7  ;;  %v967_v9 = vld [vmem:[%s12357_s26 + $0x540] sm:$0xf] }
  0xad   : > { %966 = vst [vmem:[%s12353_s23 + $0x538] sm:$0xf] %v965_v8  ;;  %v969_v10 = vld [vmem:[%s12357_s26 + $0x544] sm:$0xf]  ;;  %v971_v11 = vld [vmem:[%s12357_s26 + $0x550] sm:$0xf] }
  0xae   : > { %968 = vst [vmem:[%s12353_s23 + $0x540] sm:$0xf] %v967_v9  ;;  %970 = vst [vmem:[%s12353_s23 + $0x548] sm:$0xf] %v969_v10  ;;  %v973_v12 = vld [vmem:[%s12357_s26 + $0x554] sm:$0xf] }
  0xaf   : > { %972 = vst [vmem:[%s12353_s23 + $0x550] sm:$0xf] %v971_v11  ;;  %v975_v13 = vld [vmem:[%s12357_s26 + $0x560] sm:$0xf]  ;;  %v977_v14 = vld [vmem:[%s12357_s26 + $0x564] sm:$0xf] }
  0xb0   : > { %974 = vst [vmem:[%s12353_s23 + $0x558] sm:$0xf] %v973_v12  ;;  %976 = vst [vmem:[%s12353_s23 + $0x560] sm:$0xf] %v975_v13  ;;  %v979_v15 = vld [vmem:[%s12357_s26 + $0x570] sm:$0xf] }
  0xb1   : > { %978 = vst [vmem:[%s12353_s23 + $0x568] sm:$0xf] %v977_v14  ;;  %v981_v16 = vld [vmem:[%s12357_s26 + $0x574] sm:$0xf]  ;;  %v983_v17 = vld [vmem:[%s12357_s26 + $0x580] sm:$0xf] }
  0xb2   : > { %980 = vst [vmem:[%s12353_s23 + $0x570] sm:$0xf] %v979_v15  ;;  %982 = vst [vmem:[%s12353_s23 + $0x578] sm:$0xf] %v981_v16  ;;  %v985_v18 = vld [vmem:[%s12357_s26 + $0x584] sm:$0xf] }
  0xb3   : > { %984 = vst [vmem:[%s12353_s23 + $0x580] sm:$0xf] %v983_v17  ;;  %v987_v19 = vld [vmem:[%s12357_s26 + $0x590] sm:$0xf]  ;;  %v989_v20 = vld [vmem:[%s12357_s26 + $0x594] sm:$0xf] }
  0xb4   : > { %986 = vst [vmem:[%s12353_s23 + $0x588] sm:$0xf] %v985_v18  ;;  %988 = vst [vmem:[%s12353_s23 + $0x590] sm:$0xf] %v987_v19  ;;  %v991_v21 = vld [vmem:[%s12357_s26 + $0x5a0] sm:$0xf] }
  0xb5   : > { %990 = vst [vmem:[%s12353_s23 + $0x598] sm:$0xf] %v989_v20  ;;  %v993_v22 = vld [vmem:[%s12357_s26 + $0x5a4] sm:$0xf]  ;;  %v995_v23 = vld [vmem:[%s12357_s26 + $0x5b0] sm:$0xf] }
  0xb6   : > { %992 = vst [vmem:[%s12353_s23 + $0x5a0] sm:$0xf] %v991_v21  ;;  %994 = vst [vmem:[%s12353_s23 + $0x5a8] sm:$0xf] %v993_v22  ;;  %v997_v24 = vld [vmem:[%s12357_s26 + $0x5b4] sm:$0xf] }
  0xb7   : > { %996 = vst [vmem:[%s12353_s23 + $0x5b0] sm:$0xf] %v995_v23  ;;  %v999_v25 = vld [vmem:[%s12357_s26 + $0x5c0] sm:$0xf]  ;;  %v1001_v26 = vld [vmem:[%s12357_s26 + $0x5c4] sm:$0xf] }
  0xb8   : > { %998 = vst [vmem:[%s12353_s23 + $0x5b8] sm:$0xf] %v997_v24  ;;  %1000 = vst [vmem:[%s12353_s23 + $0x5c0] sm:$0xf] %v999_v25  ;;  %v1003_v27 = vld [vmem:[%s12357_s26 + $0x5d0] sm:$0xf] }
  0xb9   : > { %1002 = vst [vmem:[%s12353_s23 + $0x5c8] sm:$0xf] %v1001_v26  ;;  %v1005_v28 = vld [vmem:[%s12357_s26 + $0x5d4] sm:$0xf]  ;;  %v1007_v29 = vld [vmem:[%s12357_s26 + $0x5e0] sm:$0xf] }
  0xba   : > { %1004 = vst [vmem:[%s12353_s23 + $0x5d0] sm:$0xf] %v1003_v27  ;;  %1006 = vst [vmem:[%s12353_s23 + $0x5d8] sm:$0xf] %v1005_v28  ;;  %v1009_v30 = vld [vmem:[%s12357_s26 + $0x5e4] sm:$0xf] }
  0xbb   : > { %1008 = vst [vmem:[%s12353_s23 + $0x5e0] sm:$0xf] %v1007_v29  ;;  %v1011_v31 = vld [vmem:[%s12357_s26 + $0x5f0] sm:$0xf]  ;;  %v1013_v32 = vld [vmem:[%s12357_s26 + $0x5f4] sm:$0xf] }
  0xbc   : > { %1010 = vst [vmem:[%s12353_s23 + $0x5e8] sm:$0xf] %v1009_v30  ;;  %1012 = vst [vmem:[%s12353_s23 + $0x5f0] sm:$0xf] %v1011_v31  ;;  %v1015_v33 = vld [vmem:[%s12357_s26 + $0x600] sm:$0xf] }
  0xbd   : > { %1014 = vst [vmem:[%s12353_s23 + $0x5f8] sm:$0xf] %v1013_v32  ;;  %v1017_v34 = vld [vmem:[%s12357_s26 + $0x604] sm:$0xf]  ;;  %v1019_v35 = vld [vmem:[%s12357_s26 + $0x610] sm:$0xf] }
  0xbe   : > { %1016 = vst [vmem:[%s12353_s23 + $0x600] sm:$0xf] %v1015_v33  ;;  %1018 = vst [vmem:[%s12353_s23 + $0x608] sm:$0xf] %v1017_v34  ;;  %v1021_v36 = vld [vmem:[%s12357_s26 + $0x614] sm:$0xf] }
  0xbf   : > { %1020 = vst [vmem:[%s12353_s23 + $0x610] sm:$0xf] %v1019_v35  ;;  %v1023_v37 = vld [vmem:[%s12357_s26 + $0x620] sm:$0xf]  ;;  %v1025_v38 = vld [vmem:[%s12357_s26 + $0x624] sm:$0xf] }
  0xc0   : > { %1022 = vst [vmem:[%s12353_s23 + $0x618] sm:$0xf] %v1021_v36  ;;  %1024 = vst [vmem:[%s12353_s23 + $0x620] sm:$0xf] %v1023_v37  ;;  %v1027_v39 = vld [vmem:[%s12357_s26 + $0x630] sm:$0xf] }
  0xc1   : > { %1026 = vst [vmem:[%s12353_s23 + $0x628] sm:$0xf] %v1025_v38  ;;  %v1029_v40 = vld [vmem:[%s12357_s26 + $0x634] sm:$0xf]  ;;  %v1031_v41 = vld [vmem:[%s12357_s26 + $0x640] sm:$0xf] }
  0xc2   : > { %1028 = vst [vmem:[%s12353_s23 + $0x630] sm:$0xf] %v1027_v39  ;;  %1030 = vst [vmem:[%s12353_s23 + $0x638] sm:$0xf] %v1029_v40  ;;  %v1033_v42 = vld [vmem:[%s12357_s26 + $0x644] sm:$0xf] }
  0xc3   : > { %1032 = vst [vmem:[%s12353_s23 + $0x640] sm:$0xf] %v1031_v41  ;;  %v1035_v43 = vld [vmem:[%s12357_s26 + $0x650] sm:$0xf]  ;;  %v1037_v44 = vld [vmem:[%s12357_s26 + $0x654] sm:$0xf] }
  0xc4   : > { %1034 = vst [vmem:[%s12353_s23 + $0x648] sm:$0xf] %v1033_v42  ;;  %1036 = vst [vmem:[%s12353_s23 + $0x650] sm:$0xf] %v1035_v43  ;;  %v1039_v45 = vld [vmem:[%s12357_s26 + $0x660] sm:$0xf] }
  0xc5   : > { %1038 = vst [vmem:[%s12353_s23 + $0x658] sm:$0xf] %v1037_v44  ;;  %v1041_v46 = vld [vmem:[%s12357_s26 + $0x664] sm:$0xf]  ;;  %v1043_v47 = vld [vmem:[%s12357_s26 + $0x670] sm:$0xf] }
  0xc6   : > { %1040 = vst [vmem:[%s12353_s23 + $0x660] sm:$0xf] %v1039_v45  ;;  %1042 = vst [vmem:[%s12353_s23 + $0x668] sm:$0xf] %v1041_v46  ;;  %v1045_v48 = vld [vmem:[%s12357_s26 + $0x674] sm:$0xf] }
  0xc7   : > { %1044 = vst [vmem:[%s12353_s23 + $0x670] sm:$0xf] %v1043_v47  ;;  %v1047_v49 = vld [vmem:[%s12357_s26 + $0x680] sm:$0xf]  ;;  %v1049_v50 = vld [vmem:[%s12357_s26 + $0x684] sm:$0xf] }
  0xc8   : > { %1046 = vst [vmem:[%s12353_s23 + $0x678] sm:$0xf] %v1045_v48  ;;  %1048 = vst [vmem:[%s12353_s23 + $0x680] sm:$0xf] %v1047_v49  ;;  %v1051_v51 = vld [vmem:[%s12357_s26 + $0x690] sm:$0xf] }
  0xc9   : > { %1050 = vst [vmem:[%s12353_s23 + $0x688] sm:$0xf] %v1049_v50  ;;  %v1053_v52 = vld [vmem:[%s12357_s26 + $0x694] sm:$0xf]  ;;  %v1055_v53 = vld [vmem:[%s12357_s26 + $0x6a0] sm:$0xf] }
  0xca   : > { %1052 = vst [vmem:[%s12353_s23 + $0x690] sm:$0xf] %v1051_v51  ;;  %1054 = vst [vmem:[%s12353_s23 + $0x698] sm:$0xf] %v1053_v52  ;;  %v1057_v54 = vld [vmem:[%s12357_s26 + $0x6a4] sm:$0xf] }
  0xcb   : > { %1056 = vst [vmem:[%s12353_s23 + $0x6a0] sm:$0xf] %v1055_v53  ;;  %v1059_v55 = vld [vmem:[%s12357_s26 + $0x6b0] sm:$0xf]  ;;  %v1061_v56 = vld [vmem:[%s12357_s26 + $0x6b4] sm:$0xf] }
  0xcc   : > { %1058 = vst [vmem:[%s12353_s23 + $0x6a8] sm:$0xf] %v1057_v54  ;;  %1060 = vst [vmem:[%s12353_s23 + $0x6b0] sm:$0xf] %v1059_v55  ;;  %v1063_v57 = vld [vmem:[%s12357_s26 + $0x6c0] sm:$0xf] }
  0xcd   : > { %1062 = vst [vmem:[%s12353_s23 + $0x6b8] sm:$0xf] %v1061_v56  ;;  %v1065_v58 = vld [vmem:[%s12357_s26 + $0x6c4] sm:$0xf]  ;;  %v1067_v59 = vld [vmem:[%s12357_s26 + $0x6d0] sm:$0xf] }
  0xce   : > { %1064 = vst [vmem:[%s12353_s23 + $0x6c0] sm:$0xf] %v1063_v57  ;;  %1066 = vst [vmem:[%s12353_s23 + $0x6c8] sm:$0xf] %v1065_v58  ;;  %v1069_v60 = vld [vmem:[%s12357_s26 + $0x6d4] sm:$0xf] }
  0xcf   : > { %1068 = vst [vmem:[%s12353_s23 + $0x6d0] sm:$0xf] %v1067_v59  ;;  %v1071_v61 = vld [vmem:[%s12357_s26 + $0x6e0] sm:$0xf]  ;;  %v1073_v62 = vld [vmem:[%s12357_s26 + $0x6e4] sm:$0xf] }
  0xd0   : > { %1070 = vst [vmem:[%s12353_s23 + $0x6d8] sm:$0xf] %v1069_v60  ;;  %1072 = vst [vmem:[%s12353_s23 + $0x6e0] sm:$0xf] %v1071_v61  ;;  %v1075_v63 = vld [vmem:[%s12357_s26 + $0x6f0] sm:$0xf] }
  0xd1   : > { %1074 = vst [vmem:[%s12353_s23 + $0x6e8] sm:$0xf] %v1073_v62  ;;  %v1077_v0 = vld [vmem:[%s12357_s26 + $0x6f4] sm:$0xf]  ;;  %v1079_v1 = vld [vmem:[%s12357_s26 + $0x700] sm:$0xf] }
  0xd2   : > { %1076 = vst [vmem:[%s12353_s23 + $0x6f0] sm:$0xf] %v1075_v63  ;;  %1078 = vst [vmem:[%s12353_s23 + $0x6f8] sm:$0xf] %v1077_v0  ;;  %v1081_v2 = vld [vmem:[%s12357_s26 + $0x704] sm:$0xf] }
  0xd3   : > { %1080 = vst [vmem:[%s12353_s23 + $0x700] sm:$0xf] %v1079_v1  ;;  %v1083_v3 = vld [vmem:[%s12357_s26 + $0x710] sm:$0xf]  ;;  %v1085_v4 = vld [vmem:[%s12357_s26 + $0x714] sm:$0xf] }
  0xd4   : > { %1082 = vst [vmem:[%s12353_s23 + $0x708] sm:$0xf] %v1081_v2  ;;  %1084 = vst [vmem:[%s12353_s23 + $0x710] sm:$0xf] %v1083_v3  ;;  %v1087_v5 = vld [vmem:[%s12357_s26 + $0x720] sm:$0xf] }
  0xd5   : > { %1086 = vst [vmem:[%s12353_s23 + $0x718] sm:$0xf] %v1085_v4  ;;  %v1089_v6 = vld [vmem:[%s12357_s26 + $0x724] sm:$0xf]  ;;  %v1091_v7 = vld [vmem:[%s12357_s26 + $0x730] sm:$0xf] }
  0xd6   : > { %1088 = vst [vmem:[%s12353_s23 + $0x720] sm:$0xf] %v1087_v5  ;;  %1090 = vst [vmem:[%s12353_s23 + $0x728] sm:$0xf] %v1089_v6  ;;  %v1093_v8 = vld [vmem:[%s12357_s26 + $0x734] sm:$0xf] }
  0xd7   : > { %1092 = vst [vmem:[%s12353_s23 + $0x730] sm:$0xf] %v1091_v7  ;;  %v1095_v9 = vld [vmem:[%s12357_s26 + $0x740] sm:$0xf]  ;;  %v1097_v10 = vld [vmem:[%s12357_s26 + $0x744] sm:$0xf] }
  0xd8   : > { %1094 = vst [vmem:[%s12353_s23 + $0x738] sm:$0xf] %v1093_v8  ;;  %1096 = vst [vmem:[%s12353_s23 + $0x740] sm:$0xf] %v1095_v9  ;;  %v1099_v11 = vld [vmem:[%s12357_s26 + $0x750] sm:$0xf] }
  0xd9   : > { %1098 = vst [vmem:[%s12353_s23 + $0x748] sm:$0xf] %v1097_v10  ;;  %v1101_v12 = vld [vmem:[%s12357_s26 + $0x754] sm:$0xf]  ;;  %v1103_v13 = vld [vmem:[%s12357_s26 + $0x760] sm:$0xf] }
  0xda   : > { %1100 = vst [vmem:[%s12353_s23 + $0x750] sm:$0xf] %v1099_v11  ;;  %1102 = vst [vmem:[%s12353_s23 + $0x758] sm:$0xf] %v1101_v12  ;;  %v1105_v14 = vld [vmem:[%s12357_s26 + $0x764] sm:$0xf] }
  0xdb   : > { %1104 = vst [vmem:[%s12353_s23 + $0x760] sm:$0xf] %v1103_v13  ;;  %v1107_v15 = vld [vmem:[%s12357_s26 + $0x770] sm:$0xf]  ;;  %v1109_v16 = vld [vmem:[%s12357_s26 + $0x774] sm:$0xf] }
  0xdc   : > { %1106 = vst [vmem:[%s12353_s23 + $0x768] sm:$0xf] %v1105_v14  ;;  %1108 = vst [vmem:[%s12353_s23 + $0x770] sm:$0xf] %v1107_v15  ;;  %v1111_v17 = vld [vmem:[%s12357_s26 + $0x780] sm:$0xf] }
  0xdd   : > { %1110 = vst [vmem:[%s12353_s23 + $0x778] sm:$0xf] %v1109_v16  ;;  %v1113_v18 = vld [vmem:[%s12357_s26 + $0x784] sm:$0xf]  ;;  %v1115_v19 = vld [vmem:[%s12357_s26 + $0x790] sm:$0xf] }
  0xde   : > { %1112 = vst [vmem:[%s12353_s23 + $0x780] sm:$0xf] %v1111_v17  ;;  %1114 = vst [vmem:[%s12353_s23 + $0x788] sm:$0xf] %v1113_v18  ;;  %v1117_v20 = vld [vmem:[%s12357_s26 + $0x794] sm:$0xf] }
  0xdf   : > { %1116 = vst [vmem:[%s12353_s23 + $0x790] sm:$0xf] %v1115_v19  ;;  %v1119_v21 = vld [vmem:[%s12357_s26 + $0x7a0] sm:$0xf]  ;;  %v1121_v22 = vld [vmem:[%s12357_s26 + $0x7a4] sm:$0xf] }
  0xe0   : > { %1118 = vst [vmem:[%s12353_s23 + $0x798] sm:$0xf] %v1117_v20  ;;  %1120 = vst [vmem:[%s12353_s23 + $0x7a0] sm:$0xf] %v1119_v21  ;;  %v1123_v23 = vld [vmem:[%s12357_s26 + $0x7b0] sm:$0xf] }
  0xe1   : > { %1122 = vst [vmem:[%s12353_s23 + $0x7a8] sm:$0xf] %v1121_v22  ;;  %v1125_v24 = vld [vmem:[%s12357_s26 + $0x7b4] sm:$0xf]  ;;  %v1127_v25 = vld [vmem:[%s12357_s26 + $0x7c0] sm:$0xf] }
  0xe2   : > { %1124 = vst [vmem:[%s12353_s23 + $0x7b0] sm:$0xf] %v1123_v23  ;;  %1126 = vst [vmem:[%s12353_s23 + $0x7b8] sm:$0xf] %v1125_v24  ;;  %v1129_v26 = vld [vmem:[%s12357_s26 + $0x7c4] sm:$0xf] }
  0xe3   : > { %1128 = vst [vmem:[%s12353_s23 + $0x7c0] sm:$0xf] %v1127_v25  ;;  %v1131_v27 = vld [vmem:[%s12357_s26 + $0x7d0] sm:$0xf]  ;;  %v1133_v28 = vld [vmem:[%s12357_s26 + $0x7d4] sm:$0xf] }
  0xe4   : > { %1130 = vst [vmem:[%s12353_s23 + $0x7c8] sm:$0xf] %v1129_v26  ;;  %1132 = vst [vmem:[%s12353_s23 + $0x7d0] sm:$0xf] %v1131_v27  ;;  %v1135_v29 = vld [vmem:[%s12357_s26 + $0x7e0] sm:$0xf] }
  0xe5   : > { %1134 = vst [vmem:[%s12353_s23 + $0x7d8] sm:$0xf] %v1133_v28  ;;  %v1137_v30 = vld [vmem:[%s12357_s26 + $0x7e4] sm:$0xf]  ;;  %v1139_v31 = vld [vmem:[%s12357_s26 + $0x7f0] sm:$0xf] }
  0xe6   : > { %1136 = vst [vmem:[%s12353_s23 + $0x7e0] sm:$0xf] %v1135_v29  ;;  %1138 = vst [vmem:[%s12353_s23 + $0x7e8] sm:$0xf] %v1137_v30  ;;  %v1141_v32 = vld [vmem:[%s12357_s26 + $0x7f4] sm:$0xf] }
  0xe7   : > { %1140 = vst [vmem:[%s12353_s23 + $0x7f0] sm:$0xf] %v1139_v31  ;;  %v1143_v33 = vld [vmem:[%s12357_s26 + $0x800] sm:$0xf]  ;;  %v1145_v34 = vld [vmem:[%s12357_s26 + $0x804] sm:$0xf] }
  0xe8   : > { %1142 = vst [vmem:[%s12353_s23 + $0x7f8] sm:$0xf] %v1141_v32  ;;  %1144 = vst [vmem:[%s12353_s23 + $0x800] sm:$0xf] %v1143_v33  ;;  %v1147_v35 = vld [vmem:[%s12357_s26 + $0x810] sm:$0xf] }
  0xe9   : > { %1146 = vst [vmem:[%s12353_s23 + $0x808] sm:$0xf] %v1145_v34  ;;  %v1149_v36 = vld [vmem:[%s12357_s26 + $0x814] sm:$0xf]  ;;  %v1151_v37 = vld [vmem:[%s12357_s26 + $0x820] sm:$0xf] }
  0xea   : > { %1148 = vst [vmem:[%s12353_s23 + $0x810] sm:$0xf] %v1147_v35  ;;  %1150 = vst [vmem:[%s12353_s23 + $0x818] sm:$0xf] %v1149_v36  ;;  %v1153_v38 = vld [vmem:[%s12357_s26 + $0x824] sm:$0xf] }
  0xeb   : > { %1152 = vst [vmem:[%s12353_s23 + $0x820] sm:$0xf] %v1151_v37  ;;  %v1155_v39 = vld [vmem:[%s12357_s26 + $0x830] sm:$0xf]  ;;  %v1157_v40 = vld [vmem:[%s12357_s26 + $0x834] sm:$0xf] }
  0xec   : > { %1154 = vst [vmem:[%s12353_s23 + $0x828] sm:$0xf] %v1153_v38  ;;  %1156 = vst [vmem:[%s12353_s23 + $0x830] sm:$0xf] %v1155_v39  ;;  %v1159_v41 = vld [vmem:[%s12357_s26 + $0x840] sm:$0xf] }
  0xed   : > { %1158 = vst [vmem:[%s12353_s23 + $0x838] sm:$0xf] %v1157_v40  ;;  %v1161_v42 = vld [vmem:[%s12357_s26 + $0x844] sm:$0xf]  ;;  %v1163_v43 = vld [vmem:[%s12357_s26 + $0x850] sm:$0xf] }
  0xee   : > { %1160 = vst [vmem:[%s12353_s23 + $0x840] sm:$0xf] %v1159_v41  ;;  %1162 = vst [vmem:[%s12353_s23 + $0x848] sm:$0xf] %v1161_v42  ;;  %v1165_v44 = vld [vmem:[%s12357_s26 + $0x854] sm:$0xf] }
  0xef   : > { %1164 = vst [vmem:[%s12353_s23 + $0x850] sm:$0xf] %v1163_v43  ;;  %v1167_v45 = vld [vmem:[%s12357_s26 + $0x860] sm:$0xf]  ;;  %v1169_v46 = vld [vmem:[%s12357_s26 + $0x864] sm:$0xf] }
  0xf0   : > { %1166 = vst [vmem:[%s12353_s23 + $0x858] sm:$0xf] %v1165_v44  ;;  %1168 = vst [vmem:[%s12353_s23 + $0x860] sm:$0xf] %v1167_v45  ;;  %v1171_v47 = vld [vmem:[%s12357_s26 + $0x870] sm:$0xf] }
  0xf1   : > { %1170 = vst [vmem:[%s12353_s23 + $0x868] sm:$0xf] %v1169_v46  ;;  %v1173_v48 = vld [vmem:[%s12357_s26 + $0x874] sm:$0xf]  ;;  %v1175_v49 = vld [vmem:[%s12357_s26 + $0x880] sm:$0xf] }
  0xf2   : > { %1172 = vst [vmem:[%s12353_s23 + $0x870] sm:$0xf] %v1171_v47  ;;  %1174 = vst [vmem:[%s12353_s23 + $0x878] sm:$0xf] %v1173_v48  ;;  %v1177_v50 = vld [vmem:[%s12357_s26 + $0x884] sm:$0xf] }
  0xf3   : > { %1176 = vst [vmem:[%s12353_s23 + $0x880] sm:$0xf] %v1175_v49  ;;  %v1179_v51 = vld [vmem:[%s12357_s26 + $0x890] sm:$0xf]  ;;  %v1181_v52 = vld [vmem:[%s12357_s26 + $0x894] sm:$0xf] }
  0xf4   : > { %1178 = vst [vmem:[%s12353_s23 + $0x888] sm:$0xf] %v1177_v50  ;;  %1180 = vst [vmem:[%s12353_s23 + $0x890] sm:$0xf] %v1179_v51  ;;  %v1183_v53 = vld [vmem:[%s12357_s26 + $0x8a0] sm:$0xf] }
  0xf5   : > { %1182 = vst [vmem:[%s12353_s23 + $0x898] sm:$0xf] %v1181_v52  ;;  %v1185_v54 = vld [vmem:[%s12357_s26 + $0x8a4] sm:$0xf]  ;;  %v1187_v55 = vld [vmem:[%s12357_s26 + $0x8b0] sm:$0xf] }
  0xf6   : > { %1184 = vst [vmem:[%s12353_s23 + $0x8a0] sm:$0xf] %v1183_v53  ;;  %1186 = vst [vmem:[%s12353_s23 + $0x8a8] sm:$0xf] %v1185_v54  ;;  %v1189_v56 = vld [vmem:[%s12357_s26 + $0x8b4] sm:$0xf] }
  0xf7   : > { %1188 = vst [vmem:[%s12353_s23 + $0x8b0] sm:$0xf] %v1187_v55  ;;  %v1191_v57 = vld [vmem:[%s12357_s26 + $0x8c0] sm:$0xf]  ;;  %v1193_v58 = vld [vmem:[%s12357_s26 + $0x8c4] sm:$0xf] }
  0xf8   : > { %1190 = vst [vmem:[%s12353_s23 + $0x8b8] sm:$0xf] %v1189_v56  ;;  %1192 = vst [vmem:[%s12353_s23 + $0x8c0] sm:$0xf] %v1191_v57  ;;  %v1195_v59 = vld [vmem:[%s12357_s26 + $0x8d0] sm:$0xf] }
  0xf9   : > { %1194 = vst [vmem:[%s12353_s23 + $0x8c8] sm:$0xf] %v1193_v58  ;;  %v1197_v60 = vld [vmem:[%s12357_s26 + $0x8d4] sm:$0xf]  ;;  %v1199_v61 = vld [vmem:[%s12357_s26 + $0x8e0] sm:$0xf] }
  0xfa   : > { %1196 = vst [vmem:[%s12353_s23 + $0x8d0] sm:$0xf] %v1195_v59  ;;  %1198 = vst [vmem:[%s12353_s23 + $0x8d8] sm:$0xf] %v1197_v60  ;;  %v1201_v62 = vld [vmem:[%s12357_s26 + $0x8e4] sm:$0xf] }
  0xfb   : > { %1200 = vst [vmem:[%s12353_s23 + $0x8e0] sm:$0xf] %v1199_v61  ;;  %v1203_v63 = vld [vmem:[%s12357_s26 + $0x8f0] sm:$0xf]  ;;  %v1205_v0 = vld [vmem:[%s12357_s26 + $0x8f4] sm:$0xf] }
  0xfc   : > { %1202 = vst [vmem:[%s12353_s23 + $0x8e8] sm:$0xf] %v1201_v62  ;;  %1204 = vst [vmem:[%s12353_s23 + $0x8f0] sm:$0xf] %v1203_v63  ;;  %v1207_v1 = vld [vmem:[%s12357_s26 + $0x900] sm:$0xf] }
  0xfd   : > { %1206 = vst [vmem:[%s12353_s23 + $0x8f8] sm:$0xf] %v1205_v0  ;;  %v1209_v2 = vld [vmem:[%s12357_s26 + $0x904] sm:$0xf]  ;;  %v1211_v3 = vld [vmem:[%s12357_s26 + $0x910] sm:$0xf] }
  0xfe   : > { %1208 = vst [vmem:[%s12353_s23 + $0x900] sm:$0xf] %v1207_v1  ;;  %1210 = vst [vmem:[%s12353_s23 + $0x908] sm:$0xf] %v1209_v2  ;;  %v1213_v4 = vld [vmem:[%s12357_s26 + $0x914] sm:$0xf] }
  0xff   : > { %1212 = vst [vmem:[%s12353_s23 + $0x910] sm:$0xf] %v1211_v3  ;;  %v1215_v5 = vld [vmem:[%s12357_s26 + $0x920] sm:$0xf]  ;;  %v1217_v6 = vld [vmem:[%s12357_s26 + $0x924] sm:$0xf] }
 0x100   : > { %1214 = vst [vmem:[%s12353_s23 + $0x918] sm:$0xf] %v1213_v4  ;;  %1216 = vst [vmem:[%s12353_s23 + $0x920] sm:$0xf] %v1215_v5  ;;  %v1219_v7 = vld [vmem:[%s12357_s26 + $0x930] sm:$0xf] }
 0x101   : > { %1218 = vst [vmem:[%s12353_s23 + $0x928] sm:$0xf] %v1217_v6  ;;  %v1221_v8 = vld [vmem:[%s12357_s26 + $0x934] sm:$0xf]  ;;  %v1223_v9 = vld [vmem:[%s12357_s26 + $0x940] sm:$0xf] }
 0x102   : > { %1220 = vst [vmem:[%s12353_s23 + $0x930] sm:$0xf] %v1219_v7  ;;  %1222 = vst [vmem:[%s12353_s23 + $0x938] sm:$0xf] %v1221_v8  ;;  %v1225_v10 = vld [vmem:[%s12357_s26 + $0x944] sm:$0xf] }
 0x103   : > { %1224 = vst [vmem:[%s12353_s23 + $0x940] sm:$0xf] %v1223_v9  ;;  %v1227_v11 = vld [vmem:[%s12357_s26 + $0x950] sm:$0xf]  ;;  %v1229_v12 = vld [vmem:[%s12357_s26 + $0x954] sm:$0xf] }
 0x104   : > { %1226 = vst [vmem:[%s12353_s23 + $0x948] sm:$0xf] %v1225_v10  ;;  %1228 = vst [vmem:[%s12353_s23 + $0x950] sm:$0xf] %v1227_v11  ;;  %v1231_v13 = vld [vmem:[%s12357_s26 + $0x960] sm:$0xf] }
 0x105   : > { %1230 = vst [vmem:[%s12353_s23 + $0x958] sm:$0xf] %v1229_v12  ;;  %v1233_v14 = vld [vmem:[%s12357_s26 + $0x964] sm:$0xf]  ;;  %v1235_v15 = vld [vmem:[%s12357_s26 + $0x970] sm:$0xf] }
 0x106   : > { %1232 = vst [vmem:[%s12353_s23 + $0x960] sm:$0xf] %v1231_v13  ;;  %1234 = vst [vmem:[%s12353_s23 + $0x968] sm:$0xf] %v1233_v14  ;;  %v1237_v16 = vld [vmem:[%s12357_s26 + $0x974] sm:$0xf] }
 0x107   : > { %1236 = vst [vmem:[%s12353_s23 + $0x970] sm:$0xf] %v1235_v15  ;;  %v1239_v17 = vld [vmem:[%s12357_s26 + $0x980] sm:$0xf]  ;;  %v1241_v18 = vld [vmem:[%s12357_s26 + $0x984] sm:$0xf] }
 0x108   : > { %1238 = vst [vmem:[%s12353_s23 + $0x978] sm:$0xf] %v1237_v16  ;;  %1240 = vst [vmem:[%s12353_s23 + $0x980] sm:$0xf] %v1239_v17  ;;  %v1243_v19 = vld [vmem:[%s12357_s26 + $0x990] sm:$0xf] }
 0x109   : > { %1242 = vst [vmem:[%s12353_s23 + $0x988] sm:$0xf] %v1241_v18  ;;  %v1245_v20 = vld [vmem:[%s12357_s26 + $0x994] sm:$0xf]  ;;  %v1247_v21 = vld [vmem:[%s12357_s26 + $0x9a0] sm:$0xf] }
 0x10a   : > { %1244 = vst [vmem:[%s12353_s23 + $0x990] sm:$0xf] %v1243_v19  ;;  %1246 = vst [vmem:[%s12353_s23 + $0x998] sm:$0xf] %v1245_v20  ;;  %v1249_v22 = vld [vmem:[%s12357_s26 + $0x9a4] sm:$0xf] }
 0x10b   : > { %1248 = vst [vmem:[%s12353_s23 + $0x9a0] sm:$0xf] %v1247_v21  ;;  %v1251_v23 = vld [vmem:[%s12357_s26 + $0x9b0] sm:$0xf]  ;;  %v1253_v24 = vld [vmem:[%s12357_s26 + $0x9b4] sm:$0xf] }
 0x10c   : > { %1250 = vst [vmem:[%s12353_s23 + $0x9a8] sm:$0xf] %v1249_v22  ;;  %1252 = vst [vmem:[%s12353_s23 + $0x9b0] sm:$0xf] %v1251_v23  ;;  %v1255_v25 = vld [vmem:[%s12357_s26 + $0x9c0] sm:$0xf] }
 0x10d   : > { %1254 = vst [vmem:[%s12353_s23 + $0x9b8] sm:$0xf] %v1253_v24  ;;  %v1257_v26 = vld [vmem:[%s12357_s26 + $0x9c4] sm:$0xf]  ;;  %v1259_v27 = vld [vmem:[%s12357_s26 + $0x9d0] sm:$0xf] }
 0x10e   : > { %1256 = vst [vmem:[%s12353_s23 + $0x9c0] sm:$0xf] %v1255_v25  ;;  %1258 = vst [vmem:[%s12353_s23 + $0x9c8] sm:$0xf] %v1257_v26  ;;  %v1261_v28 = vld [vmem:[%s12357_s26 + $0x9d4] sm:$0xf] }
 0x10f   : > { %1260 = vst [vmem:[%s12353_s23 + $0x9d0] sm:$0xf] %v1259_v27  ;;  %v1263_v29 = vld [vmem:[%s12357_s26 + $0x9e0] sm:$0xf]  ;;  %v1265_v30 = vld [vmem:[%s12357_s26 + $0x9e4] sm:$0xf] }
 0x110   : > { %1262 = vst [vmem:[%s12353_s23 + $0x9d8] sm:$0xf] %v1261_v28  ;;  %1264 = vst [vmem:[%s12353_s23 + $0x9e0] sm:$0xf] %v1263_v29  ;;  %v1267_v31 = vld [vmem:[%s12357_s26 + $0x9f0] sm:$0xf] }
 0x111   : > { %1266 = vst [vmem:[%s12353_s23 + $0x9e8] sm:$0xf] %v1265_v30  ;;  %v1269_v32 = vld [vmem:[%s12357_s26 + $0x9f4] sm:$0xf]  ;;  %v1271_v33 = vld [vmem:[%s12357_s26 + $0xa00] sm:$0xf] }
 0x112   : > { %1268 = vst [vmem:[%s12353_s23 + $0x9f0] sm:$0xf] %v1267_v31  ;;  %1270 = vst [vmem:[%s12353_s23 + $0x9f8] sm:$0xf] %v1269_v32  ;;  %v1273_v34 = vld [vmem:[%s12357_s26 + $0xa04] sm:$0xf] }
 0x113   : > { %1272 = vst [vmem:[%s12353_s23 + $0xa00] sm:$0xf] %v1271_v33  ;;  %v1275_v35 = vld [vmem:[%s12357_s26 + $0xa10] sm:$0xf]  ;;  %v1277_v36 = vld [vmem:[%s12357_s26 + $0xa14] sm:$0xf] }
 0x114   : > { %1274 = vst [vmem:[%s12353_s23 + $0xa08] sm:$0xf] %v1273_v34  ;;  %1276 = vst [vmem:[%s12353_s23 + $0xa10] sm:$0xf] %v1275_v35  ;;  %v1279_v37 = vld [vmem:[%s12357_s26 + $0xa20] sm:$0xf] }
 0x115   : > { %1278 = vst [vmem:[%s12353_s23 + $0xa18] sm:$0xf] %v1277_v36  ;;  %v1281_v38 = vld [vmem:[%s12357_s26 + $0xa24] sm:$0xf]  ;;  %v1283_v39 = vld [vmem:[%s12357_s26 + $0xa30] sm:$0xf] }
 0x116   : > { %1280 = vst [vmem:[%s12353_s23 + $0xa20] sm:$0xf] %v1279_v37  ;;  %1282 = vst [vmem:[%s12353_s23 + $0xa28] sm:$0xf] %v1281_v38  ;;  %v1285_v40 = vld [vmem:[%s12357_s26 + $0xa34] sm:$0xf] }
 0x117   : > { %1284 = vst [vmem:[%s12353_s23 + $0xa30] sm:$0xf] %v1283_v39  ;;  %v1287_v41 = vld [vmem:[%s12357_s26 + $0xa40] sm:$0xf]  ;;  %v1289_v42 = vld [vmem:[%s12357_s26 + $0xa44] sm:$0xf] }
 0x118   : > { %1286 = vst [vmem:[%s12353_s23 + $0xa38] sm:$0xf] %v1285_v40  ;;  %1288 = vst [vmem:[%s12353_s23 + $0xa40] sm:$0xf] %v1287_v41  ;;  %v1291_v43 = vld [vmem:[%s12357_s26 + $0xa50] sm:$0xf] }
 0x119   : > { %1290 = vst [vmem:[%s12353_s23 + $0xa48] sm:$0xf] %v1289_v42  ;;  %v1293_v44 = vld [vmem:[%s12357_s26 + $0xa54] sm:$0xf]  ;;  %v1295_v45 = vld [vmem:[%s12357_s26 + $0xa60] sm:$0xf] }
 0x11a   : > { %1292 = vst [vmem:[%s12353_s23 + $0xa50] sm:$0xf] %v1291_v43  ;;  %1294 = vst [vmem:[%s12353_s23 + $0xa58] sm:$0xf] %v1293_v44  ;;  %v1297_v46 = vld [vmem:[%s12357_s26 + $0xa64] sm:$0xf] }
 0x11b   : > { %1296 = vst [vmem:[%s12353_s23 + $0xa60] sm:$0xf] %v1295_v45  ;;  %v1299_v47 = vld [vmem:[%s12357_s26 + $0xa70] sm:$0xf]  ;;  %v1301_v48 = vld [vmem:[%s12357_s26 + $0xa74] sm:$0xf] }
 0x11c   : > { %1298 = vst [vmem:[%s12353_s23 + $0xa68] sm:$0xf] %v1297_v46  ;;  %1300 = vst [vmem:[%s12353_s23 + $0xa70] sm:$0xf] %v1299_v47  ;;  %v1303_v49 = vld [vmem:[%s12357_s26 + $0xa80] sm:$0xf] }
 0x11d   : > { %1302 = vst [vmem:[%s12353_s23 + $0xa78] sm:$0xf] %v1301_v48  ;;  %v1305_v50 = vld [vmem:[%s12357_s26 + $0xa84] sm:$0xf]  ;;  %v1307_v51 = vld [vmem:[%s12357_s26 + $0xa90] sm:$0xf] }
 0x11e   : > { %1304 = vst [vmem:[%s12353_s23 + $0xa80] sm:$0xf] %v1303_v49  ;;  %1306 = vst [vmem:[%s12353_s23 + $0xa88] sm:$0xf] %v1305_v50  ;;  %v1309_v52 = vld [vmem:[%s12357_s26 + $0xa94] sm:$0xf] }
 0x11f   : > { %1308 = vst [vmem:[%s12353_s23 + $0xa90] sm:$0xf] %v1307_v51  ;;  %v1311_v53 = vld [vmem:[%s12357_s26 + $0xaa0] sm:$0xf]  ;;  %v1313_v54 = vld [vmem:[%s12357_s26 + $0xaa4] sm:$0xf] }
 0x120   : > { %1310 = vst [vmem:[%s12353_s23 + $0xa98] sm:$0xf] %v1309_v52  ;;  %1312 = vst [vmem:[%s12353_s23 + $0xaa0] sm:$0xf] %v1311_v53  ;;  %v1315_v55 = vld [vmem:[%s12357_s26 + $0xab0] sm:$0xf] }
 0x121   : > { %1314 = vst [vmem:[%s12353_s23 + $0xaa8] sm:$0xf] %v1313_v54  ;;  %v1317_v56 = vld [vmem:[%s12357_s26 + $0xab4] sm:$0xf]  ;;  %v1319_v57 = vld [vmem:[%s12357_s26 + $0xac0] sm:$0xf] }
 0x122   : > { %1316 = vst [vmem:[%s12353_s23 + $0xab0] sm:$0xf] %v1315_v55  ;;  %1318 = vst [vmem:[%s12353_s23 + $0xab8] sm:$0xf] %v1317_v56  ;;  %v1321_v58 = vld [vmem:[%s12357_s26 + $0xac4] sm:$0xf] }
 0x123   : > { %1320 = vst [vmem:[%s12353_s23 + $0xac0] sm:$0xf] %v1319_v57  ;;  %v1323_v59 = vld [vmem:[%s12357_s26 + $0xad0] sm:$0xf]  ;;  %v1325_v60 = vld [vmem:[%s12357_s26 + $0xad4] sm:$0xf] }
 0x124   : > { %1322 = vst [vmem:[%s12353_s23 + $0xac8] sm:$0xf] %v1321_v58  ;;  %1324 = vst [vmem:[%s12353_s23 + $0xad0] sm:$0xf] %v1323_v59  ;;  %v1327_v61 = vld [vmem:[%s12357_s26 + $0xae0] sm:$0xf] }
 0x125   : > { %1326 = vst [vmem:[%s12353_s23 + $0xad8] sm:$0xf] %v1325_v60  ;;  %v1329_v62 = vld [vmem:[%s12357_s26 + $0xae4] sm:$0xf]  ;;  %v1331_v63 = vld [vmem:[%s12357_s26 + $0xaf0] sm:$0xf] }
 0x126   : > { %1328 = vst [vmem:[%s12353_s23 + $0xae0] sm:$0xf] %v1327_v61  ;;  %1330 = vst [vmem:[%s12353_s23 + $0xae8] sm:$0xf] %v1329_v62  ;;  %v1333_v0 = vld [vmem:[%s12357_s26 + $0xaf4] sm:$0xf] }
 0x127   : > { %1332 = vst [vmem:[%s12353_s23 + $0xaf0] sm:$0xf] %v1331_v63  ;;  %v1335_v1 = vld [vmem:[%s12357_s26 + $0xb00] sm:$0xf]  ;;  %v1337_v2 = vld [vmem:[%s12357_s26 + $0xb04] sm:$0xf] }
 0x128   : > { %1334 = vst [vmem:[%s12353_s23 + $0xaf8] sm:$0xf] %v1333_v0  ;;  %1336 = vst [vmem:[%s12353_s23 + $0xb00] sm:$0xf] %v1335_v1  ;;  %v1339_v3 = vld [vmem:[%s12357_s26 + $0xb10] sm:$0xf] }
 0x129   : > { %1338 = vst [vmem:[%s12353_s23 + $0xb08] sm:$0xf] %v1337_v2  ;;  %v1341_v4 = vld [vmem:[%s12357_s26 + $0xb14] sm:$0xf]  ;;  %v1343_v5 = vld [vmem:[%s12357_s26 + $0xb20] sm:$0xf] }
 0x12a   : > { %1340 = vst [vmem:[%s12353_s23 + $0xb10] sm:$0xf] %v1339_v3  ;;  %1342 = vst [vmem:[%s12353_s23 + $0xb18] sm:$0xf] %v1341_v4  ;;  %v1345_v6 = vld [vmem:[%s12357_s26 + $0xb24] sm:$0xf] }
 0x12b   : > { %1344 = vst [vmem:[%s12353_s23 + $0xb20] sm:$0xf] %v1343_v5  ;;  %v1347_v7 = vld [vmem:[%s12357_s26 + $0xb30] sm:$0xf]  ;;  %v1349_v8 = vld [vmem:[%s12357_s26 + $0xb34] sm:$0xf] }
 0x12c   : > { %1346 = vst [vmem:[%s12353_s23 + $0xb28] sm:$0xf] %v1345_v6  ;;  %1348 = vst [vmem:[%s12353_s23 + $0xb30] sm:$0xf] %v1347_v7  ;;  %v1351_v9 = vld [vmem:[%s12357_s26 + $0xb40] sm:$0xf] }
 0x12d   : > { %1350 = vst [vmem:[%s12353_s23 + $0xb38] sm:$0xf] %v1349_v8  ;;  %v1353_v10 = vld [vmem:[%s12357_s26 + $0xb44] sm:$0xf]  ;;  %v1355_v11 = vld [vmem:[%s12357_s26 + $0xb50] sm:$0xf] }
 0x12e   : > { %1352 = vst [vmem:[%s12353_s23 + $0xb40] sm:$0xf] %v1351_v9  ;;  %1354 = vst [vmem:[%s12353_s23 + $0xb48] sm:$0xf] %v1353_v10  ;;  %v1357_v12 = vld [vmem:[%s12357_s26 + $0xb54] sm:$0xf] }
 0x12f   : > { %1356 = vst [vmem:[%s12353_s23 + $0xb50] sm:$0xf] %v1355_v11  ;;  %v1359_v13 = vld [vmem:[%s12357_s26 + $0xb60] sm:$0xf]  ;;  %v1361_v14 = vld [vmem:[%s12357_s26 + $0xb64] sm:$0xf] }
 0x130   : > { %1358 = vst [vmem:[%s12353_s23 + $0xb58] sm:$0xf] %v1357_v12  ;;  %1360 = vst [vmem:[%s12353_s23 + $0xb60] sm:$0xf] %v1359_v13  ;;  %v1363_v15 = vld [vmem:[%s12357_s26 + $0xb70] sm:$0xf] }
 0x131   : > { %1362 = vst [vmem:[%s12353_s23 + $0xb68] sm:$0xf] %v1361_v14  ;;  %v1365_v16 = vld [vmem:[%s12357_s26 + $0xb74] sm:$0xf]  ;;  %v1367_v17 = vld [vmem:[%s12357_s26 + $0xb80] sm:$0xf] }
 0x132   : > { %1364 = vst [vmem:[%s12353_s23 + $0xb70] sm:$0xf] %v1363_v15  ;;  %1366 = vst [vmem:[%s12353_s23 + $0xb78] sm:$0xf] %v1365_v16  ;;  %v1369_v18 = vld [vmem:[%s12357_s26 + $0xb84] sm:$0xf] }
 0x133   : > { %1368 = vst [vmem:[%s12353_s23 + $0xb80] sm:$0xf] %v1367_v17  ;;  %v1371_v19 = vld [vmem:[%s12357_s26 + $0xb90] sm:$0xf]  ;;  %v1373_v20 = vld [vmem:[%s12357_s26 + $0xb94] sm:$0xf] }
 0x134   : > { %1370 = vst [vmem:[%s12353_s23 + $0xb88] sm:$0xf] %v1369_v18  ;;  %1372 = vst [vmem:[%s12353_s23 + $0xb90] sm:$0xf] %v1371_v19  ;;  %v1375_v21 = vld [vmem:[%s12357_s26 + $0xba0] sm:$0xf] }
 0x135   : > { %1374 = vst [vmem:[%s12353_s23 + $0xb98] sm:$0xf] %v1373_v20  ;;  %v1377_v22 = vld [vmem:[%s12357_s26 + $0xba4] sm:$0xf]  ;;  %v1379_v23 = vld [vmem:[%s12357_s26 + $0xbb0] sm:$0xf] }
 0x136   : > { %1376 = vst [vmem:[%s12353_s23 + $0xba0] sm:$0xf] %v1375_v21  ;;  %1378 = vst [vmem:[%s12353_s23 + $0xba8] sm:$0xf] %v1377_v22  ;;  %v1381_v24 = vld [vmem:[%s12357_s26 + $0xbb4] sm:$0xf] }
 0x137   : > { %1380 = vst [vmem:[%s12353_s23 + $0xbb0] sm:$0xf] %v1379_v23  ;;  %v1383_v25 = vld [vmem:[%s12357_s26 + $0xbc0] sm:$0xf]  ;;  %v1385_v26 = vld [vmem:[%s12357_s26 + $0xbc4] sm:$0xf] }
 0x138   : > { %1382 = vst [vmem:[%s12353_s23 + $0xbb8] sm:$0xf] %v1381_v24  ;;  %1384 = vst [vmem:[%s12353_s23 + $0xbc0] sm:$0xf] %v1383_v25  ;;  %v1387_v27 = vld [vmem:[%s12357_s26 + $0xbd0] sm:$0xf] }
 0x139   : > { %1386 = vst [vmem:[%s12353_s23 + $0xbc8] sm:$0xf] %v1385_v26  ;;  %v1389_v28 = vld [vmem:[%s12357_s26 + $0xbd4] sm:$0xf]  ;;  %v1391_v29 = vld [vmem:[%s12357_s26 + $0xbe0] sm:$0xf] }
 0x13a   : > { %1388 = vst [vmem:[%s12353_s23 + $0xbd0] sm:$0xf] %v1387_v27  ;;  %1390 = vst [vmem:[%s12353_s23 + $0xbd8] sm:$0xf] %v1389_v28  ;;  %v1393_v30 = vld [vmem:[%s12357_s26 + $0xbe4] sm:$0xf] }
 0x13b   : > { %1392 = vst [vmem:[%s12353_s23 + $0xbe0] sm:$0xf] %v1391_v29  ;;  %v1395_v31 = vld [vmem:[%s12357_s26 + $0xbf0] sm:$0xf]  ;;  %v1397_v32 = vld [vmem:[%s12357_s26 + $0xbf4] sm:$0xf] }
 0x13c   : > { %1394 = vst [vmem:[%s12353_s23 + $0xbe8] sm:$0xf] %v1393_v30  ;;  %1396 = vst [vmem:[%s12353_s23 + $0xbf0] sm:$0xf] %v1395_v31  ;;  %v1399_v33 = vld [vmem:[%s12357_s26 + $0xc00] sm:$0xf] }
 0x13d   : > { %1398 = vst [vmem:[%s12353_s23 + $0xbf8] sm:$0xf] %v1397_v32  ;;  %v1401_v34 = vld [vmem:[%s12357_s26 + $0xc04] sm:$0xf]  ;;  %v1403_v35 = vld [vmem:[%s12357_s26 + $0xc10] sm:$0xf] }
 0x13e   : > { %1400 = vst [vmem:[%s12353_s23 + $0xc00] sm:$0xf] %v1399_v33  ;;  %1402 = vst [vmem:[%s12353_s23 + $0xc08] sm:$0xf] %v1401_v34  ;;  %v1405_v36 = vld [vmem:[%s12357_s26 + $0xc14] sm:$0xf] }
 0x13f   : > { %1404 = vst [vmem:[%s12353_s23 + $0xc10] sm:$0xf] %v1403_v35  ;;  %v1407_v37 = vld [vmem:[%s12357_s26 + $0xc20] sm:$0xf]  ;;  %v1409_v38 = vld [vmem:[%s12357_s26 + $0xc24] sm:$0xf] }
 0x140   : > { %1406 = vst [vmem:[%s12353_s23 + $0xc18] sm:$0xf] %v1405_v36  ;;  %1408 = vst [vmem:[%s12353_s23 + $0xc20] sm:$0xf] %v1407_v37  ;;  %v1411_v39 = vld [vmem:[%s12357_s26 + $0xc30] sm:$0xf] }
 0x141   : > { %1410 = vst [vmem:[%s12353_s23 + $0xc28] sm:$0xf] %v1409_v38  ;;  %v1413_v40 = vld [vmem:[%s12357_s26 + $0xc34] sm:$0xf]  ;;  %v1415_v41 = vld [vmem:[%s12357_s26 + $0xc40] sm:$0xf] }
 0x142   : > { %1412 = vst [vmem:[%s12353_s23 + $0xc30] sm:$0xf] %v1411_v39  ;;  %1414 = vst [vmem:[%s12353_s23 + $0xc38] sm:$0xf] %v1413_v40  ;;  %v1417_v42 = vld [vmem:[%s12357_s26 + $0xc44] sm:$0xf] }
 0x143   : > { %1416 = vst [vmem:[%s12353_s23 + $0xc40] sm:$0xf] %v1415_v41  ;;  %v1419_v43 = vld [vmem:[%s12357_s26 + $0xc50] sm:$0xf]  ;;  %v1421_v44 = vld [vmem:[%s12357_s26 + $0xc54] sm:$0xf] }
 0x144   : > { %1418 = vst [vmem:[%s12353_s23 + $0xc48] sm:$0xf] %v1417_v42  ;;  %1420 = vst [vmem:[%s12353_s23 + $0xc50] sm:$0xf] %v1419_v43  ;;  %v1423_v45 = vld [vmem:[%s12357_s26 + $0xc60] sm:$0xf] }
 0x145   : > { %1422 = vst [vmem:[%s12353_s23 + $0xc58] sm:$0xf] %v1421_v44  ;;  %v1425_v46 = vld [vmem:[%s12357_s26 + $0xc64] sm:$0xf]  ;;  %v1427_v47 = vld [vmem:[%s12357_s26 + $0xc70] sm:$0xf] }
 0x146   : > { %1424 = vst [vmem:[%s12353_s23 + $0xc60] sm:$0xf] %v1423_v45  ;;  %1426 = vst [vmem:[%s12353_s23 + $0xc68] sm:$0xf] %v1425_v46  ;;  %v1429_v48 = vld [vmem:[%s12357_s26 + $0xc74] sm:$0xf] }
 0x147   : > { %1428 = vst [vmem:[%s12353_s23 + $0xc70] sm:$0xf] %v1427_v47  ;;  %v1431_v49 = vld [vmem:[%s12357_s26 + $0xc80] sm:$0xf]  ;;  %v1433_v50 = vld [vmem:[%s12357_s26 + $0xc84] sm:$0xf] }
 0x148   : > { %1430 = vst [vmem:[%s12353_s23 + $0xc78] sm:$0xf] %v1429_v48  ;;  %1432 = vst [vmem:[%s12353_s23 + $0xc80] sm:$0xf] %v1431_v49  ;;  %v1435_v51 = vld [vmem:[%s12357_s26 + $0xc90] sm:$0xf] }
 0x149   : > { %1434 = vst [vmem:[%s12353_s23 + $0xc88] sm:$0xf] %v1433_v50  ;;  %v1437_v52 = vld [vmem:[%s12357_s26 + $0xc94] sm:$0xf]  ;;  %v1439_v53 = vld [vmem:[%s12357_s26 + $0xca0] sm:$0xf] }
 0x14a   : > { %1436 = vst [vmem:[%s12353_s23 + $0xc90] sm:$0xf] %v1435_v51  ;;  %1438 = vst [vmem:[%s12353_s23 + $0xc98] sm:$0xf] %v1437_v52  ;;  %v1441_v54 = vld [vmem:[%s12357_s26 + $0xca4] sm:$0xf] }
 0x14b   : > { %1440 = vst [vmem:[%s12353_s23 + $0xca0] sm:$0xf] %v1439_v53  ;;  %v1443_v55 = vld [vmem:[%s12357_s26 + $0xcb0] sm:$0xf]  ;;  %v1445_v56 = vld [vmem:[%s12357_s26 + $0xcb4] sm:$0xf] }
 0x14c   : > { %1442 = vst [vmem:[%s12353_s23 + $0xca8] sm:$0xf] %v1441_v54  ;;  %1444 = vst [vmem:[%s12353_s23 + $0xcb0] sm:$0xf] %v1443_v55  ;;  %v1447_v57 = vld [vmem:[%s12357_s26 + $0xcc0] sm:$0xf] }
 0x14d   : > { %1446 = vst [vmem:[%s12353_s23 + $0xcb8] sm:$0xf] %v1445_v56  ;;  %v1449_v58 = vld [vmem:[%s12357_s26 + $0xcc4] sm:$0xf]  ;;  %v1451_v59 = vld [vmem:[%s12357_s26 + $0xcd0] sm:$0xf] }
 0x14e   : > { %1448 = vst [vmem:[%s12353_s23 + $0xcc0] sm:$0xf] %v1447_v57  ;;  %1450 = vst [vmem:[%s12353_s23 + $0xcc8] sm:$0xf] %v1449_v58  ;;  %v1453_v60 = vld [vmem:[%s12357_s26 + $0xcd4] sm:$0xf] }
 0x14f   : > { %1452 = vst [vmem:[%s12353_s23 + $0xcd0] sm:$0xf] %v1451_v59  ;;  %v1455_v61 = vld [vmem:[%s12357_s26 + $0xce0] sm:$0xf]  ;;  %v1457_v62 = vld [vmem:[%s12357_s26 + $0xce4] sm:$0xf] }
 0x150   : > { %1454 = vst [vmem:[%s12353_s23 + $0xcd8] sm:$0xf] %v1453_v60  ;;  %1456 = vst [vmem:[%s12353_s23 + $0xce0] sm:$0xf] %v1455_v61  ;;  %v1459_v63 = vld [vmem:[%s12357_s26 + $0xcf0] sm:$0xf] }
 0x151   : > { %1458 = vst [vmem:[%s12353_s23 + $0xce8] sm:$0xf] %v1457_v62  ;;  %v1461_v0 = vld [vmem:[%s12357_s26 + $0xcf4] sm:$0xf]  ;;  %v1463_v1 = vld [vmem:[%s12357_s26 + $0xd00] sm:$0xf] }
 0x152   : > { %1460 = vst [vmem:[%s12353_s23 + $0xcf0] sm:$0xf] %v1459_v63  ;;  %1462 = vst [vmem:[%s12353_s23 + $0xcf8] sm:$0xf] %v1461_v0  ;;  %v1465_v2 = vld [vmem:[%s12357_s26 + $0xd04] sm:$0xf] }
 0x153   : > { %1464 = vst [vmem:[%s12353_s23 + $0xd00] sm:$0xf] %v1463_v1  ;;  %v1467_v3 = vld [vmem:[%s12357_s26 + $0xd10] sm:$0xf]  ;;  %v1469_v4 = vld [vmem:[%s12357_s26 + $0xd14] sm:$0xf] }
 0x154   : > { %1466 = vst [vmem:[%s12353_s23 + $0xd08] sm:$0xf] %v1465_v2  ;;  %1468 = vst [vmem:[%s12353_s23 + $0xd10] sm:$0xf] %v1467_v3  ;;  %v1471_v5 = vld [vmem:[%s12357_s26 + $0xd20] sm:$0xf] }
 0x155   : > { %1470 = vst [vmem:[%s12353_s23 + $0xd18] sm:$0xf] %v1469_v4  ;;  %v1473_v6 = vld [vmem:[%s12357_s26 + $0xd24] sm:$0xf]  ;;  %v1475_v7 = vld [vmem:[%s12357_s26 + $0xd30] sm:$0xf] }
 0x156   : > { %1472 = vst [vmem:[%s12353_s23 + $0xd20] sm:$0xf] %v1471_v5  ;;  %1474 = vst [vmem:[%s12353_s23 + $0xd28] sm:$0xf] %v1473_v6  ;;  %v1477_v8 = vld [vmem:[%s12357_s26 + $0xd34] sm:$0xf] }
 0x157   : > { %1476 = vst [vmem:[%s12353_s23 + $0xd30] sm:$0xf] %v1475_v7  ;;  %v1479_v9 = vld [vmem:[%s12357_s26 + $0xd40] sm:$0xf]  ;;  %v1481_v10 = vld [vmem:[%s12357_s26 + $0xd44] sm:$0xf] }
 0x158   : > { %1478 = vst [vmem:[%s12353_s23 + $0xd38] sm:$0xf] %v1477_v8  ;;  %1480 = vst [vmem:[%s12353_s23 + $0xd40] sm:$0xf] %v1479_v9  ;;  %v1483_v11 = vld [vmem:[%s12357_s26 + $0xd50] sm:$0xf] }
 0x159   : > { %1482 = vst [vmem:[%s12353_s23 + $0xd48] sm:$0xf] %v1481_v10  ;;  %v1485_v12 = vld [vmem:[%s12357_s26 + $0xd54] sm:$0xf]  ;;  %v1487_v13 = vld [vmem:[%s12357_s26 + $0xd60] sm:$0xf] }
 0x15a   : > { %1484 = vst [vmem:[%s12353_s23 + $0xd50] sm:$0xf] %v1483_v11  ;;  %1486 = vst [vmem:[%s12353_s23 + $0xd58] sm:$0xf] %v1485_v12  ;;  %v1489_v14 = vld [vmem:[%s12357_s26 + $0xd64] sm:$0xf] }
 0x15b   : > { %1488 = vst [vmem:[%s12353_s23 + $0xd60] sm:$0xf] %v1487_v13  ;;  %v1491_v15 = vld [vmem:[%s12357_s26 + $0xd70] sm:$0xf]  ;;  %v1493_v16 = vld [vmem:[%s12357_s26 + $0xd74] sm:$0xf] }
 0x15c   : > { %1490 = vst [vmem:[%s12353_s23 + $0xd68] sm:$0xf] %v1489_v14  ;;  %1492 = vst [vmem:[%s12353_s23 + $0xd70] sm:$0xf] %v1491_v15  ;;  %v1495_v17 = vld [vmem:[%s12357_s26 + $0xd80] sm:$0xf] }
 0x15d   : > { %1494 = vst [vmem:[%s12353_s23 + $0xd78] sm:$0xf] %v1493_v16  ;;  %v1497_v18 = vld [vmem:[%s12357_s26 + $0xd84] sm:$0xf]  ;;  %v1499_v19 = vld [vmem:[%s12357_s26 + $0xd90] sm:$0xf] }
 0x15e   : > { %1496 = vst [vmem:[%s12353_s23 + $0xd80] sm:$0xf] %v1495_v17  ;;  %1498 = vst [vmem:[%s12353_s23 + $0xd88] sm:$0xf] %v1497_v18  ;;  %v1501_v20 = vld [vmem:[%s12357_s26 + $0xd94] sm:$0xf] }
 0x15f   : > { %1500 = vst [vmem:[%s12353_s23 + $0xd90] sm:$0xf] %v1499_v19  ;;  %v1503_v21 = vld [vmem:[%s12357_s26 + $0xda0] sm:$0xf]  ;;  %v1505_v22 = vld [vmem:[%s12357_s26 + $0xda4] sm:$0xf] }
 0x160   : > { %1502 = vst [vmem:[%s12353_s23 + $0xd98] sm:$0xf] %v1501_v20  ;;  %1504 = vst [vmem:[%s12353_s23 + $0xda0] sm:$0xf] %v1503_v21  ;;  %v1507_v23 = vld [vmem:[%s12357_s26 + $0xdb0] sm:$0xf] }
 0x161   : > { %1506 = vst [vmem:[%s12353_s23 + $0xda8] sm:$0xf] %v1505_v22  ;;  %v1509_v24 = vld [vmem:[%s12357_s26 + $0xdb4] sm:$0xf]  ;;  %v1511_v25 = vld [vmem:[%s12357_s26 + $0xdc0] sm:$0xf] }
 0x162   : > { %1508 = vst [vmem:[%s12353_s23 + $0xdb0] sm:$0xf] %v1507_v23  ;;  %1510 = vst [vmem:[%s12353_s23 + $0xdb8] sm:$0xf] %v1509_v24  ;;  %v1513_v26 = vld [vmem:[%s12357_s26 + $0xdc4] sm:$0xf] }
 0x163   : > { %1512 = vst [vmem:[%s12353_s23 + $0xdc0] sm:$0xf] %v1511_v25  ;;  %v1515_v27 = vld [vmem:[%s12357_s26 + $0xdd0] sm:$0xf]  ;;  %v1517_v28 = vld [vmem:[%s12357_s26 + $0xdd4] sm:$0xf] }
 0x164   : > { %1514 = vst [vmem:[%s12353_s23 + $0xdc8] sm:$0xf] %v1513_v26  ;;  %1516 = vst [vmem:[%s12353_s23 + $0xdd0] sm:$0xf] %v1515_v27  ;;  %v1519_v29 = vld [vmem:[%s12357_s26 + $0xde0] sm:$0xf] }
 0x165   : > { %1518 = vst [vmem:[%s12353_s23 + $0xdd8] sm:$0xf] %v1517_v28  ;;  %v1521_v30 = vld [vmem:[%s12357_s26 + $0xde4] sm:$0xf]  ;;  %v1523_v31 = vld [vmem:[%s12357_s26 + $0xdf0] sm:$0xf] }
 0x166   : > { %1520 = vst [vmem:[%s12353_s23 + $0xde0] sm:$0xf] %v1519_v29  ;;  %1522 = vst [vmem:[%s12353_s23 + $0xde8] sm:$0xf] %v1521_v30  ;;  %v1525_v32 = vld [vmem:[%s12357_s26 + $0xdf4] sm:$0xf] }
 0x167   : > { %1524 = vst [vmem:[%s12353_s23 + $0xdf0] sm:$0xf] %v1523_v31  ;;  %v1527_v33 = vld [vmem:[%s12357_s26 + $0xe00] sm:$0xf]  ;;  %v1529_v34 = vld [vmem:[%s12357_s26 + $0xe04] sm:$0xf] }
 0x168   : > { %1526 = vst [vmem:[%s12353_s23 + $0xdf8] sm:$0xf] %v1525_v32  ;;  %1528 = vst [vmem:[%s12353_s23 + $0xe00] sm:$0xf] %v1527_v33  ;;  %v1531_v35 = vld [vmem:[%s12357_s26 + $0xe10] sm:$0xf] }
 0x169   : > { %1530 = vst [vmem:[%s12353_s23 + $0xe08] sm:$0xf] %v1529_v34  ;;  %v1533_v36 = vld [vmem:[%s12357_s26 + $0xe14] sm:$0xf]  ;;  %v1535_v37 = vld [vmem:[%s12357_s26 + $0xe20] sm:$0xf] }
 0x16a   : > { %1532 = vst [vmem:[%s12353_s23 + $0xe10] sm:$0xf] %v1531_v35  ;;  %1534 = vst [vmem:[%s12353_s23 + $0xe18] sm:$0xf] %v1533_v36  ;;  %v1537_v38 = vld [vmem:[%s12357_s26 + $0xe24] sm:$0xf] }
 0x16b   : > { %1536 = vst [vmem:[%s12353_s23 + $0xe20] sm:$0xf] %v1535_v37  ;;  %v1539_v39 = vld [vmem:[%s12357_s26 + $0xe30] sm:$0xf]  ;;  %v1541_v40 = vld [vmem:[%s12357_s26 + $0xe34] sm:$0xf] }
 0x16c   : > { %1538 = vst [vmem:[%s12353_s23 + $0xe28] sm:$0xf] %v1537_v38  ;;  %1540 = vst [vmem:[%s12353_s23 + $0xe30] sm:$0xf] %v1539_v39  ;;  %v1543_v41 = vld [vmem:[%s12357_s26 + $0xe40] sm:$0xf] }
 0x16d   : > { %1542 = vst [vmem:[%s12353_s23 + $0xe38] sm:$0xf] %v1541_v40  ;;  %v1545_v42 = vld [vmem:[%s12357_s26 + $0xe44] sm:$0xf]  ;;  %v1547_v43 = vld [vmem:[%s12357_s26 + $0xe50] sm:$0xf] }
 0x16e   : > { %1544 = vst [vmem:[%s12353_s23 + $0xe40] sm:$0xf] %v1543_v41  ;;  %1546 = vst [vmem:[%s12353_s23 + $0xe48] sm:$0xf] %v1545_v42  ;;  %v1549_v44 = vld [vmem:[%s12357_s26 + $0xe54] sm:$0xf] }
 0x16f   : > { %1548 = vst [vmem:[%s12353_s23 + $0xe50] sm:$0xf] %v1547_v43  ;;  %v1551_v45 = vld [vmem:[%s12357_s26 + $0xe60] sm:$0xf]  ;;  %v1553_v46 = vld [vmem:[%s12357_s26 + $0xe64] sm:$0xf] }
 0x170   : > { %1550 = vst [vmem:[%s12353_s23 + $0xe58] sm:$0xf] %v1549_v44  ;;  %1552 = vst [vmem:[%s12353_s23 + $0xe60] sm:$0xf] %v1551_v45  ;;  %v1555_v47 = vld [vmem:[%s12357_s26 + $0xe70] sm:$0xf] }
 0x171   : > { %1554 = vst [vmem:[%s12353_s23 + $0xe68] sm:$0xf] %v1553_v46  ;;  %v1557_v48 = vld [vmem:[%s12357_s26 + $0xe74] sm:$0xf]  ;;  %v1559_v49 = vld [vmem:[%s12357_s26 + $0xe80] sm:$0xf] }
 0x172   : > { %1556 = vst [vmem:[%s12353_s23 + $0xe70] sm:$0xf] %v1555_v47  ;;  %1558 = vst [vmem:[%s12353_s23 + $0xe78] sm:$0xf] %v1557_v48  ;;  %v1561_v50 = vld [vmem:[%s12357_s26 + $0xe84] sm:$0xf] }
 0x173   : > { %1560 = vst [vmem:[%s12353_s23 + $0xe80] sm:$0xf] %v1559_v49  ;;  %v1563_v51 = vld [vmem:[%s12357_s26 + $0xe90] sm:$0xf]  ;;  %v1565_v52 = vld [vmem:[%s12357_s26 + $0xe94] sm:$0xf] }
 0x174   : > { %1562 = vst [vmem:[%s12353_s23 + $0xe88] sm:$0xf] %v1561_v50  ;;  %1564 = vst [vmem:[%s12353_s23 + $0xe90] sm:$0xf] %v1563_v51  ;;  %v1567_v53 = vld [vmem:[%s12357_s26 + $0xea0] sm:$0xf] }
 0x175   : > { %1566 = vst [vmem:[%s12353_s23 + $0xe98] sm:$0xf] %v1565_v52  ;;  %v1569_v54 = vld [vmem:[%s12357_s26 + $0xea4] sm:$0xf]  ;;  %v1571_v55 = vld [vmem:[%s12357_s26 + $0xeb0] sm:$0xf] }
 0x176   : > { %1568 = vst [vmem:[%s12353_s23 + $0xea0] sm:$0xf] %v1567_v53  ;;  %1570 = vst [vmem:[%s12353_s23 + $0xea8] sm:$0xf] %v1569_v54  ;;  %v1573_v56 = vld [vmem:[%s12357_s26 + $0xeb4] sm:$0xf] }
 0x177   : > { %1572 = vst [vmem:[%s12353_s23 + $0xeb0] sm:$0xf] %v1571_v55  ;;  %v1575_v57 = vld [vmem:[%s12357_s26 + $0xec0] sm:$0xf]  ;;  %v1577_v58 = vld [vmem:[%s12357_s26 + $0xec4] sm:$0xf] }
 0x178   : > { %1574 = vst [vmem:[%s12353_s23 + $0xeb8] sm:$0xf] %v1573_v56  ;;  %1576 = vst [vmem:[%s12353_s23 + $0xec0] sm:$0xf] %v1575_v57  ;;  %v1579_v59 = vld [vmem:[%s12357_s26 + $0xed0] sm:$0xf] }
 0x179   : > { %1578 = vst [vmem:[%s12353_s23 + $0xec8] sm:$0xf] %v1577_v58  ;;  %v1581_v60 = vld [vmem:[%s12357_s26 + $0xed4] sm:$0xf]  ;;  %v1583_v61 = vld [vmem:[%s12357_s26 + $0xee0] sm:$0xf] }
 0x17a   : > { %1580 = vst [vmem:[%s12353_s23 + $0xed0] sm:$0xf] %v1579_v59  ;;  %1582 = vst [vmem:[%s12353_s23 + $0xed8] sm:$0xf] %v1581_v60  ;;  %v1585_v62 = vld [vmem:[%s12357_s26 + $0xee4] sm:$0xf] }
 0x17b   : > { %1584 = vst [vmem:[%s12353_s23 + $0xee0] sm:$0xf] %v1583_v61  ;;  %v1587_v63 = vld [vmem:[%s12357_s26 + $0xef0] sm:$0xf]  ;;  %v1589_v0 = vld [vmem:[%s12357_s26 + $0xef4] sm:$0xf] }
 0x17c   : > { %1586 = vst [vmem:[%s12353_s23 + $0xee8] sm:$0xf] %v1585_v62  ;;  %1588 = vst [vmem:[%s12353_s23 + $0xef0] sm:$0xf] %v1587_v63  ;;  %v1591_v1 = vld [vmem:[%s12357_s26 + $0xf00] sm:$0xf] }
 0x17d   : > { %1590 = vst [vmem:[%s12353_s23 + $0xef8] sm:$0xf] %v1589_v0  ;;  %v1593_v2 = vld [vmem:[%s12357_s26 + $0xf04] sm:$0xf]  ;;  %v1595_v3 = vld [vmem:[%s12357_s26 + $0xf10] sm:$0xf] }
 0x17e   : > { %1592 = vst [vmem:[%s12353_s23 + $0xf00] sm:$0xf] %v1591_v1  ;;  %1594 = vst [vmem:[%s12353_s23 + $0xf08] sm:$0xf] %v1593_v2  ;;  %v1597_v4 = vld [vmem:[%s12357_s26 + $0xf14] sm:$0xf] }
 0x17f   : > { %1596 = vst [vmem:[%s12353_s23 + $0xf10] sm:$0xf] %v1595_v3  ;;  %v1599_v5 = vld [vmem:[%s12357_s26 + $0xf20] sm:$0xf]  ;;  %v1601_v6 = vld [vmem:[%s12357_s26 + $0xf24] sm:$0xf] }
 0x180   : > { %1598 = vst [vmem:[%s12353_s23 + $0xf18] sm:$0xf] %v1597_v4  ;;  %1600 = vst [vmem:[%s12353_s23 + $0xf20] sm:$0xf] %v1599_v5  ;;  %v1603_v7 = vld [vmem:[%s12357_s26 + $0xf30] sm:$0xf] }
 0x181   : > { %1602 = vst [vmem:[%s12353_s23 + $0xf28] sm:$0xf] %v1601_v6  ;;  %v1605_v8 = vld [vmem:[%s12357_s26 + $0xf34] sm:$0xf]  ;;  %v1607_v9 = vld [vmem:[%s12357_s26 + $0xf40] sm:$0xf] }
 0x182   : > { %1604 = vst [vmem:[%s12353_s23 + $0xf30] sm:$0xf] %v1603_v7  ;;  %1606 = vst [vmem:[%s12353_s23 + $0xf38] sm:$0xf] %v1605_v8  ;;  %v1609_v10 = vld [vmem:[%s12357_s26 + $0xf44] sm:$0xf] }
 0x183   : > { %1608 = vst [vmem:[%s12353_s23 + $0xf40] sm:$0xf] %v1607_v9  ;;  %v1611_v11 = vld [vmem:[%s12357_s26 + $0xf50] sm:$0xf]  ;;  %v1613_v12 = vld [vmem:[%s12357_s26 + $0xf54] sm:$0xf] }
 0x184   : > { %1610 = vst [vmem:[%s12353_s23 + $0xf48] sm:$0xf] %v1609_v10  ;;  %1612 = vst [vmem:[%s12353_s23 + $0xf50] sm:$0xf] %v1611_v11  ;;  %v1615_v13 = vld [vmem:[%s12357_s26 + $0xf60] sm:$0xf] }
 0x185   : > { %1614 = vst [vmem:[%s12353_s23 + $0xf58] sm:$0xf] %v1613_v12  ;;  %v1617_v14 = vld [vmem:[%s12357_s26 + $0xf64] sm:$0xf]  ;;  %v1619_v15 = vld [vmem:[%s12357_s26 + $0xf70] sm:$0xf] }
 0x186   : > { %1616 = vst [vmem:[%s12353_s23 + $0xf60] sm:$0xf] %v1615_v13  ;;  %1618 = vst [vmem:[%s12353_s23 + $0xf68] sm:$0xf] %v1617_v14  ;;  %v1621_v16 = vld [vmem:[%s12357_s26 + $0xf74] sm:$0xf] }
 0x187   : > { %1620 = vst [vmem:[%s12353_s23 + $0xf70] sm:$0xf] %v1619_v15  ;;  %v1623_v17 = vld [vmem:[%s12357_s26 + $0xf80] sm:$0xf]  ;;  %v1625_v18 = vld [vmem:[%s12357_s26 + $0xf84] sm:$0xf] }
 0x188   : > { %1622 = vst [vmem:[%s12353_s23 + $0xf78] sm:$0xf] %v1621_v16  ;;  %1624 = vst [vmem:[%s12353_s23 + $0xf80] sm:$0xf] %v1623_v17  ;;  %v1627_v19 = vld [vmem:[%s12357_s26 + $0xf90] sm:$0xf] }
 0x189   : > { %1626 = vst [vmem:[%s12353_s23 + $0xf88] sm:$0xf] %v1625_v18  ;;  %v1629_v20 = vld [vmem:[%s12357_s26 + $0xf94] sm:$0xf]  ;;  %v1631_v21 = vld [vmem:[%s12357_s26 + $0xfa0] sm:$0xf] }
 0x18a   : > { %1628 = vst [vmem:[%s12353_s23 + $0xf90] sm:$0xf] %v1627_v19  ;;  %1630 = vst [vmem:[%s12353_s23 + $0xf98] sm:$0xf] %v1629_v20  ;;  %v1633_v22 = vld [vmem:[%s12357_s26 + $0xfa4] sm:$0xf] }
 0x18b   : > { %1632 = vst [vmem:[%s12353_s23 + $0xfa0] sm:$0xf] %v1631_v21  ;;  %v1635_v23 = vld [vmem:[%s12357_s26 + $0xfb0] sm:$0xf]  ;;  %v1637_v24 = vld [vmem:[%s12357_s26 + $0xfb4] sm:$0xf] }
 0x18c   : > { %1634 = vst [vmem:[%s12353_s23 + $0xfa8] sm:$0xf] %v1633_v22  ;;  %1636 = vst [vmem:[%s12353_s23 + $0xfb0] sm:$0xf] %v1635_v23  ;;  %v1639_v25 = vld [vmem:[%s12357_s26 + $0xfc0] sm:$0xf] }
 0x18d   : > { %1638 = vst [vmem:[%s12353_s23 + $0xfb8] sm:$0xf] %v1637_v24  ;;  %v1641_v26 = vld [vmem:[%s12357_s26 + $0xfc4] sm:$0xf]  ;;  %v1643_v27 = vld [vmem:[%s12357_s26 + $0xfd0] sm:$0xf] }
 0x18e   : > { %1640 = vst [vmem:[%s12353_s23 + $0xfc0] sm:$0xf] %v1639_v25  ;;  %1642 = vst [vmem:[%s12353_s23 + $0xfc8] sm:$0xf] %v1641_v26  ;;  %v1645_v28 = vld [vmem:[%s12357_s26 + $0xfd4] sm:$0xf] }
 0x18f   : > { %1644 = vst [vmem:[%s12353_s23 + $0xfd0] sm:$0xf] %v1643_v27  ;;  %v1647_v29 = vld [vmem:[%s12357_s26 + $0xfe0] sm:$0xf]  ;;  %v1649_v30 = vld [vmem:[%s12357_s26 + $0xfe4] sm:$0xf] }
 0x190   : > { %1646 = vst [vmem:[%s12353_s23 + $0xfd8] sm:$0xf] %v1645_v28  ;;  %1648 = vst [vmem:[%s12353_s23 + $0xfe0] sm:$0xf] %v1647_v29  ;;  %v1651_v31 = vld [vmem:[%s12357_s26 + $0xff0] sm:$0xf] }
 0x191   : > { %1650 = vst [vmem:[%s12353_s23 + $0xfe8] sm:$0xf] %v1649_v30  ;;  %v1653_v32 = vld [vmem:[%s12357_s26 + $0xff4] sm:$0xf]  ;;  %1652 = vst [vmem:[%s12353_s23 + $0xff0] sm:$0xf] %v1651_v31 }
 0x192   : > { %1654 = vst [vmem:[%s12353_s23 + $0xff8] sm:$0xf] %v1653_v32  ;;  %p1656_p0 = scmp.ge.s32.totalorder %s1655_s13, 2  ;;  %s627_s28 = sadd.s32 1, %s12365_s28  }
 0x193   : > { %p624_p1 = scmp.ge.s32.totalorder %s627_s28, 2  }
 0x194   : > { %s16734_s13 = smov (%p1656_p0, %s1655_s13), 0 }
 0x195   : > { %s11479_s29 = sshll.u32 %s16734_s13, 3  ;;  %s11480_s0 = sshll.u32 %s16734_s13, 2 }
 0x196   : > { %s1660_s26 = scalar_lea.vmem %s16501_s14, %s11479_s29   ;;  %s1661_s23 = scalar_lea.vmem [#allocation3], %s11480_s0  }
 0x197   : > { %s16537_s27 = smov %s16734_s13  ;;  %626 = sbr.rel (!%p624_p1) target bundleno = 61 (0x3d), region = 313 }
 0x19e   :  { %4831 = vsyncadd [#allocation6 + $0x1], 65536  ;;  %v4850_v33 = vld [vmem:[%s16502_s15] sm:$0xf]  ;;  %v4854_v35 = vld [vmem:[%s16502_s15 + $0x4] sm:$0xf] }
 0x19f   :  { %v4852_v34 = vld [vmem:[%s16502_s15 + $0x20] sm:$0xf]  ;;  %4851 = vst [vmem:[#allocation4] sm:$0xf] %v4850_v33  ;;  %v4856_v36 = vld [vmem:[%s16502_s15 + $0x24] sm:$0xf] }
 0x1a0   :  { %4853 = vst [vmem:[#allocation4 + $0x4] sm:$0xf] %v4852_v34  ;;  %v4858_v37 = vld [vmem:[%s16502_s15 + $0x8] sm:$0xf]  ;;  %4855 = vst [vmem:[#allocation4 + $0x8] sm:$0xf] %v4854_v35 }
 0x1a1   :  { %4857 = vst [vmem:[#allocation4 + $0xc] sm:$0xf] %v4856_v36  ;;  %4859 = vst [vmem:[#allocation4 + $0x10] sm:$0xf] %v4858_v37  ;;  %v4860_v38 = vld [vmem:[%s16502_s15 + $0x28] sm:$0xf] }
 0x1a2   :  { %v4862_v39 = vld [vmem:[%s16502_s15 + $0xc] sm:$0xf]  ;;  %4861 = vst [vmem:[#allocation4 + $0x14] sm:$0xf] %v4860_v38  ;;  %v4866_v41 = vld [vmem:[%s16502_s15 + $0x10] sm:$0xf] }
 0x1a3   :  { %v4864_v40 = vld [vmem:[%s16502_s15 + $0x2c] sm:$0xf]  ;;  %4863 = vst [vmem:[#allocation4 + $0x18] sm:$0xf] %v4862_v39  ;;  %v4868_v42 = vld [vmem:[%s16502_s15 + $0x30] sm:$0xf] }
 0x1a4   :  { %4865 = vst [vmem:[#allocation4 + $0x1c] sm:$0xf] %v4864_v40  ;;  %v4870_v43 = vld [vmem:[%s16502_s15 + $0x14] sm:$0xf]  ;;  %4867 = vst [vmem:[#allocation4 + $0x20] sm:$0xf] %v4866_v41 }
 0x1a5   :  { %4869 = vst [vmem:[#allocation4 + $0x24] sm:$0xf] %v4868_v42  ;;  %4871 = vst [vmem:[#allocation4 + $0x28] sm:$0xf] %v4870_v43  ;;  %v4872_v44 = vld [vmem:[%s16502_s15 + $0x34] sm:$0xf] }
 0x1a6   :  { %v4874_v45 = vld [vmem:[%s16502_s15 + $0x18] sm:$0xf]  ;;  %4873 = vst [vmem:[#allocation4 + $0x2c] sm:$0xf] %v4872_v44  ;;  %v4878_v47 = vld [vmem:[%s16502_s15 + $0x1c] sm:$0xf] }
 0x1a7   :  { %v4876_v46 = vld [vmem:[%s16502_s15 + $0x38] sm:$0xf]  ;;  %4875 = vst [vmem:[#allocation4 + $0x30] sm:$0xf] %v4874_v45  ;;  %v4880_v48 = vld [vmem:[%s16502_s15 + $0x3c] sm:$0xff]  }
 0x1a8   :  { %4877 = vst [vmem:[#allocation4 + $0x34] sm:$0xf] %v4876_v46  ;;  %v4884_v49 = vld [vmem:[%s16502_s15 + $0x60] sm:$0xf]  ;;  %4879 = vst [vmem:[#allocation4 + $0x38] sm:$0xf] %v4878_v47 }
 0x1a9   :  { %4881 = vst [vmem:[#allocation4 + $0x3c] sm:$0xff] %v4880_v48   ;;  %4885 = vst [vmem:[#allocation4 + $0x44] sm:$0xf] %v4884_v49  ;;  %v4886_v50 = vld [vmem:[%s16502_s15 + $0x44] sm:$0xf]  ;;  %v4912_v63 = vld [vmem:[%s16502_s15 + $0x7c] sm:$0xff]  }
 0x1aa   :  { %v4888_v51 = vld [vmem:[%s16502_s15 + $0x64] sm:$0xf]  ;;  %v4890_v52 = vld [vmem:[%s16502_s15 + $0x48] sm:$0xf]  ;;  %4887 = vst [vmem:[#allocation4 + $0x48] sm:$0xf] %v4886_v50 }
 0x1ab   :  { %4889 = vst [vmem:[#allocation4 + $0x4c] sm:$0xf] %v4888_v51  ;;  %4891 = vst [vmem:[#allocation4 + $0x50] sm:$0xf] %v4890_v52  ;;  %v4892_v53 = vld [vmem:[%s16502_s15 + $0x68] sm:$0xf] }
 0x1ac   :  { %v4894_v54 = vld [vmem:[%s16502_s15 + $0x4c] sm:$0xf]  ;;  %4893 = vst [vmem:[#allocation4 + $0x54] sm:$0xf] %v4892_v53  ;;  %v4898_v56 = vld [vmem:[%s16502_s15 + $0x50] sm:$0xf] }
 0x1ad   :  { %v4896_v55 = vld [vmem:[%s16502_s15 + $0x6c] sm:$0xf]  ;;  %4895 = vst [vmem:[#allocation4 + $0x58] sm:$0xf] %v4894_v54  ;;  %v4900_v57 = vld [vmem:[%s16502_s15 + $0x70] sm:$0xf] }
 0x1ae   :  { %4897 = vst [vmem:[#allocation4 + $0x5c] sm:$0xf] %v4896_v55  ;;  %v4902_v58 = vld [vmem:[%s16502_s15 + $0x54] sm:$0xf]  ;;  %4899 = vst [vmem:[#allocation4 + $0x60] sm:$0xf] %v4898_v56 }
 0x1af   :  { %4901 = vst [vmem:[#allocation4 + $0x64] sm:$0xf] %v4900_v57  ;;  %4903 = vst [vmem:[#allocation4 + $0x68] sm:$0xf] %v4902_v58  ;;  %v4904_v59 = vld [vmem:[%s16502_s15 + $0x74] sm:$0xf] }
 0x1b0   :  { %v4906_v60 = vld [vmem:[%s16502_s15 + $0x58] sm:$0xf]  ;;  %4905 = vst [vmem:[#allocation4 + $0x6c] sm:$0xf] %v4904_v59  ;;  %v4910_v62 = vld [vmem:[%s16502_s15 + $0x5c] sm:$0xf] }
 0x1b1   :  { %v4908_v61 = vld [vmem:[%s16502_s15 + $0x78] sm:$0xf]  ;;  %4907 = vst [vmem:[#allocation4 + $0x70] sm:$0xf] %v4906_v60  ;;  %v4916_v0 = vld [vmem:[%s16502_s15 + $0xa0] sm:$0xf] }
 0x1b2   :  { %4909 = vst [vmem:[#allocation4 + $0x74] sm:$0xf] %v4908_v61  ;;  %4911 = vst [vmem:[#allocation4 + $0x78] sm:$0xf] %v4910_v62  ;;  %v4918_v1 = vld [vmem:[%s16502_s15 + $0x84] sm:$0xf] }
 0x1b3   :  { %4913 = vst [vmem:[#allocation4 + $0x7c] sm:$0xff] %v4912_v63   ;;  %4917 = vst [vmem:[#allocation4 + $0x84] sm:$0xf] %v4916_v0  ;;  %v4920_v2 = vld [vmem:[%s16502_s15 + $0xa4] sm:$0xf]  ;;  %v4944_v14 = vld [vmem:[%s16502_s15 + $0xbc] sm:$0xff]  }
 0x1b4   :  { %v4922_v3 = vld [vmem:[%s16502_s15 + $0x88] sm:$0xf]  ;;  %4919 = vst [vmem:[#allocation4 + $0x88] sm:$0xf] %v4918_v1  ;;  %4921 = vst [vmem:[#allocation4 + $0x8c] sm:$0xf] %v4920_v2 }
 0x1b5   :  { %4923 = vst [vmem:[#allocation4 + $0x90] sm:$0xf] %v4922_v3  ;;  %v4924_v4 = vld [vmem:[%s16502_s15 + $0xa8] sm:$0xf]  ;;  %v4926_v5 = vld [vmem:[%s16502_s15 + $0x8c] sm:$0xf] }
 0x1b6   :  { %v4928_v6 = vld [vmem:[%s16502_s15 + $0xac] sm:$0xf]  ;;  %4925 = vst [vmem:[#allocation4 + $0x94] sm:$0xf] %v4924_v4  ;;  %4927 = vst [vmem:[#allocation4 + $0x98] sm:$0xf] %v4926_v5 }
 0x1b7   :  { %4929 = vst [vmem:[#allocation4 + $0x9c] sm:$0xf] %v4928_v6  ;;  %v4930_v7 = vld [vmem:[%s16502_s15 + $0x90] sm:$0xf]  ;;  %v4934_v9 = vld [vmem:[%s16502_s15 + $0x94] sm:$0xf] }
 0x1b8   :  { %v4932_v8 = vld [vmem:[%s16502_s15 + $0xb0] sm:$0xf]  ;;  %4931 = vst [vmem:[#allocation4 + $0xa0] sm:$0xf] %v4930_v7  ;;  %4935 = vst [vmem:[#allocation4 + $0xa8] sm:$0xf] %v4934_v9 }
 0x1b9   :  { %4933 = vst [vmem:[#allocation4 + $0xa4] sm:$0xf] %v4932_v8  ;;  %v4936_v10 = vld [vmem:[%s16502_s15 + $0xb4] sm:$0xf]  ;;  %v4938_v11 = vld [vmem:[%s16502_s15 + $0x98] sm:$0xf] }
 0x1ba   :  { %v4940_v12 = vld [vmem:[%s16502_s15 + $0xb8] sm:$0xf]  ;;  %4937 = vst [vmem:[#allocation4 + $0xac] sm:$0xf] %v4936_v10  ;;  %4939 = vst [vmem:[#allocation4 + $0xb0] sm:$0xf] %v4938_v11 }
 0x1bb   :  { %4941 = vst [vmem:[#allocation4 + $0xb4] sm:$0xf] %v4940_v12  ;;  %v4942_v13 = vld [vmem:[%s16502_s15 + $0x9c] sm:$0xf]  ;;  %v4948_v15 = vld [vmem:[%s16502_s15 + $0xe0] sm:$0xf] }
 0x1bc   :  { %4943 = vst [vmem:[#allocation4 + $0xb8] sm:$0xf] %v4942_v13  ;;  %4945 = vst [vmem:[#allocation4 + $0xbc] sm:$0xff] %v4944_v14   ;;  %v4950_v16 = vld [vmem:[%s16502_s15 + $0xc4] sm:$0xf]  ;;  %v4976_v29 = vld [vmem:[%s16502_s15 + $0xfc] sm:$0xff]  }
 0x1bd   :  { %4949 = vst [vmem:[#allocation4 + $0xc4] sm:$0xf] %v4948_v15  ;;  %v4952_v17 = vld [vmem:[%s16502_s15 + $0xe4] sm:$0xf]  ;;  %v4954_v18 = vld [vmem:[%s16502_s15 + $0xc8] sm:$0xf] }
 0x1be   :  { %4951 = vst [vmem:[#allocation4 + $0xc8] sm:$0xf] %v4950_v16  ;;  %4953 = vst [vmem:[#allocation4 + $0xcc] sm:$0xf] %v4952_v17  ;;  %v4956_v19 = vld [vmem:[%s16502_s15 + $0xe8] sm:$0xf] }
 0x1bf   :  { %4955 = vst [vmem:[#allocation4 + $0xd0] sm:$0xf] %v4954_v18  ;;  %v4958_v20 = vld [vmem:[%s16502_s15 + $0xcc] sm:$0xf]  ;;  %4957 = vst [vmem:[#allocation4 + $0xd4] sm:$0xf] %v4956_v19 }
 0x1c0   :  { %v4960_v21 = vld [vmem:[%s16502_s15 + $0xec] sm:$0xf]  ;;  %4959 = vst [vmem:[#allocation4 + $0xd8] sm:$0xf] %v4958_v20  ;;  %v4962_v22 = vld [vmem:[%s16502_s15 + $0xd0] sm:$0xf] }
 0x1c1   :  { %4961 = vst [vmem:[#allocation4 + $0xdc] sm:$0xf] %v4960_v21  ;;  %v4964_v23 = vld [vmem:[%s16502_s15 + $0xf0] sm:$0xf]  ;;  %v4966_v24 = vld [vmem:[%s16502_s15 + $0xd4] sm:$0xf] }
 0x1c2   :  { %4963 = vst [vmem:[#allocation4 + $0xe0] sm:$0xf] %v4962_v22  ;;  %4965 = vst [vmem:[#allocation4 + $0xe4] sm:$0xf] %v4964_v23  ;;  %v4968_v25 = vld [vmem:[%s16502_s15 + $0xf4] sm:$0xf] }
 0x1c3   :  { %4967 = vst [vmem:[#allocation4 + $0xe8] sm:$0xf] %v4966_v24  ;;  %v4970_v26 = vld [vmem:[%s16502_s15 + $0xd8] sm:$0xf]  ;;  %4969 = vst [vmem:[#allocation4 + $0xec] sm:$0xf] %v4968_v25 }
 0x1c4   :  { %v4972_v27 = vld [vmem:[%s16502_s15 + $0xf8] sm:$0xf]  ;;  %4971 = vst [vmem:[#allocation4 + $0xf0] sm:$0xf] %v4970_v26  ;;  %v4974_v28 = vld [vmem:[%s16502_s15 + $0xdc] sm:$0xf] }
 0x1c5   :  { %4973 = vst [vmem:[#allocation4 + $0xf4] sm:$0xf] %v4972_v27  ;;  %v4980_v30 = vld [vmem:[%s16502_s15 + $0x120] sm:$0xf]  ;;  %4975 = vst [vmem:[#allocation4 + $0xf8] sm:$0xf] %v4974_v28 }
 0x1c6   :  { %4977 = vst [vmem:[#allocation4 + $0xfc] sm:$0xff] %v4976_v29   ;;  %4981 = vst [vmem:[#allocation4 + $0x104] sm:$0xf] %v4980_v30  ;;  %v4982_v31 = vld [vmem:[%s16502_s15 + $0x104] sm:$0xf]  ;;  %v5008_v44 = vld [vmem:[%s16502_s15 + $0x13c] sm:$0xff]  }
 0x1c7   :  { %v4984_v32 = vld [vmem:[%s16502_s15 + $0x124] sm:$0xf]  ;;  %v4986_v33 = vld [vmem:[%s16502_s15 + $0x108] sm:$0xf]  ;;  %4983 = vst [vmem:[#allocation4 + $0x108] sm:$0xf] %v4982_v31 }
 0x1c8   :  { %4985 = vst [vmem:[#allocation4 + $0x10c] sm:$0xf] %v4984_v32  ;;  %4987 = vst [vmem:[#allocation4 + $0x110] sm:$0xf] %v4986_v33  ;;  %v4988_v34 = vld [vmem:[%s16502_s15 + $0x128] sm:$0xf] }
 0x1c9   :  { %v4990_v35 = vld [vmem:[%s16502_s15 + $0x10c] sm:$0xf]  ;;  %4989 = vst [vmem:[#allocation4 + $0x114] sm:$0xf] %v4988_v34  ;;  %v4994_v37 = vld [vmem:[%s16502_s15 + $0x110] sm:$0xf] }
 0x1ca   :  { %v4992_v36 = vld [vmem:[%s16502_s15 + $0x12c] sm:$0xf]  ;;  %4991 = vst [vmem:[#allocation4 + $0x118] sm:$0xf] %v4990_v35  ;;  %v4996_v38 = vld [vmem:[%s16502_s15 + $0x130] sm:$0xf] }
 0x1cb   :  { %4993 = vst [vmem:[#allocation4 + $0x11c] sm:$0xf] %v4992_v36  ;;  %v4998_v39 = vld [vmem:[%s16502_s15 + $0x114] sm:$0xf]  ;;  %4995 = vst [vmem:[#allocation4 + $0x120] sm:$0xf] %v4994_v37 }
 0x1cc   :  { %4997 = vst [vmem:[#allocation4 + $0x124] sm:$0xf] %v4996_v38  ;;  %4999 = vst [vmem:[#allocation4 + $0x128] sm:$0xf] %v4998_v39  ;;  %v5000_v40 = vld [vmem:[%s16502_s15 + $0x134] sm:$0xf] }
 0x1cd   :  { %v5002_v41 = vld [vmem:[%s16502_s15 + $0x118] sm:$0xf]  ;;  %5001 = vst [vmem:[#allocation4 + $0x12c] sm:$0xf] %v5000_v40  ;;  %v5006_v43 = vld [vmem:[%s16502_s15 + $0x11c] sm:$0xf] }
 0x1ce   :  { %v5004_v42 = vld [vmem:[%s16502_s15 + $0x138] sm:$0xf]  ;;  %5003 = vst [vmem:[#allocation4 + $0x130] sm:$0xf] %v5002_v41  ;;  %v5012_v45 = vld [vmem:[%s16502_s15 + $0x160] sm:$0xf] }
 0x1cf   :  { %5005 = vst [vmem:[#allocation4 + $0x134] sm:$0xf] %v5004_v42  ;;  %5007 = vst [vmem:[#allocation4 + $0x138] sm:$0xf] %v5006_v43  ;;  %v5014_v46 = vld [vmem:[%s16502_s15 + $0x144] sm:$0xf] }
 0x1d0   :  { %5009 = vst [vmem:[#allocation4 + $0x13c] sm:$0xff] %v5008_v44   ;;  %5013 = vst [vmem:[#allocation4 + $0x144] sm:$0xf] %v5012_v45  ;;  %v5016_v47 = vld [vmem:[%s16502_s15 + $0x164] sm:$0xf]  ;;  %v5040_v59 = vld [vmem:[%s16502_s15 + $0x17c] sm:$0xff]  }
 0x1d1   :  { %v5018_v48 = vld [vmem:[%s16502_s15 + $0x148] sm:$0xf]  ;;  %5015 = vst [vmem:[#allocation4 + $0x148] sm:$0xf] %v5014_v46  ;;  %5017 = vst [vmem:[#allocation4 + $0x14c] sm:$0xf] %v5016_v47 }
 0x1d2   :  { %5019 = vst [vmem:[#allocation4 + $0x150] sm:$0xf] %v5018_v48  ;;  %v5020_v49 = vld [vmem:[%s16502_s15 + $0x168] sm:$0xf]  ;;  %v5022_v50 = vld [vmem:[%s16502_s15 + $0x14c] sm:$0xf] }
 0x1d3   :  { %v5024_v51 = vld [vmem:[%s16502_s15 + $0x16c] sm:$0xf]  ;;  %5021 = vst [vmem:[#allocation4 + $0x154] sm:$0xf] %v5020_v49  ;;  %5023 = vst [vmem:[#allocation4 + $0x158] sm:$0xf] %v5022_v50 }
 0x1d4   :  { %5025 = vst [vmem:[#allocation4 + $0x15c] sm:$0xf] %v5024_v51  ;;  %v5026_v52 = vld [vmem:[%s16502_s15 + $0x150] sm:$0xf]  ;;  %v5030_v54 = vld [vmem:[%s16502_s15 + $0x154] sm:$0xf] }
 0x1d5   :  { %v5028_v53 = vld [vmem:[%s16502_s15 + $0x170] sm:$0xf]  ;;  %5027 = vst [vmem:[#allocation4 + $0x160] sm:$0xf] %v5026_v52  ;;  %5031 = vst [vmem:[#allocation4 + $0x168] sm:$0xf] %v5030_v54 }
 0x1d6   :  { %5029 = vst [vmem:[#allocation4 + $0x164] sm:$0xf] %v5028_v53  ;;  %v5032_v55 = vld [vmem:[%s16502_s15 + $0x174] sm:$0xf]  ;;  %v5034_v56 = vld [vmem:[%s16502_s15 + $0x158] sm:$0xf] }
 0x1d7   :  { %v5036_v57 = vld [vmem:[%s16502_s15 + $0x178] sm:$0xf]  ;;  %5033 = vst [vmem:[#allocation4 + $0x16c] sm:$0xf] %v5032_v55  ;;  %5035 = vst [vmem:[#allocation4 + $0x170] sm:$0xf] %v5034_v56 }
 0x1d8   :  { %5037 = vst [vmem:[#allocation4 + $0x174] sm:$0xf] %v5036_v57  ;;  %v5038_v58 = vld [vmem:[%s16502_s15 + $0x15c] sm:$0xf]  ;;  %v5044_v60 = vld [vmem:[%s16502_s15 + $0x1a0] sm:$0xf] }
 0x1d9   :  { %5039 = vst [vmem:[#allocation4 + $0x178] sm:$0xf] %v5038_v58  ;;  %5041 = vst [vmem:[#allocation4 + $0x17c] sm:$0xff] %v5040_v59   ;;  %v5046_v61 = vld [vmem:[%s16502_s15 + $0x184] sm:$0xf]  ;;  %v5072_v10 = vld [vmem:[%s16502_s15 + $0x1bc] sm:$0xff]  }
 0x1da   :  { %5045 = vst [vmem:[#allocation4 + $0x184] sm:$0xf] %v5044_v60  ;;  %v5048_v62 = vld [vmem:[%s16502_s15 + $0x1a4] sm:$0xf]  ;;  %v5050_v63 = vld [vmem:[%s16502_s15 + $0x188] sm:$0xf] }
 0x1db   :  { %5047 = vst [vmem:[#allocation4 + $0x188] sm:$0xf] %v5046_v61  ;;  %5049 = vst [vmem:[#allocation4 + $0x18c] sm:$0xf] %v5048_v62  ;;  %v5052_v0 = vld [vmem:[%s16502_s15 + $0x1a8] sm:$0xf] }
 0x1dc   :  { %5051 = vst [vmem:[#allocation4 + $0x190] sm:$0xf] %v5050_v63  ;;  %v5054_v1 = vld [vmem:[%s16502_s15 + $0x18c] sm:$0xf]  ;;  %5053 = vst [vmem:[#allocation4 + $0x194] sm:$0xf] %v5052_v0 }
 0x1dd   :  { %v5056_v2 = vld [vmem:[%s16502_s15 + $0x1ac] sm:$0xf]  ;;  %5055 = vst [vmem:[#allocation4 + $0x198] sm:$0xf] %v5054_v1  ;;  %v5058_v3 = vld [vmem:[%s16502_s15 + $0x190] sm:$0xf] }
 0x1de   :  { %5057 = vst [vmem:[#allocation4 + $0x19c] sm:$0xf] %v5056_v2  ;;  %v5060_v4 = vld [vmem:[%s16502_s15 + $0x1b0] sm:$0xf]  ;;  %v5062_v5 = vld [vmem:[%s16502_s15 + $0x194] sm:$0xf] }
 0x1df   :  { %5059 = vst [vmem:[#allocation4 + $0x1a0] sm:$0xf] %v5058_v3  ;;  %5061 = vst [vmem:[#allocation4 + $0x1a4] sm:$0xf] %v5060_v4  ;;  %v5064_v6 = vld [vmem:[%s16502_s15 + $0x1b4] sm:$0xf] }
 0x1e0   :  { %5063 = vst [vmem:[#allocation4 + $0x1a8] sm:$0xf] %v5062_v5  ;;  %v5066_v7 = vld [vmem:[%s16502_s15 + $0x198] sm:$0xf]  ;;  %5065 = vst [vmem:[#allocation4 + $0x1ac] sm:$0xf] %v5064_v6 }
 0x1e1   :  { %v5068_v8 = vld [vmem:[%s16502_s15 + $0x1b8] sm:$0xf]  ;;  %5067 = vst [vmem:[#allocation4 + $0x1b0] sm:$0xf] %v5066_v7  ;;  %v5070_v9 = vld [vmem:[%s16502_s15 + $0x19c] sm:$0xf] }
 0x1e2   :  { %5069 = vst [vmem:[#allocation4 + $0x1b4] sm:$0xf] %v5068_v8  ;;  %v5076_v11 = vld [vmem:[%s16502_s15 + $0x1e0] sm:$0xf]  ;;  %5071 = vst [vmem:[#allocation4 + $0x1b8] sm:$0xf] %v5070_v9 }
 0x1e3   :  { %5073 = vst [vmem:[#allocation4 + $0x1bc] sm:$0xff] %v5072_v10   ;;  %5077 = vst [vmem:[#allocation4 + $0x1c4] sm:$0xf] %v5076_v11  ;;  %v5078_v12 = vld [vmem:[%s16502_s15 + $0x1c4] sm:$0xf]  ;;  %v5104_v25 = vld [vmem:[%s16502_s15 + $0x1fc] sm:$0xff]  }
 0x1e4   :  { %v5080_v13 = vld [vmem:[%s16502_s15 + $0x1e4] sm:$0xf]  ;;  %v5082_v14 = vld [vmem:[%s16502_s15 + $0x1c8] sm:$0xf]  ;;  %5079 = vst [vmem:[#allocation4 + $0x1c8] sm:$0xf] %v5078_v12 }
 0x1e5   :  { %5081 = vst [vmem:[#allocation4 + $0x1cc] sm:$0xf] %v5080_v13  ;;  %5083 = vst [vmem:[#allocation4 + $0x1d0] sm:$0xf] %v5082_v14  ;;  %v5084_v15 = vld [vmem:[%s16502_s15 + $0x1e8] sm:$0xf] }
 0x1e6   :  { %v5086_v16 = vld [vmem:[%s16502_s15 + $0x1cc] sm:$0xf]  ;;  %5085 = vst [vmem:[#allocation4 + $0x1d4] sm:$0xf] %v5084_v15  ;;  %v5090_v18 = vld [vmem:[%s16502_s15 + $0x1d0] sm:$0xf] }
 0x1e7   :  { %v5088_v17 = vld [vmem:[%s16502_s15 + $0x1ec] sm:$0xf]  ;;  %5087 = vst [vmem:[#allocation4 + $0x1d8] sm:$0xf] %v5086_v16  ;;  %v5092_v19 = vld [vmem:[%s16502_s15 + $0x1f0] sm:$0xf] }
 0x1e8   :  { %5089 = vst [vmem:[#allocation4 + $0x1dc] sm:$0xf] %v5088_v17  ;;  %v5094_v20 = vld [vmem:[%s16502_s15 + $0x1d4] sm:$0xf]  ;;  %5091 = vst [vmem:[#allocation4 + $0x1e0] sm:$0xf] %v5090_v18 }
 0x1e9   :  { %5093 = vst [vmem:[#allocation4 + $0x1e4] sm:$0xf] %v5092_v19  ;;  %5095 = vst [vmem:[#allocation4 + $0x1e8] sm:$0xf] %v5094_v20  ;;  %v5096_v21 = vld [vmem:[%s16502_s15 + $0x1f4] sm:$0xf] }
 0x1ea   :  { %v5098_v22 = vld [vmem:[%s16502_s15 + $0x1d8] sm:$0xf]  ;;  %5097 = vst [vmem:[#allocation4 + $0x1ec] sm:$0xf] %v5096_v21  ;;  %v5102_v24 = vld [vmem:[%s16502_s15 + $0x1dc] sm:$0xf] }
 0x1eb   :  { %v5100_v23 = vld [vmem:[%s16502_s15 + $0x1f8] sm:$0xf]  ;;  %5099 = vst [vmem:[#allocation4 + $0x1f0] sm:$0xf] %v5098_v22  ;;  %v5108_v26 = vld [vmem:[%s16502_s15 + $0x220] sm:$0xf] }
 0x1ec   :  { %5101 = vst [vmem:[#allocation4 + $0x1f4] sm:$0xf] %v5100_v23  ;;  %5103 = vst [vmem:[#allocation4 + $0x1f8] sm:$0xf] %v5102_v24  ;;  %v5110_v27 = vld [vmem:[%s16502_s15 + $0x204] sm:$0xf] }
 0x1ed   :  { %5105 = vst [vmem:[#allocation4 + $0x1fc] sm:$0xff] %v5104_v25   ;;  %5109 = vst [vmem:[#allocation4 + $0x204] sm:$0xf] %v5108_v26  ;;  %v5112_v28 = vld [vmem:[%s16502_s15 + $0x224] sm:$0xf]  ;;  %v5136_v40 = vld [vmem:[%s16502_s15 + $0x23c] sm:$0xff]  }
 0x1ee   :  { %v5114_v29 = vld [vmem:[%s16502_s15 + $0x208] sm:$0xf]  ;;  %5111 = vst [vmem:[#allocation4 + $0x208] sm:$0xf] %v5110_v27  ;;  %5113 = vst [vmem:[#allocation4 + $0x20c] sm:$0xf] %v5112_v28 }
 0x1ef   :  { %5115 = vst [vmem:[#allocation4 + $0x210] sm:$0xf] %v5114_v29  ;;  %v5116_v30 = vld [vmem:[%s16502_s15 + $0x228] sm:$0xf]  ;;  %v5118_v31 = vld [vmem:[%s16502_s15 + $0x20c] sm:$0xf] }
 0x1f0   :  { %v5120_v32 = vld [vmem:[%s16502_s15 + $0x22c] sm:$0xf]  ;;  %5117 = vst [vmem:[#allocation4 + $0x214] sm:$0xf] %v5116_v30  ;;  %5119 = vst [vmem:[#allocation4 + $0x218] sm:$0xf] %v5118_v31 }
 0x1f1   :  { %5121 = vst [vmem:[#allocation4 + $0x21c] sm:$0xf] %v5120_v32  ;;  %v5122_v33 = vld [vmem:[%s16502_s15 + $0x210] sm:$0xf]  ;;  %v5126_v35 = vld [vmem:[%s16502_s15 + $0x214] sm:$0xf] }
 0x1f2   :  { %v5124_v34 = vld [vmem:[%s16502_s15 + $0x230] sm:$0xf]  ;;  %5123 = vst [vmem:[#allocation4 + $0x220] sm:$0xf] %v5122_v33  ;;  %5127 = vst [vmem:[#allocation4 + $0x228] sm:$0xf] %v5126_v35 }
 0x1f3   :  { %5125 = vst [vmem:[#allocation4 + $0x224] sm:$0xf] %v5124_v34  ;;  %v5128_v36 = vld [vmem:[%s16502_s15 + $0x234] sm:$0xf]  ;;  %v5130_v37 = vld [vmem:[%s16502_s15 + $0x218] sm:$0xf] }
 0x1f4   :  { %v5132_v38 = vld [vmem:[%s16502_s15 + $0x238] sm:$0xf]  ;;  %5129 = vst [vmem:[#allocation4 + $0x22c] sm:$0xf] %v5128_v36  ;;  %5131 = vst [vmem:[#allocation4 + $0x230] sm:$0xf] %v5130_v37 }
 0x1f5   :  { %5133 = vst [vmem:[#allocation4 + $0x234] sm:$0xf] %v5132_v38  ;;  %v5134_v39 = vld [vmem:[%s16502_s15 + $0x21c] sm:$0xf]  ;;  %v5140_v41 = vld [vmem:[%s16502_s15 + $0x260] sm:$0xf] }
 0x1f6   :  { %5135 = vst [vmem:[#allocation4 + $0x238] sm:$0xf] %v5134_v39  ;;  %5137 = vst [vmem:[#allocation4 + $0x23c] sm:$0xff] %v5136_v40   ;;  %v5142_v42 = vld [vmem:[%s16502_s15 + $0x244] sm:$0xf]  ;;  %v5168_v55 = vld [vmem:[%s16502_s15 + $0x27c] sm:$0xff]  }
 0x1f7   :  { %5141 = vst [vmem:[#allocation4 + $0x244] sm:$0xf] %v5140_v41  ;;  %v5144_v43 = vld [vmem:[%s16502_s15 + $0x264] sm:$0xf]  ;;  %v5146_v44 = vld [vmem:[%s16502_s15 + $0x248] sm:$0xf] }
 0x1f8   :  { %5143 = vst [vmem:[#allocation4 + $0x248] sm:$0xf] %v5142_v42  ;;  %5145 = vst [vmem:[#allocation4 + $0x24c] sm:$0xf] %v5144_v43  ;;  %v5148_v45 = vld [vmem:[%s16502_s15 + $0x268] sm:$0xf] }
 0x1f9   :  { %5147 = vst [vmem:[#allocation4 + $0x250] sm:$0xf] %v5146_v44  ;;  %v5150_v46 = vld [vmem:[%s16502_s15 + $0x24c] sm:$0xf]  ;;  %5149 = vst [vmem:[#allocation4 + $0x254] sm:$0xf] %v5148_v45 }
 0x1fa   :  { %v5152_v47 = vld [vmem:[%s16502_s15 + $0x26c] sm:$0xf]  ;;  %5151 = vst [vmem:[#allocation4 + $0x258] sm:$0xf] %v5150_v46  ;;  %v5154_v48 = vld [vmem:[%s16502_s15 + $0x250] sm:$0xf] }
 0x1fb   :  { %5153 = vst [vmem:[#allocation4 + $0x25c] sm:$0xf] %v5152_v47  ;;  %v5156_v49 = vld [vmem:[%s16502_s15 + $0x270] sm:$0xf]  ;;  %v5158_v50 = vld [vmem:[%s16502_s15 + $0x254] sm:$0xf] }
 0x1fc   :  { %5155 = vst [vmem:[#allocation4 + $0x260] sm:$0xf] %v5154_v48  ;;  %5157 = vst [vmem:[#allocation4 + $0x264] sm:$0xf] %v5156_v49  ;;  %v5160_v51 = vld [vmem:[%s16502_s15 + $0x274] sm:$0xf] }
 0x1fd   :  { %5159 = vst [vmem:[#allocation4 + $0x268] sm:$0xf] %v5158_v50  ;;  %v5162_v52 = vld [vmem:[%s16502_s15 + $0x258] sm:$0xf]  ;;  %5161 = vst [vmem:[#allocation4 + $0x26c] sm:$0xf] %v5160_v51 }
 0x1fe   :  { %v5164_v53 = vld [vmem:[%s16502_s15 + $0x278] sm:$0xf]  ;;  %5163 = vst [vmem:[#allocation4 + $0x270] sm:$0xf] %v5162_v52  ;;  %v5166_v54 = vld [vmem:[%s16502_s15 + $0x25c] sm:$0xf] }
 0x1ff   :  { %5165 = vst [vmem:[#allocation4 + $0x274] sm:$0xf] %v5164_v53  ;;  %v5172_v56 = vld [vmem:[%s16502_s15 + $0x2a0] sm:$0xf]  ;;  %5167 = vst [vmem:[#allocation4 + $0x278] sm:$0xf] %v5166_v54 }
 0x200   :  { %5169 = vst [vmem:[#allocation4 + $0x27c] sm:$0xff] %v5168_v55   ;;  %5173 = vst [vmem:[#allocation4 + $0x284] sm:$0xf] %v5172_v56  ;;  %v5174_v57 = vld [vmem:[%s16502_s15 + $0x284] sm:$0xf]  ;;  %v5200_v6 = vld [vmem:[%s16502_s15 + $0x2bc] sm:$0xff]  }
 0x201   :  { %v5176_v58 = vld [vmem:[%s16502_s15 + $0x2a4] sm:$0xf]  ;;  %v5178_v59 = vld [vmem:[%s16502_s15 + $0x288] sm:$0xf]  ;;  %5175 = vst [vmem:[#allocation4 + $0x288] sm:$0xf] %v5174_v57 }
 0x202   :  { %5177 = vst [vmem:[#allocation4 + $0x28c] sm:$0xf] %v5176_v58  ;;  %5179 = vst [vmem:[#allocation4 + $0x290] sm:$0xf] %v5178_v59  ;;  %v5180_v60 = vld [vmem:[%s16502_s15 + $0x2a8] sm:$0xf] }
 0x203   :  { %v5182_v61 = vld [vmem:[%s16502_s15 + $0x28c] sm:$0xf]  ;;  %5181 = vst [vmem:[#allocation4 + $0x294] sm:$0xf] %v5180_v60  ;;  %v5186_v63 = vld [vmem:[%s16502_s15 + $0x290] sm:$0xf] }
 0x204   :  { %v5184_v62 = vld [vmem:[%s16502_s15 + $0x2ac] sm:$0xf]  ;;  %5183 = vst [vmem:[#allocation4 + $0x298] sm:$0xf] %v5182_v61  ;;  %v5188_v0 = vld [vmem:[%s16502_s15 + $0x2b0] sm:$0xf] }
 0x205   :  { %5185 = vst [vmem:[#allocation4 + $0x29c] sm:$0xf] %v5184_v62  ;;  %v5190_v1 = vld [vmem:[%s16502_s15 + $0x294] sm:$0xf]  ;;  %5187 = vst [vmem:[#allocation4 + $0x2a0] sm:$0xf] %v5186_v63 }
 0x206   :  { %5189 = vst [vmem:[#allocation4 + $0x2a4] sm:$0xf] %v5188_v0  ;;  %5191 = vst [vmem:[#allocation4 + $0x2a8] sm:$0xf] %v5190_v1  ;;  %v5192_v2 = vld [vmem:[%s16502_s15 + $0x2b4] sm:$0xf] }
 0x207   :  { %v5194_v3 = vld [vmem:[%s16502_s15 + $0x298] sm:$0xf]  ;;  %5193 = vst [vmem:[#allocation4 + $0x2ac] sm:$0xf] %v5192_v2  ;;  %v5198_v5 = vld [vmem:[%s16502_s15 + $0x29c] sm:$0xf] }
 0x208   :  { %v5196_v4 = vld [vmem:[%s16502_s15 + $0x2b8] sm:$0xf]  ;;  %5195 = vst [vmem:[#allocation4 + $0x2b0] sm:$0xf] %v5194_v3  ;;  %v5204_v7 = vld [vmem:[%s16502_s15 + $0x2e0] sm:$0xf] }
 0x209   :  { %5197 = vst [vmem:[#allocation4 + $0x2b4] sm:$0xf] %v5196_v4  ;;  %5199 = vst [vmem:[#allocation4 + $0x2b8] sm:$0xf] %v5198_v5  ;;  %v5206_v8 = vld [vmem:[%s16502_s15 + $0x2c4] sm:$0xf] }
 0x20a   :  { %5201 = vst [vmem:[#allocation4 + $0x2bc] sm:$0xff] %v5200_v6   ;;  %5205 = vst [vmem:[#allocation4 + $0x2c4] sm:$0xf] %v5204_v7  ;;  %v5208_v9 = vld [vmem:[%s16502_s15 + $0x2e4] sm:$0xf]  ;;  %v5232_v21 = vld [vmem:[%s16502_s15 + $0x2fc] sm:$0xff]  }
 0x20b   :  { %v5210_v10 = vld [vmem:[%s16502_s15 + $0x2c8] sm:$0xf]  ;;  %5207 = vst [vmem:[#allocation4 + $0x2c8] sm:$0xf] %v5206_v8  ;;  %5209 = vst [vmem:[#allocation4 + $0x2cc] sm:$0xf] %v5208_v9 }
 0x20c   :  { %5211 = vst [vmem:[#allocation4 + $0x2d0] sm:$0xf] %v5210_v10  ;;  %v5212_v11 = vld [vmem:[%s16502_s15 + $0x2e8] sm:$0xf]  ;;  %v5214_v12 = vld [vmem:[%s16502_s15 + $0x2cc] sm:$0xf] }
 0x20d   :  { %v5216_v13 = vld [vmem:[%s16502_s15 + $0x2ec] sm:$0xf]  ;;  %5213 = vst [vmem:[#allocation4 + $0x2d4] sm:$0xf] %v5212_v11  ;;  %5215 = vst [vmem:[#allocation4 + $0x2d8] sm:$0xf] %v5214_v12 }
 0x20e   :  { %5217 = vst [vmem:[#allocation4 + $0x2dc] sm:$0xf] %v5216_v13  ;;  %v5218_v14 = vld [vmem:[%s16502_s15 + $0x2d0] sm:$0xf]  ;;  %v5222_v16 = vld [vmem:[%s16502_s15 + $0x2d4] sm:$0xf] }
 0x20f   :  { %v5220_v15 = vld [vmem:[%s16502_s15 + $0x2f0] sm:$0xf]  ;;  %5219 = vst [vmem:[#allocation4 + $0x2e0] sm:$0xf] %v5218_v14  ;;  %5223 = vst [vmem:[#allocation4 + $0x2e8] sm:$0xf] %v5222_v16 }
 0x210   :  { %5221 = vst [vmem:[#allocation4 + $0x2e4] sm:$0xf] %v5220_v15  ;;  %v5224_v17 = vld [vmem:[%s16502_s15 + $0x2f4] sm:$0xf]  ;;  %v5226_v18 = vld [vmem:[%s16502_s15 + $0x2d8] sm:$0xf] }
 0x211   :  { %v5228_v19 = vld [vmem:[%s16502_s15 + $0x2f8] sm:$0xf]  ;;  %5225 = vst [vmem:[#allocation4 + $0x2ec] sm:$0xf] %v5224_v17  ;;  %5227 = vst [vmem:[#allocation4 + $0x2f0] sm:$0xf] %v5226_v18 }
 0x212   :  { %5229 = vst [vmem:[#allocation4 + $0x2f4] sm:$0xf] %v5228_v19  ;;  %v5230_v20 = vld [vmem:[%s16502_s15 + $0x2dc] sm:$0xf]  ;;  %v5236_v22 = vld [vmem:[%s16502_s15 + $0x320] sm:$0xf] }
 0x213   :  { %5231 = vst [vmem:[#allocation4 + $0x2f8] sm:$0xf] %v5230_v20  ;;  %5233 = vst [vmem:[#allocation4 + $0x2fc] sm:$0xff] %v5232_v21   ;;  %v5238_v23 = vld [vmem:[%s16502_s15 + $0x304] sm:$0xf]  ;;  %v5264_v36 = vld [vmem:[%s16502_s15 + $0x33c] sm:$0xff]  }
 0x214   :  { %5237 = vst [vmem:[#allocation4 + $0x304] sm:$0xf] %v5236_v22  ;;  %v5240_v24 = vld [vmem:[%s16502_s15 + $0x324] sm:$0xf]  ;;  %v5242_v25 = vld [vmem:[%s16502_s15 + $0x308] sm:$0xf] }
 0x215   :  { %5239 = vst [vmem:[#allocation4 + $0x308] sm:$0xf] %v5238_v23  ;;  %5241 = vst [vmem:[#allocation4 + $0x30c] sm:$0xf] %v5240_v24  ;;  %v5244_v26 = vld [vmem:[%s16502_s15 + $0x328] sm:$0xf] }
 0x216   :  { %5243 = vst [vmem:[#allocation4 + $0x310] sm:$0xf] %v5242_v25  ;;  %v5246_v27 = vld [vmem:[%s16502_s15 + $0x30c] sm:$0xf]  ;;  %5245 = vst [vmem:[#allocation4 + $0x314] sm:$0xf] %v5244_v26 }
 0x217   :  { %v5248_v28 = vld [vmem:[%s16502_s15 + $0x32c] sm:$0xf]  ;;  %5247 = vst [vmem:[#allocation4 + $0x318] sm:$0xf] %v5246_v27  ;;  %v5250_v29 = vld [vmem:[%s16502_s15 + $0x310] sm:$0xf] }
 0x218   :  { %5249 = vst [vmem:[#allocation4 + $0x31c] sm:$0xf] %v5248_v28  ;;  %v5252_v30 = vld [vmem:[%s16502_s15 + $0x330] sm:$0xf]  ;;  %v5254_v31 = vld [vmem:[%s16502_s15 + $0x314] sm:$0xf] }
 0x219   :  { %5251 = vst [vmem:[#allocation4 + $0x320] sm:$0xf] %v5250_v29  ;;  %5253 = vst [vmem:[#allocation4 + $0x324] sm:$0xf] %v5252_v30  ;;  %v5256_v32 = vld [vmem:[%s16502_s15 + $0x334] sm:$0xf] }
 0x21a   :  { %5255 = vst [vmem:[#allocation4 + $0x328] sm:$0xf] %v5254_v31  ;;  %v5258_v33 = vld [vmem:[%s16502_s15 + $0x318] sm:$0xf]  ;;  %5257 = vst [vmem:[#allocation4 + $0x32c] sm:$0xf] %v5256_v32 }
 0x21b   :  { %v5260_v34 = vld [vmem:[%s16502_s15 + $0x338] sm:$0xf]  ;;  %5259 = vst [vmem:[#allocation4 + $0x330] sm:$0xf] %v5258_v33  ;;  %v5262_v35 = vld [vmem:[%s16502_s15 + $0x31c] sm:$0xf] }
 0x21c   :  { %5261 = vst [vmem:[#allocation4 + $0x334] sm:$0xf] %v5260_v34  ;;  %v5268_v37 = vld [vmem:[%s16502_s15 + $0x360] sm:$0xf]  ;;  %5263 = vst [vmem:[#allocation4 + $0x338] sm:$0xf] %v5262_v35 }
 0x21d   :  { %5265 = vst [vmem:[#allocation4 + $0x33c] sm:$0xff] %v5264_v36   ;;  %5269 = vst [vmem:[#allocation4 + $0x344] sm:$0xf] %v5268_v37  ;;  %v5270_v38 = vld [vmem:[%s16502_s15 + $0x344] sm:$0xf]  ;;  %v5296_v51 = vld [vmem:[%s16502_s15 + $0x37c] sm:$0xff]  }
 0x21e   :  { %v5272_v39 = vld [vmem:[%s16502_s15 + $0x364] sm:$0xf]  ;;  %v5274_v40 = vld [vmem:[%s16502_s15 + $0x348] sm:$0xf]  ;;  %5271 = vst [vmem:[#allocation4 + $0x348] sm:$0xf] %v5270_v38 }
 0x21f   :  { %5273 = vst [vmem:[#allocation4 + $0x34c] sm:$0xf] %v5272_v39  ;;  %5275 = vst [vmem:[#allocation4 + $0x350] sm:$0xf] %v5274_v40  ;;  %v5276_v41 = vld [vmem:[%s16502_s15 + $0x368] sm:$0xf] }
 0x220   :  { %v5278_v42 = vld [vmem:[%s16502_s15 + $0x34c] sm:$0xf]  ;;  %5277 = vst [vmem:[#allocation4 + $0x354] sm:$0xf] %v5276_v41  ;;  %v5282_v44 = vld [vmem:[%s16502_s15 + $0x350] sm:$0xf] }
 0x221   :  { %v5280_v43 = vld [vmem:[%s16502_s15 + $0x36c] sm:$0xf]  ;;  %5279 = vst [vmem:[#allocation4 + $0x358] sm:$0xf] %v5278_v42  ;;  %v5284_v45 = vld [vmem:[%s16502_s15 + $0x370] sm:$0xf] }
 0x222   :  { %5281 = vst [vmem:[#allocation4 + $0x35c] sm:$0xf] %v5280_v43  ;;  %v5286_v46 = vld [vmem:[%s16502_s15 + $0x354] sm:$0xf]  ;;  %5283 = vst [vmem:[#allocation4 + $0x360] sm:$0xf] %v5282_v44 }
 0x223   :  { %5285 = vst [vmem:[#allocation4 + $0x364] sm:$0xf] %v5284_v45  ;;  %5287 = vst [vmem:[#allocation4 + $0x368] sm:$0xf] %v5286_v46  ;;  %v5288_v47 = vld [vmem:[%s16502_s15 + $0x374] sm:$0xf] }
 0x224   :  { %v5290_v48 = vld [vmem:[%s16502_s15 + $0x358] sm:$0xf]  ;;  %5289 = vst [vmem:[#allocation4 + $0x36c] sm:$0xf] %v5288_v47  ;;  %v5294_v50 = vld [vmem:[%s16502_s15 + $0x35c] sm:$0xf] }
 0x225   :  { %v5292_v49 = vld [vmem:[%s16502_s15 + $0x378] sm:$0xf]  ;;  %5291 = vst [vmem:[#allocation4 + $0x370] sm:$0xf] %v5290_v48  ;;  %v5300_v52 = vld [vmem:[%s16502_s15 + $0x3a0] sm:$0xf] }
 0x226   :  { %5293 = vst [vmem:[#allocation4 + $0x374] sm:$0xf] %v5292_v49  ;;  %5295 = vst [vmem:[#allocation4 + $0x378] sm:$0xf] %v5294_v50  ;;  %v5302_v53 = vld [vmem:[%s16502_s15 + $0x384] sm:$0xf] }
 0x227   :  { %5297 = vst [vmem:[#allocation4 + $0x37c] sm:$0xff] %v5296_v51   ;;  %5301 = vst [vmem:[#allocation4 + $0x384] sm:$0xf] %v5300_v52  ;;  %v5304_v54 = vld [vmem:[%s16502_s15 + $0x3a4] sm:$0xf]  ;;  %v5328_v2 = vld [vmem:[%s16502_s15 + $0x3bc] sm:$0xff]  }
 0x228   :  { %v5306_v55 = vld [vmem:[%s16502_s15 + $0x388] sm:$0xf]  ;;  %5303 = vst [vmem:[#allocation4 + $0x388] sm:$0xf] %v5302_v53  ;;  %5305 = vst [vmem:[#allocation4 + $0x38c] sm:$0xf] %v5304_v54 }
 0x229   :  { %5307 = vst [vmem:[#allocation4 + $0x390] sm:$0xf] %v5306_v55  ;;  %v5308_v56 = vld [vmem:[%s16502_s15 + $0x3a8] sm:$0xf]  ;;  %v5310_v57 = vld [vmem:[%s16502_s15 + $0x38c] sm:$0xf] }
 0x22a   :  { %v5312_v58 = vld [vmem:[%s16502_s15 + $0x3ac] sm:$0xf]  ;;  %5309 = vst [vmem:[#allocation4 + $0x394] sm:$0xf] %v5308_v56  ;;  %5311 = vst [vmem:[#allocation4 + $0x398] sm:$0xf] %v5310_v57 }
 0x22b   :  { %5313 = vst [vmem:[#allocation4 + $0x39c] sm:$0xf] %v5312_v58  ;;  %v5314_v59 = vld [vmem:[%s16502_s15 + $0x390] sm:$0xf]  ;;  %v5318_v61 = vld [vmem:[%s16502_s15 + $0x394] sm:$0xf] }
 0x22c   :  { %v5316_v60 = vld [vmem:[%s16502_s15 + $0x3b0] sm:$0xf]  ;;  %5315 = vst [vmem:[#allocation4 + $0x3a0] sm:$0xf] %v5314_v59  ;;  %5319 = vst [vmem:[#allocation4 + $0x3a8] sm:$0xf] %v5318_v61 }
 0x22d   :  { %5317 = vst [vmem:[#allocation4 + $0x3a4] sm:$0xf] %v5316_v60  ;;  %v5320_v62 = vld [vmem:[%s16502_s15 + $0x3b4] sm:$0xf]  ;;  %v5322_v63 = vld [vmem:[%s16502_s15 + $0x398] sm:$0xf] }
 0x22e   :  { %v5324_v0 = vld [vmem:[%s16502_s15 + $0x3b8] sm:$0xf]  ;;  %5321 = vst [vmem:[#allocation4 + $0x3ac] sm:$0xf] %v5320_v62  ;;  %5323 = vst [vmem:[#allocation4 + $0x3b0] sm:$0xf] %v5322_v63 }
 0x22f   :  { %5325 = vst [vmem:[#allocation4 + $0x3b4] sm:$0xf] %v5324_v0  ;;  %v5326_v1 = vld [vmem:[%s16502_s15 + $0x39c] sm:$0xf]  ;;  %v5332_v3 = vld [vmem:[%s16502_s15 + $0x3e0] sm:$0xf] }
 0x230   :  { %5327 = vst [vmem:[#allocation4 + $0x3b8] sm:$0xf] %v5326_v1  ;;  %5329 = vst [vmem:[#allocation4 + $0x3bc] sm:$0xff] %v5328_v2   ;;  %v5334_v4 = vld [vmem:[%s16502_s15 + $0x3c4] sm:$0xf] }
 0x231   :  { %5333 = vst [vmem:[#allocation4 + $0x3c4] sm:$0xf] %v5332_v3  ;;  %v5336_v5 = vld [vmem:[%s16502_s15 + $0x3e4] sm:$0xf]  ;;  %v5338_v6 = vld [vmem:[%s16502_s15 + $0x3c8] sm:$0xf] }
 0x232   :  { %5335 = vst [vmem:[#allocation4 + $0x3c8] sm:$0xf] %v5334_v4  ;;  %5337 = vst [vmem:[#allocation4 + $0x3cc] sm:$0xf] %v5336_v5  ;;  %v5340_v7 = vld [vmem:[%s16502_s15 + $0x3e8] sm:$0xf] }
 0x233   :  { %5339 = vst [vmem:[#allocation4 + $0x3d0] sm:$0xf] %v5338_v6  ;;  %v5342_v8 = vld [vmem:[%s16502_s15 + $0x3cc] sm:$0xf]  ;;  %5341 = vst [vmem:[#allocation4 + $0x3d4] sm:$0xf] %v5340_v7 }
 0x234   :  { %v5344_v9 = vld [vmem:[%s16502_s15 + $0x3ec] sm:$0xf]  ;;  %5343 = vst [vmem:[#allocation4 + $0x3d8] sm:$0xf] %v5342_v8  ;;  %v5346_v10 = vld [vmem:[%s16502_s15 + $0x3d0] sm:$0xf] }
 0x235   :  { %5345 = vst [vmem:[#allocation4 + $0x3dc] sm:$0xf] %v5344_v9  ;;  %v5348_v11 = vld [vmem:[%s16502_s15 + $0x3f0] sm:$0xf]  ;;  %v5350_v12 = vld [vmem:[%s16502_s15 + $0x3d4] sm:$0xf] }
 0x236   :  { %5347 = vst [vmem:[#allocation4 + $0x3e0] sm:$0xf] %v5346_v10  ;;  %5349 = vst [vmem:[#allocation4 + $0x3e4] sm:$0xf] %v5348_v11  ;;  %v5352_v13 = vld [vmem:[%s16502_s15 + $0x3f4] sm:$0xf] }
 0x237   :  { %5351 = vst [vmem:[#allocation4 + $0x3e8] sm:$0xf] %v5350_v12  ;;  %v5354_v14 = vld [vmem:[%s16502_s15 + $0x3d8] sm:$0xf]  ;;  %5353 = vst [vmem:[#allocation4 + $0x3ec] sm:$0xf] %v5352_v13 }
 0x238   :  { %v5356_v15 = vld [vmem:[%s16502_s15 + $0x3f8] sm:$0xf]  ;;  %5355 = vst [vmem:[#allocation4 + $0x3f0] sm:$0xf] %v5354_v14  ;;  %v5358_v16 = vld [vmem:[%s16502_s15 + $0x3dc] sm:$0xf] }
 0x239   :  { %5357 = vst [vmem:[#allocation4 + $0x3f4] sm:$0xf] %v5356_v15  ;;  %v5360_v17 = vld [vmem:[%s16502_s15 + $0x3fc] sm:$0xf]  ;;  %5359 = vst [vmem:[#allocation4 + $0x3f8] sm:$0xf] %v5358_v16 }
 0x23a   :  { %5361 = vst [vmem:[#allocation4 + $0x3fc] sm:$0xf] %v5360_v17 }
 0x23b   :  { %5904 = vsyncadd [#allocation6 + $0x2], 16384  ;;  %v14537_v18 = vld [vmem:[%s16503_s16] sm:$0xff]  ;;  %v14542_v19 = vld [vmem:[%s16503_s16 + $0x8] sm:$0xff] }
 0x23c   :  { %16538 = vst [vmem:[#allocation21_spill] sm:$0xff] %v14537_v18  ;;  %16539 = vst [vmem:[#allocation22_spill] sm:$0xff] %v14542_v19  ;;  %v14547_v20 = vld [vmem:[%s16503_s16 + $0x10] sm:$0xff]  ;;  %v14552_v21 = vld [vmem:[%s16503_s16 + $0x18] sm:$0xff] }
 0x23d   :  { %16540 = vst [vmem:[#allocation23_spill] sm:$0xff] %v14547_v20  ;;  %16541 = vst [vmem:[#allocation24_spill] sm:$0xff] %v14552_v21  ;;  %v14557_v22 = vld [vmem:[%s16503_s16 + $0x20] sm:$0xff]  ;;  %v14562_v23 = vld [vmem:[%s16503_s16 + $0x28] sm:$0xff] }
 0x23e   :  { %16542 = vst [vmem:[#allocation25_spill] sm:$0xff] %v14557_v22  ;;  %16543 = vst [vmem:[#allocation26_spill] sm:$0xff] %v14562_v23  ;;  %v14567_v24 = vld [vmem:[%s16503_s16 + $0x30] sm:$0xff]  ;;  %v14572_v25 = vld [vmem:[%s16503_s16 + $0x38] sm:$0xff] }
 0x23f   :  { %16544 = vst [vmem:[#allocation27_spill] sm:$0xff] %v14567_v24  ;;  %16545 = vst [vmem:[#allocation28_spill] sm:$0xff] %v14572_v25  ;;  %v14577_v26 = vld [vmem:[%s16503_s16 + $0x40] sm:$0xff]  ;;  %v14582_v27 = vld [vmem:[%s16503_s16 + $0x48] sm:$0xff] }
 0x240   :  { %16546 = vst [vmem:[#allocation29_spill] sm:$0xff] %v14577_v26  ;;  %16547 = vst [vmem:[#allocation30_spill] sm:$0xff] %v14582_v27  ;;  %v14587_v28 = vld [vmem:[%s16503_s16 + $0x50] sm:$0xff]  ;;  %v14592_v29 = vld [vmem:[%s16503_s16 + $0x58] sm:$0xff] }
 0x241   :  { %16548 = vst [vmem:[#allocation31_spill] sm:$0xff] %v14587_v28  ;;  %16549 = vst [vmem:[#allocation32_spill] sm:$0xff] %v14592_v29  ;;  %v14597_v30 = vld [vmem:[%s16503_s16 + $0x60] sm:$0xff]  ;;  %v14602_v31 = vld [vmem:[%s16503_s16 + $0x68] sm:$0xff] }
 0x242   :  { %16550 = vst [vmem:[#allocation33_spill] sm:$0xff] %v14597_v30  ;;  %16551 = vst [vmem:[#allocation34_spill] sm:$0xff] %v14602_v31  ;;  %v14607_v32 = vld [vmem:[%s16503_s16 + $0x70] sm:$0xff]  ;;  %v14612_v33 = vld [vmem:[%s16503_s16 + $0x78] sm:$0xff] }
 0x243   :  { %16552 = vst [vmem:[#allocation35_spill] sm:$0xff] %v14607_v32  ;;  %16553 = vst [vmem:[#allocation36_spill] sm:$0xff] %v14612_v33  ;;  %v14617_v34 = vld [vmem:[%s16503_s16 + $0x80] sm:$0xff]  ;;  %v14622_v35 = vld [vmem:[%s16503_s16 + $0x88] sm:$0xff] }
 0x244   :  { %16554 = vst [vmem:[#allocation37_spill] sm:$0xff] %v14617_v34  ;;  %16555 = vst [vmem:[#allocation38_spill] sm:$0xff] %v14622_v35  ;;  %v14627_v36 = vld [vmem:[%s16503_s16 + $0x90] sm:$0xff]  ;;  %v14632_v37 = vld [vmem:[%s16503_s16 + $0x98] sm:$0xff] }
 0x245   :  { %16556 = vst [vmem:[#allocation39_spill] sm:$0xff] %v14627_v36  ;;  %16557 = vst [vmem:[#allocation40_spill] sm:$0xff] %v14632_v37  ;;  %v14637_v38 = vld [vmem:[%s16503_s16 + $0xa0] sm:$0xff]  ;;  %v14642_v39 = vld [vmem:[%s16503_s16 + $0xa8] sm:$0xff] }
 0x246   :  { %16558 = vst [vmem:[#allocation41_spill] sm:$0xff] %v14637_v38  ;;  %16559 = vst [vmem:[#allocation42_spill] sm:$0xff] %v14642_v39  ;;  %v14647_v40 = vld [vmem:[%s16503_s16 + $0xb0] sm:$0xff]  ;;  %v14652_v41 = vld [vmem:[%s16503_s16 + $0xb8] sm:$0xff] }
 0x247   :  { %16560 = vst [vmem:[#allocation43_spill] sm:$0xff] %v14647_v40  ;;  %16561 = vst [vmem:[#allocation44_spill] sm:$0xff] %v14652_v41  ;;  %v14657_v42 = vld [vmem:[%s16503_s16 + $0xc0] sm:$0xff]  ;;  %v14662_v43 = vld [vmem:[%s16503_s16 + $0xc8] sm:$0xff] }
 0x248   :  { %16562 = vst [vmem:[#allocation45_spill] sm:$0xff] %v14657_v42  ;;  %16563 = vst [vmem:[#allocation46_spill] sm:$0xff] %v14662_v43  ;;  %v14667_v44 = vld [vmem:[%s16503_s16 + $0xd0] sm:$0xff]  ;;  %v14672_v45 = vld [vmem:[%s16503_s16 + $0xd8] sm:$0xff] }
 0x249   :  { %16564 = vst [vmem:[#allocation47_spill] sm:$0xff] %v14667_v44  ;;  %16565 = vst [vmem:[#allocation48_spill] sm:$0xff] %v14672_v45  ;;  %v14677_v46 = vld [vmem:[%s16503_s16 + $0xe0] sm:$0xff]  ;;  %v14682_v47 = vld [vmem:[%s16503_s16 + $0xe8] sm:$0xff] }
 0x24a   :  { %16566 = vst [vmem:[#allocation49_spill] sm:$0xff] %v14677_v46  ;;  %16567 = vst [vmem:[#allocation50_spill] sm:$0xff] %v14682_v47  ;;  %v14687_v48 = vld [vmem:[%s16503_s16 + $0xf0] sm:$0xff]  ;;  %v14692_v49 = vld [vmem:[%s16503_s16 + $0xf8] sm:$0xff] }
 0x24b   :  { %16568 = vst [vmem:[#allocation51_spill] sm:$0xff] %v14687_v48  ;;  %16569 = vst [vmem:[#allocation52_spill] sm:$0xff] %v14692_v49  ;;  %v14697_v50 = vld [vmem:[%s16503_s16 + $0x100] sm:$0xff]  ;;  %v14702_v51 = vld [vmem:[%s16503_s16 + $0x108] sm:$0xff] }
 0x24c   :  { %16570 = vst [vmem:[#allocation53_spill] sm:$0xff] %v14697_v50  ;;  %16571 = vst [vmem:[#allocation54_spill] sm:$0xff] %v14702_v51  ;;  %v14707_v52 = vld [vmem:[%s16503_s16 + $0x110] sm:$0xff]  ;;  %v14712_v53 = vld [vmem:[%s16503_s16 + $0x118] sm:$0xff] }
 0x24d   :  { %16572 = vst [vmem:[#allocation55_spill] sm:$0xff] %v14707_v52  ;;  %16573 = vst [vmem:[#allocation56_spill] sm:$0xff] %v14712_v53  ;;  %v14717_v54 = vld [vmem:[%s16503_s16 + $0x120] sm:$0xff]  ;;  %v14722_v55 = vld [vmem:[%s16503_s16 + $0x128] sm:$0xff] }
 0x24e   :  { %16574 = vst [vmem:[#allocation57_spill] sm:$0xff] %v14717_v54  ;;  %16575 = vst [vmem:[#allocation58_spill] sm:$0xff] %v14722_v55  ;;  %v14727_v56 = vld [vmem:[%s16503_s16 + $0x130] sm:$0xff]  ;;  %v14732_v57 = vld [vmem:[%s16503_s16 + $0x138] sm:$0xff] }
 0x24f   :  { %16576 = vst [vmem:[#allocation59_spill] sm:$0xff] %v14727_v56  ;;  %16577 = vst [vmem:[#allocation60_spill] sm:$0xff] %v14732_v57  ;;  %v14737_v58 = vld [vmem:[%s16503_s16 + $0x140] sm:$0xff]  ;;  %v14742_v59 = vld [vmem:[%s16503_s16 + $0x148] sm:$0xff] }
 0x250   :  { %16578 = vst [vmem:[#allocation61_spill] sm:$0xff] %v14737_v58  ;;  %16579 = vst [vmem:[#allocation62_spill] sm:$0xff] %v14742_v59  ;;  %v14747_v60 = vld [vmem:[%s16503_s16 + $0x150] sm:$0xff]  ;;  %v14752_v61 = vld [vmem:[%s16503_s16 + $0x158] sm:$0xff] }
 0x251   :  { %16580 = vst [vmem:[#allocation63_spill] sm:$0xff] %v14747_v60  ;;  %16581 = vst [vmem:[#allocation64_spill] sm:$0xff] %v14752_v61  ;;  %v14757_v62 = vld [vmem:[%s16503_s16 + $0x160] sm:$0xff]  ;;  %v14762_v63 = vld [vmem:[%s16503_s16 + $0x168] sm:$0xff] }
 0x252   :  { %16582 = vst [vmem:[#allocation65_spill] sm:$0xff] %v14757_v62  ;;  %16583 = vst [vmem:[#allocation66_spill] sm:$0xff] %v14762_v63  ;;  %v14767_v0 = vld [vmem:[%s16503_s16 + $0x170] sm:$0xff]  ;;  %v14772_v1 = vld [vmem:[%s16503_s16 + $0x178] sm:$0xff] }
 0x253   :  { %16584 = vst [vmem:[#allocation67_spill] sm:$0xff] %v14767_v0  ;;  %16585 = vst [vmem:[#allocation68_spill] sm:$0xff] %v14772_v1  ;;  %v14777_v2 = vld [vmem:[%s16503_s16 + $0x180] sm:$0xff]  ;;  %v14782_v3 = vld [vmem:[%s16503_s16 + $0x188] sm:$0xff] }
 0x254   :  { %16586 = vst [vmem:[#allocation69_spill] sm:$0xff] %v14777_v2  ;;  %16587 = vst [vmem:[#allocation70_spill] sm:$0xff] %v14782_v3  ;;  %v14787_v4 = vld [vmem:[%s16503_s16 + $0x190] sm:$0xff]  ;;  %v14792_v5 = vld [vmem:[%s16503_s16 + $0x198] sm:$0xff] }
 0x255   :  { %16588 = vst [vmem:[#allocation71_spill] sm:$0xff] %v14787_v4  ;;  %16589 = vst [vmem:[#allocation72_spill] sm:$0xff] %v14792_v5  ;;  %v14797_v6 = vld [vmem:[%s16503_s16 + $0x1a0] sm:$0xff]  ;;  %v14802_v7 = vld [vmem:[%s16503_s16 + $0x1a8] sm:$0xff] }
 0x256   :  { %16590 = vst [vmem:[#allocation73_spill] sm:$0xff] %v14797_v6  ;;  %16591 = vst [vmem:[#allocation74_spill] sm:$0xff] %v14802_v7  ;;  %v14807_v8 = vld [vmem:[%s16503_s16 + $0x1b0] sm:$0xff]  ;;  %v14812_v9 = vld [vmem:[%s16503_s16 + $0x1b8] sm:$0xff] }
 0x257   :  { %16592 = vst [vmem:[#allocation75_spill] sm:$0xff] %v14807_v8  ;;  %16593 = vst [vmem:[#allocation76_spill] sm:$0xff] %v14812_v9  ;;  %v14817_v10 = vld [vmem:[%s16503_s16 + $0x1c0] sm:$0xff]  ;;  %v14822_v11 = vld [vmem:[%s16503_s16 + $0x1c8] sm:$0xff] }
 0x258   :  { %16594 = vst [vmem:[#allocation77_spill] sm:$0xff] %v14817_v10  ;;  %16595 = vst [vmem:[#allocation78_spill] sm:$0xff] %v14822_v11  ;;  %v14827_v12 = vld [vmem:[%s16503_s16 + $0x1d0] sm:$0xff]  ;;  %v14832_v13 = vld [vmem:[%s16503_s16 + $0x1d8] sm:$0xff] }
 0x259   :  { %16596 = vst [vmem:[#allocation79_spill] sm:$0xff] %v14827_v12  ;;  %16597 = vst [vmem:[#allocation80_spill] sm:$0xff] %v14832_v13  ;;  %v14837_v14 = vld [vmem:[%s16503_s16 + $0x1e0] sm:$0xff]  ;;  %v14842_v15 = vld [vmem:[%s16503_s16 + $0x1e8] sm:$0xff] }
 0x25a   :  { %16598 = vst [vmem:[#allocation81_spill] sm:$0xff] %v14837_v14  ;;  %16599 = vst [vmem:[#allocation82_spill] sm:$0xff] %v14842_v15  ;;  %v14847_v16 = vld [vmem:[%s16503_s16 + $0x1f0] sm:$0xff]  ;;  %v14852_v17 = vld [vmem:[%s16503_s16 + $0x1f8] sm:$0xff] }
 0x25b   :  { %16600 = vst [vmem:[#allocation83_spill] sm:$0xff] %v14847_v16  ;;  %16601 = vst [vmem:[#allocation84_spill] sm:$0xff] %v14852_v17 }
 0x25c   :  { %6073 = vsyncadd [#allocation6 + $0x3], 8192  ;;  %s16602_s23 = sld [smem:[#allocation108_spill]]  ;;  %v16507_v57 = vmov 0   ;;  %s16603_s22 = sld [smem:[#allocation107_spill]]  ;;  %vm6232_vm0 = vcmask 785408  }
 0x25d   :  { %6271 = vmatprep.mubr.bf16.mxu0 %v16507_v57  ;;  %6324 = vmatprep.mubr.bf16.mxu1 %v16507_v57  ;;  %v16604_v51 = vmov 0  }
 0x262   :  { %v14857_v9 = vld [vmem:[%s16602_s23 + $0x4] ss:$16 sps:$4 sm:$0xff]   ;;  %v14864_v1 = vld [vmem:[%s16602_s23 + $0xc] ss:$16 sps:$4 sm:$0xff]   ;;  %v14869_v17 = vld [vmem:[%s16602_s23] ss:$16 sps:$4 sm:$0xff]  }
 0x263   :  { %v14874_v8 = vld [vmem:[%s16602_s23 + $0x8] ss:$16 sps:$4 sm:$0xff]   ;;  %6239 = vmatprep.subr.bf16.mxu0 %v14857_v9  ;;  %v14880_v57 = vld [vmem:[%s16602_s23 + $0x24] ss:$16 sps:$4 sm:$0xff]   ;;  %6292 = vmatprep.subr.bf16.mxu1 %v14864_v1  ;;  %v14887_v56 = vld [vmem:[%s16602_s23 + $0x2c] ss:$16 sps:$4 sm:$0xff]  }
 0x264   :  { %6240 = vmatpush1.bf16.msra.mxu0 %v14869_v17  ;;  %6293 = vmatpush1.bf16.msra.mxu1 %v14874_v8  ;;  %v14894_v16 = vld [vmem:[%s16602_s23 + $0x20] ss:$16 sps:$4 sm:$0xff]   ;;  %v14899_v0 = vld [vmem:[%s16602_s23 + $0x28] ss:$16 sps:$4 sm:$0xff]   ;;  %v14905_v7 = vld [vmem:[%s16602_s23 + $0x44] ss:$16 sps:$4 sm:$0xff]  }
 0x265   :  { %6241 = vmatprep.subr.bf16.mxu0 %v14880_v57  ;;  %6294 = vmatprep.subr.bf16.mxu1 %v14887_v56  ;;  %v14910_v55 = vld [vmem:[%s16602_s23 + $0x4c] ss:$16 sps:$4 sm:$0xff]   ;;  %v14915_v15 = vld [vmem:[%s16602_s23 + $0x40] ss:$16 sps:$4 sm:$0xff]   ;;  %v14921_v63 = vld [vmem:[%s16602_s23 + $0x48] ss:$16 sps:$4 sm:$0xff]  }
 0x266   :  { %v14928_v6 = vld [vmem:[%s16602_s23 + $0x64] ss:$16 sps:$4 sm:$0xff]   ;;  %v14934_v54 = vld [vmem:[%s16602_s23 + $0x6c] ss:$16 sps:$4 sm:$0xff]   ;;  %v14940_v14 = vld [vmem:[%s16602_s23 + $0x60] ss:$16 sps:$4 sm:$0xff]  }
 0x267   :  { %v14947_v62 = vld [vmem:[%s16602_s23 + $0x68] ss:$16 sps:$4 sm:$0xff]   ;;  %v14952_v5 = vld [vmem:[%s16602_s23 + $0x84] ss:$16 sps:$4 sm:$0xff]   ;;  %v14958_v53 = vld [vmem:[%s16602_s23 + $0x8c] ss:$16 sps:$4 sm:$0xff]  }
 0x268   :  { %6242 = vmatpush1.bf16.msra.mxu0 %v14894_v16  ;;  %6295 = vmatpush1.bf16.msra.mxu1 %v14899_v0  ;;  %v14963_v13 = vld [vmem:[%s16602_s23 + $0x80] ss:$16 sps:$4 sm:$0xff]   ;;  %v14969_v61 = vld [vmem:[%s16602_s23 + $0x88] ss:$16 sps:$4 sm:$0xff]   ;;  %v14976_v4 = vld [vmem:[%s16602_s23 + $0xa4] ss:$16 sps:$4 sm:$0xff]  }
 0x269   :  { %6243 = vmatprep.subr.bf16.mxu0 %v14905_v7  ;;  %6296 = vmatprep.subr.bf16.mxu1 %v14910_v55  ;;  %v14982_v52 = vld [vmem:[%s16602_s23 + $0xac] ss:$16 sps:$4 sm:$0xff]   ;;  %v14988_v12 = vld [vmem:[%s16602_s23 + $0xa0] ss:$16 sps:$4 sm:$0xff]   ;;  %v14995_v60 = vld [vmem:[%s16602_s23 + $0xa8] ss:$16 sps:$4 sm:$0xff]  }
 0x26a   :  { %v11765_v3 = vld [vmem:[%s16603_s22] sm:$0xff]   ;;  %v11766_v11 = vld [vmem:[%s16603_s22 + $0x8] sm:$0xff]  }
 0x26c   :  { %6244 = vmatpush1.bf16.msra.mxu0 %v14915_v15  ;;  %6297 = vmatpush1.bf16.msra.mxu1 %v14921_v63 }
 0x26d   :  { %6245 = vmatprep.subr.bf16.mxu0 %v14928_v6  ;;  %6298 = vmatprep.subr.bf16.mxu1 %v14934_v54 }
 0x270   :  { %6246 = vmatpush1.bf16.msra.mxu0 %v14940_v14  ;;  %6299 = vmatpush1.bf16.msra.mxu1 %v14947_v62 }
 0x271   :  { %6247 = vmatprep.subr.bf16.mxu0 %v14952_v5  ;;  %6300 = vmatprep.subr.bf16.mxu1 %v14958_v53 }
 0x274   :  { %6248 = vmatpush1.bf16.msra.mxu0 %v14963_v13  ;;  %6301 = vmatpush1.bf16.msra.mxu1 %v14969_v61 }
 0x275   :  { %6249 = vmatprep.subr.bf16.mxu0 %v14976_v4  ;;  %6302 = vmatprep.subr.bf16.mxu1 %v14982_v52 }
 0x278   :  { %6250 = vmatpush1.bf16.msra.mxu0 %v14988_v12  ;;  %6303 = vmatpush1.bf16.msra.mxu1 %v14995_v60 }
 0x279   :  { %6365 = vmatprep.subr.bf16.mxu0 %v14857_v9  ;;  %6418 = vmatprep.subr.bf16.mxu1 %v14864_v1 }
 0x27b   :  { %11507 = vmatmul.mubr.msk.bf16.vlgmr.msra.gmra.mrb[0].mxu0 %vm6232_vm0, %v11765_v3  ;;  %11509 = vmatmul.mubr.msk.bf16.vlgmr.msra.gmra.mrb[0].mxu1 %vm6232_vm0, %v11765_v3  ;;  %v11767_v3 = vld [vmem:[%s16603_s22 + $0x10] sm:$0xff]  }
 0x27c   :  { %6366 = vmatpush1.bf16.msra.mxu0 %v14869_v17  ;;  %6419 = vmatpush1.bf16.msra.mxu1 %v14874_v8 }
 0x27d   :  { %6367 = vmatprep.subr.bf16.mxu0 %v14880_v57  ;;  %6420 = vmatprep.subr.bf16.mxu1 %v14887_v56 }
 0x27e   :  { %6281 = vmatprep.mubr.bf16.mxu0 %v16604_v51  ;;  %6334 = vmatprep.mubr.bf16.mxu1 %v16604_v51 }
 0x280   :  { %6368 = vmatpush1.bf16.msra.mxu0 %v14894_v16  ;;  %6421 = vmatpush1.bf16.msra.mxu1 %v14899_v0 }
 0x281   :  { %6369 = vmatprep.subr.bf16.mxu0 %v14905_v7  ;;  %6422 = vmatprep.subr.bf16.mxu1 %v14910_v55 }
 0x283   :  { %11508 = vmatmul.mubr.msk.bf16.gmra.mrb[4].mxu0 %vm6232_vm0, %v11766_v11  ;;  %11510 = vmatmul.mubr.msk.bf16.gmra.mrb[4].mxu1 %vm6232_vm0, %v11766_v11  ;;  %v11768_v11 = vld [vmem:[%s16603_s22 + $0x18] sm:$0xff]  }
 0x284   :  { %6370 = vmatpush1.bf16.msra.mxu0 %v14915_v15  ;;  %6423 = vmatpush1.bf16.msra.mxu1 %v14921_v63 }
 0x285   :  { %6371 = vmatprep.subr.bf16.mxu0 %v14928_v6  ;;  %6424 = vmatprep.subr.bf16.mxu1 %v14934_v54 }
 0x286   :  { %6397 = vmatprep.mubr.bf16.mxu0 %v16604_v51  ;;  %6450 = vmatprep.mubr.bf16.mxu1 %v16604_v51 }
 0x288   :  { %6372 = vmatpush1.bf16.msra.mxu0 %v14940_v14  ;;  %6425 = vmatpush1.bf16.msra.mxu1 %v14947_v62 }
 0x289   :  { %6373 = vmatprep.subr.bf16.mxu0 %v14952_v5  ;;  %6426 = vmatprep.subr.bf16.mxu1 %v14958_v53 }
 0x28c   :  { %6374 = vmatpush1.bf16.msra.mxu0 %v14963_v13  ;;  %6427 = vmatpush1.bf16.msra.mxu1 %v14969_v61 }
 0x28d   :  { %6375 = vmatprep.subr.bf16.mxu0 %v14976_v4  ;;  %6428 = vmatprep.subr.bf16.mxu1 %v14982_v52 }
 0x290   :  { %6376 = vmatpush1.bf16.msra.mxu0 %v14988_v12  ;;  %6429 = vmatpush1.bf16.msra.mxu1 %v14995_v60 }
 0x291   :  { %6507 = vmatprep.subr.bf16.mxu0 %v14857_v9  ;;  %6560 = vmatprep.subr.bf16.mxu1 %v14864_v1 }
 0x293   :  { %11513 = vmatmul.mubr.msk.bf16.vlgmr.msra.gmra.mrb[8].mxu0 %vm6232_vm0, %v11767_v3  ;;  %11515 = vmatmul.mubr.msk.bf16.vlgmr.msra.gmra.mrb[8].mxu1 %vm6232_vm0, %v11767_v3  ;;  %v11769_v3 = vld [vmem:[%s16603_s22 + $0x20] sm:$0xff]  }
 0x294   :  { %6508 = vmatpush1.bf16.msra.mxu0 %v14869_v17  ;;  %6561 = vmatpush1.bf16.msra.mxu1 %v14874_v8 }
 0x295   :  { %6509 = vmatprep.subr.bf16.mxu0 %v14880_v57  ;;  %6562 = vmatprep.subr.bf16.mxu1 %v14887_v56 }
 0x296   :  { %6407 = vmatprep.mubr.bf16.mxu0 %v16604_v51  ;;  %6460 = vmatprep.mubr.bf16.mxu1 %v16604_v51 }
 0x298   :  { %6510 = vmatpush1.bf16.msra.mxu0 %v14894_v16  ;;  %6563 = vmatpush1.bf16.msra.mxu1 %v14899_v0 }
 0x299   :  { %6511 = vmatprep.subr.bf16.mxu0 %v14905_v7  ;;  %6564 = vmatprep.subr.bf16.mxu1 %v14910_v55 }
 0x29b   :  { %11514 = vmatmul.mubr.msk.bf16.gmra.mrb[12].mxu0 %vm6232_vm0, %v11768_v11  ;;  %11516 = vmatmul.mubr.msk.bf16.gmra.mrb[12].mxu1 %vm6232_vm0, %v11768_v11 }
 0x29c   :  { %6512 = vmatpush1.bf16.msra.mxu0 %v14915_v15  ;;  %6565 = vmatpush1.bf16.msra.mxu1 %v14921_v63 }
 0x29d   :  { %6513 = vmatprep.subr.bf16.mxu0 %v14928_v6  ;;  %6566 = vmatprep.subr.bf16.mxu1 %v14934_v54 }
 0x29e   :  { %6539 = vmatprep.mubr.bf16.mxu0 %v16604_v51  ;;  %6592 = vmatprep.mubr.bf16.mxu1 %v16604_v51 }
 0x2a0   :  { %6514 = vmatpush1.bf16.msra.mxu0 %v14940_v14  ;;  %6567 = vmatpush1.bf16.msra.mxu1 %v14947_v62 }
 0x2a1   :  { %6515 = vmatprep.subr.bf16.mxu0 %v14952_v5  ;;  %6568 = vmatprep.subr.bf16.mxu1 %v14958_v53 }
 0x2a4   :  { %6516 = vmatpush1.bf16.msra.mxu0 %v14963_v13  ;;  %6569 = vmatpush1.bf16.msra.mxu1 %v14969_v61 }
 0x2a5   :  { %6517 = vmatprep.subr.bf16.mxu0 %v14976_v4  ;;  %6570 = vmatprep.subr.bf16.mxu1 %v14982_v52 }
 0x2a8   :  { %6518 = vmatpush1.bf16.msra.mxu0 %v14988_v12  ;;  %6571 = vmatpush1.bf16.msra.mxu1 %v14995_v60 }
 0x2a9   :  { %6649 = vmatprep.subr.bf16.mxu0 %v14857_v9  ;;  %6702 = vmatprep.subr.bf16.mxu1 %v14864_v1  ;;  %v11770_v1 = vld [vmem:[%s16603_s22 + $0x28] sm:$0xff]  }
 0x2ab   :  { %11519 = vmatmul.mubr.msk.bf16.vlgmr.msra.gmra.mrb[16].mxu0 %vm6232_vm0, %v11769_v3  ;;  %11521 = vmatmul.mubr.msk.bf16.vlgmr.msra.gmra.mrb[16].mxu1 %vm6232_vm0, %v11769_v3 }
 0x2ac   :  { %6650 = vmatpush1.bf16.msra.mxu0 %v14869_v17  ;;  %6703 = vmatpush1.bf16.msra.mxu1 %v14874_v8 }
 0x2ad   :  { %6651 = vmatprep.subr.bf16.mxu0 %v14880_v57  ;;  %6704 = vmatprep.subr.bf16.mxu1 %v14887_v56 }
 0x2ae   :  { %6549 = vmatprep.mubr.bf16.mxu0 %v16604_v51  ;;  %6602 = vmatprep.mubr.bf16.mxu1 %v16604_v51 }
 0x2b0   :  { %6652 = vmatpush1.bf16.msra.mxu0 %v14894_v16  ;;  %6705 = vmatpush1.bf16.msra.mxu1 %v14899_v0 }
 0x2b1   :  { %6653 = vmatprep.subr.bf16.mxu0 %v14905_v7  ;;  %6706 = vmatprep.subr.bf16.mxu1 %v14910_v55 }
 0x2b3   :  { %11520 = vmatmul.mubr.msk.bf16.gmra.mrb[20].mxu0 %vm6232_vm0, %v11770_v1  ;;  %11522 = vmatmul.mubr.msk.bf16.gmra.mrb[20].mxu1 %vm6232_vm0, %v11770_v1 }
 0x2b4   :  { %6654 = vmatpush1.bf16.msra.mxu0 %v14915_v15  ;;  %6707 = vmatpush1.bf16.msra.mxu1 %v14921_v63 }
 0x2b5   :  { %6655 = vmatprep.subr.bf16.mxu0 %v14928_v6  ;;  %6708 = vmatprep.subr.bf16.mxu1 %v14934_v54  ;;  %v11771_v54 = vld [vmem:[%s16603_s22 + $0x30] sm:$0xff]  }
 0x2b6   :  { %6681 = vmatprep.mubr.bf16.mxu0 %v16604_v51  ;;  %6734 = vmatprep.mubr.bf16.mxu1 %v16604_v51 }
 0x2b8   :  { %6656 = vmatpush1.bf16.msra.mxu0 %v14940_v14  ;;  %6709 = vmatpush1.bf16.msra.mxu1 %v14947_v62 }
 0x2b9   :  { %6657 = vmatprep.subr.bf16.mxu0 %v14952_v5  ;;  %6710 = vmatprep.subr.bf16.mxu1 %v14958_v53 }
 0x2bc   :  { %6658 = vmatpush1.bf16.msra.mxu0 %v14963_v13  ;;  %6711 = vmatpush1.bf16.msra.mxu1 %v14969_v61 }
 0x2bd   :  { %6659 = vmatprep.subr.bf16.mxu0 %v14976_v4  ;;  %6712 = vmatprep.subr.bf16.mxu1 %v14982_v52  ;;  %v11772_v52 = vld [vmem:[%s16603_s22 + $0x38] sm:$0xff]  }
 0x2c0   :  { %6660 = vmatpush1.bf16.msra.mxu0 %v14988_v12  ;;  %6713 = vmatpush1.bf16.msra.mxu1 %v14995_v60 }
 0x2c3   :  { %11525 = vmatmul.mubr.msk.bf16.vlgmr.msra.gmra.mrb[24].mxu0 %vm6232_vm0, %v11771_v54  ;;  %11527 = vmatmul.mubr.msk.bf16.vlgmr.msra.gmra.mrb[24].mxu1 %vm6232_vm0, %v11771_v54 }
 0x2c4   :  { %6691 = vmatprep.mubr.bf16.mxu0 %v16604_v51  ;;  %6744 = vmatprep.mubr.bf16.mxu1 %v16604_v51 }
 0x2cb   :  { %11526 = vmatmul.mubr.msk.bf16.gmra.mrb[28].mxu0 %vm6232_vm0, %v11772_v52  ;;  %11528 = vmatmul.mubr.msk.bf16.gmra.mrb[28].mxu1 %vm6232_vm0, %v11772_v52 }
 0x34e   :  { %v6273_v53 = vpop.f32.mrb[0].mxu0  ;;  %v6326_v56 = vpop.f32.mrb[0].mxu1 }
 0x34f   :  { %v6275_v55 = vpop.f32.mrb[1].mxu0  ;;  %v6328_v60 = vpop.f32.mrb[1].mxu1 }
 0x350   :  { %v6277_v57 = vpop.f32.mrb[2].mxu0  ;;  %v6330_v62 = vpop.f32.mrb[2].mxu1 }
 0x351   :  { %v6279_v61 = vpop.f32.mrb[3].mxu0  ;;  %v6332_v63 = vpop.f32.mrb[3].mxu1 }
 0x356   :  { %v6283_v0 = vpop.f32.mrb[4].mxu0  ;;  %v6336_v5 = vpop.f32.mrb[4].mxu1 }
 0x357   :  { %v6285_v4 = vpop.f32.mrb[5].mxu0  ;;  %v6338_v6 = vpop.f32.mrb[5].mxu1 }
 0x358   :  { %v15126_v51 = vpop.f32.mrb[6].mxu0  ;;  %v15130_v8 = vpop.f32.mrb[6].mxu1 }
 0x359   :  { %v15128_v7 = vpop.f32.mrb[7].mxu0  ;;  %v15132_v9 = vpop.f32.mrb[7].mxu1 }
 0x366   :  { %v6399_v12 = vpop.f32.mrb[8].mxu0  ;;  %v6452_v14 = vpop.f32.mrb[8].mxu1 }
 0x367   :  { %v6471_v13 = vmax.f32 %v6273_v53, %v6399_v12  ;;  %v6401_v15 = vpop.f32.mrb[9].mxu0  ;;  %v6473_v16 = vmax.f32 %v6326_v56, %v6452_v14  ;;  %v6454_v11 = vpop.f32.mrb[9].mxu1 }
 0x368   :  { %v6472_v17 = vmax.f32 %v6275_v55, %v6401_v15  ;;  %v6403_v3 = vpop.f32.mrb[10].mxu0  ;;  %v6474_v1 = vmax.f32 %v6328_v60, %v6454_v11  ;;  %v6456_v52 = vpop.f32.mrb[10].mxu1 }
 0x369   :  { %v6475_v54 = vmax.f32 %v6277_v57, %v6403_v3  ;;  %v6405_v59 = vpop.f32.mrb[11].mxu0  ;;  %v6477_v2 = vmax.f32 %v6330_v62, %v6456_v52  ;;  %v6458_v10 = vpop.f32.mrb[11].mxu1 }
 0x36a   :  { %v6476_v50 = vmax.f32 %v6279_v61, %v6405_v59  ;;  %v6478_v58 = vmax.f32 %v6332_v63, %v6458_v10 }
 0x36e   :  { %v6409_v41 = vpop.f32.mrb[12].mxu0  ;;  %v6462_v49 = vpop.f32.mrb[12].mxu1 }
 0x36f   :  { %v6479_v25 = vmax.f32 %v6283_v0, %v6409_v41  ;;  %v6411_v33 = vpop.f32.mrb[13].mxu0  ;;  %v6481_v40 = vmax.f32 %v6336_v5, %v6462_v49  ;;  %v6464_v12 = vpop.f32.mrb[13].mxu1 }
 0x370   :  { %v6480_v53 = vmax.f32 %v6285_v4, %v6411_v33  ;;  %v6413_v24 = vpop.f32.mrb[14].mxu0  ;;  %v6482_v56 = vmax.f32 %v6338_v6, %v6464_v12  ;;  %v6466_v14 = vpop.f32.mrb[14].mxu1 }
 0x371   :  { %v6483_v55 = vmax.f32 %v15126_v51, %v6413_v24  ;;  %v6415_v60 = vpop.f32.mrb[15].mxu0  ;;  %v6485_v57 = vmax.f32 %v15130_v8, %v6466_v14  ;;  %v6468_v59 = vpop.f32.mrb[15].mxu1 }
 0x372   :  { %v6484_v62 = vmax.f32 %v15128_v7, %v6415_v60  ;;  %v6486_v10 = vmax.f32 %v15132_v9, %v6468_v59 }
 0x37e   :  { %v6541_v61 = vpop.f32.mrb[16].mxu0  ;;  %v6594_v63 = vpop.f32.mrb[16].mxu1 }
 0x37f   :  { %v6613_v41 = vmax.f32 %v6471_v13, %v6541_v61  ;;  %v6543_v0 = vpop.f32.mrb[17].mxu0  ;;  %v6615_v49 = vmax.f32 %v6473_v16, %v6594_v63  ;;  %v6596_v4 = vpop.f32.mrb[17].mxu1 }
 0x380   :  { %v6614_v33 = vmax.f32 %v6472_v17, %v6543_v0  ;;  %v6545_v5 = vpop.f32.mrb[18].mxu0  ;;  %v6616_v6 = vmax.f32 %v6474_v1, %v6596_v4  ;;  %v6598_v24 = vpop.f32.mrb[18].mxu1 }
 0x381   :  { %v6617_v15 = vmax.f32 %v6475_v54, %v6545_v5  ;;  %v6547_v51 = vpop.f32.mrb[19].mxu0  ;;  %v6619_v11 = vmax.f32 %v6477_v2, %v6598_v24  ;;  %v6600_v8 = vpop.f32.mrb[19].mxu1 }
 0x382   :  { %v6618_v3 = vmax.f32 %v6476_v50, %v6547_v51  ;;  %v6620_v52 = vmax.f32 %v6478_v58, %v6600_v8  ;;  %v6773_v50 = vlaneseq }
 0x386   :  { %v6551_v7 = vpop.f32.mrb[20].mxu0  ;;  %v6604_v9 = vpop.f32.mrb[20].mxu1 }
 0x387   :  { %v15138_v12 = vmax.f32 %v6479_v25, %v6551_v7  ;;  %v6553_v14 = vpop.f32.mrb[21].mxu0  ;;  %v15140_v13 = vmax.f32 %v6481_v40, %v6604_v9  ;;  %v6606_v16 = vpop.f32.mrb[21].mxu1  ;;  %v15154_v40 = vshrl.u32 %v6773_v50, 7 }
 0x388   :  { %v15142_v60 = vmax.f32 %v6480_v53, %v6553_v14  ;;  %v6555_v17 = vpop.f32.mrb[22].mxu0  ;;  %v15144_v59 = vmax.f32 %v6482_v56, %v6606_v16  ;;  %v6608_v54 = vpop.f32.mrb[22].mxu1  ;;  %v6771_v56 = vld [vmem:[%s16489_s2] sm:$0xf] }
 0x389   :  { %v15146_v1 = vmax.f32 %v6483_v55, %v6555_v17  ;;  %v6557_v2 = vpop.f32.mrb[23].mxu0  ;;  %v15148_v61 = vmax.f32 %v6485_v57, %v6608_v54  ;;  %v6610_v25 = vpop.f32.mrb[23].mxu1  ;;  %16605 = vst [vmem:[#allocation85_spill] sm:$0xff] %v15154_v40  ;;  %v15157_v53 = vsub.s32 0, %v15154_v40  ;;  %v15163_v55 = vsub.s32 2, %v15154_v40 }
 0x38a   :  { %v15150_v58 = vmax.f32 %v6484_v62, %v6557_v2  ;;  %v15152_v63 = vmax.f32 %v6486_v10, %v6610_v25  ;;  %v15166_v57 = vsub.s32 1, %v15154_v40  ;;  %v15169_v62 = vsub.s32 3, %v15154_v40 }
 0x38b   :  { %16606 = vst [vmem:[#allocation86_spill] sm:$0xff] %v15157_v53  ;;  %16607 = vst [vmem:[#allocation87_spill] sm:$0xff] %v15163_v55  ;;  %v15172_v10 = vrot.slane %v6771_v56, %v15157_v53  ;;  %v15175_v4 = vrot.slane %v6771_v56, %v15163_v55 }
 0x38c   :  { %16608 = vst [vmem:[#allocation88_spill] sm:$0xff] %v15166_v57  ;;  %16609 = vst [vmem:[#allocation89_spill] sm:$0xff] %v15169_v62  ;;  %v15178_v5 = vrot.slane %v6771_v56, %v15166_v57  ;;  %v15181_v7 = vrot.slane %v6771_v56, %v15169_v62 }
 0x396   :  { %v6683_v0 = vpop.f32.mrb[24].mxu0  ;;  %v6736_v51 = vpop.f32.mrb[24].mxu1 }
 0x397   :  { %v6755_v24 = vmax.f32 %v6613_v41, %v6683_v0  ;;  %v6685_v8 = vpop.f32.mrb[25].mxu0  ;;  %v6757_v9 = vmax.f32 %v6615_v49, %v6736_v51  ;;  %v6738_v16 = vpop.f32.mrb[25].mxu1 }
 0x398   :  { %v6756_v14 = vmax.f32 %v6614_v33, %v6685_v8  ;;  %v6687_v17 = vpop.f32.mrb[26].mxu0  ;;  %v6758_v2 = vmax.f32 %v6616_v6, %v6738_v16  ;;  %v6740_v25 = vpop.f32.mrb[26].mxu1 }
 0x399   :  { %v6793_v54 = vadd.f32 %v15172_v10, %v6755_v24  ;;  %v6759_v50 = vmax.f32 %v6617_v15, %v6687_v17  ;;  %v6689_v48 = vpop.f32.mrb[27].mxu0  ;;  %v6795_v32 = vadd.f32 %v15175_v4, %v6757_v9  ;;  %v6761_v41 = vmax.f32 %v6619_v11, %v6740_v25  ;;  %v6742_v23 = vpop.f32.mrb[27].mxu1 }
 0x39a   :  { %v6794_v39 = vadd.f32 %v15178_v5, %v6756_v14  ;;  %v6760_v0 = vmax.f32 %v6618_v3, %v6689_v48  ;;  %v6796_v49 = vadd.f32 %v15181_v7, %v6758_v2  ;;  %v6762_v56 = vmax.f32 %v6620_v52, %v6742_v23 }
 0x39b   :  { %v15186_v47 = vmax.f32 %v6793_v54, 0.0  ;;  %v6797_v33 = vadd.f32 %v15172_v10, %v6759_v50  ;;  %v15190_v51 = vmax.f32 %v6795_v32, 0.0  ;;  %v6799_v15 = vadd.f32 %v15175_v4, %v6761_v41 }
 0x39c   :  { %v15192_v6 = vmax.f32 %v6794_v39, 0.0  ;;  %v6798_v24 = vadd.f32 %v15178_v5, %v6760_v0  ;;  %v15198_v48 = vmax.f32 %v6796_v49, 0.0  ;;  %v6800_v8 = vadd.f32 %v15181_v7, %v6762_v56 }
 0x39d   :  { %v6861_v11 = vmul.f32 %v15186_v47, %v15186_v47  ;;  %v15200_v3 = vmax.f32 %v6797_v33, 0.0  ;;  %v6863_v23 = vmul.f32 %v15190_v51, %v15190_v51  ;;  %v15207_v39 = vmax.f32 %v6799_v15, 0.0 }
 0x39e   :  { %v6862_v32 = vmul.f32 %v15192_v6, %v15192_v6  ;;  %v15209_v52 = vmax.f32 %v6798_v24, 0.0  ;;  %v6693_v9 = vpop.f32.mrb[28].mxu0  ;;  %v6864_v14 = vmul.f32 %v15198_v48, %v15198_v48  ;;  %v15217_v54 = vmax.f32 %v6800_v8, 0.0  ;;  %v6746_v2 = vpop.f32.mrb[28].mxu1 }
 0x39f   :  { %v6825_v16 = vadd.f32 %v15200_v3, %v15186_v47  ;;  %v6865_v17 = vmul.f32 %v15200_v3, %v15200_v3  ;;  %v6695_v50 = vpop.f32.mrb[29].mxu0  ;;  %v6843_v25 = vadd.f32 %v15207_v39, %v15190_v51  ;;  %v6867_v41 = vmul.f32 %v15207_v39, %v15207_v39  ;;  %v6748_v33 = vpop.f32.mrb[29].mxu1 }
 0x3a0   :  { %v6834_v0 = vadd.f32 %v15209_v52, %v15192_v6  ;;  %v6866_v49 = vmul.f32 %v15209_v52, %v15209_v52  ;;  %v6697_v56 = vpop.f32.mrb[30].mxu0  ;;  %v6852_v24 = vadd.f32 %v15217_v54, %v15198_v48  ;;  %v6868_v8 = vmul.f32 %v15217_v54, %v15217_v54  ;;  %v6750_v38 = vpop.f32.mrb[30].mxu1 }
 0x3a1   :  { %v6877_v15 = vadd.f32 %v6865_v17, %v6861_v11  ;;  %v6763_v31 = vmax.f32 %v15138_v12, %v6693_v9  ;;  %v6699_v22 = vpop.f32.mrb[31].mxu0  ;;  %v6895_v46 = vadd.f32 %v6867_v41, %v6863_v23  ;;  %v6765_v37 = vmax.f32 %v15140_v13, %v6746_v2  ;;  %v6752_v45 = vpop.f32.mrb[31].mxu1 }
 0x3a2   :  { %v6886_v30 = vadd.f32 %v6866_v49, %v6862_v32  ;;  %v6764_v21 = vmax.f32 %v15142_v60, %v6695_v50  ;;  %v6904_v29 = vadd.f32 %v6868_v8, %v6864_v14  ;;  %v6766_v17 = vmax.f32 %v15144_v59, %v6748_v33 }
 0x3a3   :  { %v6801_v11 = vadd.f32 %v15172_v10, %v6763_v31  ;;  %v6767_v36 = vmax.f32 %v15146_v1, %v6697_v56  ;;  %v6803_v20 = vadd.f32 %v15175_v4, %v6765_v37  ;;  %v6769_v9 = vmax.f32 %v15148_v61, %v6750_v38 }
 0x3a4   :  { %v6802_v12 = vadd.f32 %v15178_v5, %v6764_v21  ;;  %v6768_v23 = vmax.f32 %v15150_v58, %v6699_v22  ;;  %v6804_v13 = vadd.f32 %v15181_v7, %v6766_v17  ;;  %v6770_v31 = vmax.f32 %v15152_v63, %v6752_v45 }
 0x3a5   :  { %v15241_v32 = vmax.f32 %v6801_v11, 0.0  ;;  %v6805_v60 = vadd.f32 %v15172_v10, %v6767_v36  ;;  %v15246_v14 = vmax.f32 %v6803_v20, 0.0  ;;  %v6807_v37 = vadd.f32 %v15175_v4, %v6769_v9 }
 0x3a6   :  { %v15248_v59 = vmax.f32 %v6802_v12, 0.0  ;;  %v6806_v21 = vadd.f32 %v15178_v5, %v6768_v23  ;;  %v15255_v1 = vmax.f32 %v6804_v13, 0.0  ;;  %v6808_v33 = vadd.f32 %v15181_v7, %v6770_v31 }
 0x3a7   :  { %v6826_v38 = vadd.f32 %v6825_v16, %v15241_v32  ;;  %v6869_v22 = vmul.f32 %v15241_v32, %v15241_v32  ;;  %v15257_v61 = vmax.f32 %v6805_v60, 0.0  ;;  %v6844_v36 = vadd.f32 %v6843_v25, %v15246_v14 }
 0x3a8   :  { %v6871_v20 = vmul.f32 %v15246_v14, %v15246_v14  ;;  %v6835_v45 = vadd.f32 %v6834_v0, %v15248_v59  ;;  %v6870_v58 = vmul.f32 %v15248_v59, %v15248_v59  ;;  %v6853_v10 = vadd.f32 %v6852_v24, %v15255_v1 }
 0x3a9   :  { %v6878_v63 = vadd.f32 %v6877_v15, %v6869_v22  ;;  %v6872_v4 = vmul.f32 %v15255_v1, %v15255_v1  ;;  %v6827_v5 = vadd.f32 %v6826_v38, %v15257_v61  ;;  %v6873_v50 = vmul.f32 %v15257_v61, %v15257_v61 }
 0x3aa   :  { %v6896_v16 = vadd.f32 %v6895_v46, %v6871_v20  ;;  %v6887_v2 = vadd.f32 %v6886_v30, %v6870_v58  ;;  %v15271_v25 = vmax.f32 %v6807_v37, 0.0  ;;  %v15273_v49 = vmax.f32 %v6806_v21, 0.0 }
 0x3ab   :  { %v6905_v41 = vadd.f32 %v6904_v29, %v6872_v4  ;;  %v6828_v0 = vrot.slane %v6827_v5, 4  ;;  %v6879_v56 = vadd.f32 %v6878_v63, %v6873_v50  ;;  %v15282_v11 = vmax.f32 %v6808_v33, 0.0 }
 0x3ac   :  { %v6845_v15 = vadd.f32 %v6844_v36, %v15271_v25  ;;  %v6875_v24 = vmul.f32 %v15271_v25, %v15271_v25  ;;  %v6836_v30 = vadd.f32 %v6835_v45, %v15273_v49  ;;  %v6874_v46 = vmul.f32 %v15273_v49, %v15273_v49 }
 0x3ad   :  { %v6829_v8 = vadd.f32 %v6828_v0, %v6827_v5  ;;  %v6880_v29 = vrot.slane %v6879_v56, 4  ;;  %v6854_v13 = vadd.f32 %v6853_v10, %v15282_v11  ;;  %v6876_v21 = vmul.f32 %v15282_v11, %v15282_v11 }
 0x3ae   :  { %v6846_v17 = vrot.slane %v6845_v15, 4  ;;  %v6897_v12 = vadd.f32 %v6896_v16, %v6875_v24  ;;  %v6837_v23 = vrot.slane %v6836_v30, 4  ;;  %v6888_v7 = vadd.f32 %v6887_v2, %v6874_v46 }
 0x3af   :  { %v6830_v9 = vrot.slane %v6829_v8, 2  ;;  %v6881_v60 = vadd.f32 %v6880_v29, %v6879_v56  ;;  %v6855_v20 = vrot.slane %v6854_v13, 4  ;;  %v6906_v4 = vadd.f32 %v6905_v41, %v6876_v21 }
 0x3b0   :  { %v6847_v31 = vadd.f32 %v6846_v17, %v6845_v15  ;;  %v6898_v37 = vrot.slane %v6897_v12, 4  ;;  %v6838_v22 = vadd.f32 %v6837_v23, %v6836_v30  ;;  %v6889_v36 = vrot.slane %v6888_v7, 4 }
 0x3b1   :  { %v6831_v38 = vadd.f32 %v6830_v9, %v6829_v8  ;;  %v6882_v45 = vrot.slane %v6881_v60, 2  ;;  %v6856_v2 = vadd.f32 %v6855_v20, %v6854_v13  ;;  %v6907_v56 = vrot.slane %v6906_v4, 4 }
 0x3b2   :  { %v6848_v58 = vrot.slane %v6847_v31, 2  ;;  %v6899_v63 = vadd.f32 %v6898_v37, %v6897_v12  ;;  %v6839_v16 = vrot.slane %v6838_v22, 2  ;;  %v6890_v50 = vadd.f32 %v6889_v36, %v6888_v7 }
 0x3b3   :  { %v6832_v5 = vrot.slane %v6831_v38, 1  ;;  %v6883_v0 = vadd.f32 %v6882_v45, %v6881_v60  ;;  %v6857_v46 = vrot.slane %v6856_v2, 2  ;;  %v6908_v17 = vadd.f32 %v6907_v56, %v6906_v4 }
 0x3b4   :  { %v6849_v10 = vadd.f32 %v6848_v58, %v6847_v31  ;;  %v6900_v33 = vrot.slane %v6899_v63, 2  ;;  %v6840_v15 = vadd.f32 %v6839_v16, %v6838_v22  ;;  %v6891_v24 = vrot.slane %v6890_v50, 2 }
 0x3b5   :  { %v6833_v29 = vadd.f32 %v6832_v5, %v6831_v38  ;;  %v6884_v8 = vrot.slane %v6883_v0, 1  ;;  %v6858_v12 = vadd.f32 %v6857_v46, %v6856_v2  ;;  %v6909_v37 = vrot.slane %v6908_v17, 2 }
 0x3b6   :  { %v6901_v30 = vadd.f32 %v6900_v33, %v6899_v63  ;;  %v6850_v9 = vrot.slane %v6849_v10, 1  ;;  %v6841_v23 = vrot.slane %v6840_v15, 1  ;;  %v6892_v44 = vadd.f32 %v6891_v24, %v6890_v50 }
 0x3b7   :  { %v6885_v41 = vadd.f32 %v6884_v8, %v6883_v0  ;;  %v6859_v60 = vrot.slane %v6858_v12, 1  ;;  %v6910_v31 = vadd.f32 %v6909_v37, %v6908_v17 }
 0x3b8   :  { %v6902_v21 = vrot.slane %v6901_v30, 1  ;;  %v6842_v7 = vadd.f32 %v6841_v23, %v6840_v15  ;;  %v6893_v13 = vrot.slane %v6892_v44, 1  ;;  %v6851_v36 = vadd.f32 %v6850_v9, %v6849_v10 }
 0x3b9   :  { %v6911_v45 = vrot.slane %v6910_v31, 1  ;;  %v6860_v5 = vadd.f32 %v6859_v60, %v6858_v12 }
 0x3ba   :  { %v6894_v20 = vadd.f32 %v6893_v13, %v6892_v44  ;;  %v6913_v22 = vadd.f32 %v6842_v7, %v6833_v29  ;;  %v6903_v58 = vadd.f32 %v6902_v21, %v6901_v30 }
 0x3bb   :  { %v6912_v4 = vadd.f32 %v6911_v45, %v6910_v31 }
 0x3bc   :  { %v6917_v38 = vadd.f32 %v6894_v20, %v6885_v41  ;;  %v6914_v63 = vadd.f32 %v6913_v22, %v6851_v36 }
 0x3be   :  { %v6915_v16 = vadd.f32 %v6914_v63, %v6860_v5  ;;  %v6918_v33 = vadd.f32 %v6917_v38, %v6903_v58 }
 0x3c0   :  { %v6916_v50 = vmul.f32 0.0078125, %v6915_v16  ;;  %v6919_v2 = vadd.f32 %v6918_v33, %v6912_v4 }
 0x3c2   :  { %v6920_v0 = vmul.f32 0.0078125, %v6919_v2  ;;  %v6921_v56 = vmul.f32 %v6916_v50, %v6916_v50  ;;  %v6928_v15 = vrot.slane %v6916_v50, %v15157_v53 }
 0x3c4   :  { %v6922_v24 = vsub.f32 %v6920_v0, %v6921_v56  ;;  %v6929_v46 = vsub.f32 %v15186_v47, %v6928_v15  ;;  %v6930_v44 = vsub.f32 %v15192_v6, %v6928_v15  ;;  %v6931_v10 = vsub.f32 %v15190_v51, %v6928_v15 }
 0x3c5   :  { %v6932_v29 = vsub.f32 %v15198_v48, %v6928_v15  ;;  %v6933_v8 = vsub.f32 %v15200_v3, %v6928_v15  ;;  %v6934_v30 = vsub.f32 %v15209_v52, %v6928_v15  ;;  %v6935_v17 = vsub.f32 %v15207_v39, %v6928_v15  ;;  %v6945_v52 = vld [vmem:[%s16490_s3] sm:$0xf] }
 0x3c6   :  { %v6923_v9 = vadd.f32 1e-05, %v6922_v24  ;;  %v6936_v23 = vsub.f32 %v15217_v54, %v6928_v15  ;;  %v6937_v12 = vsub.f32 %v15241_v32, %v6928_v15  ;;  %v6938_v41 = vsub.f32 %v15248_v59, %v6928_v15 }
 0x3c7   :  { %v6939_v47 = vsub.f32 %v15246_v14, %v6928_v15  ;;  %v6940_v6 = vsub.f32 %v15255_v1, %v6928_v15  ;;  %v6941_v51 = vsub.f32 %v15257_v61, %v6928_v15  ;;  %v6942_v48 = vsub.f32 %v15273_v49, %v6928_v15  ;;  %v7003_v61 = vld [vmem:[%s16491_s4] sm:$0xf] }
 0x3c8   :  { %11773 = vrsqrt.f32 %v6923_v9  ;;  %v6943_v3 = vsub.f32 %v15271_v25, %v6928_v15  ;;  %v6944_v39 = vsub.f32 %v15282_v11, %v6928_v15  ;;  %v6950_v54 = vrot.slane %v6945_v52, %v15157_v53 }
 0x3c9   :  { %v6958_v32 = vrot.slane %v6945_v52, %v15163_v55  ;;  %v6954_v14 = vrot.slane %v6945_v52, %v15166_v57  ;;  %v6962_v59 = vrot.slane %v6945_v52, %v15169_v62  ;;  %v7008_v31 = vrot.slane %v7003_v61, %v15157_v53 }
 0x3ca   :  { %v7016_v36 = vrot.slane %v7003_v61, %v15163_v55  ;;  %v7012_v20 = vrot.slane %v7003_v61, %v15166_v57  ;;  %v7020_v22 = vrot.slane %v7003_v61, %v15169_v62 }
 0x3d2   :  { %v11774_v1 = vpop.eup %11773 }
 0x3d3   :  { %v6967_v25 = vmul.f32 %v11774_v1, %v6950_v54  ;;  %v6968_v49 = vmul.f32 %v11774_v1, %v6954_v14  ;;  %v6969_v11 = vmul.f32 %v11774_v1, %v6958_v32  ;;  %v6970_v37 = vmul.f32 %v11774_v1, %v6962_v59 }
 0x3d5   :  { %v6974_v21 = vrot.slane %v6967_v25, %v15157_v53  ;;  %v6978_v7 = vrot.slane %v6968_v49, %v15157_v53  ;;  %v6982_v13 = vrot.slane %v6969_v11, %v15157_v53  ;;  %v6986_v60 = vrot.slane %v6970_v37, %v15157_v53 }
 0x3d7   :  { %v6987_v45 = vmul.f32 %v6974_v21, %v6929_v46  ;;  %v6988_v58 = vmul.f32 %v6978_v7, %v6930_v44  ;;  %v6989_v38 = vmul.f32 %v6982_v13, %v6931_v10  ;;  %v6990_v5 = vmul.f32 %v6986_v60, %v6932_v29 }
 0x3d8   :  { %v6991_v63 = vmul.f32 %v6974_v21, %v6933_v8  ;;  %v6992_v4 = vmul.f32 %v6978_v7, %v6934_v30  ;;  %v6993_v16 = vmul.f32 %v6982_v13, %v6935_v17  ;;  %v6994_v33 = vmul.f32 %v6986_v60, %v6936_v23 }
 0x3d9   :  { %v6995_v50 = vmul.f32 %v6974_v21, %v6937_v12  ;;  %v6996_v2 = vmul.f32 %v6978_v7, %v6938_v41  ;;  %v6997_v0 = vmul.f32 %v6982_v13, %v6939_v47  ;;  %v6998_v56 = vmul.f32 %v6986_v60, %v6940_v6 }
 0x3da   :  { %v6999_v15 = vmul.f32 %v6974_v21, %v6941_v51  ;;  %v7000_v24 = vmul.f32 %v6978_v7, %v6942_v48  ;;  %v7001_v9 = vmul.f32 %v6982_v13, %v6943_v3  ;;  %v7002_v52 = vmul.f32 %v6986_v60, %v6944_v39 }
 0x3db   :  { %v7025_v54 = vadd.f32 %v7008_v31, %v6987_v45  ;;  %v7026_v32 = vadd.f32 %v7012_v20, %v6988_v58  ;;  %v7027_v14 = vadd.f32 %v7016_v36, %v6989_v38  ;;  %v7028_v59 = vadd.f32 %v7020_v22, %v6990_v5 }
 0x3dc   :  { %v7029_v46 = vadd.f32 %v7008_v31, %v6991_v63  ;;  %v7030_v44 = vadd.f32 %v7012_v20, %v6992_v4  ;;  %v7031_v10 = vadd.f32 %v7016_v36, %v6993_v16  ;;  %v7032_v29 = vadd.f32 %v7020_v22, %v6994_v33 }
 0x3dd   :  { %v7033_v8 = vadd.f32 %v7008_v31, %v6995_v50  ;;  %v7034_v30 = vadd.f32 %v7012_v20, %v6996_v2  ;;  %v7035_v17 = vadd.f32 %v7016_v36, %v6997_v0  ;;  %v7036_v23 = vadd.f32 %v7020_v22, %v6998_v56 }
 0x3de   :  { %v7037_v12 = vadd.f32 %v7008_v31, %v6999_v15  ;;  %v7038_v41 = vadd.f32 %v7012_v20, %v7000_v24  ;;  %v7039_v47 = vadd.f32 %v7016_v36, %v7001_v9  ;;  %v7040_v6 = vadd.f32 %v7020_v22, %v7002_v52 }
 0x3df   :  { %v15322_v51 = vpack.c.bf16 %v7029_v46, %v7025_v54  ;;  %v15324_v48 = vpack.c.bf16 %v7030_v44, %v7026_v32  ;;  %v15326_v3 = vpack.c.bf16 %v7031_v10, %v7027_v14  ;;  %v15328_v39 = vpack.c.bf16 %v7032_v29, %v7028_v59 }
 0x3e0   :  { %v15330_v1 = vpack.c.bf16 %v7037_v12, %v7033_v8  ;;  %v15332_v61 = vpack.c.bf16 %v7038_v41, %v7034_v30  ;;  %v15334_v25 = vpack.c.bf16 %v7039_v47, %v7035_v17  ;;  %v15336_v49 = vpack.c.bf16 %v7040_v6, %v7036_v23 }
 0x3e1   :  { %16610 = vst [vmem:[#allocation90_spill] sm:$0xff] %v15326_v3  ;;  %v7049_v11 = vunpack.c.l.bf16 %v15322_v51  ;;  %v7050_v37 = vunpack.c.l.bf16 %v15324_v48  ;;  %v7051_v21 = vunpack.c.l.bf16 %v15326_v3  ;;  %v7052_v7 = vunpack.c.l.bf16 %v15328_v39 }
 0x3e2   :  { %16611 = vst [vmem:[#allocation91_spill] sm:$0xff] %v15334_v25  ;;  %16612 = vst [vmem:[#allocation92_spill] sm:$0xff] %v15336_v49  ;;  %v7053_v13 = vunpack.c.h.bf16 %v15322_v51  ;;  %v7054_v60 = vunpack.c.h.bf16 %v15324_v48  ;;  %v7055_v31 = vunpack.c.h.bf16 %v15326_v3  ;;  %v7056_v36 = vunpack.c.h.bf16 %v15328_v39 }
 0x3e3   :  { %v7057_v20 = vunpack.c.l.bf16 %v15330_v1  ;;  %v7058_v22 = vunpack.c.l.bf16 %v15332_v61  ;;  %v7059_v45 = vunpack.c.l.bf16 %v15334_v25  ;;  %v7060_v58 = vunpack.c.l.bf16 %v15336_v49 }
 0x3e4   :  { %v7061_v38 = vunpack.c.h.bf16 %v15330_v1  ;;  %v7062_v5 = vunpack.c.h.bf16 %v15332_v61  ;;  %v7063_v63 = vunpack.c.h.bf16 %v15334_v25  ;;  %v7064_v4 = vunpack.c.h.bf16 %v15336_v49 }
 0x3e5   :  { %v15354_v16 = vsub.f32 %v7025_v54, %v7049_v11  ;;  %v7066_v33 = vsub.f32 %v7026_v32, %v7050_v37  ;;  %v15356_v50 = vsub.f32 %v7027_v14, %v7051_v21  ;;  %v15358_v2 = vsub.f32 %v7028_v59, %v7052_v7 }
 0x3e6   :  { %v15360_v0 = vsub.f32 %v7029_v46, %v7053_v13  ;;  %v7070_v56 = vsub.f32 %v7030_v44, %v7054_v60  ;;  %v15362_v15 = vsub.f32 %v7031_v10, %v7055_v31  ;;  %v15364_v24 = vsub.f32 %v7032_v29, %v7056_v36 }
 0x3e7   :  { %v15366_v9 = vsub.f32 %v7033_v8, %v7057_v20  ;;  %v15368_v52 = vsub.f32 %v7034_v30, %v7058_v22  ;;  %v15370_v28 = vsub.f32 %v7035_v17, %v7059_v45  ;;  %v15372_v54 = vsub.f32 %v7036_v23, %v7060_v58 }
 0x3e8   :  { %v15374_v32 = vsub.f32 %v7037_v12, %v7061_v38  ;;  %v15376_v14 = vsub.f32 %v7038_v41, %v7062_v5  ;;  %v15378_v59 = vsub.f32 %v7039_v47, %v7063_v63  ;;  %v15380_v46 = vsub.f32 %v7040_v6, %v7064_v4 }
 0x3e9   :  { %v7082_v10 = vpack.c.bf16 %v7070_v56, %v7066_v33 }
 0x3ea   :  { %12341 = dma.done.wait [#allocation6], 8192 }
 0x3eb   :  { %12342 = vsyncadd [#allocation6], 4294959104  ;;  %7189 = vmatprep.mubr.bf16.mxu0 %v7082_v10  ;;  %v15396_v41 = vld [vmem:[#allocation2 + $0x8] sm:$0xff]  ;;  %v15398_v47 = vld [vmem:[#allocation2] sm:$0xff]  ;;  %v16613_v42 = vpack.c.bf16 %v15360_v0, %v15354_v16  ;;  %v16614_v26 = vpack.c.bf16 %v15376_v14, %v15368_v52 }
 0x3ec   :  { %v15400_v6 = vld [vmem:[#allocation2 + $0x18] sm:$0xff]  ;;  %7157 = vmatprep.subr.bf16.mxu0 %v15396_v41  ;;  %v15405_v11 = vld [vmem:[#allocation2 + $0x10] sm:$0xff]  ;;  %v15407_v37 = vld [vmem:[#allocation2 + $0x28] sm:$0xff] }
 0x3ed   :  { %7158 = vmatpush1.bf16.msra.mxu0 %v15398_v47  ;;  %v15411_v21 = vld [vmem:[#allocation2 + $0x20] sm:$0xff]  ;;  %v15413_v7 = vld [vmem:[#allocation2 + $0x38] sm:$0xff]  ;;  %v15417_v13 = vld [vmem:[#allocation2 + $0x30] sm:$0xff] }
 0x3ee   :  { %7159 = vmatprep.subr.bf16.mxu0 %v15400_v6  ;;  %v15419_v60 = vld [vmem:[#allocation2 + $0x48] sm:$0xff]  ;;  %v15423_v31 = vld [vmem:[#allocation2 + $0x40] sm:$0xff]  ;;  %v15425_v36 = vld [vmem:[#allocation2 + $0x58] sm:$0xff] }
 0x3ef   :  { %v15429_v20 = vld [vmem:[#allocation2 + $0x50] sm:$0xff]  ;;  %v15431_v22 = vld [vmem:[#allocation2 + $0x68] sm:$0xff]  ;;  %v15435_v45 = vld [vmem:[#allocation2 + $0x60] sm:$0xff] }
 0x3f0   :  { %v15437_v58 = vld [vmem:[#allocation2 + $0x78] sm:$0xff]  ;;  %v15441_v38 = vld [vmem:[#allocation2 + $0x70] sm:$0xff]  ;;  %v15443_v5 = vld [vmem:[#allocation2 + $0x88] sm:$0xff] }
 0x3f1   :  { %7160 = vmatpush1.bf16.msra.mxu0 %v15405_v11  ;;  %v15447_v63 = vld [vmem:[#allocation2 + $0x80] sm:$0xff]  ;;  %v15449_v4 = vld [vmem:[#allocation2 + $0x98] sm:$0xff]  ;;  %v15453_v33 = vld [vmem:[#allocation2 + $0x90] sm:$0xff] }
 0x3f2   :  { %7161 = vmatprep.subr.bf16.mxu0 %v15407_v37  ;;  %v15455_v56 = vld [vmem:[#allocation2 + $0xa8] sm:$0xff]  ;;  %v15459_v10 = vld [vmem:[#allocation2 + $0xa0] sm:$0xff]  ;;  %v15461_v23 = vld [vmem:[#allocation2 + $0xb8] sm:$0xff] }
 0x3f3   :  { %v15465_v12 = vld [vmem:[#allocation2 + $0xb0] sm:$0xff]  ;;  %v15467_v29 = vld [vmem:[#allocation2 + $0xc8] sm:$0xff]  ;;  %v15471_v8 = vld [vmem:[#allocation2 + $0xc0] sm:$0xff] }
 0x3f4   :  { %v15473_v30 = vld [vmem:[#allocation2 + $0xd8] sm:$0xff]  ;;  %v15477_v17 = vld [vmem:[#allocation2 + $0xd0] sm:$0xff]  ;;  %v15479_v44 = vld [vmem:[#allocation2 + $0xe8] sm:$0xff] }
 0x3f5   :  { %7162 = vmatpush1.bf16.msra.mxu0 %v15411_v21  ;;  %v15483_v35 = vld [vmem:[#allocation2 + $0xe0] sm:$0xff]  ;;  %v15485_v19 = vld [vmem:[#allocation2 + $0xf8] sm:$0xff]  ;;  %v15489_v43 = vld [vmem:[#allocation2 + $0xf0] sm:$0xff] }
 0x3f6   :  { %7163 = vmatprep.subr.bf16.mxu0 %v15413_v7  ;;  %v15491_v27 = vld [vmem:[#allocation2 + $0x108] sm:$0xff]  ;;  %v15495_v34 = vld [vmem:[#allocation2 + $0x100] sm:$0xff]  ;;  %v15497_v18 = vld [vmem:[#allocation2 + $0x118] sm:$0xff] }
 0x3f7   :  { %v15507_v62 = vld [vmem:[#allocation2 + $0x110] sm:$0xff]  ;;  %v15509_v55 = vld [vmem:[#allocation2 + $0x128] sm:$0xff]  ;;  %v15513_v40 = vld [vmem:[#allocation2 + $0x120] sm:$0xff] }
 0x3f8   :  { %v15515_v16 = vld [vmem:[#allocation2 + $0x138] sm:$0xff]  ;;  %v15525_v0 = vld [vmem:[#allocation2 + $0x130] sm:$0xff]  ;;  %v15527_v52 = vld [vmem:[#allocation2 + $0x148] sm:$0xff] }
 0x3f9   :  { %7164 = vmatpush1.bf16.msra.mxu0 %v15417_v13  ;;  %v15531_v14 = vld [vmem:[#allocation2 + $0x140] sm:$0xff]  ;;  %v15551_v57 = vld [vmem:[#allocation2 + $0x188] sm:$0xff]  ;;  %v15557_v25 = vld [vmem:[#allocation2 + $0x198] sm:$0xff] }
 0x3fa   :  { %7165 = vmatprep.subr.bf16.mxu0 %v15419_v60  ;;  %16619 = vst [vmem:[#allocation95_spill] sm:$0xff] %v15551_v57  ;;  %v15555_v53 = vld [vmem:[#allocation2 + $0x180] sm:$0xff]  ;;  %16621 = vst [vmem:[#allocation97_spill] sm:$0xff] %v15557_v25  ;;  %v15561_v49 = vld [vmem:[#allocation2 + $0x190] sm:$0xff] }
 0x3fb   :  { %16620 = vst [vmem:[#allocation96_spill] sm:$0xff] %v15555_v53  ;;  %16622 = vst [vmem:[#allocation98_spill] sm:$0xff] %v15561_v49  ;;  %v15563_v3 = vld [vmem:[#allocation2 + $0x1a8] sm:$0xff] }
 0x3fc   :  { %16623 = vst [vmem:[#allocation99_spill] sm:$0xff] %v15563_v3 }
 0x3fd   :  { %7166 = vmatpush1.bf16.msra.mxu0 %v15423_v31 }
 0x3fe   :  { %7167 = vmatprep.subr.bf16.mxu0 %v15425_v36 }
 0x401   :  { %7168 = vmatpush1.bf16.msra.mxu0 %v15429_v20 }
 0x402   :  { %7169 = vmatprep.subr.bf16.mxu0 %v15431_v22 }
 0x405   :  { %7170 = vmatpush1.bf16.msra.mxu0 %v15435_v45 }
 0x406   :  { %7171 = vmatprep.subr.bf16.mxu0 %v15437_v58 }
 0x409   :  { %7172 = vmatpush1.bf16.msra.mxu0 %v15441_v38 }
 0x40a   :  { %7173 = vmatprep.subr.bf16.mxu0 %v15443_v5 }
 0x40d   :  { %7174 = vmatpush1.bf16.msra.mxu0 %v15447_v63 }
 0x40e   :  { %7175 = vmatprep.subr.bf16.mxu0 %v15449_v4 }
 0x411   :  { %7176 = vmatpush1.bf16.msra.mxu0 %v15453_v33 }
 0x412   :  { %7177 = vmatprep.subr.bf16.mxu0 %v15455_v56 }
 0x415   :  { %7178 = vmatpush1.bf16.msra.mxu0 %v15459_v10 }
 0x416   :  { %7179 = vmatprep.subr.bf16.mxu0 %v15461_v23 }
 0x419   :  { %7180 = vmatpush1.bf16.msra.mxu0 %v15465_v12 }
 0x41a   :  { %7181 = vmatprep.subr.bf16.mxu0 %v15467_v29 }
 0x41d   :  { %7182 = vmatpush1.bf16.msra.mxu0 %v15471_v8 }
 0x41e   :  { %7183 = vmatprep.subr.bf16.mxu0 %v15473_v30 }
 0x421   :  { %7184 = vmatpush1.bf16.msra.mxu0 %v15477_v17 }
 0x422   :  { %7185 = vmatprep.subr.bf16.mxu0 %v15479_v44 }
 0x425   :  { %7186 = vmatpush1.bf16.msra.mxu0 %v15483_v35 }
 0x426   :  { %7187 = vmatprep.subr.bf16.mxu0 %v15485_v19 }
 0x429   :  { %7188 = vmatpush1.bf16.msra.mxu0 %v15489_v43 }
 0x42a   :  { %7210 = vmatprep.subr.bf16.mxu0 %v15491_v27 }
 0x42c   :  { %7190 = vmatmul.mubr.bf16.vlgmr.msra.gmra.mrb[32].mxu0 %v16613_v42  ;;  %v16615_v42 = vpack.c.bf16 %v15374_v32, %v15366_v9  ;;  %v15533_v9 = vld [vmem:[#allocation2 + $0x158] sm:$0xff]  ;;  %v15543_v32 = vld [vmem:[#allocation2 + $0x160] sm:$0xff] }
 0x42d   :  { %7211 = vmatpush1.bf16.msra.mxu0 %v15495_v34  ;;  %7199 = vmatprep.mubr.bf16.mxu0 %v16614_v26  ;;  %v16616_v26 = vpack.c.bf16 %v15364_v24, %v15358_v2  ;;  %v15537_v2 = vld [vmem:[#allocation2 + $0x150] sm:$0xff]  ;;  %v15539_v24 = vld [vmem:[#allocation2 + $0x168] sm:$0xff] }
 0x42e   :  { %7212 = vmatprep.subr.bf16.mxu0 %v15497_v18 }
 0x431   :  { %7213 = vmatpush1.bf16.msra.mxu0 %v15507_v62 }
 0x432   :  { %7214 = vmatprep.subr.bf16.mxu0 %v15509_v55 }
 0x434   :  { %7200 = vmatmul.mubr.bf16.gmra.mrb[36].mxu0 %v16615_v42  ;;  %v15545_v42 = vld [vmem:[#allocation2 + $0x178] sm:$0xff] }
 0x435   :  { %7215 = vmatpush1.bf16.msra.mxu0 %v15513_v40  ;;  %7242 = vmatprep.mubr.bf16.mxu0 %v16616_v26  ;;  %16617 = vst [vmem:[#allocation93_spill] sm:$0xff] %v15545_v42  ;;  %v15549_v26 = vld [vmem:[#allocation2 + $0x170] sm:$0xff] }
 0x436   :  { %7216 = vmatprep.subr.bf16.mxu0 %v15515_v16  ;;  %16618 = vst [vmem:[#allocation94_spill] sm:$0xff] %v15549_v26 }
 0x439   :  { %7217 = vmatpush1.bf16.msra.mxu0 %v15525_v0 }
 0x43a   :  { %7218 = vmatprep.subr.bf16.mxu0 %v15527_v52 }
 0x43d   :  { %7219 = vmatpush1.bf16.msra.mxu0 %v15531_v14 }
 0x43e   :  { %7220 = vmatprep.subr.bf16.mxu0 %v15533_v9 }
 0x441   :  { %7221 = vmatpush1.bf16.msra.mxu0 %v15537_v2 }
 0x442   :  { %7222 = vmatprep.subr.bf16.mxu0 %v15539_v24 }
 0x445   :  { %7223 = vmatpush1.bf16.msra.mxu0 %v15543_v32 }
 0x446   :  { %7224 = vmatprep.subr.bf16.mxu0 %v15545_v42  ;;  %v15567_v42 = vld [vmem:[#allocation2 + $0x1a0] sm:$0xff] }
 0x447   :  { %16624 = vst [vmem:[#allocation100_spill] sm:$0xff] %v15567_v42 }
 0x449   :  { %7225 = vmatpush1.bf16.msra.mxu0 %v15549_v26  ;;  %v15569_v26 = vld [vmem:[#allocation2 + $0x1b8] sm:$0xff] }
 0x44a   :  { %7226 = vmatprep.subr.bf16.mxu0 %v15551_v57  ;;  %16625 = vst [vmem:[#allocation101_spill] sm:$0xff] %v15569_v26  ;;  %v15573_v57 = vld [vmem:[#allocation2 + $0x1b0] sm:$0xff] }
 0x44b   :  { %16626 = vst [vmem:[#allocation102_spill] sm:$0xff] %v15573_v57 }
 0x44d   :  { %7227 = vmatpush1.bf16.msra.mxu0 %v15555_v53  ;;  %v15575_v53 = vld [vmem:[#allocation2 + $0x1c8] sm:$0xff] }
 0x44e   :  { %7228 = vmatprep.subr.bf16.mxu0 %v15557_v25  ;;  %16627 = vst [vmem:[#allocation103_spill] sm:$0xff] %v15575_v53  ;;  %v15579_v25 = vld [vmem:[#allocation2 + $0x1c0] sm:$0xff] }
 0x451   :  { %7229 = vmatpush1.bf16.msra.mxu0 %v15561_v49  ;;  %v15581_v49 = vld [vmem:[#allocation2 + $0x1d8] sm:$0xff] }
 0x452   :  { %7230 = vmatprep.subr.bf16.mxu0 %v15563_v3  ;;  %16628 = vst [vmem:[#allocation104_spill] sm:$0xff] %v15581_v49  ;;  %v15585_v3 = vld [vmem:[#allocation2 + $0x1d0] sm:$0xff] }
 0x455   :  { %7231 = vmatpush1.bf16.msra.mxu0 %v15567_v42  ;;  %v15587_v42 = vld [vmem:[#allocation2 + $0x1e8] sm:$0xff] }
 0x456   :  { %7232 = vmatprep.subr.bf16.mxu0 %v15569_v26  ;;  %16629 = vst [vmem:[#allocation105_spill] sm:$0xff] %v15587_v42  ;;  %v15591_v26 = vld [vmem:[#allocation2 + $0x1e0] sm:$0xff] }
 0x459   :  { %7233 = vmatpush1.bf16.msra.mxu0 %v15573_v57  ;;  %v15593_v57 = vld [vmem:[#allocation2 + $0x1f8] sm:$0xff] }
 0x45a   :  { %7234 = vmatprep.subr.bf16.mxu0 %v15575_v53  ;;  %v15597_v53 = vld [vmem:[#allocation2 + $0x1f0] sm:$0xff] }
 0x45b   :  { %16630 = vst [vmem:[#allocation106_spill] sm:$0xff] %v15597_v53 }
 0x45d   :  { %7235 = vmatpush1.bf16.msra.mxu0 %v15579_v25 }
 0x45e   :  { %7236 = vmatprep.subr.bf16.mxu0 %v15581_v49  ;;  %v16631_v49 = vpack.c.bf16 %v15362_v15, %v15356_v50  ;;  %v16651_v50 = vld [vmem:[#allocation86_spill] sm:$0xff]  ;;  %v16652_v15 = vld [vmem:[#allocation88_spill] sm:$0xff] }
 0x461   :  { %7237 = vmatpush1.bf16.msra.mxu0 %v15585_v3 }
 0x462   :  { %7238 = vmatprep.subr.bf16.mxu0 %v15587_v42  ;;  %v16632_v42 = vpack.c.bf16 %v15380_v46, %v15372_v54 }
 0x465   :  { %7239 = vmatpush1.bf16.msra.mxu0 %v15591_v26 }
 0x466   :  { %7240 = vmatprep.subr.bf16.mxu0 %v15593_v57 }
 0x469   :  { %7241 = vmatpush1.bf16.msra.mxu0 %v15597_v53  ;;  %v16633_v53 = vpack.c.bf16 %v15378_v59, %v15370_v28  ;;  %v16637_v28 = vld [vmem:[#allocation96_spill] sm:$0xff] }
 0x46a   :  { %7263 = vmatprep.subr.bf16.mxu0 %v15396_v41 }
 0x46c   :  { %7243 = vmatmul.mubr.bf16.vlgmr.msra.gmra.mrb[32].mxu0 %v16631_v49  ;;  %v16650_v49 = vld [vmem:[#allocation91_spill] sm:$0xff] }
 0x46d   :  { %7264 = vmatpush1.bf16.msra.mxu0 %v15398_v47  ;;  %7252 = vmatprep.mubr.bf16.mxu0 %v16632_v42 }
 0x46e   :  { %7265 = vmatprep.subr.bf16.mxu0 %v15400_v6 }
 0x471   :  { %7266 = vmatpush1.bf16.msra.mxu0 %v15405_v11 }
 0x472   :  { %7267 = vmatprep.subr.bf16.mxu0 %v15407_v37 }
 0x474   :  { %7253 = vmatmul.mubr.bf16.gmra.mrb[36].mxu0 %v16633_v53  ;;  %v16642_v53 = vld [vmem:[#allocation101_spill] sm:$0xff] }
 0x475   :  { %7268 = vmatpush1.bf16.msra.mxu0 %v15411_v21  ;;  %7295 = vmatprep.mubr.bf16.mxu0 %v15324_v48  ;;  %v16646_v48 = vld [vmem:[#allocation105_spill] sm:$0xff] }
 0x476   :  { %7269 = vmatprep.subr.bf16.mxu0 %v15413_v7 }
 0x479   :  { %7270 = vmatpush1.bf16.msra.mxu0 %v15417_v13 }
 0x47a   :  { %7271 = vmatprep.subr.bf16.mxu0 %v15419_v60 }
 0x47d   :  { %7272 = vmatpush1.bf16.msra.mxu0 %v15423_v31 }
 0x47e   :  { %7273 = vmatprep.subr.bf16.mxu0 %v15425_v36 }
 0x481   :  { %7274 = vmatpush1.bf16.msra.mxu0 %v15429_v20 }
 0x482   :  { %7275 = vmatprep.subr.bf16.mxu0 %v15431_v22 }
 0x485   :  { %7276 = vmatpush1.bf16.msra.mxu0 %v15435_v45 }
 0x486   :  { %7277 = vmatprep.subr.bf16.mxu0 %v15437_v58 }
 0x489   :  { %7278 = vmatpush1.bf16.msra.mxu0 %v15441_v38 }
 0x48a   :  { %7279 = vmatprep.subr.bf16.mxu0 %v15443_v5 }
 0x48d   :  { %7280 = vmatpush1.bf16.msra.mxu0 %v15447_v63 }
 0x48e   :  { %7281 = vmatprep.subr.bf16.mxu0 %v15449_v4 }
 0x491   :  { %7282 = vmatpush1.bf16.msra.mxu0 %v15453_v33 }
 0x492   :  { %7283 = vmatprep.subr.bf16.mxu0 %v15455_v56 }
 0x495   :  { %7284 = vmatpush1.bf16.msra.mxu0 %v15459_v10 }
 0x496   :  { %7285 = vmatprep.subr.bf16.mxu0 %v15461_v23 }
 0x499   :  { %7286 = vmatpush1.bf16.msra.mxu0 %v15465_v12 }
 0x49a   :  { %7287 = vmatprep.subr.bf16.mxu0 %v15467_v29 }
 0x49d   :  { %7288 = vmatpush1.bf16.msra.mxu0 %v15471_v8 }
 0x49e   :  { %7289 = vmatprep.subr.bf16.mxu0 %v15473_v30 }
 0x4a1   :  { %7290 = vmatpush1.bf16.msra.mxu0 %v15477_v17 }
 0x4a2   :  { %7291 = vmatprep.subr.bf16.mxu0 %v15479_v44 }
 0x4a5   :  { %7292 = vmatpush1.bf16.msra.mxu0 %v15483_v35  ;;  %v16639_v35 = vld [vmem:[#allocation98_spill] sm:$0xff] }
 0x4a6   :  { %7293 = vmatprep.subr.bf16.mxu0 %v15485_v19  ;;  %v16635_v19 = vld [vmem:[#allocation94_spill] sm:$0xff] }
 0x4a9   :  { %7294 = vmatpush1.bf16.msra.mxu0 %v15489_v43  ;;  %v16640_v43 = vld [vmem:[#allocation99_spill] sm:$0xff] }
 0x4aa   :  { %7316 = vmatprep.subr.bf16.mxu0 %v15491_v27  ;;  %v16636_v27 = vld [vmem:[#allocation95_spill] sm:$0xff] }
 0x4ac   :  { %7296 = vmatmul.mubr.bf16.vlgmr.msra.gmra.mrb[32].mxu0 %v15322_v51  ;;  %v16645_v51 = vld [vmem:[#allocation104_spill] sm:$0xff] }
 0x4ad   :  { %7317 = vmatpush1.bf16.msra.mxu0 %v15495_v34  ;;  %7305 = vmatprep.mubr.bf16.mxu0 %v15332_v61  ;;  %v16638_v34 = vld [vmem:[#allocation97_spill] sm:$0xff]  ;;  %v16649_v61 = vld [vmem:[#allocation92_spill] sm:$0xff] }
 0x4ae   :  { %7318 = vmatprep.subr.bf16.mxu0 %v15497_v18  ;;  %v16634_v18 = vld [vmem:[#allocation93_spill] sm:$0xff] }
 0x4b1   :  { %7319 = vmatpush1.bf16.msra.mxu0 %v15507_v62  ;;  %v16644_v62 = vld [vmem:[#allocation103_spill] sm:$0xff] }
 0x4b2   :  { %7320 = vmatprep.subr.bf16.mxu0 %v15509_v55  ;;  %v16643_v55 = vld [vmem:[#allocation102_spill] sm:$0xff] }
 0x4b4   :  { %7306 = vmatmul.mubr.bf16.gmra.mrb[36].mxu0 %v15330_v1  ;;  %v16648_v1 = vld [vmem:[#allocation90_spill] sm:$0xff] }
 0x4b5   :  { %7321 = vmatpush1.bf16.msra.mxu0 %v15513_v40  ;;  %7348 = vmatprep.mubr.bf16.mxu0 %v15328_v39  ;;  %v16641_v40 = vld [vmem:[#allocation100_spill] sm:$0xff]  ;;  %v16647_v39 = vld [vmem:[#allocation106_spill] sm:$0xff] }
 0x4b6   :  { %7322 = vmatprep.subr.bf16.mxu0 %v15515_v16 }
 0x4b9   :  { %7323 = vmatpush1.bf16.msra.mxu0 %v15525_v0 }
 0x4ba   :  { %7324 = vmatprep.subr.bf16.mxu0 %v15527_v52 }
 0x4bd   :  { %7325 = vmatpush1.bf16.msra.mxu0 %v15531_v14 }
 0x4be   :  { %7326 = vmatprep.subr.bf16.mxu0 %v15533_v9 }
 0x4c1   :  { %7327 = vmatpush1.bf16.msra.mxu0 %v15537_v2 }
 0x4c2   :  { %7328 = vmatprep.subr.bf16.mxu0 %v15539_v24 }
 0x4c5   :  { %7329 = vmatpush1.bf16.msra.mxu0 %v15543_v32 }
 0x4c6   :  { %7330 = vmatprep.subr.bf16.mxu0 %v16634_v18 }
 0x4c9   :  { %7331 = vmatpush1.bf16.msra.mxu0 %v16635_v19 }
 0x4ca   :  { %7332 = vmatprep.subr.bf16.mxu0 %v16636_v27 }
 0x4cd   :  { %7333 = vmatpush1.bf16.msra.mxu0 %v16637_v28 }
 0x4ce   :  { %7334 = vmatprep.subr.bf16.mxu0 %v16638_v34 }
 0x4d1   :  { %7335 = vmatpush1.bf16.msra.mxu0 %v16639_v35 }
 0x4d2   :  { %7336 = vmatprep.subr.bf16.mxu0 %v16640_v43 }
 0x4d5   :  { %7337 = vmatpush1.bf16.msra.mxu0 %v16641_v40 }
 0x4d6   :  { %7338 = vmatprep.subr.bf16.mxu0 %v16642_v53 }
 0x4d9   :  { %7339 = vmatpush1.bf16.msra.mxu0 %v16643_v55 }
 0x4da   :  { %7340 = vmatprep.subr.bf16.mxu0 %v16644_v62 }
 0x4dd   :  { %7341 = vmatpush1.bf16.msra.mxu0 %v15579_v25  ;;  %v7369_v25 = vld [vmem:[%s16492_s5] sm:$0x3] }
 0x4de   :  { %7342 = vmatprep.subr.bf16.mxu0 %v16645_v51  ;;  %v7378_v54 = vrot.slane %v7369_v25, %v16652_v15 }
 0x4e1   :  { %7343 = vmatpush1.bf16.msra.mxu0 %v15585_v3  ;;  %v7374_v3 = vrot.slane %v7369_v25, %v16651_v50 }
 0x4e2   :  { %7344 = vmatprep.subr.bf16.mxu0 %v16646_v48 }
 0x4e5   :  { %7345 = vmatpush1.bf16.msra.mxu0 %v15591_v26 }
 0x4e6   :  { %7346 = vmatprep.subr.bf16.mxu0 %v15593_v57 }
 0x4e9   :  { %7347 = vmatpush1.bf16.msra.mxu0 %v16647_v39 }
 0x4ec   :  { %7349 = vmatmul.mubr.bf16.vlgmr.msra.gmra.mrb[32].mxu0 %v16648_v1 }
 0x4ed   :  { %7358 = vmatprep.mubr.bf16.mxu0 %v16649_v61 }
 0x4f4   :  { %7359 = vmatmul.mubr.bf16.gmra.mrb[36].mxu0 %v16650_v49 }
 0x5bf   :  { %v7350_v59 = vpop.f32.mrb[32].mxu0 }
 0x5c0   :  { %v7381_v46 = vadd.f32 %v7374_v3, %v7350_v59  ;;  %v7352_v44 = vpop.f32.mrb[33].mxu0 }
 0x5c1   :  { %v7382_v57 = vadd.f32 %v7378_v54, %v7352_v44  ;;  %v7354_v29 = vpop.f32.mrb[34].mxu0 }
 0x5c2   :  { %v7383_v8 = vadd.f32 %v7374_v3, %v7354_v29  ;;  %v7356_v30 = vpop.f32.mrb[35].mxu0  ;;  %v7389_v23 = vmax.f32 %v7381_v46, 0.0 }
 0x5c3   :  { %v7384_v17 = vadd.f32 %v7378_v54, %v7356_v30  ;;  %v7390_v41 = vmax.f32 %v7382_v57, 0.0 }
 0x5c4   :  { %v7391_v12 = vmax.f32 %v7383_v8, 0.0 }
 0x5c5   :  { %v7392_v47 = vmax.f32 %v7384_v17, 0.0 }
 0x5c6   :  { %v7397_v6 = vadd.f32 %v7391_v12, %v7389_v23 }
 0x5c7   :  { %v7406_v11 = vadd.f32 %v7392_v47, %v7390_v41  ;;  %v7360_v37 = vpop.f32.mrb[36].mxu0 }
 0x5c8   :  { %v7385_v21 = vadd.f32 %v7374_v3, %v7360_v37  ;;  %v7362_v7 = vpop.f32.mrb[37].mxu0 }
 0x5c9   :  { %v7386_v13 = vadd.f32 %v7378_v54, %v7362_v7  ;;  %v7364_v60 = vpop.f32.mrb[38].mxu0 }
 0x5ca   :  { %v7393_v31 = vmax.f32 %v7385_v21, 0.0  ;;  %v7387_v36 = vadd.f32 %v7374_v3, %v7364_v60  ;;  %v7366_v20 = vpop.f32.mrb[39].mxu0 }
 0x5cb   :  { %v7394_v22 = vmax.f32 %v7386_v13, 0.0  ;;  %v7388_v45 = vadd.f32 %v7378_v54, %v7366_v20 }
 0x5cc   :  { %v7398_v58 = vadd.f32 %v7397_v6, %v7393_v31  ;;  %v7395_v38 = vmax.f32 %v7387_v36, 0.0  ;;  %v7458_v36 = vld [vmem:[%s16493_s6] sm:$0x3] }
 0x5cd   :  { %v7407_v5 = vadd.f32 %v7406_v11, %v7394_v22  ;;  %v7396_v63 = vmax.f32 %v7388_v45, 0.0  ;;  %v7463_v20 = vrot.slane %v7458_v36, %v16651_v50 }
 0x5ce   :  { %v7399_v4 = vadd.f32 %v7398_v58, %v7395_v38  ;;  %v7488_v58 = vld [vmem:[%s16494_s7] sm:$0x3] }
 0x5cf   :  { %v7408_v33 = vadd.f32 %v7407_v5, %v7396_v63 }
 0x5d0   :  { %v7400_v56 = vrot.slane %v7399_v4, 4 }
 0x5d1   :  { %v7409_v10 = vrot.slane %v7408_v33, 4 }
 0x5d2   :  { %v7401_v16 = vadd.f32 %v7400_v56, %v7399_v4 }
 0x5d3   :  { %v7410_v0 = vadd.f32 %v7409_v10, %v7408_v33  ;;  %v7493_v33 = vrot.slane %v7488_v58, %v16651_v50  ;;  %v7497_v10 = vrot.slane %v7488_v58, %v16652_v15 }
 0x5d4   :  { %v7402_v52 = vrot.slane %v7401_v16, 2 }
 0x5d5   :  { %v7411_v14 = vrot.slane %v7410_v0, 2 }
 0x5d6   :  { %v7403_v9 = vadd.f32 %v7402_v52, %v7401_v16 }
 0x5d7   :  { %v7412_v2 = vadd.f32 %v7411_v14, %v7410_v0 }
 0x5d8   :  { %v7404_v24 = vrot.slane %v7403_v9, 1 }
 0x5d9   :  { %v7413_v32 = vrot.slane %v7412_v2, 1 }
 0x5da   :  { %v7405_v42 = vadd.f32 %v7404_v24, %v7403_v9 }
 0x5db   :  { %v7414_v26 = vadd.f32 %v7413_v32, %v7412_v2 }
 0x5dc   :  { %v7416_v18 = vmul.f32 0.03125, %v7405_v42 }
 0x5dd   :  { %v7417_v19 = vmul.f32 0.03125, %v7414_v26 }
 0x5de   :  { %v7418_v27 = vsub.f32 %v7389_v23, %v7416_v18  ;;  %v7420_v28 = vsub.f32 %v7391_v12, %v7416_v18  ;;  %v7422_v34 = vsub.f32 %v7393_v31, %v7416_v18  ;;  %v7424_v35 = vsub.f32 %v7395_v38, %v7416_v18 }
 0x5df   :  { %v7419_v43 = vsub.f32 %v7390_v41, %v7417_v19  ;;  %v7421_v40 = vsub.f32 %v7392_v47, %v7417_v19  ;;  %v7423_v53 = vsub.f32 %v7394_v22, %v7417_v19  ;;  %v7425_v55 = vsub.f32 %v7396_v63, %v7417_v19 }
 0x5e0   :  { %v7426_v62 = vmul.f32 %v7418_v27, %v7418_v27  ;;  %v7428_v51 = vmul.f32 %v7420_v28, %v7420_v28  ;;  %v7430_v1 = vmul.f32 %v7422_v34, %v7422_v34  ;;  %v7432_v3 = vmul.f32 %v7424_v35, %v7424_v35 }
 0x5e1   :  { %v7427_v48 = vmul.f32 %v7419_v43, %v7419_v43  ;;  %v7429_v39 = vmul.f32 %v7421_v40, %v7421_v40  ;;  %v7431_v49 = vmul.f32 %v7423_v53, %v7423_v53  ;;  %v7433_v59 = vmul.f32 %v7425_v55, %v7425_v55 }
 0x5e2   :  { %v7434_v61 = vadd.f32 %v7428_v51, %v7426_v62  ;;  %v7467_v22 = vrot.slane %v7458_v36, %v16652_v15  ;;  %v16653_v36 = vld [vmem:[#allocation85_spill] sm:$0xff] }
 0x5e3   :  { %v7443_v25 = vadd.f32 %v7429_v39, %v7427_v48 }
 0x5e4   :  { %v7435_v54 = vadd.f32 %v7434_v61, %v7430_v1 }
 0x5e5   :  { %v7444_v46 = vadd.f32 %v7443_v25, %v7431_v49 }
 0x5e6   :  { %v7436_v44 = vadd.f32 %v7435_v54, %v7432_v3 }
 0x5e7   :  { %v7445_v57 = vadd.f32 %v7444_v46, %v7433_v59 }
 0x5e8   :  { %v7437_v29 = vrot.slane %v7436_v44, 4 }
 0x5e9   :  { %v7446_v8 = vrot.slane %v7445_v57, 4 }
 0x5ea   :  { %v7438_v30 = vadd.f32 %v7437_v29, %v7436_v44 }
 0x5eb   :  { %v7447_v17 = vadd.f32 %v7446_v8, %v7445_v57 }
 0x5ec   :  { %v7439_v23 = vrot.slane %v7438_v30, 2 }
 0x5ed   :  { %v7448_v12 = vrot.slane %v7447_v17, 2 }
 0x5ee   :  { %v7440_v41 = vadd.f32 %v7439_v23, %v7438_v30 }
 0x5ef   :  { %v7449_v47 = vadd.f32 %v7448_v12, %v7447_v17 }
 0x5f0   :  { %v7441_v6 = vrot.slane %v7440_v41, 1 }
 0x5f1   :  { %v7450_v11 = vrot.slane %v7449_v47, 1 }
 0x5f2   :  { %v7442_v37 = vadd.f32 %v7441_v6, %v7440_v41 }
 0x5f3   :  { %v7451_v21 = vadd.f32 %v7450_v11, %v7449_v47 }
 0x5f4   :  { %v7452_v7 = vmul.f32 0.03125, %v7442_v37 }
 0x5f5   :  { %v7453_v13 = vmul.f32 0.03125, %v7451_v21 }
 0x5f6   :  { %v7454_v60 = vadd.f32 1e-05, %v7452_v7 }
 0x5f7   :  { %v7455_v31 = vadd.f32 1e-05, %v7453_v13 }
 0x5f8   :  { %11775 = vrsqrt.f32 %v7454_v60 }
 0x5f9   :  { %11777 = vrsqrt.f32 %v7455_v31 }
 0x602   :  { %v11776_v45 = vpop.eup %11775 }
 0x603   :  { %v11778_v38 = vpop.eup %11777  ;;  %v7470_v5 = vmul.f32 %v11776_v45, %v7463_v20 }
 0x604   :  { %v7471_v63 = vmul.f32 %v11778_v38, %v7467_v22 }
 0x605   :  { %v7475_v4 = vrot.slane %v7470_v5, %v16651_v50 }
 0x606   :  { %v7479_v56 = vrot.slane %v7471_v63, %v16651_v50 }
 0x607   :  { %v7480_v16 = vmul.f32 %v7475_v4, %v7418_v27  ;;  %v7482_v0 = vmul.f32 %v7475_v4, %v7420_v28  ;;  %v7484_v52 = vmul.f32 %v7475_v4, %v7422_v34  ;;  %v7486_v14 = vmul.f32 %v7475_v4, %v7424_v35 }
 0x608   :  { %v7481_v9 = vmul.f32 %v7479_v56, %v7419_v43  ;;  %v7483_v2 = vmul.f32 %v7479_v56, %v7421_v40  ;;  %v7485_v24 = vmul.f32 %v7479_v56, %v7423_v53  ;;  %v7487_v32 = vmul.f32 %v7479_v56, %v7425_v55 }
 0x609   :  { %v7500_v42 = vadd.f32 %v7493_v33, %v7480_v16  ;;  %v7502_v26 = vadd.f32 %v7493_v33, %v7482_v0  ;;  %v7504_v18 = vadd.f32 %v7493_v33, %v7484_v52  ;;  %v7506_v19 = vadd.f32 %v7493_v33, %v7486_v14 }
 0x60a   :  { %v7501_v62 = vadd.f32 %v7497_v10, %v7481_v9  ;;  %v7503_v51 = vadd.f32 %v7497_v10, %v7483_v2  ;;  %v7505_v48 = vadd.f32 %v7497_v10, %v7485_v24  ;;  %v7507_v39 = vadd.f32 %v7497_v10, %v7487_v32 }
 0x60b   :  { %7508 = vst [vmem:[#allocation7] sm:$0xff] %v7500_v42  ;;  %7510 = vst [vmem:[#allocation7 + $0x10] sm:$0xff] %v7502_v26  ;;  %v12368_v27 = vmov 1966171168  }
 0x60c   :  { %7512 = vst [vmem:[#allocation7 + $0x20] sm:$0xff] %v7504_v18  ;;  %7514 = vst [vmem:[#allocation7 + $0x30] sm:$0xff] %v7506_v19  ;;  %v7524_v28 = vunpack.c.l.s4 %v12368_v27 }
 0x60d   :  { %7509 = vst [vmem:[#allocation7 + $0x8] sm:$0xff] %v7501_v62  ;;  %7511 = vst [vmem:[#allocation7 + $0x18] sm:$0xff] %v7503_v51 }
 0x60e   :  { %7513 = vst [vmem:[#allocation7 + $0x28] sm:$0xff] %v7505_v48  ;;  %7515 = vst [vmem:[#allocation7 + $0x38] sm:$0xff] %v7507_v39  ;;  %v7525_v25 = vunpack.c.0.s8 %v7524_v28 }
 0x610   :  { %v15761_v20 = vsub.s32 %v7525_v25, %v16653_v36 }
 0x612   :  { %v15698_v34 = vld [vmem:[#allocation7] sm:$0x3]  ;;  %v15700_v35 = vld [vmem:[#allocation7] sm:$0xc]  ;;  %v15702_v43 = vld [vmem:[#allocation7] sm:$0x30] }
 0x613   :  { %v7518_v40 = vpack.c.bf16 %v15698_v34, %v15698_v34  ;;  %v7566_v53 = vpack.c.bf16 %v15700_v35, %v15700_v35  ;;  %v7616_v55 = vpack.c.bf16 %v15702_v43, %v15702_v43  ;;  %v15710_v1 = vld [vmem:[#allocation7] sm:$0xc0]  ;;  %v15712_v61 = vld [vmem:[#allocation7 + $0x10] sm:$0x3]  ;;  %v15714_v49 = vld [vmem:[#allocation7 + $0x10] sm:$0xc] }
 0x614   :  { %v7666_v3 = vpack.c.bf16 %v15710_v1, %v15710_v1  ;;  %v7718_v54 = vpack.c.bf16 %v15712_v61, %v15712_v61  ;;  %v7766_v59 = vpack.c.bf16 %v15714_v49, %v15714_v49  ;;  %v15722_v46 = vld [vmem:[#allocation7 + $0x10] sm:$0x30]  ;;  %v15724_v44 = vld [vmem:[#allocation7 + $0x10] sm:$0xc0]  ;;  %v15742_v47 = vld [vmem:[#allocation7 + $0x20] sm:$0x3] }
 0x615   :  { %v15726_v57 = vunpack.c.l.bf16 %v7518_v40  ;;  %v15728_v29 = vunpack.c.l.bf16 %v7566_v53  ;;  %v15730_v8 = vunpack.c.l.bf16 %v7616_v55  ;;  %v7816_v30 = vpack.c.bf16 %v15722_v46, %v15722_v46  ;;  %v15744_v6 = vld [vmem:[#allocation7 + $0x20] sm:$0xc]  ;;  %v15746_v11 = vld [vmem:[#allocation7 + $0x20] sm:$0x30]  ;;  %v15754_v13 = vld [vmem:[#allocation7 + $0x20] sm:$0xc0] }
 0x616   :  { %v15734_v17 = vunpack.c.l.bf16 %v7666_v3  ;;  %v15736_v23 = vunpack.c.l.bf16 %v7718_v54  ;;  %v15738_v12 = vunpack.c.l.bf16 %v7766_v59  ;;  %v7866_v41 = vpack.c.bf16 %v15724_v44, %v15724_v44  ;;  %v15756_v60 = vld [vmem:[#allocation7 + $0x30] sm:$0x3]  ;;  %v15758_v31 = vld [vmem:[#allocation7 + $0x30] sm:$0xc]  ;;  %v15771_v5 = vld [vmem:[#allocation7 + $0x30] sm:$0x30] }
 0x617   :  { %v7541_v37 = vsub.f32 %v15698_v34, %v15726_v57  ;;  %v7590_v21 = vsub.f32 %v15700_v35, %v15728_v29  ;;  %v15752_v7 = vunpack.c.l.bf16 %v7816_v30  ;;  %v7918_v4 = vpack.c.bf16 %v15742_v47, %v15742_v47  ;;  %v15781_v10 = vld [vmem:[#allocation7 + $0x30] sm:$0xc0]  ;;  %v7517_v62 = vld [vmem:[#allocation7 + $0x8] sm:$0x3]  ;;  %v7565_v51 = vld [vmem:[#allocation7 + $0x8] sm:$0xc] }
 0x618   :  { %v15773_v63 = vunpack.c.l.bf16 %v7866_v41  ;;  %v7966_v33 = vpack.c.bf16 %v15744_v6, %v15744_v6  ;;  %v8016_v56 = vpack.c.bf16 %v15746_v11, %v15746_v11  ;;  %v8066_v0 = vpack.c.bf16 %v15754_v13, %v15754_v13  ;;  %v7615_v40 = vld [vmem:[#allocation7 + $0x8] sm:$0x30]  ;;  %v7665_v54 = vld [vmem:[#allocation7 + $0x8] sm:$0xc0] }
 0x619   :  { %v8118_v52 = vpack.c.bf16 %v15756_v60, %v15756_v60  ;;  %v8166_v14 = vpack.c.bf16 %v15758_v31, %v15758_v31  ;;  %v15791_v9 = vunpack.c.l.bf16 %v7918_v4  ;;  %v8216_v32 = vpack.c.bf16 %v15771_v5, %v15771_v5 }
 0x61a   :  { %v15793_v2 = vunpack.c.l.bf16 %v7966_v33  ;;  %v15795_v24 = vunpack.c.l.bf16 %v8016_v56  ;;  %v15799_v42 = vunpack.c.l.bf16 %v8066_v0  ;;  %v8266_v19 = vpack.c.bf16 %v15781_v10, %v15781_v10 }
 0x61b   :  { %v15801_v26 = vunpack.c.l.bf16 %v8118_v52  ;;  %v15803_v18 = vunpack.c.l.bf16 %v8166_v14  ;;  %v15813_v28 = vunpack.c.l.bf16 %v8216_v32  ;;  %v7519_v30 = vpack.c.bf16 %v7517_v62, %v7517_v62  ;;  %v7717_v14 = vld [vmem:[#allocation7 + $0x18] sm:$0x3] }
 0x61c   :  { %v15823_v59 = vunpack.c.l.bf16 %v8266_v19  ;;  %v11529_v41 = vpack.c.bf16 %v7517_v62, %v15698_v34  ;;  %v7567_v4 = vpack.c.bf16 %v7565_v51, %v7565_v51  ;;  %v11533_v56 = vpack.c.bf16 %v7565_v51, %v15700_v35 }
 0x61d   :  { %v7617_v0 = vpack.c.bf16 %v7615_v40, %v7615_v40  ;;  %v11537_v52 = vpack.c.bf16 %v7615_v40, %v15702_v43  ;;  %v7540_v25 = vunpack.c.l.bf16 %v7519_v30  ;;  %v7667_v55 = vpack.c.bf16 %v7665_v54, %v7665_v54 }
 0x61e   :  { %v7529_v32 = vrot.slane %v11529_v41, %v15761_v20  ;;  %v7589_v3 = vunpack.c.l.bf16 %v7567_v4  ;;  %v7577_v19 = vrot.slane %v11533_v56, %v15761_v20  ;;  %v11539_v39 = vpack.c.bf16 %v7665_v54, %v15710_v1 }
 0x61f   :  { %v7627_v53 = vrot.slane %v11537_v52, %v15761_v20  ;;  %v7639_v27 = vunpack.c.l.bf16 %v7617_v0  ;;  %v7542_v33 = vsub.f32 %v7517_v62, %v7540_v25  ;;  %v7690_v16 = vunpack.c.l.bf16 %v7667_v55  ;;  %v7815_v25 = vld [vmem:[#allocation7 + $0x18] sm:$0x30] }
 0x620   :  { %11530 = vst.sshfl [vmem:[#allocation8] sm:$0x5 pattern:$0x73625140] %v7529_v32  ;;  %v7591_v48 = vsub.f32 %v7565_v51, %v7589_v3  ;;  %v7719_v38 = vpack.c.bf16 %v7717_v14, %v7717_v14  ;;  %v7578_v58 = vcombine.high %v7577_v19, %v7577_v19  ;;  %v7677_v30 = vrot.slane %v11539_v39, %v15761_v20  ;;  %v7765_v51 = vld [vmem:[#allocation7 + $0x18] sm:$0xc] }
 0x621   :  { %v7634_v45 = vrot.slane %v7627_v53, %v15761_v20  ;;  %v7641_v22 = vsub.f32 %v7615_v40, %v7639_v27  ;;  %v11531_v41 = vpack.c.bf16 %v7542_v33, %v7541_v37  ;;  %v7692_v56 = vsub.f32 %v7665_v54, %v7690_v16  ;;  %v7917_v19 = vld [vmem:[#allocation7 + $0x28] sm:$0x3] }
 0x622   :  { %v11535_v4 = vpack.c.bf16 %v7591_v48, %v7590_v21  ;;  %v11541_v62 = vpack.c.bf16 %v7717_v14, %v15712_v61  ;;  %11534 = vst.sshfl [vmem:[#allocation8 + $0x2] sm:$0x5 pattern:$0x73625140] %v7578_v58  ;;  %v16654_v53 = vsub.f32 %v15702_v43, %v15730_v8  ;;  %v7678_v40 = vcombine.high %v7677_v30, %v7677_v30  ;;  %v7865_v48 = vld [vmem:[#allocation7 + $0x18] sm:$0xc0] }
 0x623   :  { %v7635_v55 = vcombine.high %v7634_v45, %v7634_v45  ;;  %v7740_v39 = vunpack.c.l.bf16 %v7719_v38  ;;  %v7554_v34 = vrot.slane %v11531_v41, %v15761_v20  ;;  %v16655_v35 = vsub.f32 %v15710_v1, %v15734_v17 }
 0x624   :  { %v11538_v27 = vpack.c.bf16 %v7641_v22, %v16654_v53  ;;  %v7603_v57 = vrot.slane %v11535_v4, %v15761_v20  ;;  %v7729_v37 = vrot.slane %v11541_v62, %v15761_v20  ;;  %v7685_v45 = vrot.slane %v7678_v40, %v15761_v20 }
 0x625   :  { %v11540_v29 = vpack.c.bf16 %v7692_v56, %v16655_v35  ;;  %7637 = vst [vmem:[#allocation8 + $0x4] sm:$0x3] %v7635_v55  ;;  %v7742_v43 = vsub.f32 %v7717_v14, %v7740_v39  ;;  %v7767_v8 = vpack.c.bf16 %v7765_v51, %v7765_v51  ;;  %11532 = vst.sshfl [vmem:[#allocation9] sm:$0x5 pattern:$0x73625140] %v7554_v34 }
 0x626   :  { %v7653_v21 = vrot.slane %v11538_v27, %v15761_v20  ;;  %v7604_v22 = vcombine.high %v7603_v57, %v7603_v57  ;;  %11542 = vst.sshfl [vmem:[#allocation8 + $0x8] sm:$0x5 pattern:$0x73625140] %v7729_v37  ;;  %v11545_v38 = vpack.c.bf16 %v7765_v51, %v15714_v49  ;;  %v7817_v16 = vpack.c.bf16 %v7815_v25, %v7815_v25  ;;  %v7965_v57 = vld [vmem:[#allocation7 + $0x28] sm:$0xc] }
 0x627   :  { %v7704_v58 = vrot.slane %v11540_v29, %v15761_v20  ;;  %v7686_v17 = vcombine.high %v7685_v45, %v7685_v45  ;;  %v16656_v3 = vsub.f32 %v15712_v61, %v15736_v23  ;;  %v7789_v33 = vunpack.c.l.bf16 %v7767_v8 }
 0x628   :  { %v7660_v1 = vrot.slane %v7653_v21, %v15761_v20  ;;  %11536 = vst.sshfl [vmem:[#allocation9 + $0x2] sm:$0x5 pattern:$0x73625140] %v7604_v22  ;;  %v7777_v52 = vrot.slane %v11545_v38, %v15761_v20  ;;  %v11549_v14 = vpack.c.bf16 %v7815_v25, %v15722_v46  ;;  %v7839_v32 = vunpack.c.l.bf16 %v7817_v16 }
 0x629   :  { %v11543_v54 = vpack.c.bf16 %v7742_v43, %v16656_v3  ;;  %v7705_v0 = vcombine.high %v7704_v58, %v7704_v58  ;;  %7688 = vst [vmem:[#allocation8 + $0x6] sm:$0x3] %v7686_v17  ;;  %v7791_v4 = vsub.f32 %v7765_v51, %v7789_v33  ;;  %v7867_v56 = vpack.c.bf16 %v7865_v48, %v7865_v48  ;;  %v8015_v43 = vld [vmem:[#allocation7 + $0x28] sm:$0x30] }
 0x62a   :  { %v7661_v30 = vcombine.high %v7660_v1, %v7660_v1  ;;  %v7778_v55 = vcombine.high %v7777_v52, %v7777_v52  ;;  %v7827_v61 = vrot.slane %v11549_v14, %v15761_v20  ;;  %v7841_v23 = vsub.f32 %v7815_v25, %v7839_v32 }
 0x62b   :  { %v7754_v41 = vrot.slane %v11543_v54, %v15761_v20  ;;  %v7712_v62 = vrot.slane %v7705_v0, %v15761_v20  ;;  %v16657_v53 = vsub.f32 %v15714_v49, %v15738_v12  ;;  %v11551_v40 = vpack.c.bf16 %v7865_v48, %v15724_v44 }
 0x62c   :  { %7663 = vst [vmem:[#allocation9 + $0x4] sm:$0x3] %v7661_v30  ;;  %v7890_v39 = vunpack.c.l.bf16 %v7867_v56  ;;  %v7919_v34 = vpack.c.bf16 %v7917_v19, %v7917_v19  ;;  %11546 = vst.sshfl [vmem:[#allocation8 + $0xa] sm:$0x5 pattern:$0x73625140] %v7778_v55  ;;  %v7834_v51 = vrot.slane %v7827_v61, %v15761_v20  ;;  %v16658_v29 = vsub.f32 %v15722_v46, %v15752_v7 }
 0x62d   :  { %11544 = vst.sshfl [vmem:[#allocation9 + $0x8] sm:$0x5 pattern:$0x73625140] %v7754_v41  ;;  %v11547_v27 = vpack.c.bf16 %v7791_v4, %v16657_v53  ;;  %v7713_v35 = vcombine.high %v7712_v62, %v7712_v62  ;;  %v11553_v25 = vpack.c.bf16 %v7917_v19, %v15742_v47  ;;  %v7877_v49 = vrot.slane %v11551_v40, %v15761_v20  ;;  %v8117_v56 = vld [vmem:[#allocation7 + $0x38] sm:$0x3] }
 0x62e   :  { %v11550_v37 = vpack.c.bf16 %v7841_v23, %v16658_v29  ;;  %v7892_v12 = vsub.f32 %v7865_v48, %v7890_v39  ;;  %v7940_v45 = vunpack.c.l.bf16 %v7919_v34  ;;  %v7835_v8 = vcombine.high %v7834_v51, %v7834_v51 }
 0x62f   :  { %v7803_v21 = vrot.slane %v11547_v27, %v15761_v20  ;;  %7715 = vst [vmem:[#allocation9 + $0x6] sm:$0x3] %v7713_v35  ;;  %v7929_v58 = vrot.slane %v11553_v25, %v15761_v20  ;;  %v7967_v38 = vpack.c.bf16 %v7965_v57, %v7965_v57  ;;  %v7878_v1 = vcombine.high %v7877_v49, %v7877_v49  ;;  %v8165_v25 = vld [vmem:[#allocation7 + $0x38] sm:$0xc] }
 0x630   :  { %v7853_v22 = vrot.slane %v11550_v37, %v15761_v20  ;;  %v16659_v46 = vsub.f32 %v15724_v44, %v15773_v63  ;;  %v7942_v17 = vsub.f32 %v7917_v19, %v7940_v45  ;;  %7837 = vst [vmem:[#allocation8 + $0xc] sm:$0x3] %v7835_v8  ;;  %v11557_v48 = vpack.c.bf16 %v7965_v57, %v15744_v6  ;;  %v8065_v63 = vld [vmem:[#allocation7 + $0x28] sm:$0xc0] }
 0x631   :  { %v7804_v16 = vcombine.high %v7803_v21, %v7803_v21  ;;  %11554 = vst.sshfl [vmem:[#allocation8 + $0x10] sm:$0x5 pattern:$0x73625140] %v7929_v58  ;;  %v7989_v54 = vunpack.c.l.bf16 %v7967_v38  ;;  %v8017_v33 = vpack.c.bf16 %v8015_v43, %v8015_v43  ;;  %v7885_v0 = vrot.slane %v7878_v1, %v15761_v20 }
 0x632   :  { %v11552_v7 = vpack.c.bf16 %v7892_v12, %v16659_v46  ;;  %v7860_v3 = vrot.slane %v7853_v22, %v15761_v20  ;;  %v16660_v14 = vsub.f32 %v15742_v47, %v15791_v9  ;;  %v11561_v44 = vpack.c.bf16 %v8015_v43, %v15746_v11 }
 0x633   :  { %11548 = vst.sshfl [vmem:[#allocation9 + $0xa] sm:$0x5 pattern:$0x73625140] %v7804_v16  ;;  %v7977_v30 = vrot.slane %v11557_v48, %v15761_v20  ;;  %v7991_v41 = vsub.f32 %v7965_v57, %v7989_v54  ;;  %v8039_v4 = vunpack.c.l.bf16 %v8017_v33  ;;  %v7886_v62 = vcombine.high %v7885_v0, %v7885_v0 }
 0x634   :  { %v7904_v52 = vrot.slane %v11552_v7, %v15761_v20  ;;  %v11555_v32 = vpack.c.bf16 %v7942_v17, %v16660_v14  ;;  %v7861_v19 = vcombine.high %v7860_v3, %v7860_v3  ;;  %v8027_v23 = vrot.slane %v11561_v44, %v15761_v20 }
 0x635   :  { %v7978_v53 = vcombine.high %v7977_v30, %v7977_v30  ;;  %v16661_v47 = vsub.f32 %v15744_v6, %v15793_v2  ;;  %v8041_v27 = vsub.f32 %v8015_v43, %v8039_v4  ;;  %v8067_v40 = vpack.c.bf16 %v8065_v63, %v8065_v63  ;;  %7888 = vst [vmem:[#allocation8 + $0xe] sm:$0x3] %v7886_v62  ;;  %v8215_v43 = vld [vmem:[#allocation7 + $0x38] sm:$0x30] }
 0x636   :  { %v7905_v55 = vcombine.high %v7904_v52, %v7904_v52  ;;  %v7954_v61 = vrot.slane %v11555_v32, %v15761_v20  ;;  %7863 = vst [vmem:[#allocation9 + $0xc] sm:$0x3] %v7861_v19  ;;  %v8034_v34 = vrot.slane %v8027_v23, %v15761_v20  ;;  %v11563_v57 = vpack.c.bf16 %v8065_v63, %v15754_v13  ;;  %v8265_v32 = vld [vmem:[#allocation7 + $0x38] sm:$0xc0] }
 0x637   :  { %v11559_v9 = vpack.c.bf16 %v7991_v41, %v16661_v47  ;;  %v8119_v35 = vpack.c.bf16 %v8117_v56, %v8117_v56  ;;  %11558 = vst.sshfl [vmem:[#allocation8 + $0x12] sm:$0x5 pattern:$0x73625140] %v7978_v53  ;;  %v16662_v29 = vsub.f32 %v15746_v11, %v15795_v24  ;;  %v8090_v6 = vunpack.c.l.bf16 %v8067_v40 }
 0x638   :  { %v7912_v39 = vrot.slane %v7905_v55, %v15761_v20  ;;  %11556 = vst.sshfl [vmem:[#allocation9 + $0x10] sm:$0x5 pattern:$0x73625140] %v7954_v61  ;;  %v11565_v2 = vpack.c.bf16 %v8117_v56, %v15756_v60  ;;  %v8035_v49 = vcombine.high %v8034_v34, %v8034_v34  ;;  %v8077_v12 = vrot.slane %v11563_v57, %v15761_v20 }
 0x639   :  { %v8003_v51 = vrot.slane %v11559_v9, %v15761_v20  ;;  %v11562_v37 = vpack.c.bf16 %v8041_v27, %v16662_v29  ;;  %v8140_v45 = vunpack.c.l.bf16 %v8119_v35  ;;  %v8092_v58 = vsub.f32 %v8065_v63, %v8090_v6 }
 0x63a   :  { %v7913_v21 = vcombine.high %v7912_v39, %v7912_v39  ;;  %v8129_v38 = vrot.slane %v11565_v2, %v15761_v20  ;;  %8037 = vst [vmem:[#allocation8 + $0x14] sm:$0x3] %v8035_v49  ;;  %v8078_v11 = vcombine.high %v8077_v12, %v8077_v12  ;;  %v8167_v16 = vpack.c.bf16 %v8165_v25, %v8165_v25 }
 0x63b   :  { %v8004_v8 = vcombine.high %v8003_v51, %v8003_v51  ;;  %v8053_v22 = vrot.slane %v11562_v37, %v15761_v20  ;;  %v8142_v24 = vsub.f32 %v8117_v56, %v8140_v45  ;;  %v11569_v1 = vpack.c.bf16 %v8165_v25, %v15758_v31 }
 0x63c   :  { %7915 = vst [vmem:[#allocation9 + $0xe] sm:$0x3] %v7913_v21  ;;  %v16663_v7 = vsub.f32 %v15754_v13, %v15799_v42  ;;  %11566 = vst.sshfl [vmem:[#allocation8 + $0x18] sm:$0x5 pattern:$0x73625140] %v8129_v38  ;;  %v8217_v3 = vpack.c.bf16 %v8215_v43, %v8215_v43  ;;  %v11573_v48 = vpack.c.bf16 %v8215_v43, %v15771_v5  ;;  %v8189_v14 = vunpack.c.l.bf16 %v8167_v16 }
 0x63d   :  { %11560 = vst.sshfl [vmem:[#allocation9 + $0x12] sm:$0x5 pattern:$0x73625140] %v8004_v8  ;;  %v8060_v46 = vrot.slane %v8053_v22, %v15761_v20  ;;  %v8085_v54 = vrot.slane %v8078_v11, %v15761_v20  ;;  %v16664_v33 = vsub.f32 %v15756_v60, %v15801_v26  ;;  %v8177_v52 = vrot.slane %v11569_v1, %v15761_v20 }
 0x63e   :  { %v11564_v17 = vpack.c.bf16 %v8092_v58, %v16663_v7  ;;  %v8227_v13 = vrot.slane %v11573_v48, %v15761_v20  ;;  %v8239_v42 = vunpack.c.l.bf16 %v8217_v3  ;;  %v8191_v4 = vsub.f32 %v8165_v25, %v8189_v14 }
 0x63f   :  { %v11567_v0 = vpack.c.bf16 %v8142_v24, %v16664_v33  ;;  %v8061_v44 = vcombine.high %v8060_v46, %v8060_v46  ;;  %v8086_v19 = vcombine.high %v8085_v54, %v8085_v54  ;;  %v8178_v41 = vcombine.high %v8177_v52, %v8177_v52 }
 0x640   :  { %v8104_v63 = vrot.slane %v11564_v17, %v15761_v20  ;;  %v8234_v60 = vrot.slane %v8227_v13, %v15761_v20  ;;  %v8241_v26 = vsub.f32 %v8215_v43, %v8239_v42  ;;  %v8267_v62 = vpack.c.bf16 %v8265_v32, %v8265_v32 }
 0x641   :  { %v8154_v30 = vrot.slane %v11567_v0, %v15761_v20  ;;  %8063 = vst [vmem:[#allocation9 + $0x14] sm:$0x3] %v8061_v44  ;;  %v8291_v55 = vsub.f32 %v15781_v10, %v15823_v59  ;;  %8088 = vst [vmem:[#allocation8 + $0x16] sm:$0x3] %v8086_v19  ;;  %v16665_v61 = vsub.f32 %v15758_v31, %v15803_v18 }
 0x642   :  { %v8105_v56 = vcombine.high %v8104_v63, %v8104_v63  ;;  %11570 = vst.sshfl [vmem:[#allocation8 + $0x1a] sm:$0x5 pattern:$0x73625140] %v8178_v41  ;;  %v11575_v53 = vpack.c.bf16 %v8265_v32, %v15781_v10  ;;  %v8235_v9 = vcombine.high %v8234_v60, %v8234_v60  ;;  %v16666_v27 = vsub.f32 %v15771_v5, %v15813_v28 }
 0x643   :  { %11568 = vst.sshfl [vmem:[#allocation9 + $0x18] sm:$0x5 pattern:$0x73625140] %v8154_v30  ;;  %v11571_v23 = vpack.c.bf16 %v8191_v4, %v16665_v61  ;;  %v8290_v39 = vunpack.c.l.bf16 %v8267_v62 }
 0x644   :  { %v8112_v47 = vrot.slane %v8105_v56, %v15761_v20  ;;  %v11574_v40 = vpack.c.bf16 %v8241_v26, %v16666_v27  ;;  %v8277_v59 = vrot.slane %v11575_v53, %v15761_v20  ;;  %8237 = vst [vmem:[#allocation8 + $0x1c] sm:$0x3] %v8235_v9 }
 0x645   :  { %v8203_v34 = vrot.slane %v11571_v23, %v15761_v20  ;;  %v8292_v31 = vsub.f32 %v8265_v32, %v8290_v39 }
 0x646   :  { %v8113_v57 = vcombine.high %v8112_v47, %v8112_v47  ;;  %v8253_v35 = vrot.slane %v11574_v40, %v15761_v20  ;;  %v8278_v51 = vcombine.high %v8277_v59, %v8277_v59 }
 0x647   :  { %v8204_v18 = vcombine.high %v8203_v34, %v8203_v34  ;;  %v11576_v29 = vpack.c.bf16 %v8292_v31, %v8291_v55 }
 0x648   :  { %8115 = vst [vmem:[#allocation9 + $0x16] sm:$0x3] %v8113_v57  ;;  %v8260_v10 = vrot.slane %v8253_v35, %v15761_v20  ;;  %v8285_v5 = vrot.slane %v8278_v51, %v15761_v20 }
 0x649   :  { %11572 = vst.sshfl [vmem:[#allocation9 + $0x1a] sm:$0x5 pattern:$0x73625140] %v8204_v18  ;;  %v8304_v37 = vrot.slane %v11576_v29, %v15761_v20 }
 0x64a   :  { %v8261_v28 = vcombine.high %v8260_v10, %v8260_v10  ;;  %v8286_v6 = vcombine.high %v8285_v5, %v8285_v5 }
 0x64b   :  { %v8305_v2 = vcombine.high %v8304_v37, %v8304_v37 }
 0x64c   :  { %8263 = vst [vmem:[#allocation9 + $0x1c] sm:$0x3] %v8261_v28  ;;  %8288 = vst [vmem:[#allocation8 + $0x1e] sm:$0x3] %v8286_v6 }
 0x64d   :  { %v8312_v25 = vrot.slane %v8305_v2, %v15761_v20 }
 0x64f   :  { %v8313_v21 = vcombine.high %v8312_v25, %v8312_v25 }
 0x651   :  { %8315 = vst [vmem:[#allocation9 + $0x1e] sm:$0x3] %v8313_v21 }
 0x652   :  { %12343 = dma.done.wait [#allocation6 + $0x1], 65536 }
 0x653   :  { %12344 = vsyncadd [#allocation6 + $0x1], 4294901760  ;;  %v8325_v49 = vld [vmem:[#allocation3 + $0x8] sm:$0xff]  ;;  %v8324_v12 = vld [vmem:[#allocation3] sm:$0xff]  ;;  %vm10632_vm1 = vcmask 1041408  }
 0x654   :  { %v8327_v45 = vld [vmem:[#allocation3 + $0x18] sm:$0xff]  ;;  %9072 = vmatprep.subr.bf16.mxu1 %v8325_v49  ;;  %v8326_v43 = vld [vmem:[#allocation3 + $0x10] sm:$0xff]  ;;  %v8329_v8 = vld [vmem:[#allocation3 + $0x28] sm:$0xff] }
 0x655   :  { %9073 = vmatpush1.bf16.msra.mxu1 %v8324_v12  ;;  %v8328_v22 = vld [vmem:[#allocation3 + $0x20] sm:$0xff]  ;;  %v8331_v58 = vld [vmem:[#allocation3 + $0x38] sm:$0xff]  ;;  %v8330_v11 = vld [vmem:[#allocation3 + $0x30] sm:$0xff] }
 0x656   :  { %9074 = vmatprep.subr.bf16.mxu1 %v8327_v45  ;;  %v15938_v38 = vld [vmem:[#allocation9] sm:$0xff]  ;;  %v8333_v16 = vld [vmem:[#allocation3 + $0x48] sm:$0xff]  ;;  %v8335_v17 = vld [vmem:[#allocation3 + $0x58] sm:$0xff] }
 0x657   :  { %v8851_v24 = vrot.slane %v15938_v38, %v15761_v20  ;;  %v8332_v46 = vld [vmem:[#allocation3 + $0x40] sm:$0xff]  ;;  %v8334_v3 = vld [vmem:[#allocation3 + $0x50] sm:$0xff]  ;;  %v8337_v48 = vld [vmem:[#allocation3 + $0x68] sm:$0xff] }
 0x658   :  { %v8336_v54 = vld [vmem:[#allocation3 + $0x60] sm:$0xff]  ;;  %v8339_v33 = vld [vmem:[#allocation3 + $0x78] sm:$0xff]  ;;  %v8338_v0 = vld [vmem:[#allocation3 + $0x70] sm:$0xff] }
 0x659   :  { %9075 = vmatpush1.bf16.msra.mxu1 %v8326_v43  ;;  %v8859_v1 = vcombine.high %v8851_v24, %v8851_v24  ;;  %v8341_v52 = vld [vmem:[#allocation3 + $0x88] sm:$0xff]  ;;  %v8340_v14 = vld [vmem:[#allocation3 + $0x80] sm:$0xff]  ;;  %v8343_v32 = vld [vmem:[#allocation3 + $0x98] sm:$0xff]  ;;  %v15944_v23 = vrot.slane %v8851_v24, %v15761_v20 }
 0x65a   :  { %9076 = vmatprep.subr.bf16.mxu1 %v8329_v8  ;;  %v8342_v44 = vld [vmem:[#allocation3 + $0x90] sm:$0xff]  ;;  %v8345_v63 = vld [vmem:[#allocation3 + $0xa8] sm:$0xff]  ;;  %v8344_v13 = vld [vmem:[#allocation3 + $0xa0] sm:$0xff] }
 0x65b   :  { %v8881_v7 = vrot.slane %v8859_v1, %v15761_v20  ;;  %v8347_v42 = vld [vmem:[#allocation3 + $0xb8] sm:$0xff]  ;;  %v8346_v19 = vld [vmem:[#allocation3 + $0xb0] sm:$0xff]  ;;  %v8349_v30 = vld [vmem:[#allocation3 + $0xc8] sm:$0xff] }
 0x65c   :  { %v8348_v41 = vld [vmem:[#allocation3 + $0xc0] sm:$0xff]  ;;  %v8351_v4 = vld [vmem:[#allocation3 + $0xd8] sm:$0xff]  ;;  %v8350_v56 = vld [vmem:[#allocation3 + $0xd0] sm:$0xff] }
 0x65d   :  { %9077 = vmatpush1.bf16.msra.mxu1 %v8328_v22  ;;  %9104 = vmatprep.mubr.bf16.mxu1 %v8881_v7  ;;  %v8353_v60 = vld [vmem:[#allocation3 + $0xe8] sm:$0xff]  ;;  %v8352_v26 = vld [vmem:[#allocation3 + $0xe0] sm:$0xff]  ;;  %v8355_v62 = vld [vmem:[#allocation3 + $0xf8] sm:$0xff]  ;;  %v8891_v53 = vcombine.high %v8881_v7, %v8881_v7 }
 0x65e   :  { %9078 = vmatprep.subr.bf16.mxu1 %v8331_v58  ;;  %v8354_v55 = vld [vmem:[#allocation3 + $0xf0] sm:$0xff]  ;;  %v8357_v61 = vld [vmem:[#allocation3 + $0x108] sm:$0xff]  ;;  %v8356_v47 = vld [vmem:[#allocation3 + $0x100] sm:$0xff] }
 0x65f   :  { %v8359_v9 = vld [vmem:[#allocation3 + $0x118] sm:$0xff]  ;;  %v8453_v27 = vld [vmem:[#allocation3 + $0x408] sm:$0xff]  ;;  %v8452_v40 = vld [vmem:[#allocation3 + $0x400] sm:$0xff] }
 0x660   :  { %v8358_v39 = vld [vmem:[#allocation3 + $0x110] sm:$0xff]  ;;  %9236 = vmatprep.subr.bf16.mxu0 %v8453_v27  ;;  %v8361_v34 = vld [vmem:[#allocation3 + $0x128] sm:$0xff]  ;;  %v8455_v59 = vld [vmem:[#allocation3 + $0x418] sm:$0xff] }
 0x661   :  { %9079 = vmatpush1.bf16.msra.mxu1 %v8330_v11  ;;  %9237 = vmatpush1.bf16.msra.mxu0 %v8452_v40  ;;  %v8454_v57 = vld [vmem:[#allocation3 + $0x410] sm:$0xff]  ;;  %v8360_v35 = vld [vmem:[#allocation3 + $0x120] sm:$0xff]  ;;  %v8363_v31 = vld [vmem:[#allocation3 + $0x138] sm:$0xff] }
 0x662   :  { %9080 = vmatprep.subr.bf16.mxu1 %v8333_v16  ;;  %9238 = vmatprep.subr.bf16.mxu0 %v8455_v59  ;;  %v8457_v18 = vld [vmem:[#allocation3 + $0x428] sm:$0xff]  ;;  %v8456_v51 = vld [vmem:[#allocation3 + $0x420] sm:$0xff]  ;;  %v8362_v10 = vld [vmem:[#allocation3 + $0x130] sm:$0xff] }
 0x663   :  { %v8365_v29 = vld [vmem:[#allocation3 + $0x148] sm:$0xff]  ;;  %v8459_v5 = vld [vmem:[#allocation3 + $0x438] sm:$0xff]  ;;  %v8458_v28 = vld [vmem:[#allocation3 + $0x430] sm:$0xff] }
 0x664   :  { %v8364_v37 = vld [vmem:[#allocation3 + $0x140] sm:$0xff]  ;;  %v8367_v6 = vld [vmem:[#allocation3 + $0x158] sm:$0xff]  ;;  %v8461_v2 = vld [vmem:[#allocation3 + $0x448] sm:$0xff] }
 0x665   :  { %9081 = vmatpush1.bf16.msra.mxu1 %v8332_v46  ;;  %9239 = vmatpush1.bf16.msra.mxu0 %v8454_v57  ;;  %v8460_v25 = vld [vmem:[#allocation3 + $0x440] sm:$0xff]  ;;  %v8366_v21 = vld [vmem:[#allocation3 + $0x150] sm:$0xff]  ;;  %v8369_v49 = vld [vmem:[#allocation3 + $0x168] sm:$0xff] }
 0x666   :  { %9082 = vmatprep.subr.bf16.mxu1 %v8335_v17  ;;  %9240 = vmatprep.subr.bf16.mxu0 %v8457_v18  ;;  %v8463_v12 = vld [vmem:[#allocation3 + $0x458] sm:$0xff]  ;;  %v8462_v45 = vld [vmem:[#allocation3 + $0x450] sm:$0xff]  ;;  %v8368_v43 = vld [vmem:[#allocation3 + $0x160] sm:$0xff] }
 0x667   :  { %v8371_v8 = vld [vmem:[#allocation3 + $0x178] sm:$0xff]  ;;  %v8465_v22 = vld [vmem:[#allocation3 + $0x468] sm:$0xff]  ;;  %v8464_v58 = vld [vmem:[#allocation3 + $0x460] sm:$0xff] }
 0x668   :  { %v8370_v11 = vld [vmem:[#allocation3 + $0x170] sm:$0xff]  ;;  %v8373_v24 = vld [vmem:[#allocation3 + $0x188] sm:$0xff]  ;;  %v8467_v16 = vld [vmem:[#allocation3 + $0x478] sm:$0xff] }
 0x669   :  { %9083 = vmatpush1.bf16.msra.mxu1 %v8334_v3  ;;  %9241 = vmatpush1.bf16.msra.mxu0 %v8456_v51  ;;  %v8466_v1 = vld [vmem:[#allocation3 + $0x470] sm:$0xff]  ;;  %v8372_v46 = vld [vmem:[#allocation3 + $0x180] sm:$0xff]  ;;  %v8375_v7 = vld [vmem:[#allocation3 + $0x198] sm:$0xff] }
 0x66a   :  { %9084 = vmatprep.subr.bf16.mxu1 %v8337_v48  ;;  %9242 = vmatprep.subr.bf16.mxu0 %v8459_v5  ;;  %v8469_v17 = vld [vmem:[#allocation3 + $0x488] sm:$0xff]  ;;  %v8468_v3 = vld [vmem:[#allocation3 + $0x480] sm:$0xff]  ;;  %v8374_v48 = vld [vmem:[#allocation3 + $0x190] sm:$0xff] }
 0x66b   :  { %v8481_v27 = vld [vmem:[#allocation3 + $0x4e8] sm:$0xff]  ;;  %v8480_v40 = vld [vmem:[#allocation3 + $0x4e0] sm:$0xff]  ;;  %v8483_v18 = vld [vmem:[#allocation3 + $0x4f8] sm:$0xff] }
 0x66c   :  { %v8389_v59 = vld [vmem:[#allocation3 + $0x208] sm:$0xff]  ;;  %v8482_v51 = vld [vmem:[#allocation3 + $0x4f0] sm:$0xff]  ;;  %v8391_v5 = vld [vmem:[#allocation3 + $0x218] sm:$0xff] }
 0x66d   :  { %9085 = vmatpush1.bf16.msra.mxu1 %v8336_v54  ;;  %9243 = vmatpush1.bf16.msra.mxu0 %v8458_v28  ;;  %v8377_v54 = vld [vmem:[#allocation3 + $0x1a8] sm:$0xff] }
 0x66e   :  { %9086 = vmatprep.subr.bf16.mxu1 %v8339_v33  ;;  %9244 = vmatprep.subr.bf16.mxu0 %v8461_v2  ;;  %v8471_v33 = vld [vmem:[#allocation3 + $0x498] sm:$0xff]  ;;  %v8390_v2 = vld [vmem:[#allocation3 + $0x210] sm:$0xff] }
 0x671   :  { %9087 = vmatpush1.bf16.msra.mxu1 %v8338_v0  ;;  %9245 = vmatpush1.bf16.msra.mxu0 %v8460_v25  ;;  %v8470_v0 = vld [vmem:[#allocation3 + $0x490] sm:$0xff]  ;;  %v8393_v25 = vld [vmem:[#allocation3 + $0x228] sm:$0xff] }
 0x672   :  { %9088 = vmatprep.subr.bf16.mxu1 %v8341_v52  ;;  %9246 = vmatprep.subr.bf16.mxu0 %v8463_v12  ;;  %v8376_v52 = vld [vmem:[#allocation3 + $0x1a0] sm:$0xff] }
 0x673   :  { %v8392_v12 = vld [vmem:[#allocation3 + $0x220] sm:$0xff] }
 0x675   :  { %9089 = vmatpush1.bf16.msra.mxu1 %v8340_v14  ;;  %9247 = vmatpush1.bf16.msra.mxu0 %v8462_v45  ;;  %v8379_v14 = vld [vmem:[#allocation3 + $0x1b8] sm:$0xff] }
 0x676   :  { %9090 = vmatprep.subr.bf16.mxu1 %v8343_v32  ;;  %9248 = vmatprep.subr.bf16.mxu0 %v8465_v22  ;;  %v8473_v32 = vld [vmem:[#allocation3 + $0x4a8] sm:$0xff]  ;;  %v8395_v45 = vld [vmem:[#allocation3 + $0x238] sm:$0xff]  ;;  %v8394_v22 = vld [vmem:[#allocation3 + $0x230] sm:$0xff] }
 0x679   :  { %9091 = vmatpush1.bf16.msra.mxu1 %v8342_v44  ;;  %9249 = vmatpush1.bf16.msra.mxu0 %v8464_v58  ;;  %v8472_v44 = vld [vmem:[#allocation3 + $0x4a0] sm:$0xff]  ;;  %v8397_v58 = vld [vmem:[#allocation3 + $0x248] sm:$0xff] }
 0x67a   :  { %9092 = vmatprep.subr.bf16.mxu1 %v8345_v63  ;;  %9250 = vmatprep.subr.bf16.mxu0 %v8467_v16  ;;  %v8378_v63 = vld [vmem:[#allocation3 + $0x1b0] sm:$0xff]  ;;  %v8396_v16 = vld [vmem:[#allocation3 + $0x240] sm:$0xff] }
 0x67d   :  { %9093 = vmatpush1.bf16.msra.mxu1 %v8344_v13  ;;  %9251 = vmatpush1.bf16.msra.mxu0 %v8466_v1  ;;  %v8381_v13 = vld [vmem:[#allocation3 + $0x1c8] sm:$0xff]  ;;  %v8399_v1 = vld [vmem:[#allocation3 + $0x258] sm:$0xff] }
 0x67e   :  { %9094 = vmatprep.subr.bf16.mxu1 %v8347_v42  ;;  %9252 = vmatprep.subr.bf16.mxu0 %v8469_v17  ;;  %v8475_v42 = vld [vmem:[#allocation3 + $0x4b8] sm:$0xff]  ;;  %v8524_v17 = vld [vmem:[#allocation3 + $0x640] sm:$0xff] }
 0x681   :  { %9095 = vmatpush1.bf16.msra.mxu1 %v8346_v19  ;;  %9253 = vmatpush1.bf16.msra.mxu0 %v8468_v3  ;;  %v8474_v19 = vld [vmem:[#allocation3 + $0x4b0] sm:$0xff]  ;;  %v8401_v3 = vld [vmem:[#allocation3 + $0x268] sm:$0xff] }
 0x682   :  { %9096 = vmatprep.subr.bf16.mxu1 %v8349_v30  ;;  %9254 = vmatprep.subr.bf16.mxu0 %v8471_v33  ;;  %v8380_v30 = vld [vmem:[#allocation3 + $0x1c0] sm:$0xff]  ;;  %v8526_v33 = vld [vmem:[#allocation3 + $0x650] sm:$0xff] }
 0x685   :  { %9097 = vmatpush1.bf16.msra.mxu1 %v8348_v41  ;;  %9255 = vmatpush1.bf16.msra.mxu0 %v8470_v0  ;;  %v8383_v41 = vld [vmem:[#allocation3 + $0x1d8] sm:$0xff] }
 0x686   :  { %9098 = vmatprep.subr.bf16.mxu1 %v8351_v4  ;;  %9256 = vmatprep.subr.bf16.mxu0 %v8473_v32  ;;  %v8844_v4 = vcombine.high %v15938_v38, %v15938_v38  ;;  %v8403_v0 = vld [vmem:[#allocation3 + $0x278] sm:$0xff]  ;;  %v8402_v32 = vld [vmem:[#allocation3 + $0x270] sm:$0xff] }
 0x689   :  { %9099 = vmatpush1.bf16.msra.mxu1 %v8350_v56  ;;  %9257 = vmatpush1.bf16.msra.mxu0 %v8472_v44  ;;  %v8477_v56 = vld [vmem:[#allocation3 + $0x4c8] sm:$0xff] }
 0x68a   :  { %9100 = vmatprep.subr.bf16.mxu1 %v8353_v60  ;;  %9258 = vmatprep.subr.bf16.mxu0 %v8475_v42  ;;  %v8476_v60 = vld [vmem:[#allocation3 + $0x4c0] sm:$0xff]  ;;  %v8405_v44 = vld [vmem:[#allocation3 + $0x288] sm:$0xff] }
 0x68b   :  { %v8404_v42 = vld [vmem:[#allocation3 + $0x280] sm:$0xff] }
 0x68d   :  { %9101 = vmatpush1.bf16.msra.mxu1 %v8352_v26  ;;  %9259 = vmatpush1.bf16.msra.mxu0 %v8474_v19  ;;  %v8382_v26 = vld [vmem:[#allocation3 + $0x1d0] sm:$0xff]  ;;  %v8407_v19 = vld [vmem:[#allocation3 + $0x298] sm:$0xff] }
 0x68e   :  { %9102 = vmatprep.subr.bf16.mxu1 %v8355_v62  ;;  %9260 = vmatprep.subr.bf16.mxu0 %v8477_v56  ;;  %v8385_v62 = vld [vmem:[#allocation3 + $0x1e8] sm:$0xff] }
 0x68f   :  { %v8409_v56 = vld [vmem:[#allocation3 + $0x2a8] sm:$0xff] }
 0x691   :  { %9103 = vmatpush1.bf16.msra.mxu1 %v8354_v55  ;;  %9261 = vmatpush1.bf16.msra.mxu0 %v8476_v60  ;;  %v15950_v55 = vrot.slane %v8844_v4, %v15761_v20  ;;  %v8406_v4 = vld [vmem:[#allocation3 + $0x290] sm:$0xff]  ;;  %v8535_v60 = vld [vmem:[#allocation3 + $0x698] sm:$0xff] }
 0x692   :  { %9113 = vmatprep.subr.bf16.mxu1 %v8357_v61  ;;  %v8479_v61 = vld [vmem:[#allocation3 + $0x4d8] sm:$0xff] }
 0x693   :  { %9262 = vmatprep.subr.bf16.mxu0 %v8479_v61  ;;  %v8860_v38 = vcombine.high %v15950_v55, %v15950_v55  ;;  %v8411_v61 = vld [vmem:[#allocation3 + $0x2b8] sm:$0xff] }
 0x694   :  { %9105 = vmatmul.mubr.bf16.vlgmr.msra.gmra.mrb[32].mxu1 %v15944_v23 }
 0x695   :  { %9114 = vmatpush1.bf16.msra.mxu1 %v8356_v47  ;;  %9145 = vmatprep.mubr.bf16.mxu1 %v8891_v53  ;;  %v8478_v53 = vld [vmem:[#allocation3 + $0x4d0] sm:$0xff]  ;;  %v8384_v47 = vld [vmem:[#allocation3 + $0x1e0] sm:$0xff] }
 0x696   :  { %9115 = vmatprep.subr.bf16.mxu1 %v8359_v9  ;;  %v8387_v9 = vld [vmem:[#allocation3 + $0x1f8] sm:$0xff]  ;;  %9263 = vmatpush1.bf16.msra.mxu0 %v8478_v53  ;;  %v8537_v53 = vld [vmem:[#allocation3 + $0x6a8] sm:$0xff] }
 0x697   :  { %9264 = vmatprep.subr.bf16.mxu0 %v8481_v27  ;;  %v8539_v27 = vld [vmem:[#allocation3 + $0x6b8] sm:$0xff] }
 0x699   :  { %9116 = vmatpush1.bf16.msra.mxu1 %v8358_v39  ;;  %v8386_v39 = vld [vmem:[#allocation3 + $0x1f0] sm:$0xff] }
 0x69a   :  { %9117 = vmatprep.subr.bf16.mxu1 %v8361_v34  ;;  %v15954_v34 = vld [vmem:[#allocation9 + $0x8] sm:$0xff]  ;;  %9265 = vmatpush1.bf16.msra.mxu0 %v8480_v40  ;;  %v8538_v40 = vld [vmem:[#allocation3 + $0x6b0] sm:$0xff] }
 0x69b   :  { %v8900_v57 = vrot.slane %v15954_v34, %v15761_v20  ;;  %9266 = vmatprep.subr.bf16.mxu0 %v8483_v18  ;;  %v8414_v18 = vld [vmem:[#allocation3 + $0x2d0] sm:$0xff] }
 0x69d   :  { %9118 = vmatpush1.bf16.msra.mxu1 %v8360_v35  ;;  %v8889_v35 = vcombine.high %v15944_v23, %v15944_v23  ;;  %v8517_v23 = vld [vmem:[#allocation3 + $0x608] sm:$0xff] }
 0x69e   :  { %9119 = vmatprep.subr.bf16.mxu1 %v8363_v31  ;;  %v15961_v31 = vrot.slane %v8860_v38, %v15761_v20  ;;  %9267 = vmatpush1.bf16.msra.mxu0 %v8482_v51  ;;  %v8413_v38 = vld [vmem:[#allocation3 + $0x2c8] sm:$0xff] }
 0x69f   :  { %9318 = vmatprep.subr.bf16.mxu0 %v8517_v23  ;;  %v8417_v51 = vld [vmem:[#allocation3 + $0x2e8] sm:$0xff]  ;;  %v8419_v23 = vld [vmem:[#allocation3 + $0x2f8] sm:$0xff] }
 0x6a1   :  { %9120 = vmatpush1.bf16.msra.mxu1 %v8362_v10  ;;  %v8908_v10 = vcombine.high %v8900_v57, %v8900_v57 }
 0x6a2   :  { %9121 = vmatprep.subr.bf16.mxu1 %v8365_v29  ;;  %v8388_v29 = vld [vmem:[#allocation3 + $0x200] sm:$0xff] }
 0x6a3   :  { %v15964_v28 = vrot.slane %v8908_v10, %v15761_v20  ;;  %v8543_v10 = vld [vmem:[#allocation3 + $0x6d8] sm:$0xff] }
 0x6a5   :  { %9122 = vmatpush1.bf16.msra.mxu1 %v8364_v37  ;;  %v15967_v37 = vrot.slane %v8900_v57, %v15761_v20  ;;  %9268 = vmatprep.mubr.bf16.mxu0 %v15964_v28  ;;  %v8541_v57 = vld [vmem:[#allocation3 + $0x6c8] sm:$0xff] }
 0x6a6   :  { %9123 = vmatprep.subr.bf16.mxu1 %v8367_v6  ;;  %v8516_v6 = vld [vmem:[#allocation3 + $0x600] sm:$0xff] }
 0x6a7   :  { %9269 = vmatmul.mubr.bf16.vlgmr.msra.gmra.mrb[40].mxu0 %v15967_v37 }
 0x6a8   :  { %9319 = vmatpush1.bf16.msra.mxu0 %v8516_v6  ;;  %v8893_v6 = vcombine.high %v15954_v34, %v15954_v34  ;;  %v8547_v34 = vld [vmem:[#allocation3 + $0x6f8] sm:$0xff] }
 0x6a9   :  { %9124 = vmatpush1.bf16.msra.mxu1 %v8366_v21  ;;  %v8519_v21 = vld [vmem:[#allocation3 + $0x618] sm:$0xff] }
 0x6aa   :  { %9125 = vmatprep.subr.bf16.mxu1 %v8369_v49  ;;  %v8518_v49 = vld [vmem:[#allocation3 + $0x610] sm:$0xff]  ;;  %9320 = vmatprep.subr.bf16.mxu0 %v8519_v21 }
 0x6ab   :  { %v8418_v21 = vld [vmem:[#allocation3 + $0x2f0] sm:$0xff] }
 0x6ac   :  { %9321 = vmatpush1.bf16.msra.mxu0 %v8518_v49  ;;  %v8421_v49 = vld [vmem:[#allocation3 + $0x308] sm:$0xff] }
 0x6ad   :  { %9126 = vmatpush1.bf16.msra.mxu1 %v8368_v43  ;;  %v8521_v43 = vld [vmem:[#allocation3 + $0x628] sm:$0xff] }
 0x6ae   :  { %9127 = vmatprep.subr.bf16.mxu1 %v8371_v8  ;;  %v8520_v8 = vld [vmem:[#allocation3 + $0x620] sm:$0xff]  ;;  %9322 = vmatprep.subr.bf16.mxu0 %v8521_v43  ;;  %v8892_v43 = vcombine.high %v15961_v31, %v15961_v31 }
 0x6b0   :  { %9323 = vmatpush1.bf16.msra.mxu0 %v8520_v8  ;;  %v8546_v8 = vld [vmem:[#allocation3 + $0x6f0] sm:$0xff] }
 0x6b1   :  { %9128 = vmatpush1.bf16.msra.mxu1 %v8370_v11  ;;  %v8523_v11 = vld [vmem:[#allocation3 + $0x638] sm:$0xff] }
 0x6b2   :  { %9129 = vmatprep.subr.bf16.mxu1 %v8373_v24  ;;  %v8522_v24 = vld [vmem:[#allocation3 + $0x630] sm:$0xff]  ;;  %9324 = vmatprep.subr.bf16.mxu0 %v8523_v11  ;;  %v8423_v11 = vld [vmem:[#allocation3 + $0x318] sm:$0xff] }
 0x6b4   :  { %9325 = vmatpush1.bf16.msra.mxu0 %v8522_v24 }
 0x6b5   :  { %9130 = vmatpush1.bf16.msra.mxu1 %v8372_v46  ;;  %v8525_v46 = vld [vmem:[#allocation3 + $0x648] sm:$0xff] }
 0x6b6   :  { %9131 = vmatprep.subr.bf16.mxu1 %v8375_v7  ;;  %v8398_v7 = vld [vmem:[#allocation3 + $0x250] sm:$0xff]  ;;  %9326 = vmatprep.subr.bf16.mxu0 %v8525_v46  ;;  %v8425_v46 = vld [vmem:[#allocation3 + $0x328] sm:$0xff] }
 0x6b8   :  { %9327 = vmatpush1.bf16.msra.mxu0 %v8524_v17  ;;  %v8582_v17 = vld [vmem:[#allocation3 + $0x810] sm:$0xff] }
 0x6b9   :  { %9132 = vmatpush1.bf16.msra.mxu1 %v8374_v48  ;;  %v8527_v48 = vld [vmem:[#allocation3 + $0x658] sm:$0xff] }
 0x6ba   :  { %9133 = vmatprep.subr.bf16.mxu1 %v8377_v54  ;;  %v8400_v54 = vld [vmem:[#allocation3 + $0x260] sm:$0xff]  ;;  %9328 = vmatprep.subr.bf16.mxu0 %v8527_v48  ;;  %v8427_v48 = vld [vmem:[#allocation3 + $0x338] sm:$0xff] }
 0x6bc   :  { %9329 = vmatpush1.bf16.msra.mxu0 %v8526_v33  ;;  %v8584_v33 = vld [vmem:[#allocation3 + $0x820] sm:$0xff] }
 0x6bd   :  { %9134 = vmatpush1.bf16.msra.mxu1 %v8376_v52  ;;  %v8529_v52 = vld [vmem:[#allocation3 + $0x668] sm:$0xff] }
 0x6be   :  { %9135 = vmatprep.subr.bf16.mxu1 %v8379_v14  ;;  %v8528_v14 = vld [vmem:[#allocation3 + $0x660] sm:$0xff]  ;;  %9330 = vmatprep.subr.bf16.mxu0 %v8529_v52  ;;  %v8429_v52 = vld [vmem:[#allocation3 + $0x348] sm:$0xff] }
 0x6c0   :  { %9331 = vmatpush1.bf16.msra.mxu0 %v8528_v14  ;;  %v8587_v14 = vld [vmem:[#allocation3 + $0x838] sm:$0xff] }
 0x6c1   :  { %9136 = vmatpush1.bf16.msra.mxu1 %v8378_v63  ;;  %v8531_v63 = vld [vmem:[#allocation3 + $0x678] sm:$0xff] }
 0x6c2   :  { %9137 = vmatprep.subr.bf16.mxu1 %v8381_v13  ;;  %v8530_v13 = vld [vmem:[#allocation3 + $0x670] sm:$0xff]  ;;  %9332 = vmatprep.subr.bf16.mxu0 %v8531_v63  ;;  %v8431_v63 = vld [vmem:[#allocation3 + $0x358] sm:$0xff] }
 0x6c4   :  { %9333 = vmatpush1.bf16.msra.mxu0 %v8530_v13  ;;  %v8589_v13 = vld [vmem:[#allocation3 + $0x848] sm:$0xff] }
 0x6c5   :  { %9138 = vmatpush1.bf16.msra.mxu1 %v8380_v30  ;;  %v8533_v30 = vld [vmem:[#allocation3 + $0x688] sm:$0xff] }
 0x6c6   :  { %9139 = vmatprep.subr.bf16.mxu1 %v8383_v41  ;;  %v8532_v41 = vld [vmem:[#allocation3 + $0x680] sm:$0xff]  ;;  %9334 = vmatprep.subr.bf16.mxu0 %v8533_v30  ;;  %v8433_v30 = vld [vmem:[#allocation3 + $0x368] sm:$0xff] }
 0x6c8   :  { %9335 = vmatpush1.bf16.msra.mxu0 %v8532_v41  ;;  %v8591_v41 = vld [vmem:[#allocation3 + $0x858] sm:$0xff] }
 0x6c9   :  { %9140 = vmatpush1.bf16.msra.mxu1 %v8382_v26  ;;  %v8534_v26 = vld [vmem:[#allocation3 + $0x690] sm:$0xff]  ;;  %9336 = vmatprep.subr.bf16.mxu0 %v8535_v60  ;;  %v8435_v60 = vld [vmem:[#allocation3 + $0x378] sm:$0xff] }
 0x6ca   :  { %9141 = vmatprep.subr.bf16.mxu1 %v8385_v62  ;;  %v8408_v62 = vld [vmem:[#allocation3 + $0x2a0] sm:$0xff] }
 0x6cc   :  { %9337 = vmatpush1.bf16.msra.mxu0 %v8534_v26  ;;  %v8593_v26 = vld [vmem:[#allocation3 + $0x868] sm:$0xff] }
 0x6cd   :  { %9142 = vmatpush1.bf16.msra.mxu1 %v8384_v47  ;;  %v8536_v47 = vld [vmem:[#allocation3 + $0x6a0] sm:$0xff]  ;;  %9338 = vmatprep.subr.bf16.mxu0 %v8537_v53  ;;  %v8437_v53 = vld [vmem:[#allocation3 + $0x388] sm:$0xff] }
 0x6ce   :  { %9143 = vmatprep.subr.bf16.mxu1 %v8387_v9  ;;  %v8410_v9 = vld [vmem:[#allocation3 + $0x2b0] sm:$0xff] }
 0x6d0   :  { %9339 = vmatpush1.bf16.msra.mxu0 %v8536_v47  ;;  %v8595_v47 = vld [vmem:[#allocation3 + $0x878] sm:$0xff] }
 0x6d1   :  { %9144 = vmatpush1.bf16.msra.mxu1 %v8386_v39  ;;  %v8412_v39 = vld [vmem:[#allocation3 + $0x2c0] sm:$0xff]  ;;  %9340 = vmatprep.subr.bf16.mxu0 %v8539_v27  ;;  %v8439_v27 = vld [vmem:[#allocation3 + $0x398] sm:$0xff] }
 0x6d2   :  { %9154 = vmatprep.subr.bf16.mxu1 %v8389_v59  ;;  %v8415_v59 = vld [vmem:[#allocation3 + $0x2d8] sm:$0xff] }
 0x6d4   :  { %9146 = vmatmul.mubr.bf16.vlgmr.msra.gmra.mrb[36].mxu1 %v8889_v35  ;;  %9341 = vmatpush1.bf16.msra.mxu0 %v8538_v40  ;;  %v8540_v35 = vld [vmem:[#allocation3 + $0x6c0] sm:$0xff]  ;;  %v8597_v40 = vld [vmem:[#allocation3 + $0x888] sm:$0xff] }
 0x6d5   :  { %9155 = vmatpush1.bf16.msra.mxu1 %v8388_v29  ;;  %9186 = vmatprep.mubr.bf16.mxu1 %v15961_v31  ;;  %v8542_v29 = vld [vmem:[#allocation3 + $0x6d0] sm:$0xff]  ;;  %v8580_v31 = vld [vmem:[#allocation3 + $0x800] sm:$0xff] }
 0x6d6   :  { %9156 = vmatprep.subr.bf16.mxu1 %v8391_v5  ;;  %9342 = vmatprep.subr.bf16.mxu0 %v8541_v57  ;;  %v8416_v5 = vld [vmem:[#allocation3 + $0x2e0] sm:$0xff]  ;;  %v8441_v57 = vld [vmem:[#allocation3 + $0x3a8] sm:$0xff] }
 0x6d8   :  { %9343 = vmatpush1.bf16.msra.mxu0 %v8540_v35  ;;  %v8599_v35 = vld [vmem:[#allocation3 + $0x898] sm:$0xff] }
 0x6d9   :  { %9157 = vmatpush1.bf16.msra.mxu1 %v8390_v2  ;;  %9344 = vmatprep.subr.bf16.mxu0 %v8543_v10  ;;  %v8545_v2 = vld [vmem:[#allocation3 + $0x6e8] sm:$0xff]  ;;  %v8443_v10 = vld [vmem:[#allocation3 + $0x3b8] sm:$0xff] }
 0x6da   :  { %9158 = vmatprep.subr.bf16.mxu1 %v8393_v25  ;;  %v8544_v25 = vld [vmem:[#allocation3 + $0x6e0] sm:$0xff] }
 0x6dc   :  { %9345 = vmatpush1.bf16.msra.mxu0 %v8542_v29  ;;  %v8601_v29 = vld [vmem:[#allocation3 + $0x8a8] sm:$0xff] }
 0x6dd   :  { %9159 = vmatpush1.bf16.msra.mxu1 %v8392_v12  ;;  %9346 = vmatprep.subr.bf16.mxu0 %v8545_v2  ;;  %v8907_v12 = vrot.slane %v8893_v6, %v15761_v20  ;;  %v8445_v6 = vld [vmem:[#allocation3 + $0x3c8] sm:$0xff]  ;;  %v8603_v2 = vld [vmem:[#allocation3 + $0x8b8] sm:$0xff] }
 0x6de   :  { %9160 = vmatprep.subr.bf16.mxu1 %v8395_v45  ;;  %v15977_v45 = vrot.slane %v15950_v55, %v15761_v20 }
 0x6df   :  { %v15986_v55 = vrot.slane %v8907_v12, %v15761_v20 }
 0x6e0   :  { %9347 = vmatpush1.bf16.msra.mxu0 %v8544_v25  ;;  %v8602_v25 = vld [vmem:[#allocation3 + $0x8b0] sm:$0xff] }
 0x6e1   :  { %9161 = vmatpush1.bf16.msra.mxu1 %v8394_v22  ;;  %v8909_v22 = vcombine.high %v8907_v12, %v8907_v12  ;;  %9348 = vmatprep.subr.bf16.mxu0 %v8547_v34  ;;  %v8605_v12 = vld [vmem:[#allocation3 + $0x8c8] sm:$0xff]  ;;  %v8446_v34 = vld [vmem:[#allocation3 + $0x3d0] sm:$0xff] }
 0x6e2   :  { %9162 = vmatprep.subr.bf16.mxu1 %v8397_v58  ;;  %v8420_v58 = vld [vmem:[#allocation3 + $0x300] sm:$0xff] }
 0x6e3   :  { %v15982_v24 = vrot.slane %v8909_v22, %v15761_v20  ;;  %v8607_v22 = vld [vmem:[#allocation3 + $0x8d8] sm:$0xff] }
 0x6e4   :  { %9349 = vmatpush1.bf16.msra.mxu0 %v8546_v8  ;;  %v8449_v8 = vld [vmem:[#allocation3 + $0x3e8] sm:$0xff] }
 0x6e5   :  { %9163 = vmatpush1.bf16.msra.mxu1 %v8396_v16  ;;  %v8581_v16 = vld [vmem:[#allocation3 + $0x808] sm:$0xff]  ;;  %9350 = vmatprep.mubr.bf16.mxu0 %v15982_v24 }
 0x6e6   :  { %9164 = vmatprep.subr.bf16.mxu1 %v8399_v1  ;;  %v8422_v1 = vld [vmem:[#allocation3 + $0x310] sm:$0xff]  ;;  %9400 = vmatprep.subr.bf16.mxu0 %v8581_v16  ;;  %v8451_v16 = vld [vmem:[#allocation3 + $0x3f8] sm:$0xff] }
 0x6e7   :  { %9351 = vmatmul.mubr.bf16.vlgmr.msra.gmra.mrb[44].mxu0 %v15986_v55 }
 0x6e8   :  { %9401 = vmatpush1.bf16.msra.mxu0 %v8580_v31  ;;  %v8609_v31 = vld [vmem:[#allocation3 + $0x8e8] sm:$0xff] }
 0x6e9   :  { %9165 = vmatpush1.bf16.msra.mxu1 %v8398_v7  ;;  %v8583_v7 = vld [vmem:[#allocation3 + $0x818] sm:$0xff] }
 0x6ea   :  { %9166 = vmatprep.subr.bf16.mxu1 %v8401_v3  ;;  %v8424_v3 = vld [vmem:[#allocation3 + $0x320] sm:$0xff]  ;;  %9402 = vmatprep.subr.bf16.mxu0 %v8583_v7  ;;  %v15990_v7 = vld [vmem:[#allocation9 + $0x10] sm:$0xff] }
 0x6ec   :  { %9403 = vmatpush1.bf16.msra.mxu0 %v8582_v17  ;;  %v8485_v17 = vld [vmem:[#allocation3 + $0x508] sm:$0xff] }
 0x6ed   :  { %9167 = vmatpush1.bf16.msra.mxu1 %v8400_v54  ;;  %v8585_v54 = vld [vmem:[#allocation3 + $0x828] sm:$0xff] }
 0x6ee   :  { %9168 = vmatprep.subr.bf16.mxu1 %v8403_v0  ;;  %v8426_v0 = vld [vmem:[#allocation3 + $0x330] sm:$0xff]  ;;  %9404 = vmatprep.subr.bf16.mxu0 %v8585_v54  ;;  %v8940_v54 = vcombine.high %v15964_v28, %v15964_v28 }
 0x6ef   :  { %v8486_v28 = vld [vmem:[#allocation3 + $0x510] sm:$0xff] }
 0x6f0   :  { %9405 = vmatpush1.bf16.msra.mxu0 %v8584_v33  ;;  %v8611_v33 = vld [vmem:[#allocation3 + $0x8f8] sm:$0xff] }
 0x6f1   :  { %9169 = vmatpush1.bf16.msra.mxu1 %v8402_v32  ;;  %v8586_v32 = vld [vmem:[#allocation3 + $0x830] sm:$0xff]  ;;  %9406 = vmatprep.subr.bf16.mxu0 %v8587_v14  ;;  %v8484_v14 = vld [vmem:[#allocation3 + $0x500] sm:$0xff] }
 0x6f2   :  { %9170 = vmatprep.subr.bf16.mxu1 %v8405_v44  ;;  %v8428_v44 = vld [vmem:[#allocation3 + $0x340] sm:$0xff] }
 0x6f4   :  { %9407 = vmatpush1.bf16.msra.mxu0 %v8586_v32  ;;  %v8487_v32 = vld [vmem:[#allocation3 + $0x518] sm:$0xff] }
 0x6f5   :  { %9171 = vmatpush1.bf16.msra.mxu1 %v8404_v42  ;;  %v8430_v42 = vld [vmem:[#allocation3 + $0x350] sm:$0xff]  ;;  %9408 = vmatprep.subr.bf16.mxu0 %v8589_v13  ;;  %v8644_v13 = vld [vmem:[#allocation3 + $0xa00] sm:$0xff] }
 0x6f6   :  { %9172 = vmatprep.subr.bf16.mxu1 %v8407_v19  ;;  %v8588_v19 = vld [vmem:[#allocation3 + $0x840] sm:$0xff] }
 0x6f8   :  { %9409 = vmatpush1.bf16.msra.mxu0 %v8588_v19  ;;  %v8647_v19 = vld [vmem:[#allocation3 + $0xa18] sm:$0xff] }
 0x6f9   :  { %9173 = vmatpush1.bf16.msra.mxu1 %v8406_v4  ;;  %v8432_v4 = vld [vmem:[#allocation3 + $0x360] sm:$0xff]  ;;  %9410 = vmatprep.subr.bf16.mxu0 %v8591_v41 }
 0x6fa   :  { %9174 = vmatprep.subr.bf16.mxu1 %v8409_v56  ;;  %v8590_v56 = vld [vmem:[#allocation3 + $0x850] sm:$0xff]  ;;  %v8488_v41 = vld [vmem:[#allocation3 + $0x520] sm:$0xff] }
 0x6fc   :  { %9411 = vmatpush1.bf16.msra.mxu0 %v8590_v56  ;;  %v8649_v56 = vld [vmem:[#allocation3 + $0xa28] sm:$0xff] }
 0x6fd   :  { %9175 = vmatpush1.bf16.msra.mxu1 %v8408_v62  ;;  %v8592_v62 = vld [vmem:[#allocation3 + $0x860] sm:$0xff]  ;;  %9412 = vmatprep.subr.bf16.mxu0 %v8593_v26  ;;  %v8490_v26 = vld [vmem:[#allocation3 + $0x530] sm:$0xff] }
 0x6fe   :  { %9176 = vmatprep.subr.bf16.mxu1 %v8411_v61  ;;  %v8434_v61 = vld [vmem:[#allocation3 + $0x370] sm:$0xff] }
 0x700   :  { %9413 = vmatpush1.bf16.msra.mxu0 %v8592_v62  ;;  %v8493_v62 = vld [vmem:[#allocation3 + $0x548] sm:$0xff] }
 0x701   :  { %9177 = vmatpush1.bf16.msra.mxu1 %v8410_v9  ;;  %v8594_v9 = vld [vmem:[#allocation3 + $0x870] sm:$0xff]  ;;  %9414 = vmatprep.subr.bf16.mxu0 %v8595_v47  ;;  %v8492_v47 = vld [vmem:[#allocation3 + $0x540] sm:$0xff] }
 0x702   :  { %9178 = vmatprep.subr.bf16.mxu1 %v8413_v38  ;;  %v8436_v38 = vld [vmem:[#allocation3 + $0x380] sm:$0xff] }
 0x704   :  { %9415 = vmatpush1.bf16.msra.mxu0 %v8594_v9  ;;  %v8495_v9 = vld [vmem:[#allocation3 + $0x558] sm:$0xff] }
 0x705   :  { %9179 = vmatpush1.bf16.msra.mxu1 %v8412_v39  ;;  %v8596_v39 = vld [vmem:[#allocation3 + $0x880] sm:$0xff]  ;;  %9416 = vmatprep.subr.bf16.mxu0 %v8597_v40 }
 0x706   :  { %9180 = vmatprep.subr.bf16.mxu1 %v8415_v59  ;;  %v8438_v59 = vld [vmem:[#allocation3 + $0x390] sm:$0xff]  ;;  %v8652_v40 = vld [vmem:[#allocation3 + $0xa40] sm:$0xff] }
 0x708   :  { %9417 = vmatpush1.bf16.msra.mxu0 %v8596_v39 }
 0x709   :  { %9181 = vmatpush1.bf16.msra.mxu1 %v8414_v18  ;;  %v8598_v18 = vld [vmem:[#allocation3 + $0x890] sm:$0xff]  ;;  %9418 = vmatprep.subr.bf16.mxu0 %v8599_v35 }
 0x70a   :  { %9182 = vmatprep.subr.bf16.mxu1 %v8417_v51  ;;  %v8440_v51 = vld [vmem:[#allocation3 + $0x3a0] sm:$0xff] }
 0x70c   :  { %9419 = vmatpush1.bf16.msra.mxu0 %v8598_v18  ;;  %v8655_v18 = vld [vmem:[#allocation3 + $0xa58] sm:$0xff] }
 0x70d   :  { %9183 = vmatpush1.bf16.msra.mxu1 %v8416_v5  ;;  %v8600_v5 = vld [vmem:[#allocation3 + $0x8a0] sm:$0xff]  ;;  %9420 = vmatprep.subr.bf16.mxu0 %v8601_v29  ;;  %v8654_v29 = vld [vmem:[#allocation3 + $0xa50] sm:$0xff] }
 0x70e   :  { %9184 = vmatprep.subr.bf16.mxu1 %v8419_v23  ;;  %v8442_v23 = vld [vmem:[#allocation3 + $0x3b0] sm:$0xff] }
 0x710   :  { %9421 = vmatpush1.bf16.msra.mxu0 %v8600_v5  ;;  %v8499_v5 = vld [vmem:[#allocation3 + $0x578] sm:$0xff] }
 0x711   :  { %9185 = vmatpush1.bf16.msra.mxu1 %v8418_v21  ;;  %v8444_v21 = vld [vmem:[#allocation3 + $0x3c0] sm:$0xff]  ;;  %9422 = vmatprep.subr.bf16.mxu0 %v8603_v2  ;;  %v8498_v2 = vld [vmem:[#allocation3 + $0x570] sm:$0xff] }
 0x712   :  { %9195 = vmatprep.subr.bf16.mxu1 %v8421_v49  ;;  %v8447_v49 = vld [vmem:[#allocation3 + $0x3d8] sm:$0xff] }
 0x714   :  { %9187 = vmatmul.mubr.bf16.vlgmr.msra.gmra.mrb[40].mxu1 %v15977_v45  ;;  %9423 = vmatpush1.bf16.msra.mxu0 %v8602_v25  ;;  %v8501_v25 = vld [vmem:[#allocation3 + $0x588] sm:$0xff] }
 0x715   :  { %9196 = vmatpush1.bf16.msra.mxu1 %v8420_v58  ;;  %9227 = vmatprep.mubr.bf16.mxu1 %v8892_v43  ;;  %v8604_v43 = vld [vmem:[#allocation3 + $0x8c0] sm:$0xff]  ;;  %v8606_v58 = vld [vmem:[#allocation3 + $0x8d0] sm:$0xff] }
 0x716   :  { %9197 = vmatprep.subr.bf16.mxu1 %v8423_v11  ;;  %9424 = vmatprep.subr.bf16.mxu0 %v8605_v12  ;;  %v8448_v11 = vld [vmem:[#allocation3 + $0x3e0] sm:$0xff] }
 0x717   :  { %v8500_v12 = vld [vmem:[#allocation3 + $0x580] sm:$0xff] }
 0x718   :  { %9425 = vmatpush1.bf16.msra.mxu0 %v8604_v43  ;;  %v8503_v43 = vld [vmem:[#allocation3 + $0x598] sm:$0xff] }
 0x719   :  { %9198 = vmatpush1.bf16.msra.mxu1 %v8422_v1  ;;  %9426 = vmatprep.subr.bf16.mxu0 %v8607_v22  ;;  %v8608_v1 = vld [vmem:[#allocation3 + $0x8e0] sm:$0xff]  ;;  %v8502_v22 = vld [vmem:[#allocation3 + $0x590] sm:$0xff] }
 0x71a   :  { %9199 = vmatprep.subr.bf16.mxu1 %v8425_v46  ;;  %v8450_v46 = vld [vmem:[#allocation3 + $0x3f0] sm:$0xff] }
 0x71c   :  { %9427 = vmatpush1.bf16.msra.mxu0 %v8606_v58  ;;  %v8505_v58 = vld [vmem:[#allocation3 + $0x5a8] sm:$0xff] }
 0x71d   :  { %9200 = vmatpush1.bf16.msra.mxu1 %v8424_v3  ;;  %9428 = vmatprep.subr.bf16.mxu0 %v8609_v31  ;;  %v8949_v3 = vrot.slane %v15990_v7, %v15761_v20  ;;  %v8504_v31 = vld [vmem:[#allocation3 + $0x5a0] sm:$0xff] }
 0x71e   :  { %9201 = vmatprep.subr.bf16.mxu1 %v8427_v48  ;;  %v8890_v48 = vcombine.high %v15977_v45, %v15977_v45  ;;  %v8645_v45 = vld [vmem:[#allocation3 + $0xa08] sm:$0xff] }
 0x720   :  { %9429 = vmatpush1.bf16.msra.mxu0 %v8608_v1  ;;  %v8507_v1 = vld [vmem:[#allocation3 + $0x5b8] sm:$0xff] }
 0x721   :  { %9202 = vmatpush1.bf16.msra.mxu1 %v8426_v0  ;;  %v8610_v0 = vld [vmem:[#allocation3 + $0x8f0] sm:$0xff]  ;;  %9430 = vmatprep.subr.bf16.mxu0 %v8611_v33 }
 0x722   :  { %9203 = vmatprep.subr.bf16.mxu1 %v8429_v52  ;;  %v8957_v52 = vcombine.high %v8949_v3, %v8949_v3  ;;  %v8666_v33 = vld [vmem:[#allocation3 + $0xab0] sm:$0xff] }
 0x724   :  { %9431 = vmatpush1.bf16.msra.mxu0 %v8610_v0  ;;  %v8508_v0 = vld [vmem:[#allocation3 + $0x5c0] sm:$0xff] }
 0x725   :  { %9204 = vmatpush1.bf16.msra.mxu1 %v8428_v44  ;;  %v15999_v44 = vrot.slane %v8957_v52, %v15761_v20  ;;  %9482 = vmatprep.subr.bf16.mxu0 %v8645_v45  ;;  %v8511_v52 = vld [vmem:[#allocation3 + $0x5d8] sm:$0xff]  ;;  %v8510_v45 = vld [vmem:[#allocation3 + $0x5d0] sm:$0xff] }
 0x726   :  { %9205 = vmatprep.subr.bf16.mxu1 %v8431_v63  ;;  %v16002_v63 = vrot.slane %v8949_v3, %v15761_v20  ;;  %v8506_v3 = vld [vmem:[#allocation3 + $0x5b0] sm:$0xff] }
 0x727   :  { %9432 = vmatprep.mubr.bf16.mxu0 %v15999_v44 }
 0x728   :  { %9433 = vmatmul.mubr.bf16.vlgmr.msra.gmra.mrb[48].mxu0 %v16002_v63 }
 0x729   :  { %9206 = vmatpush1.bf16.msra.mxu1 %v8430_v42  ;;  %v8489_v42 = vld [vmem:[#allocation3 + $0x528] sm:$0xff]  ;;  %9483 = vmatpush1.bf16.msra.mxu0 %v8644_v13 }
 0x72a   :  { %9207 = vmatprep.subr.bf16.mxu1 %v8433_v30  ;;  %v8646_v30 = vld [vmem:[#allocation3 + $0xa10] sm:$0xff]  ;;  %9484 = vmatprep.subr.bf16.mxu0 %v8647_v19  ;;  %v8513_v13 = vld [vmem:[#allocation3 + $0x5e8] sm:$0xff]  ;;  %v8512_v19 = vld [vmem:[#allocation3 + $0x5e0] sm:$0xff] }
 0x72d   :  { %9208 = vmatpush1.bf16.msra.mxu1 %v8432_v4  ;;  %v8491_v4 = vld [vmem:[#allocation3 + $0x538] sm:$0xff]  ;;  %9485 = vmatpush1.bf16.msra.mxu0 %v8646_v30 }
 0x72e   :  { %9209 = vmatprep.subr.bf16.mxu1 %v8435_v60  ;;  %v8648_v60 = vld [vmem:[#allocation3 + $0xa20] sm:$0xff]  ;;  %9486 = vmatprep.subr.bf16.mxu0 %v8649_v56  ;;  %v8515_v30 = vld [vmem:[#allocation3 + $0x5f8] sm:$0xff]  ;;  %v8942_v56 = vcombine.high %v15990_v7, %v15990_v7 }
 0x72f   :  { %v8551_v7 = vld [vmem:[#allocation3 + $0x718] sm:$0xff] }
 0x731   :  { %9210 = vmatpush1.bf16.msra.mxu1 %v8434_v61  ;;  %9487 = vmatpush1.bf16.msra.mxu0 %v8648_v60  ;;  %v8651_v61 = vld [vmem:[#allocation3 + $0xa38] sm:$0xff]  ;;  %v8514_v60 = vld [vmem:[#allocation3 + $0x5f0] sm:$0xff] }
 0x732   :  { %9211 = vmatprep.subr.bf16.mxu1 %v8437_v53  ;;  %v8650_v53 = vld [vmem:[#allocation3 + $0xa30] sm:$0xff]  ;;  %9488 = vmatprep.subr.bf16.mxu0 %v8651_v61  ;;  %v8938_v61 = vcombine.high %v15967_v37, %v15967_v37  ;;  %v8709_v37 = vld [vmem:[#allocation3 + $0xc08] sm:$0xff] }
 0x735   :  { %9212 = vmatpush1.bf16.msra.mxu1 %v8436_v38  ;;  %9489 = vmatpush1.bf16.msra.mxu0 %v8650_v53  ;;  %v8653_v38 = vld [vmem:[#allocation3 + $0xa48] sm:$0xff]  ;;  %v8941_v53 = vcombine.high %v15982_v24, %v15982_v24  ;;  %v8550_v24 = vld [vmem:[#allocation3 + $0x710] sm:$0xff] }
 0x736   :  { %9213 = vmatprep.subr.bf16.mxu1 %v8439_v27  ;;  %v8494_v27 = vld [vmem:[#allocation3 + $0x550] sm:$0xff]  ;;  %9490 = vmatprep.subr.bf16.mxu0 %v8653_v38 }
 0x739   :  { %9214 = vmatpush1.bf16.msra.mxu1 %v8438_v59  ;;  %v8497_v59 = vld [vmem:[#allocation3 + $0x568] sm:$0xff]  ;;  %9491 = vmatpush1.bf16.msra.mxu0 %v8652_v40 }
 0x73a   :  { %9215 = vmatprep.subr.bf16.mxu1 %v8441_v57  ;;  %9492 = vmatprep.subr.bf16.mxu0 %v8655_v18  ;;  %v8553_v18 = vld [vmem:[#allocation3 + $0x728] sm:$0xff] }
 0x73d   :  { %9216 = vmatpush1.bf16.msra.mxu1 %v8440_v51  ;;  %9493 = vmatpush1.bf16.msra.mxu0 %v8654_v29  ;;  %v8552_v29 = vld [vmem:[#allocation3 + $0x720] sm:$0xff] }
 0x73e   :  { %9217 = vmatprep.subr.bf16.mxu1 %v8443_v10  ;;  %v8496_v10 = vld [vmem:[#allocation3 + $0x560] sm:$0xff] }
 0x741   :  { %9218 = vmatpush1.bf16.msra.mxu1 %v8442_v23  ;;  %v8657_v23 = vld [vmem:[#allocation3 + $0xa68] sm:$0xff] }
 0x742   :  { %9219 = vmatprep.subr.bf16.mxu1 %v8445_v6  ;;  %v8656_v6 = vld [vmem:[#allocation3 + $0xa60] sm:$0xff]  ;;  %9494 = vmatprep.subr.bf16.mxu0 %v8657_v23  ;;  %v8713_v23 = vld [vmem:[#allocation3 + $0xc28] sm:$0xff] }
 0x743   :  { %9495 = vmatpush1.bf16.msra.mxu0 %v8656_v6  ;;  %v8712_v6 = vld [vmem:[#allocation3 + $0xc20] sm:$0xff] }
 0x745   :  { %9220 = vmatpush1.bf16.msra.mxu1 %v8444_v21  ;;  %v8659_v21 = vld [vmem:[#allocation3 + $0xa78] sm:$0xff] }
 0x746   :  { %9221 = vmatprep.subr.bf16.mxu1 %v8447_v49  ;;  %v8658_v49 = vld [vmem:[#allocation3 + $0xa70] sm:$0xff]  ;;  %9496 = vmatprep.subr.bf16.mxu0 %v8659_v21  ;;  %v8715_v21 = vld [vmem:[#allocation3 + $0xc38] sm:$0xff] }
 0x747   :  { %9497 = vmatpush1.bf16.msra.mxu0 %v8658_v49  ;;  %v8714_v49 = vld [vmem:[#allocation3 + $0xc30] sm:$0xff] }
 0x749   :  { %9222 = vmatpush1.bf16.msra.mxu1 %v8446_v34  ;;  %v8661_v34 = vld [vmem:[#allocation3 + $0xa88] sm:$0xff] }
 0x74a   :  { %9223 = vmatprep.subr.bf16.mxu1 %v8449_v8  ;;  %v8660_v8 = vld [vmem:[#allocation3 + $0xa80] sm:$0xff]  ;;  %9498 = vmatprep.subr.bf16.mxu0 %v8661_v34  ;;  %v8717_v34 = vld [vmem:[#allocation3 + $0xc48] sm:$0xff] }
 0x74b   :  { %9499 = vmatpush1.bf16.msra.mxu0 %v8660_v8  ;;  %v8558_v8 = vld [vmem:[#allocation3 + $0x750] sm:$0xff] }
 0x74d   :  { %9224 = vmatpush1.bf16.msra.mxu1 %v8448_v11  ;;  %v8663_v11 = vld [vmem:[#allocation3 + $0xa98] sm:$0xff] }
 0x74e   :  { %9225 = vmatprep.subr.bf16.mxu1 %v8451_v16  ;;  %v8662_v16 = vld [vmem:[#allocation3 + $0xa90] sm:$0xff]  ;;  %9500 = vmatprep.subr.bf16.mxu0 %v8663_v11  ;;  %v8561_v11 = vld [vmem:[#allocation3 + $0x768] sm:$0xff] }
 0x74f   :  { %9501 = vmatpush1.bf16.msra.mxu0 %v8662_v16 }
 0x751   :  { %9226 = vmatpush1.bf16.msra.mxu1 %v8450_v46  ;;  %v8665_v46 = vld [vmem:[#allocation3 + $0xaa8] sm:$0xff] }
 0x752   :  { %9277 = vmatprep.subr.bf16.mxu1 %v8485_v17  ;;  %v8664_v17 = vld [vmem:[#allocation3 + $0xaa0] sm:$0xff]  ;;  %9502 = vmatprep.subr.bf16.mxu0 %v8665_v46 }
 0x753   :  { %9503 = vmatpush1.bf16.msra.mxu0 %v8664_v17  ;;  %v8719_v17 = vld [vmem:[#allocation3 + $0xc58] sm:$0xff] }
 0x754   :  { %9228 = vmatmul.mubr.bf16.vlgmr.msra.gmra.mrb[44].mxu1 %v8890_v48  ;;  %v8509_v48 = vld [vmem:[#allocation3 + $0x5c8] sm:$0xff] }
 0x755   :  { %9278 = vmatpush1.bf16.msra.mxu1 %v8484_v14  ;;  %9309 = vmatprep.mubr.bf16.mxu1 %v8940_v54  ;;  %v8667_v54 = vld [vmem:[#allocation3 + $0xab8] sm:$0xff]  ;;  %v8669_v14 = vld [vmem:[#allocation3 + $0xac8] sm:$0xff] }
 0x756   :  { %9279 = vmatprep.subr.bf16.mxu1 %v8487_v32  ;;  %9504 = vmatprep.subr.bf16.mxu0 %v8667_v54  ;;  %v8668_v32 = vld [vmem:[#allocation3 + $0xac0] sm:$0xff] }
 0x757   :  { %9505 = vmatpush1.bf16.msra.mxu0 %v8666_v33  ;;  %v8718_v33 = vld [vmem:[#allocation3 + $0xc50] sm:$0xff] }
 0x758   :  { %9506 = vmatprep.subr.bf16.mxu0 %v8669_v14  ;;  %v8721_v14 = vld [vmem:[#allocation3 + $0xc68] sm:$0xff] }
 0x759   :  { %9280 = vmatpush1.bf16.msra.mxu1 %v8486_v28  ;;  %v8671_v28 = vld [vmem:[#allocation3 + $0xad8] sm:$0xff] }
 0x75a   :  { %9281 = vmatprep.subr.bf16.mxu1 %v8489_v42  ;;  %v8670_v42 = vld [vmem:[#allocation3 + $0xad0] sm:$0xff] }
 0x75b   :  { %9507 = vmatpush1.bf16.msra.mxu0 %v8668_v32  ;;  %v8720_v32 = vld [vmem:[#allocation3 + $0xc60] sm:$0xff] }
 0x75c   :  { %9508 = vmatprep.subr.bf16.mxu0 %v8671_v28  ;;  %v8723_v28 = vld [vmem:[#allocation3 + $0xc78] sm:$0xff] }
 0x75d   :  { %9282 = vmatpush1.bf16.msra.mxu1 %v8488_v41  ;;  %v8673_v41 = vld [vmem:[#allocation3 + $0xae8] sm:$0xff] }
 0x75e   :  { %9283 = vmatprep.subr.bf16.mxu1 %v8491_v4  ;;  %v8672_v4 = vld [vmem:[#allocation3 + $0xae0] sm:$0xff] }
 0x75f   :  { %9509 = vmatpush1.bf16.msra.mxu0 %v8670_v42  ;;  %v8722_v42 = vld [vmem:[#allocation3 + $0xc70] sm:$0xff] }
 0x760   :  { %9510 = vmatprep.subr.bf16.mxu0 %v8673_v41  ;;  %v8725_v41 = vld [vmem:[#allocation3 + $0xc88] sm:$0xff] }
 0x761   :  { %9284 = vmatpush1.bf16.msra.mxu1 %v8490_v26  ;;  %v8549_v26 = vld [vmem:[#allocation3 + $0x708] sm:$0xff] }
 0x762   :  { %9285 = vmatprep.subr.bf16.mxu1 %v8493_v62  ;;  %v8956_v62 = vrot.slane %v8942_v56, %v15761_v20  ;;  %v8566_v56 = vld [vmem:[#allocation3 + $0x790] sm:$0xff] }
 0x763   :  { %9511 = vmatpush1.bf16.msra.mxu0 %v8672_v4  ;;  %v8724_v4 = vld [vmem:[#allocation3 + $0xc80] sm:$0xff] }
 0x764   :  { %v8958_v38 = vcombine.high %v8956_v62, %v8956_v62 }
 0x765   :  { %9286 = vmatpush1.bf16.msra.mxu1 %v8492_v47  ;;  %v8675_v47 = vld [vmem:[#allocation3 + $0xaf8] sm:$0xff] }
 0x766   :  { %9287 = vmatprep.subr.bf16.mxu1 %v8495_v9  ;;  %v8674_v9 = vld [vmem:[#allocation3 + $0xaf0] sm:$0xff]  ;;  %9512 = vmatprep.subr.bf16.mxu0 %v8675_v47  ;;  %v16018_v40 = vrot.slane %v8958_v38, %v15761_v20  ;;  %v8729_v47 = vld [vmem:[#allocation3 + $0xca8] sm:$0xff] }
 0x767   :  { %v16006_v39 = vpop.f32.mrb[32].mxu1  ;;  %9513 = vmatpush1.bf16.msra.mxu0 %v8674_v9  ;;  %v8728_v9 = vld [vmem:[#allocation3 + $0xca0] sm:$0xff]  ;;  %v8570_v38 = vld [vmem:[#allocation3 + $0x7b0] sm:$0xff] }
 0x768   :  { %v16008_v57 = vpop.f32.mrb[33].mxu1  ;;  %9514 = vmatprep.mubr.bf16.mxu0 %v16018_v40  ;;  %9564 = vmatprep.subr.bf16.mxu0 %v8709_v37  ;;  %v8730_v37 = vld [vmem:[#allocation3 + $0xcb0] sm:$0xff] }
 0x769   :  { %v9110_v35 = vpop.f32.mrb[34].mxu1  ;;  %9288 = vmatpush1.bf16.msra.mxu1 %v8494_v27  ;;  %v8548_v27 = vld [vmem:[#allocation3 + $0x700] sm:$0xff] }
 0x76a   :  { %v9111_v51 = vpop.f32.mrb[35].mxu1  ;;  %9289 = vmatprep.subr.bf16.mxu1 %v8497_v59  ;;  %v16021_v59 = vrot.slane %v8956_v62, %v15761_v20  ;;  %v8708_v35 = vld [vmem:[#allocation3 + $0xc00] sm:$0xff]  ;;  %v8726_v62 = vld [vmem:[#allocation3 + $0xc90] sm:$0xff] }
 0x76b   :  { %v8711_v51 = vld [vmem:[#allocation3 + $0xc18] sm:$0xff] }
 0x76c   :  { %9515 = vmatmul.mubr.bf16.vlgmr.msra.gmra.mrb[52].mxu0 %v16021_v59 }
 0x76d   :  { %9290 = vmatpush1.bf16.msra.mxu1 %v8496_v10  ;;  %9565 = vmatpush1.bf16.msra.mxu0 %v8708_v35  ;;  %v8710_v10 = vld [vmem:[#allocation3 + $0xc10] sm:$0xff]  ;;  %v8572_v35 = vld [vmem:[#allocation3 + $0x7c0] sm:$0xff] }
 0x76e   :  { %9291 = vmatprep.subr.bf16.mxu1 %v8499_v5  ;;  %9566 = vmatprep.subr.bf16.mxu0 %v8711_v51  ;;  %v8555_v5 = vld [vmem:[#allocation3 + $0x738] sm:$0xff]  ;;  %v8732_v51 = vld [vmem:[#allocation3 + $0xcc0] sm:$0xff] }
 0x771   :  { %9292 = vmatpush1.bf16.msra.mxu1 %v8498_v2  ;;  %9567 = vmatpush1.bf16.msra.mxu0 %v8710_v10  ;;  %v8554_v2 = vld [vmem:[#allocation3 + $0x730] sm:$0xff] }
 0x772   :  { %9293 = vmatprep.subr.bf16.mxu1 %v8501_v25  ;;  %9568 = vmatprep.subr.bf16.mxu0 %v8713_v23  ;;  %v8557_v25 = vld [vmem:[#allocation3 + $0x748] sm:$0xff]  ;;  %v8574_v10 = vld [vmem:[#allocation3 + $0x7d0] sm:$0xff] }
 0x773   :  { %v8734_v23 = vld [vmem:[#allocation3 + $0xcd0] sm:$0xff] }
 0x775   :  { %9294 = vmatpush1.bf16.msra.mxu1 %v8500_v12  ;;  %9569 = vmatpush1.bf16.msra.mxu0 %v8712_v6  ;;  %v8556_v12 = vld [vmem:[#allocation3 + $0x740] sm:$0xff] }
 0x776   :  { %9295 = vmatprep.subr.bf16.mxu1 %v8503_v43  ;;  %9570 = vmatprep.subr.bf16.mxu0 %v8715_v21  ;;  %v8559_v43 = vld [vmem:[#allocation3 + $0x758] sm:$0xff]  ;;  %v8576_v6 = vld [vmem:[#allocation3 + $0x7e0] sm:$0xff] }
 0x777   :  { %v8736_v21 = vld [vmem:[#allocation3 + $0xce0] sm:$0xff] }
 0x779   :  { %9296 = vmatpush1.bf16.msra.mxu1 %v8502_v22  ;;  %9571 = vmatpush1.bf16.msra.mxu0 %v8714_v49  ;;  %v8716_v22 = vld [vmem:[#allocation3 + $0xc40] sm:$0xff]  ;;  %v8578_v49 = vld [vmem:[#allocation3 + $0x7f0] sm:$0xff] }
 0x77a   :  { %9297 = vmatprep.subr.bf16.mxu1 %v8505_v58  ;;  %9572 = vmatprep.subr.bf16.mxu0 %v8717_v34  ;;  %v16031_v54 = vpop.f32.mrb[40].mxu0 }
 0x77d   :  { %9298 = vmatpush1.bf16.msra.mxu1 %v8504_v31  ;;  %9573 = vmatpush1.bf16.msra.mxu0 %v8716_v22  ;;  %v8989_v22 = vcombine.high %v15999_v44, %v15999_v44  ;;  %v8614_v44 = vld [vmem:[#allocation3 + $0x910] sm:$0xff] }
 0x77e   :  { %9299 = vmatprep.subr.bf16.mxu1 %v8507_v1  ;;  %9574 = vmatprep.subr.bf16.mxu0 %v8719_v17  ;;  %v8615_v17 = vld [vmem:[#allocation3 + $0x918] sm:$0xff] }
 0x781   :  { %9300 = vmatpush1.bf16.msra.mxu1 %v8506_v3  ;;  %9575 = vmatpush1.bf16.msra.mxu0 %v8718_v33  ;;  %v8772_v33 = vld [vmem:[#allocation3 + $0xe00] sm:$0xff] }
 0x782   :  { %9301 = vmatprep.subr.bf16.mxu1 %v8509_v48  ;;  %v8560_v48 = vld [vmem:[#allocation3 + $0x760] sm:$0xff]  ;;  %9576 = vmatprep.subr.bf16.mxu0 %v8721_v14  ;;  %v8774_v14 = vld [vmem:[#allocation3 + $0xe10] sm:$0xff] }
 0x785   :  { %9302 = vmatpush1.bf16.msra.mxu1 %v8508_v0  ;;  %v8563_v0 = vld [vmem:[#allocation3 + $0x778] sm:$0xff]  ;;  %9577 = vmatpush1.bf16.msra.mxu0 %v8720_v32  ;;  %v8616_v32 = vld [vmem:[#allocation3 + $0x920] sm:$0xff] }
 0x786   :  { %9303 = vmatprep.subr.bf16.mxu1 %v8511_v52  ;;  %v16033_v52 = vpop.f32.mrb[41].mxu0  ;;  %9578 = vmatprep.subr.bf16.mxu0 %v8723_v28  ;;  %v8618_v28 = vld [vmem:[#allocation3 + $0x930] sm:$0xff] }
 0x789   :  { %9304 = vmatpush1.bf16.msra.mxu1 %v8510_v45  ;;  %v8562_v45 = vld [vmem:[#allocation3 + $0x770] sm:$0xff]  ;;  %9579 = vmatpush1.bf16.msra.mxu0 %v8722_v42  ;;  %v8621_v42 = vld [vmem:[#allocation3 + $0x948] sm:$0xff] }
 0x78a   :  { %9305 = vmatprep.subr.bf16.mxu1 %v8513_v13  ;;  %v8565_v13 = vld [vmem:[#allocation3 + $0x788] sm:$0xff]  ;;  %9580 = vmatprep.subr.bf16.mxu0 %v8725_v41  ;;  %v8620_v41 = vld [vmem:[#allocation3 + $0x940] sm:$0xff] }
 0x78d   :  { %9306 = vmatpush1.bf16.msra.mxu1 %v8512_v19  ;;  %v8564_v19 = vld [vmem:[#allocation3 + $0x780] sm:$0xff]  ;;  %9581 = vmatpush1.bf16.msra.mxu0 %v8724_v4  ;;  %v8623_v4 = vld [vmem:[#allocation3 + $0x958] sm:$0xff] }
 0x78e   :  { %9307 = vmatprep.subr.bf16.mxu1 %v8515_v30  ;;  %v8567_v30 = vld [vmem:[#allocation3 + $0x798] sm:$0xff] }
 0x791   :  { %9308 = vmatpush1.bf16.msra.mxu1 %v8514_v60  ;;  %v8569_v60 = vld [vmem:[#allocation3 + $0x7a8] sm:$0xff] }
 0x792   :  { %9359 = vmatprep.subr.bf16.mxu1 %v8549_v26  ;;  %v8727_v26 = vld [vmem:[#allocation3 + $0xc98] sm:$0xff] }
 0x793   :  { %9582 = vmatprep.subr.bf16.mxu0 %v8727_v26  ;;  %v8780_v26 = vld [vmem:[#allocation3 + $0xe40] sm:$0xff] }
 0x794   :  { %9310 = vmatmul.mubr.bf16.vlgmr.msra.gmra.mrb[48].mxu1 %v8938_v61  ;;  %v8568_v61 = vld [vmem:[#allocation3 + $0x7a0] sm:$0xff]  ;;  %9583 = vmatpush1.bf16.msra.mxu0 %v8726_v62 }
 0x795   :  { %9360 = vmatpush1.bf16.msra.mxu1 %v8548_v27  ;;  %9391 = vmatprep.mubr.bf16.mxu1 %v8941_v53  ;;  %v8571_v53 = vld [vmem:[#allocation3 + $0x7b8] sm:$0xff]  ;;  %v8573_v27 = vld [vmem:[#allocation3 + $0x7c8] sm:$0xff] }
 0x796   :  { %9361 = vmatprep.subr.bf16.mxu1 %v8551_v7  ;;  %9584 = vmatprep.subr.bf16.mxu0 %v8729_v47  ;;  %v8731_v7 = vld [vmem:[#allocation3 + $0xcb8] sm:$0xff] }
 0x798   :  { %9585 = vmatpush1.bf16.msra.mxu0 %v8728_v9 }
 0x799   :  { %9362 = vmatpush1.bf16.msra.mxu1 %v8550_v24  ;;  %9586 = vmatprep.subr.bf16.mxu0 %v8731_v7  ;;  %v8575_v24 = vld [vmem:[#allocation3 + $0x7d8] sm:$0xff] }
 0x79a   :  { %9363 = vmatprep.subr.bf16.mxu1 %v8553_v18  ;;  %v8733_v18 = vld [vmem:[#allocation3 + $0xcc8] sm:$0xff] }
 0x79c   :  { %9587 = vmatpush1.bf16.msra.mxu0 %v8730_v37  ;;  %v8624_v37 = vld [vmem:[#allocation3 + $0x960] sm:$0xff] }
 0x79d   :  { %9364 = vmatpush1.bf16.msra.mxu1 %v8552_v29  ;;  %9588 = vmatprep.subr.bf16.mxu0 %v8733_v18  ;;  %v8577_v29 = vld [vmem:[#allocation3 + $0x7e8] sm:$0xff]  ;;  %v8627_v18 = vld [vmem:[#allocation3 + $0x978] sm:$0xff] }
 0x79e   :  { %9365 = vmatprep.subr.bf16.mxu1 %v8555_v5  ;;  %v8735_v5 = vld [vmem:[#allocation3 + $0xcd8] sm:$0xff] }
 0x7a0   :  { %9589 = vmatpush1.bf16.msra.mxu0 %v8732_v51 }
 0x7a1   :  { %9366 = vmatpush1.bf16.msra.mxu1 %v8554_v2  ;;  %9590 = vmatprep.subr.bf16.mxu0 %v8735_v5  ;;  %v8579_v2 = vld [vmem:[#allocation3 + $0x7f8] sm:$0xff]  ;;  %v8626_v5 = vld [vmem:[#allocation3 + $0x970] sm:$0xff] }
 0x7a2   :  { %9367 = vmatprep.subr.bf16.mxu1 %v8557_v25  ;;  %v8737_v25 = vld [vmem:[#allocation3 + $0xce8] sm:$0xff] }
 0x7a4   :  { %9591 = vmatpush1.bf16.msra.mxu0 %v8734_v23  ;;  %v8629_v23 = vld [vmem:[#allocation3 + $0x988] sm:$0xff] }
 0x7a5   :  { %9368 = vmatpush1.bf16.msra.mxu1 %v8556_v12  ;;  %9592 = vmatprep.subr.bf16.mxu0 %v8737_v25  ;;  %v16035_v12 = vld [vmem:[#allocation9 + $0x18] sm:$0xff]  ;;  %v8628_v25 = vld [vmem:[#allocation3 + $0x980] sm:$0xff] }
 0x7a6   :  { %9369 = vmatprep.subr.bf16.mxu1 %v8559_v43  ;;  %v8613_v43 = vld [vmem:[#allocation3 + $0x908] sm:$0xff]  ;;  %v8998_v34 = vrot.slane %v16035_v12, %v15761_v20 }
 0x7a7   :  { %v9147_v58 = vpop.f32.mrb[36].mxu1 }
 0x7a8   :  { %v16026_v16 = vadd.f32 %v9147_v58, %v16006_v39  ;;  %v9149_v31 = vpop.f32.mrb[37].mxu1  ;;  %v9274_v39 = vpop.f32.mrb[42].mxu0  ;;  %9593 = vmatpush1.bf16.msra.mxu0 %v8736_v21  ;;  %v8739_v58 = vld [vmem:[#allocation3 + $0xcf8] sm:$0xff] }
 0x7a9   :  { %v16029_v1 = vadd.f32 %v9149_v31, %v16008_v57  ;;  %v9151_v46 = vpop.f32.mrb[38].mxu1  ;;  %9370 = vmatpush1.bf16.msra.mxu1 %v8558_v8  ;;  %v9275_v57 = vpop.f32.mrb[43].mxu0  ;;  %v8939_v8 = vcombine.high %v15986_v55, %v15986_v55  ;;  %v9006_v31 = vcombine.high %v8998_v34, %v8998_v34  ;;  %9594 = vmatprep.subr.bf16.mxu0 %v8739_v58  ;;  %v8773_v55 = vld [vmem:[#allocation3 + $0xe08] sm:$0xff]  ;;  %v8775_v39 = vld [vmem:[#allocation3 + $0xe18] sm:$0xff]  ;;  %v8790_v58 = vld [vmem:[#allocation3 + $0xe90] sm:$0xff] }
 0x7aa   :  { %v9152_v3 = vpop.f32.mrb[39].mxu1  ;;  %9371 = vmatprep.subr.bf16.mxu1 %v8561_v11  ;;  %v8738_v11 = vld [vmem:[#allocation3 + $0xcf0] sm:$0xff]  ;;  %v8612_v46 = vld [vmem:[#allocation3 + $0x900] sm:$0xff]  ;;  %v8619_v57 = vld [vmem:[#allocation3 + $0x938] sm:$0xff] }
 0x7ab   :  { %v16044_v3 = vrot.slane %v9006_v31, %v15761_v20  ;;  %v8631_v21 = vld [vmem:[#allocation3 + $0x998] sm:$0xff] }
 0x7ac   :  { %9595 = vmatpush1.bf16.msra.mxu0 %v8738_v11  ;;  %v8632_v11 = vld [vmem:[#allocation3 + $0x9a0] sm:$0xff]  ;;  %v8635_v31 = vld [vmem:[#allocation3 + $0x9b8] sm:$0xff] }
 0x7ad   :  { %9372 = vmatpush1.bf16.msra.mxu1 %v8560_v48  ;;  %v16047_v48 = vrot.slane %v8998_v34, %v15761_v20  ;;  %9596 = vmatprep.mubr.bf16.mxu0 %v16044_v3  ;;  %v8630_v34 = vld [vmem:[#allocation3 + $0x990] sm:$0xff] }
 0x7ae   :  { %9373 = vmatprep.subr.bf16.mxu1 %v8563_v0  ;;  %v8617_v0 = vld [vmem:[#allocation3 + $0x928] sm:$0xff]  ;;  %9646 = vmatprep.subr.bf16.mxu0 %v8773_v55  ;;  %v8634_v55 = vld [vmem:[#allocation3 + $0x9b0] sm:$0xff] }
 0x7af   :  { %9597 = vmatmul.mubr.bf16.vlgmr.msra.gmra.mrb[56].mxu0 %v16047_v48 }
 0x7b0   :  { %9647 = vmatpush1.bf16.msra.mxu0 %v8772_v33  ;;  %v8637_v33 = vld [vmem:[#allocation3 + $0x9c8] sm:$0xff] }
 0x7b1   :  { %9374 = vmatpush1.bf16.msra.mxu1 %v8562_v45  ;;  %9648 = vmatprep.subr.bf16.mxu0 %v8775_v39  ;;  %v8777_v45 = vld [vmem:[#allocation3 + $0xe28] sm:$0xff]  ;;  %v8636_v39 = vld [vmem:[#allocation3 + $0x9c0] sm:$0xff] }
 0x7b2   :  { %9375 = vmatprep.subr.bf16.mxu1 %v8565_v13  ;;  %v8776_v13 = vld [vmem:[#allocation3 + $0xe20] sm:$0xff] }
 0x7b4   :  { %9649 = vmatpush1.bf16.msra.mxu0 %v8774_v14  ;;  %v8639_v14 = vld [vmem:[#allocation3 + $0x9d8] sm:$0xff] }
 0x7b5   :  { %9376 = vmatpush1.bf16.msra.mxu1 %v8564_v19  ;;  %9650 = vmatprep.subr.bf16.mxu0 %v8777_v45  ;;  %v8779_v19 = vld [vmem:[#allocation3 + $0xe38] sm:$0xff]  ;;  %v8638_v45 = vld [vmem:[#allocation3 + $0x9d0] sm:$0xff] }
 0x7b6   :  { %9377 = vmatprep.subr.bf16.mxu1 %v8567_v30  ;;  %v8778_v30 = vld [vmem:[#allocation3 + $0xe30] sm:$0xff] }
 0x7b8   :  { %9651 = vmatpush1.bf16.msra.mxu0 %v8776_v13  ;;  %v8641_v13 = vld [vmem:[#allocation3 + $0x9e8] sm:$0xff] }
 0x7b9   :  { %9378 = vmatpush1.bf16.msra.mxu1 %v8566_v56  ;;  %9652 = vmatprep.subr.bf16.mxu0 %v8779_v19  ;;  %v8781_v56 = vld [vmem:[#allocation3 + $0xe48] sm:$0xff]  ;;  %v8640_v19 = vld [vmem:[#allocation3 + $0x9e0] sm:$0xff] }
 0x7ba   :  { %9379 = vmatprep.subr.bf16.mxu1 %v8569_v60  ;;  %v8622_v60 = vld [vmem:[#allocation3 + $0x950] sm:$0xff] }
 0x7bc   :  { %9653 = vmatpush1.bf16.msra.mxu0 %v8778_v30  ;;  %v8643_v30 = vld [vmem:[#allocation3 + $0x9f8] sm:$0xff] }
 0x7bd   :  { %9380 = vmatpush1.bf16.msra.mxu1 %v8568_v61  ;;  %9654 = vmatprep.subr.bf16.mxu0 %v8781_v56  ;;  %v8625_v61 = vld [vmem:[#allocation3 + $0x968] sm:$0xff]  ;;  %v8991_v56 = vcombine.high %v16035_v12, %v16035_v12  ;;  %v8679_v12 = vld [vmem:[#allocation3 + $0xb18] sm:$0xff] }
 0x7be   :  { %9381 = vmatprep.subr.bf16.mxu1 %v8571_v53 }
 0x7c0   :  { %9655 = vmatpush1.bf16.msra.mxu0 %v8780_v26  ;;  %v8677_v26 = vld [vmem:[#allocation3 + $0xb08] sm:$0xff] }
 0x7c1   :  { %9382 = vmatpush1.bf16.msra.mxu1 %v8570_v38 }
 0x7c2   :  { %9383 = vmatprep.subr.bf16.mxu1 %v8573_v27  ;;  %v8783_v27 = vld [vmem:[#allocation3 + $0xe58] sm:$0xff] }
 0x7c3   :  { %9656 = vmatprep.subr.bf16.mxu0 %v8783_v27  ;;  %v8802_v27 = vld [vmem:[#allocation3 + $0xef0] sm:$0xff] }
 0x7c5   :  { %9384 = vmatpush1.bf16.msra.mxu1 %v8572_v35  ;;  %v16057_v35 = vpop.f32.mrb[44].mxu0 }
 0x7c6   :  { %9385 = vmatprep.subr.bf16.mxu1 %v8575_v24  ;;  %v8782_v24 = vld [vmem:[#allocation3 + $0xe50] sm:$0xff]  ;;  %v16059_v51 = vpop.f32.mrb[45].mxu0 }
 0x7c7   :  { %9657 = vmatpush1.bf16.msra.mxu0 %v8782_v24 }
 0x7c9   :  { %9386 = vmatpush1.bf16.msra.mxu1 %v8574_v10  ;;  %v8785_v10 = vld [vmem:[#allocation3 + $0xe68] sm:$0xff] }
 0x7ca   :  { %9387 = vmatprep.subr.bf16.mxu1 %v8577_v29  ;;  %v8784_v29 = vld [vmem:[#allocation3 + $0xe60] sm:$0xff]  ;;  %9658 = vmatprep.subr.bf16.mxu0 %v8785_v10 }
 0x7cb   :  { %9659 = vmatpush1.bf16.msra.mxu0 %v8784_v29  ;;  %v11792_v10 = vld [vmem:[#allocation3] sm:$0xff]  ;;  %v11793_v29 = vld [vmem:[#allocation3 + $0x18] sm:$0xff] }
 0x7cd   :  { %9388 = vmatpush1.bf16.msra.mxu1 %v8576_v6  ;;  %v8787_v6 = vld [vmem:[#allocation3 + $0xe78] sm:$0xff] }
 0x7ce   :  { %9389 = vmatprep.subr.bf16.mxu1 %v8579_v2  ;;  %v8786_v2 = vld [vmem:[#allocation3 + $0xe70] sm:$0xff]  ;;  %9660 = vmatprep.subr.bf16.mxu0 %v8787_v6  ;;  %v11795_v6 = vld [vmem:[#allocation3 + $0x28] sm:$0xff] }
 0x7cf   :  { %9661 = vmatpush1.bf16.msra.mxu0 %v8786_v2  ;;  %v8682_v2 = vld [vmem:[#allocation3 + $0xb30] sm:$0xff] }
 0x7d1   :  { %9390 = vmatpush1.bf16.msra.mxu1 %v8578_v49  ;;  %v8789_v49 = vld [vmem:[#allocation3 + $0xe88] sm:$0xff] }
 0x7d2   :  { %9441 = vmatprep.subr.bf16.mxu1 %v8613_v43  ;;  %v8788_v43 = vld [vmem:[#allocation3 + $0xe80] sm:$0xff]  ;;  %9662 = vmatprep.subr.bf16.mxu0 %v8789_v49  ;;  %v11797_v49 = vld [vmem:[#allocation3 + $0x38] sm:$0xff] }
 0x7d3   :  { %9663 = vmatpush1.bf16.msra.mxu0 %v8788_v43  ;;  %v8684_v43 = vld [vmem:[#allocation3 + $0xb40] sm:$0xff] }
 0x7d4   :  { %9392 = vmatmul.mubr.bf16.vlgmr.msra.gmra.mrb[52].mxu1 %v8939_v8  ;;  %v8633_v8 = vld [vmem:[#allocation3 + $0x9a8] sm:$0xff] }
 0x7d5   :  { %9442 = vmatpush1.bf16.msra.mxu1 %v8612_v46  ;;  %9473 = vmatprep.mubr.bf16.mxu1 %v8989_v22  ;;  %v8791_v22 = vld [vmem:[#allocation3 + $0xe98] sm:$0xff]  ;;  %v8793_v46 = vld [vmem:[#allocation3 + $0xea8] sm:$0xff] }
 0x7d6   :  { %9443 = vmatprep.subr.bf16.mxu1 %v8615_v17  ;;  %9664 = vmatprep.subr.bf16.mxu0 %v8791_v22  ;;  %v8792_v17 = vld [vmem:[#allocation3 + $0xea0] sm:$0xff]  ;;  %v11799_v22 = vld [vmem:[#allocation3 + $0x48] sm:$0xff] }
 0x7d7   :  { %9665 = vmatpush1.bf16.msra.mxu0 %v8790_v58  ;;  %v8686_v58 = vld [vmem:[#allocation3 + $0xb50] sm:$0xff] }
 0x7d8   :  { %9666 = vmatprep.subr.bf16.mxu0 %v8793_v46 }
 0x7d9   :  { %9444 = vmatpush1.bf16.msra.mxu1 %v8614_v44  ;;  %v8795_v44 = vld [vmem:[#allocation3 + $0xeb8] sm:$0xff] }
 0x7da   :  { %9445 = vmatprep.subr.bf16.mxu1 %v8617_v0  ;;  %v8794_v0 = vld [vmem:[#allocation3 + $0xeb0] sm:$0xff] }
 0x7db   :  { %9667 = vmatpush1.bf16.msra.mxu0 %v8792_v17 }
 0x7dc   :  { %9668 = vmatprep.subr.bf16.mxu0 %v8795_v44 }
 0x7dd   :  { %9446 = vmatpush1.bf16.msra.mxu1 %v8616_v32  ;;  %v8797_v32 = vld [vmem:[#allocation3 + $0xec8] sm:$0xff] }
 0x7de   :  { %9447 = vmatprep.subr.bf16.mxu1 %v8619_v57  ;;  %v8796_v57 = vld [vmem:[#allocation3 + $0xec0] sm:$0xff] }
 0x7df   :  { %9669 = vmatpush1.bf16.msra.mxu0 %v8794_v0  ;;  %v11801_v0 = vld [vmem:[#allocation3 + $0x58] sm:$0xff] }
 0x7e0   :  { %9670 = vmatprep.subr.bf16.mxu0 %v8797_v32  ;;  %v8688_v32 = vld [vmem:[#allocation3 + $0xb60] sm:$0xff] }
 0x7e1   :  { %9448 = vmatpush1.bf16.msra.mxu1 %v8618_v28  ;;  %v8799_v28 = vld [vmem:[#allocation3 + $0xed8] sm:$0xff] }
 0x7e2   :  { %9449 = vmatprep.subr.bf16.mxu1 %v8621_v42  ;;  %v8798_v42 = vld [vmem:[#allocation3 + $0xed0] sm:$0xff] }
 0x7e3   :  { %9671 = vmatpush1.bf16.msra.mxu0 %v8796_v57 }
 0x7e4   :  { %9672 = vmatprep.subr.bf16.mxu0 %v8799_v28  ;;  %v11802_v28 = vld [vmem:[#allocation3 + $0x50] sm:$0xff] }
 0x7e5   :  { %9450 = vmatpush1.bf16.msra.mxu1 %v8620_v41  ;;  %v8801_v41 = vld [vmem:[#allocation3 + $0xee8] sm:$0xff] }
 0x7e6   :  { %9451 = vmatprep.subr.bf16.mxu1 %v8623_v4  ;;  %v8800_v4 = vld [vmem:[#allocation3 + $0xee0] sm:$0xff] }
 0x7e7   :  { %v9188_v62 = vpop.f32.mrb[40].mxu1  ;;  %9673 = vmatpush1.bf16.msra.mxu0 %v8798_v42  ;;  %v11803_v42 = vld [vmem:[#allocation3 + $0x68] sm:$0xff] }
 0x7e8   :  { %v16052_v53 = vadd.f32 %v9188_v62, %v16026_v16  ;;  %v9190_v47 = vpop.f32.mrb[41].mxu1  ;;  %v9356_v16 = vpop.f32.mrb[46].mxu0  ;;  %9674 = vmatprep.subr.bf16.mxu0 %v8801_v41  ;;  %v9005_v62 = vrot.slane %v8991_v56, %v15761_v20  ;;  %v11804_v41 = vld [vmem:[#allocation3 + $0x60] sm:$0xff]  ;;  %v8695_v56 = vld [vmem:[#allocation3 + $0xb98] sm:$0xff] }
 0x7e9   :  { %v16055_v9 = vadd.f32 %v9190_v47, %v16029_v1  ;;  %v9192_v38 = vpop.f32.mrb[42].mxu1  ;;  %9452 = vmatpush1.bf16.msra.mxu1 %v8622_v60  ;;  %v9357_v1 = vpop.f32.mrb[47].mxu0  ;;  %v8642_v60 = vld [vmem:[#allocation3 + $0x9f0] sm:$0xff]  ;;  %v8990_v47 = vcombine.high %v16018_v40, %v16018_v40  ;;  %v8681_v40 = vld [vmem:[#allocation3 + $0xb28] sm:$0xff] }
 0x7ea   :  { %v9193_v7 = vpop.f32.mrb[43].mxu1  ;;  %9453 = vmatprep.subr.bf16.mxu1 %v8625_v61  ;;  %v8987_v61 = vcombine.high %v16002_v63, %v16002_v63  ;;  %v8803_v38 = vld [vmem:[#allocation3 + $0xef8] sm:$0xff]  ;;  %v8678_v63 = vld [vmem:[#allocation3 + $0xb10] sm:$0xff]  ;;  %v11791_v16 = vld [vmem:[#allocation3 + $0x8] sm:$0xff] }
 0x7eb   :  { %9675 = vmatpush1.bf16.msra.mxu0 %v8800_v4  ;;  %v9007_v7 = vcombine.high %v9005_v62, %v9005_v62  ;;  %v8680_v1 = vld [vmem:[#allocation3 + $0xb20] sm:$0xff]  ;;  %v11805_v4 = vld [vmem:[#allocation3 + $0x78] sm:$0xff] }
 0x7ec   :  { %9676 = vmatprep.subr.bf16.mxu0 %v8803_v38  ;;  %v11809_v38 = vld [vmem:[#allocation3 + $0x98] sm:$0xff] }
 0x7ed   :  { %9454 = vmatpush1.bf16.msra.mxu1 %v8624_v37  ;;  %v8676_v37 = vld [vmem:[#allocation3 + $0xb00] sm:$0xff]  ;;  %v16069_v24 = vrot.slane %v9007_v7, %v15761_v20  ;;  %v8699_v7 = vld [vmem:[#allocation3 + $0xbb8] sm:$0xff] }
 0x7ee   :  { %9455 = vmatprep.subr.bf16.mxu1 %v8627_v18  ;;  %v16072_v18 = vrot.slane %v9005_v62, %v15761_v20  ;;  %v8694_v62 = vld [vmem:[#allocation3 + $0xb90] sm:$0xff] }
 0x7ef   :  { %9677 = vmatpush1.bf16.msra.mxu0 %v8802_v27  ;;  %9678 = vmatprep.mubr.bf16.mxu0 %v16069_v24  ;;  %v8696_v27 = vld [vmem:[#allocation3 + $0xba0] sm:$0xff] }
 0x7f0   :  { %9960 = vmatprep.subr.bf16.mxu0 %v11791_v16  ;;  %v11812_v16 = vld [vmem:[#allocation3 + $0xa0] sm:$0xff] }
 0x7f1   :  { %9456 = vmatpush1.bf16.msra.mxu1 %v8626_v5  ;;  %v8683_v5 = vld [vmem:[#allocation3 + $0xb38] sm:$0xff] }
 0x7f2   :  { %9457 = vmatprep.subr.bf16.mxu1 %v8629_v23  ;;  %9679 = vmatmul.mubr.bf16.vlgmr.msra.gmra.mrb[60].mxu0 %v16072_v18  ;;  %v11794_v23 = vld [vmem:[#allocation3 + $0x10] sm:$0xff] }
 0x7f3   :  { %9961 = vmatpush1.bf16.msra.mxu0 %v11792_v10  ;;  %v11813_v10 = vld [vmem:[#allocation3 + $0xb8] sm:$0xff] }
 0x7f4   :  { %9962 = vmatprep.subr.bf16.mxu0 %v11793_v29  ;;  %v8700_v29 = vld [vmem:[#allocation3 + $0xbc0] sm:$0xff] }
 0x7f5   :  { %9458 = vmatpush1.bf16.msra.mxu1 %v8628_v25  ;;  %v8685_v25 = vld [vmem:[#allocation3 + $0xb48] sm:$0xff] }
 0x7f6   :  { %9459 = vmatprep.subr.bf16.mxu1 %v8631_v21  ;;  %v11796_v21 = vld [vmem:[#allocation3 + $0x20] sm:$0xff] }
 0x7f7   :  { %9963 = vmatpush1.bf16.msra.mxu0 %v11794_v23  ;;  %v11815_v23 = vld [vmem:[#allocation3 + $0xc8] sm:$0xff] }
 0x7f8   :  { %9964 = vmatprep.subr.bf16.mxu0 %v11795_v6  ;;  %v8702_v6 = vld [vmem:[#allocation3 + $0xbd0] sm:$0xff] }
 0x7f9   :  { %9460 = vmatpush1.bf16.msra.mxu1 %v8630_v34  ;;  %v8687_v34 = vld [vmem:[#allocation3 + $0xb58] sm:$0xff] }
 0x7fa   :  { %9461 = vmatprep.subr.bf16.mxu1 %v8633_v8  ;;  %v11798_v8 = vld [vmem:[#allocation3 + $0x30] sm:$0xff] }
 0x7fb   :  { %9965 = vmatpush1.bf16.msra.mxu0 %v11796_v21  ;;  %v16081_v57 = vpop.f32.mrb[48].mxu0  ;;  %v11817_v21 = vld [vmem:[#allocation3 + $0xd8] sm:$0xff] }
 0x7fc   :  { %9966 = vmatprep.subr.bf16.mxu0 %v11797_v49  ;;  %v8704_v49 = vld [vmem:[#allocation3 + $0xbe0] sm:$0xff] }
 0x7fd   :  { %9462 = vmatpush1.bf16.msra.mxu1 %v8632_v11 }
 0x7fe   :  { %9463 = vmatprep.subr.bf16.mxu1 %v8635_v31  ;;  %v8689_v31 = vld [vmem:[#allocation3 + $0xb68] sm:$0xff] }
 0x7ff   :  { %9967 = vmatpush1.bf16.msra.mxu0 %v11798_v8  ;;  %v11819_v8 = vld [vmem:[#allocation3 + $0xe8] sm:$0xff] }
 0x800   :  { %9968 = vmatprep.subr.bf16.mxu0 %v11799_v22  ;;  %v8706_v22 = vld [vmem:[#allocation3 + $0xbf0] sm:$0xff] }
 0x801   :  { %9464 = vmatpush1.bf16.msra.mxu1 %v8634_v55  ;;  %v11800_v55 = vld [vmem:[#allocation3 + $0x40] sm:$0xff] }
 0x802   :  { %9465 = vmatprep.subr.bf16.mxu1 %v8637_v33 }
 0x803   :  { %9969 = vmatpush1.bf16.msra.mxu0 %v11800_v55  ;;  %v9038_v55 = vcombine.high %v16044_v3, %v16044_v3  ;;  %v8745_v3 = vld [vmem:[#allocation3 + $0xd28] sm:$0xff] }
 0x804   :  { %9970 = vmatprep.subr.bf16.mxu0 %v11801_v0  ;;  %v8740_v0 = vld [vmem:[#allocation3 + $0xd00] sm:$0xff] }
 0x805   :  { %9466 = vmatpush1.bf16.msra.mxu1 %v8636_v39 }
 0x806   :  { %9467 = vmatprep.subr.bf16.mxu1 %v8639_v14 }
 0x807   :  { %9971 = vmatpush1.bf16.msra.mxu0 %v11802_v28  ;;  %v8742_v28 = vld [vmem:[#allocation3 + $0xd10] sm:$0xff] }
 0x808   :  { %9972 = vmatprep.subr.bf16.mxu0 %v11803_v42  ;;  %v11824_v42 = vld [vmem:[#allocation3 + $0x200] sm:$0xff] }
 0x809   :  { %9468 = vmatpush1.bf16.msra.mxu1 %v8638_v45 }
 0x80a   :  { %9469 = vmatprep.subr.bf16.mxu1 %v8641_v13  ;;  %v16086_v13 = vpop.f32.mrb[49].mxu0 }
 0x80b   :  { %9973 = vmatpush1.bf16.msra.mxu0 %v11804_v41  ;;  %v11826_v41 = vld [vmem:[#allocation3 + $0x210] sm:$0xff] }
 0x80c   :  { %9974 = vmatprep.subr.bf16.mxu0 %v11805_v4  ;;  %v11827_v4 = vld [vmem:[#allocation3 + $0x228] sm:$0xff] }
 0x80d   :  { %9470 = vmatpush1.bf16.msra.mxu1 %v8640_v19 }
 0x80e   :  { %9471 = vmatprep.subr.bf16.mxu1 %v8643_v30  ;;  %v8693_v30 = vld [vmem:[#allocation3 + $0xb88] sm:$0xff] }
 0x811   :  { %9472 = vmatpush1.bf16.msra.mxu1 %v8642_v60  ;;  %v11806_v60 = vld [vmem:[#allocation3 + $0x70] sm:$0xff] }
 0x812   :  { %9523 = vmatprep.subr.bf16.mxu1 %v8677_v26  ;;  %9975 = vmatpush1.bf16.msra.mxu0 %v11806_v60  ;;  %v11807_v26 = vld [vmem:[#allocation3 + $0x88] sm:$0xff]  ;;  %v11828_v60 = vld [vmem:[#allocation3 + $0x220] sm:$0xff] }
 0x813   :  { %9976 = vmatprep.subr.bf16.mxu0 %v11807_v26  ;;  %v11829_v26 = vld [vmem:[#allocation3 + $0x238] sm:$0xff] }
 0x814   :  { %9474 = vmatmul.mubr.bf16.vlgmr.msra.gmra.mrb[56].mxu1 %v8987_v61  ;;  %v8697_v61 = vld [vmem:[#allocation3 + $0xba8] sm:$0xff] }
 0x815   :  { %9524 = vmatpush1.bf16.msra.mxu1 %v8676_v37  ;;  %9555 = vmatprep.mubr.bf16.mxu1 %v8990_v47  ;;  %v11808_v47 = vld [vmem:[#allocation3 + $0x80] sm:$0xff]  ;;  %v11810_v37 = vld [vmem:[#allocation3 + $0x90] sm:$0xff] }
 0x816   :  { %9525 = vmatprep.subr.bf16.mxu1 %v8679_v12  ;;  %9977 = vmatpush1.bf16.msra.mxu0 %v11808_v47  ;;  %v11811_v12 = vld [vmem:[#allocation3 + $0xa8] sm:$0xff]  ;;  %v11830_v47 = vld [vmem:[#allocation3 + $0x230] sm:$0xff] }
 0x817   :  { %9978 = vmatprep.subr.bf16.mxu0 %v11809_v38  ;;  %v11831_v38 = vld [vmem:[#allocation3 + $0x248] sm:$0xff] }
 0x819   :  { %9526 = vmatpush1.bf16.msra.mxu1 %v8678_v63  ;;  %v8698_v63 = vld [vmem:[#allocation3 + $0xbb0] sm:$0xff] }
 0x81a   :  { %9527 = vmatprep.subr.bf16.mxu1 %v8681_v40  ;;  %9979 = vmatpush1.bf16.msra.mxu0 %v11810_v37  ;;  %v8701_v40 = vld [vmem:[#allocation3 + $0xbc8] sm:$0xff] }
 0x81b   :  { %9980 = vmatprep.subr.bf16.mxu0 %v11811_v12  ;;  %v8753_v37 = vld [vmem:[#allocation3 + $0xd68] sm:$0xff] }
 0x81d   :  { %9528 = vmatpush1.bf16.msra.mxu1 %v8680_v1  ;;  %v8703_v1 = vld [vmem:[#allocation3 + $0xbd8] sm:$0xff] }
 0x81e   :  { %9529 = vmatprep.subr.bf16.mxu1 %v8683_v5  ;;  %9981 = vmatpush1.bf16.msra.mxu0 %v11812_v16  ;;  %v11814_v5 = vld [vmem:[#allocation3 + $0xb0] sm:$0xff] }
 0x81f   :  { %9982 = vmatprep.subr.bf16.mxu0 %v11813_v10 }
 0x821   :  { %9530 = vmatpush1.bf16.msra.mxu1 %v8682_v2  ;;  %v8705_v2 = vld [vmem:[#allocation3 + $0xbe8] sm:$0xff] }
 0x822   :  { %9531 = vmatprep.subr.bf16.mxu1 %v8685_v25  ;;  %9983 = vmatpush1.bf16.msra.mxu0 %v11814_v5  ;;  %v11816_v25 = vld [vmem:[#allocation3 + $0xc0] sm:$0xff] }
 0x823   :  { %9984 = vmatprep.subr.bf16.mxu0 %v11815_v23  ;;  %v8752_v23 = vld [vmem:[#allocation3 + $0xd60] sm:$0xff] }
 0x825   :  { %9532 = vmatpush1.bf16.msra.mxu1 %v8684_v43  ;;  %v8707_v43 = vld [vmem:[#allocation3 + $0xbf8] sm:$0xff] }
 0x826   :  { %9533 = vmatprep.subr.bf16.mxu1 %v8687_v34  ;;  %9985 = vmatpush1.bf16.msra.mxu0 %v11816_v25  ;;  %v11818_v34 = vld [vmem:[#allocation3 + $0xd0] sm:$0xff] }
 0x827   :  { %v9229_v11 = vpop.f32.mrb[44].mxu1  ;;  %9986 = vmatprep.subr.bf16.mxu0 %v11817_v21  ;;  %v11834_v21 = vld [vmem:[#allocation3 + $0x250] sm:$0xff] }
 0x828   :  { %v9230_v46 = vadd.f32 %v9229_v11, %v16052_v53  ;;  %v9231_v17 = vpop.f32.mrb[45].mxu1  ;;  %v8691_v53 = vld [vmem:[#allocation3 + $0xb78] sm:$0xff]  ;;  %v8741_v11 = vld [vmem:[#allocation3 + $0xd08] sm:$0xff] }
 0x829   :  { %v9232_v33 = vadd.f32 %v9231_v17, %v16055_v9  ;;  %v9233_v44 = vpop.f32.mrb[46].mxu1  ;;  %9534 = vmatpush1.bf16.msra.mxu1 %v8686_v58  ;;  %v9438_v9 = vpop.f32.mrb[50].mxu0  ;;  %v16088_v58 = vld [vmem:[#allocation8] sm:$0xff] }
 0x82a   :  { %v16079_v39 = vadd.f32 %v16031_v54, %v9230_v46  ;;  %v9234_v14 = vpop.f32.mrb[47].mxu1  ;;  %9535 = vmatprep.subr.bf16.mxu1 %v8689_v31  ;;  %v9439_v19 = vpop.f32.mrb[51].mxu0  ;;  %v8690_v54 = vld [vmem:[#allocation3 + $0xb70] sm:$0xff]  ;;  %9987 = vmatpush1.bf16.msra.mxu0 %v11818_v34  ;;  %v9739_v31 = vrot.slane %v16088_v58, %v15761_v20  ;;  %v8988_v46 = vcombine.high %v16021_v59, %v16021_v59  ;;  %v11820_v17 = vld [vmem:[#allocation3 + $0xe0] sm:$0xff]  ;;  %v11823_v9 = vld [vmem:[#allocation3 + $0x208] sm:$0xff] }
 0x82b   :  { %v16084_v45 = vadd.f32 %v16033_v52, %v9232_v33  ;;  %v8692_v52 = vld [vmem:[#allocation3 + $0xb80] sm:$0xff]  ;;  %9988 = vmatprep.subr.bf16.mxu0 %v11819_v8  ;;  %v11821_v33 = vld [vmem:[#allocation3 + $0xf8] sm:$0xff]  ;;  %v8757_v34 = vld [vmem:[#allocation3 + $0xd88] sm:$0xff] }
 0x82c   :  { %v9747_v44 = vcombine.high %v9739_v31, %v9739_v31  ;;  %v8743_v14 = vld [vmem:[#allocation3 + $0xd18] sm:$0xff]  ;;  %v16100_v59 = vrot.slane %v9739_v31, %v15761_v20  ;;  %v11836_v8 = vld [vmem:[#allocation3 + $0x260] sm:$0xff]  ;;  %v11838_v31 = vld [vmem:[#allocation3 + $0x270] sm:$0xff] }
 0x82d   :  { %9536 = vmatpush1.bf16.msra.mxu1 %v8688_v32  ;;  %v11825_v19 = vld [vmem:[#allocation3 + $0x218] sm:$0xff] }
 0x82e   :  { %9537 = vmatprep.subr.bf16.mxu1 %v8691_v53  ;;  %9989 = vmatpush1.bf16.msra.mxu0 %v11820_v17  ;;  %v16097_v32 = vrot.slane %v9747_v44, %v15761_v20  ;;  %v11822_v53 = vld [vmem:[#allocation3 + $0xf0] sm:$0xff]  ;;  %v11841_v44 = vld [vmem:[#allocation3 + $0x298] sm:$0xff] }
 0x82f   :  { %9990 = vmatprep.subr.bf16.mxu0 %v11821_v33  ;;  %v8758_v17 = vld [vmem:[#allocation3 + $0xd90] sm:$0xff]  ;;  %v11840_v33 = vld [vmem:[#allocation3 + $0x280] sm:$0xff] }
 0x830   :  { %9992 = vmatprep.mubr.bf16.mxu0 %v16097_v32 }
 0x831   :  { %9538 = vmatpush1.bf16.msra.mxu1 %v8690_v54  ;;  %v8744_v54 = vld [vmem:[#allocation3 + $0xd20] sm:$0xff] }
 0x832   :  { %9539 = vmatprep.subr.bf16.mxu1 %v8693_v30  ;;  %9991 = vmatpush1.bf16.msra.mxu0 %v11822_v53  ;;  %v8747_v30 = vld [vmem:[#allocation3 + $0xd38] sm:$0xff]  ;;  %v11842_v53 = vld [vmem:[#allocation3 + $0x290] sm:$0xff] }
 0x833   :  { %10042 = vmatprep.subr.bf16.mxu0 %v11823_v9  ;;  %v8765_v9 = vld [vmem:[#allocation3 + $0xdc8] sm:$0xff] }
 0x835   :  { %9540 = vmatpush1.bf16.msra.mxu1 %v8692_v52  ;;  %9993 = vmatmul.mubr.bf16.vlgmr.msra.gmra.mrb[64].mxu0 %v16100_v59  ;;  %v8746_v52 = vld [vmem:[#allocation3 + $0xd30] sm:$0xff] }
 0x836   :  { %9541 = vmatprep.subr.bf16.mxu1 %v8695_v56  ;;  %10043 = vmatpush1.bf16.msra.mxu0 %v11824_v42  ;;  %v8749_v56 = vld [vmem:[#allocation3 + $0xd48] sm:$0xff]  ;;  %v11844_v42 = vld [vmem:[#allocation3 + $0x2a0] sm:$0xff] }
 0x837   :  { %10044 = vmatprep.subr.bf16.mxu0 %v11825_v19  ;;  %v11845_v19 = vld [vmem:[#allocation3 + $0x2b8] sm:$0xff] }
 0x839   :  { %9542 = vmatpush1.bf16.msra.mxu1 %v8694_v62  ;;  %v8748_v62 = vld [vmem:[#allocation3 + $0xd40] sm:$0xff] }
 0x83a   :  { %9543 = vmatprep.subr.bf16.mxu1 %v8697_v61  ;;  %10045 = vmatpush1.bf16.msra.mxu0 %v11826_v41  ;;  %v8751_v61 = vld [vmem:[#allocation3 + $0xd58] sm:$0xff]  ;;  %v11846_v41 = vld [vmem:[#allocation3 + $0x2b0] sm:$0xff] }
 0x83b   :  { %10046 = vmatprep.subr.bf16.mxu0 %v11827_v4  ;;  %v11847_v4 = vld [vmem:[#allocation3 + $0x2c8] sm:$0xff] }
 0x83d   :  { %9544 = vmatpush1.bf16.msra.mxu1 %v8696_v27  ;;  %v8750_v27 = vld [vmem:[#allocation3 + $0xd50] sm:$0xff] }
 0x83e   :  { %9545 = vmatprep.subr.bf16.mxu1 %v8699_v7  ;;  %10047 = vmatpush1.bf16.msra.mxu0 %v11828_v60  ;;  %v11848_v60 = vld [vmem:[#allocation3 + $0x2c0] sm:$0xff] }
 0x83f   :  { %10048 = vmatprep.subr.bf16.mxu0 %v11829_v26  ;;  %v11849_v26 = vld [vmem:[#allocation3 + $0x2d8] sm:$0xff] }
 0x841   :  { %9546 = vmatpush1.bf16.msra.mxu1 %v8698_v63 }
 0x842   :  { %9547 = vmatprep.subr.bf16.mxu1 %v8701_v40  ;;  %10049 = vmatpush1.bf16.msra.mxu0 %v11830_v47  ;;  %v11832_v40 = vld [vmem:[#allocation3 + $0x240] sm:$0xff]  ;;  %v11850_v47 = vld [vmem:[#allocation3 + $0x2d0] sm:$0xff] }
 0x843   :  { %10050 = vmatprep.subr.bf16.mxu0 %v11831_v38  ;;  %v11851_v38 = vld [vmem:[#allocation3 + $0x2e8] sm:$0xff] }
 0x845   :  { %9548 = vmatpush1.bf16.msra.mxu1 %v8700_v29  ;;  %v11833_v29 = vld [vmem:[#allocation3 + $0x258] sm:$0xff] }
 0x846   :  { %9549 = vmatprep.subr.bf16.mxu1 %v8703_v1  ;;  %10051 = vmatpush1.bf16.msra.mxu0 %v11832_v40  ;;  %v11852_v40 = vld [vmem:[#allocation3 + $0x2e0] sm:$0xff] }
 0x847   :  { %10052 = vmatprep.subr.bf16.mxu0 %v11833_v29 }
 0x849   :  { %9550 = vmatpush1.bf16.msra.mxu1 %v8702_v6  ;;  %v16109_v6 = vpop.f32.mrb[52].mxu0 }
 0x84a   :  { %9551 = vmatprep.subr.bf16.mxu1 %v8705_v2  ;;  %v16114_v25 = vpop.f32.mrb[53].mxu0  ;;  %10053 = vmatpush1.bf16.msra.mxu0 %v11834_v21  ;;  %v8806_v21 = vld [vmem:[#allocation3 + $0xf10] sm:$0xff] }
 0x84d   :  { %9552 = vmatpush1.bf16.msra.mxu1 %v8704_v49  ;;  %v11835_v49 = vld [vmem:[#allocation3 + $0x268] sm:$0xff] }
 0x84e   :  { %9553 = vmatprep.subr.bf16.mxu1 %v8707_v43  ;;  %10054 = vmatprep.subr.bf16.mxu0 %v11835_v49  ;;  %v11856_v49 = vld [vmem:[#allocation3 + $0x400] sm:$0xff] }
 0x84f   :  { %10055 = vmatpush1.bf16.msra.mxu0 %v11836_v8  ;;  %v11858_v8 = vld [vmem:[#allocation3 + $0x410] sm:$0xff] }
 0x851   :  { %9554 = vmatpush1.bf16.msra.mxu1 %v8706_v22  ;;  %v11837_v22 = vld [vmem:[#allocation3 + $0x278] sm:$0xff] }
 0x852   :  { %9605 = vmatprep.subr.bf16.mxu1 %v8741_v11  ;;  %10056 = vmatprep.subr.bf16.mxu0 %v11837_v22  ;;  %v8759_v11 = vld [vmem:[#allocation3 + $0xd98] sm:$0xff]  ;;  %v11859_v22 = vld [vmem:[#allocation3 + $0x428] sm:$0xff] }
 0x853   :  { %10057 = vmatpush1.bf16.msra.mxu0 %v11838_v31  ;;  %v11860_v31 = vld [vmem:[#allocation3 + $0x420] sm:$0xff] }
 0x854   :  { %9556 = vmatmul.mubr.bf16.vlgmr.msra.gmra.mrb[60].mxu1 %v8988_v46  ;;  %v11839_v46 = vld [vmem:[#allocation3 + $0x288] sm:$0xff] }
 0x855   :  { %9606 = vmatpush1.bf16.msra.mxu1 %v8740_v0  ;;  %9637 = vmatprep.mubr.bf16.mxu1 %v9038_v55  ;;  %v8761_v55 = vld [vmem:[#allocation3 + $0xda8] sm:$0xff]  ;;  %v8760_v0 = vld [vmem:[#allocation3 + $0xda0] sm:$0xff] }
 0x856   :  { %9607 = vmatprep.subr.bf16.mxu1 %v8743_v14  ;;  %10058 = vmatprep.subr.bf16.mxu0 %v11839_v46  ;;  %v8763_v14 = vld [vmem:[#allocation3 + $0xdb8] sm:$0xff] }
 0x857   :  { %10059 = vmatpush1.bf16.msra.mxu0 %v11840_v33  ;;  %v11861_v46 = vld [vmem:[#allocation3 + $0x438] sm:$0xff]  ;;  %v11862_v33 = vld [vmem:[#allocation3 + $0x430] sm:$0xff] }
 0x858   :  { %10060 = vmatprep.subr.bf16.mxu0 %v11841_v44  ;;  %v11863_v44 = vld [vmem:[#allocation3 + $0x448] sm:$0xff] }
 0x859   :  { %9608 = vmatpush1.bf16.msra.mxu1 %v8742_v28  ;;  %v11843_v28 = vld [vmem:[#allocation3 + $0x2a8] sm:$0xff] }
 0x85a   :  { %9609 = vmatprep.subr.bf16.mxu1 %v8745_v3  ;;  %v8762_v3 = vld [vmem:[#allocation3 + $0xdb0] sm:$0xff] }
 0x85b   :  { %10061 = vmatpush1.bf16.msra.mxu0 %v11842_v53  ;;  %v8817_v53 = vld [vmem:[#allocation3 + $0xf68] sm:$0xff] }
 0x85c   :  { %10062 = vmatprep.subr.bf16.mxu0 %v11843_v28 }
 0x85d   :  { %9610 = vmatpush1.bf16.msra.mxu1 %v8744_v54  ;;  %v8764_v54 = vld [vmem:[#allocation3 + $0xdc0] sm:$0xff] }
 0x85e   :  { %9611 = vmatprep.subr.bf16.mxu1 %v8747_v30  ;;  %v8767_v30 = vld [vmem:[#allocation3 + $0xdd8] sm:$0xff] }
 0x85f   :  { %10063 = vmatpush1.bf16.msra.mxu0 %v11844_v42 }
 0x860   :  { %10064 = vmatprep.subr.bf16.mxu0 %v11845_v19 }
 0x861   :  { %9612 = vmatpush1.bf16.msra.mxu1 %v8746_v52  ;;  %v8766_v52 = vld [vmem:[#allocation3 + $0xdd0] sm:$0xff] }
 0x862   :  { %9613 = vmatprep.subr.bf16.mxu1 %v8749_v56  ;;  %v8769_v56 = vld [vmem:[#allocation3 + $0xde8] sm:$0xff] }
 0x863   :  { %10065 = vmatpush1.bf16.msra.mxu0 %v11846_v41 }
 0x864   :  { %10066 = vmatprep.subr.bf16.mxu0 %v11847_v4  ;;  %v8816_v4 = vld [vmem:[#allocation3 + $0xf60] sm:$0xff] }
 0x865   :  { %9614 = vmatpush1.bf16.msra.mxu1 %v8748_v62  ;;  %v8768_v62 = vld [vmem:[#allocation3 + $0xde0] sm:$0xff] }
 0x866   :  { %9615 = vmatprep.subr.bf16.mxu1 %v8751_v61  ;;  %v8771_v61 = vld [vmem:[#allocation3 + $0xdf8] sm:$0xff] }
 0x867   :  { %v9311_v7 = vpop.f32.mrb[48].mxu1  ;;  %10067 = vmatpush1.bf16.msra.mxu0 %v11848_v60 }
 0x868   :  { %v9312_v12 = vadd.f32 %v9311_v7, %v16079_v39  ;;  %v9313_v63 = vpop.f32.mrb[49].mxu1  ;;  %v8755_v39 = vld [vmem:[#allocation3 + $0xd78] sm:$0xff]  ;;  %10068 = vmatprep.subr.bf16.mxu0 %v11849_v26  ;;  %v8770_v7 = vld [vmem:[#allocation3 + $0xdf0] sm:$0xff] }
 0x869   :  { %v9314_v16 = vadd.f32 %v9313_v63, %v16084_v45  ;;  %v9315_v10 = vpop.f32.mrb[50].mxu1  ;;  %9616 = vmatpush1.bf16.msra.mxu1 %v8750_v27  ;;  %v9520_v45 = vpop.f32.mrb[54].mxu0  ;;  %v9732_v27 = vcombine.high %v16088_v58, %v16088_v58  ;;  %v9036_v63 = vcombine.high %v16047_v48, %v16047_v48  ;;  %v8807_v58 = vld [vmem:[#allocation3 + $0xf18] sm:$0xff]  ;;  %v11866_v26 = vld [vmem:[#allocation3 + $0x450] sm:$0xff] }
 0x86a   :  { %v16107_v1 = vadd.f32 %v16057_v35, %v9312_v12  ;;  %v9316_v5 = vpop.f32.mrb[51].mxu1  ;;  %9617 = vmatprep.subr.bf16.mxu1 %v8753_v37  ;;  %v9521_v43 = vpop.f32.mrb[55].mxu0  ;;  %v8754_v35 = vld [vmem:[#allocation3 + $0xd70] sm:$0xff]  ;;  %v8805_v37 = vld [vmem:[#allocation3 + $0xf08] sm:$0xff]  ;;  %v11853_v10 = vld [vmem:[#allocation3 + $0x2f8] sm:$0xff] }
 0x86b   :  { %v16112_v2 = vadd.f32 %v16059_v51, %v9314_v16  ;;  %v8756_v51 = vld [vmem:[#allocation3 + $0xd80] sm:$0xff]  ;;  %10069 = vmatpush1.bf16.msra.mxu0 %v11850_v47  ;;  %v9746_v12 = vrot.slane %v9732_v27, %v15761_v20  ;;  %v9039_v16 = vcombine.high %v16069_v24, %v16069_v24  ;;  %v8809_v24 = vld [vmem:[#allocation3 + $0xf28] sm:$0xff]  ;;  %v11857_v43 = vld [vmem:[#allocation3 + $0x418] sm:$0xff] }
 0x86c   :  { %10070 = vmatprep.subr.bf16.mxu0 %v11851_v38  ;;  %v8804_v5 = vld [vmem:[#allocation3 + $0xf00] sm:$0xff]  ;;  %v11855_v45 = vld [vmem:[#allocation3 + $0x408] sm:$0xff]  ;;  %v11869_v27 = vld [vmem:[#allocation3 + $0x478] sm:$0xff] }
 0x86d   :  { %9618 = vmatpush1.bf16.msra.mxu1 %v8752_v23  ;;  %v9748_v29 = vcombine.high %v9746_v12, %v9746_v12  ;;  %v16127_v48 = vrot.slane %v9746_v12, %v15761_v20  ;;  %v8821_v47 = vld [vmem:[#allocation3 + $0xf88] sm:$0xff]  ;;  %v11868_v38 = vld [vmem:[#allocation3 + $0x460] sm:$0xff] }
 0x86e   :  { %9619 = vmatprep.subr.bf16.mxu1 %v8755_v39  ;;  %v11854_v39 = vld [vmem:[#allocation3 + $0x2f0] sm:$0xff]  ;;  %v11871_v12 = vld [vmem:[#allocation3 + $0x488] sm:$0xff] }
 0x86f   :  { %10071 = vmatpush1.bf16.msra.mxu0 %v11852_v40  ;;  %v16124_v23 = vrot.slane %v9748_v29, %v15761_v20  ;;  %v8825_v40 = vld [vmem:[#allocation3 + $0xfa8] sm:$0xff]  ;;  %v8824_v29 = vld [vmem:[#allocation3 + $0xfa0] sm:$0xff] }
 0x870   :  { %10072 = vmatprep.subr.bf16.mxu0 %v11853_v10  ;;  %v11873_v10 = vld [vmem:[#allocation3 + $0x498] sm:$0xff] }
 0x871   :  { %9620 = vmatpush1.bf16.msra.mxu1 %v8754_v35  ;;  %10074 = vmatprep.mubr.bf16.mxu0 %v16124_v23  ;;  %v8808_v35 = vld [vmem:[#allocation3 + $0xf20] sm:$0xff] }
 0x872   :  { %9621 = vmatprep.subr.bf16.mxu1 %v8757_v34  ;;  %v8811_v34 = vld [vmem:[#allocation3 + $0xf38] sm:$0xff] }
 0x873   :  { %10073 = vmatpush1.bf16.msra.mxu0 %v11854_v39  ;;  %v11875_v39 = vld [vmem:[#allocation3 + $0x4a8] sm:$0xff] }
 0x874   :  { %10124 = vmatprep.subr.bf16.mxu0 %v11855_v45  ;;  %v11876_v45 = vld [vmem:[#allocation3 + $0x4a0] sm:$0xff] }
 0x875   :  { %9622 = vmatpush1.bf16.msra.mxu1 %v8756_v51  ;;  %v8810_v51 = vld [vmem:[#allocation3 + $0xf30] sm:$0xff] }
 0x876   :  { %9623 = vmatprep.subr.bf16.mxu1 %v8759_v11  ;;  %10075 = vmatmul.mubr.bf16.vlgmr.msra.gmra.mrb[68].mxu0 %v16127_v48  ;;  %v8813_v11 = vld [vmem:[#allocation3 + $0xf48] sm:$0xff] }
 0x877   :  { %10125 = vmatpush1.bf16.msra.mxu0 %v11856_v49  ;;  %v11877_v49 = vld [vmem:[#allocation3 + $0x4b8] sm:$0xff] }
 0x878   :  { %10126 = vmatprep.subr.bf16.mxu0 %v11857_v43  ;;  %v8828_v43 = vld [vmem:[#allocation3 + $0xfc0] sm:$0xff] }
 0x879   :  { %9624 = vmatpush1.bf16.msra.mxu1 %v8758_v17  ;;  %v8812_v17 = vld [vmem:[#allocation3 + $0xf40] sm:$0xff] }
 0x87a   :  { %9625 = vmatprep.subr.bf16.mxu1 %v8761_v55  ;;  %v8815_v55 = vld [vmem:[#allocation3 + $0xf58] sm:$0xff] }
 0x87b   :  { %10127 = vmatpush1.bf16.msra.mxu0 %v11858_v8  ;;  %v11879_v8 = vld [vmem:[#allocation3 + $0x4c8] sm:$0xff] }
 0x87c   :  { %10128 = vmatprep.subr.bf16.mxu0 %v11859_v22  ;;  %v8830_v22 = vld [vmem:[#allocation3 + $0xfd0] sm:$0xff] }
 0x87d   :  { %9626 = vmatpush1.bf16.msra.mxu1 %v8760_v0  ;;  %v8814_v0 = vld [vmem:[#allocation3 + $0xf50] sm:$0xff] }
 0x87e   :  { %9627 = vmatprep.subr.bf16.mxu1 %v8763_v14 }
 0x87f   :  { %10129 = vmatpush1.bf16.msra.mxu0 %v11860_v31  ;;  %v11881_v31 = vld [vmem:[#allocation3 + $0x4d8] sm:$0xff] }
 0x880   :  { %10130 = vmatprep.subr.bf16.mxu0 %v11861_v46  ;;  %v8832_v46 = vld [vmem:[#allocation3 + $0xfe0] sm:$0xff] }
 0x881   :  { %9628 = vmatpush1.bf16.msra.mxu1 %v8762_v3 }
 0x882   :  { %9629 = vmatprep.subr.bf16.mxu1 %v8765_v9  ;;  %v11864_v9 = vld [vmem:[#allocation3 + $0x440] sm:$0xff] }
 0x883   :  { %10131 = vmatpush1.bf16.msra.mxu0 %v11862_v33  ;;  %v11883_v33 = vld [vmem:[#allocation3 + $0x4e8] sm:$0xff] }
 0x884   :  { %10132 = vmatprep.subr.bf16.mxu0 %v11863_v44  ;;  %v8834_v44 = vld [vmem:[#allocation3 + $0xff0] sm:$0xff] }
 0x885   :  { %9630 = vmatpush1.bf16.msra.mxu1 %v8764_v54  ;;  %v11865_v54 = vld [vmem:[#allocation3 + $0x458] sm:$0xff] }
 0x886   :  { %9631 = vmatprep.subr.bf16.mxu1 %v8767_v30 }
 0x887   :  { %10133 = vmatpush1.bf16.msra.mxu0 %v11864_v9  ;;  %v11885_v9 = vld [vmem:[#allocation3 + $0x4f8] sm:$0xff] }
 0x888   :  { %10134 = vmatprep.subr.bf16.mxu0 %v11865_v54 }
 0x889   :  { %9632 = vmatpush1.bf16.msra.mxu1 %v8766_v52  ;;  %v16136_v52 = vpop.f32.mrb[56].mxu0 }
 0x88a   :  { %9633 = vmatprep.subr.bf16.mxu1 %v8769_v56  ;;  %v16141_v60 = vpop.f32.mrb[57].mxu0 }
 0x88b   :  { %10135 = vmatpush1.bf16.msra.mxu0 %v11866_v26  ;;  %v11891_v26 = vld [vmem:[#allocation3 + $0x600] sm:$0xff] }
 0x88d   :  { %9634 = vmatpush1.bf16.msra.mxu1 %v8768_v62  ;;  %v11867_v62 = vld [vmem:[#allocation3 + $0x468] sm:$0xff] }
 0x88e   :  { %9635 = vmatprep.subr.bf16.mxu1 %v8771_v61  ;;  %10136 = vmatprep.subr.bf16.mxu0 %v11867_v62  ;;  %v11893_v62 = vld [vmem:[#allocation3 + $0x618] sm:$0xff] }
 0x88f   :  { %10137 = vmatpush1.bf16.msra.mxu0 %v11868_v38  ;;  %v11897_v38 = vld [vmem:[#allocation3 + $0x628] sm:$0xff] }
 0x890   :  { %10138 = vmatprep.subr.bf16.mxu0 %v11869_v27  ;;  %v11898_v27 = vld [vmem:[#allocation3 + $0x138] sm:$0xff] }
 0x891   :  { %9636 = vmatpush1.bf16.msra.mxu1 %v8770_v7  ;;  %v8823_v7 = vld [vmem:[#allocation3 + $0xf98] sm:$0xff] }
 0x892   :  { %9687 = vmatprep.subr.bf16.mxu1 %v8805_v37  ;;  %v11870_v37 = vld [vmem:[#allocation3 + $0x470] sm:$0xff] }
 0x893   :  { %10139 = vmatpush1.bf16.msra.mxu0 %v11870_v37  ;;  %v11901_v37 = vld [vmem:[#allocation3 + $0x638] sm:$0xff] }
 0x894   :  { %9638 = vmatmul.mubr.bf16.vlgmr.msra.gmra.mrb[64].mxu1 %v9036_v63  ;;  %10140 = vmatprep.subr.bf16.mxu0 %v11871_v12  ;;  %v8822_v63 = vld [vmem:[#allocation3 + $0xf90] sm:$0xff]  ;;  %v11902_v12 = vld [vmem:[#allocation3 + $0x148] sm:$0xff] }
 0x895   :  { %9688 = vmatpush1.bf16.msra.mxu1 %v8804_v5  ;;  %9719 = vmatprep.mubr.bf16.mxu1 %v9039_v16  ;;  %v11872_v16 = vld [vmem:[#allocation3 + $0x480] sm:$0xff]  ;;  %v8827_v5 = vld [vmem:[#allocation3 + $0xfb8] sm:$0xff] }
 0x896   :  { %9689 = vmatprep.subr.bf16.mxu1 %v8807_v58  ;;  %v11874_v58 = vld [vmem:[#allocation3 + $0x490] sm:$0xff] }
 0x897   :  { %10141 = vmatpush1.bf16.msra.mxu0 %v11872_v16  ;;  %v11905_v16 = vld [vmem:[#allocation3 + $0x648] sm:$0xff] }
 0x898   :  { %10142 = vmatprep.subr.bf16.mxu0 %v11873_v10  ;;  %v11906_v10 = vld [vmem:[#allocation3 + $0x158] sm:$0xff] }
 0x899   :  { %9690 = vmatpush1.bf16.msra.mxu1 %v8806_v21  ;;  %v8826_v21 = vld [vmem:[#allocation3 + $0xfb0] sm:$0xff] }
 0x89a   :  { %9691 = vmatprep.subr.bf16.mxu1 %v8809_v24  ;;  %v8829_v24 = vld [vmem:[#allocation3 + $0xfc8] sm:$0xff] }
 0x89b   :  { %10143 = vmatpush1.bf16.msra.mxu0 %v11874_v58 }
 0x89c   :  { %10144 = vmatprep.subr.bf16.mxu0 %v11875_v39  ;;  %v11907_v39 = vld [vmem:[#allocation3 + $0x640] sm:$0xff] }
 0x89d   :  { %9692 = vmatpush1.bf16.msra.mxu1 %v8808_v35  ;;  %v8831_v35 = vld [vmem:[#allocation3 + $0xfd8] sm:$0xff] }
 0x89e   :  { %9693 = vmatprep.subr.bf16.mxu1 %v8811_v34  ;;  %v11878_v34 = vld [vmem:[#allocation3 + $0x4b0] sm:$0xff] }
 0x89f   :  { %10145 = vmatpush1.bf16.msra.mxu0 %v11876_v45  ;;  %v11908_v45 = vld [vmem:[#allocation3 + $0x150] sm:$0xff] }
 0x8a0   :  { %10146 = vmatprep.subr.bf16.mxu0 %v11877_v49  ;;  %v11909_v49 = vld [vmem:[#allocation3 + $0x658] sm:$0xff] }
 0x8a1   :  { %9694 = vmatpush1.bf16.msra.mxu1 %v8810_v51  ;;  %v8833_v51 = vld [vmem:[#allocation3 + $0xfe8] sm:$0xff] }
 0x8a2   :  { %9695 = vmatprep.subr.bf16.mxu1 %v8813_v11  ;;  %v11880_v11 = vld [vmem:[#allocation3 + $0x4c0] sm:$0xff] }
 0x8a3   :  { %10147 = vmatpush1.bf16.msra.mxu0 %v11878_v34  ;;  %v11910_v34 = vld [vmem:[#allocation3 + $0x168] sm:$0xff] }
 0x8a4   :  { %10148 = vmatprep.subr.bf16.mxu0 %v11879_v8 }
 0x8a5   :  { %9696 = vmatpush1.bf16.msra.mxu1 %v8812_v17  ;;  %v8835_v17 = vld [vmem:[#allocation3 + $0xff8] sm:$0xff] }
 0x8a6   :  { %9697 = vmatprep.subr.bf16.mxu1 %v8815_v55  ;;  %v11882_v55 = vld [vmem:[#allocation3 + $0x4d0] sm:$0xff] }
 0x8a7   :  { %v9393_v14 = vpop.f32.mrb[52].mxu1  ;;  %10149 = vmatpush1.bf16.msra.mxu0 %v11880_v11  ;;  %v11912_v11 = vld [vmem:[#allocation3 + $0x160] sm:$0xff] }
 0x8a8   :  { %v9394_v28 = vadd.f32 %v9393_v14, %v16107_v1  ;;  %v9395_v3 = vpop.f32.mrb[53].mxu1  ;;  %v8819_v1 = vld [vmem:[#allocation3 + $0xf78] sm:$0xff]  ;;  %10150 = vmatprep.subr.bf16.mxu0 %v11881_v31  ;;  %v11913_v31 = vld [vmem:[#allocation3 + $0x668] sm:$0xff] }
 0x8a9   :  { %v9396_v42 = vadd.f32 %v9395_v3, %v16112_v2  ;;  %v9397_v19 = vpop.f32.mrb[54].mxu1  ;;  %9698 = vmatpush1.bf16.msra.mxu1 %v8814_v0  ;;  %v9602_v2 = vpop.f32.mrb[58].mxu0  ;;  %v16143_v0 = vld [vmem:[#allocation8 + $0x8] sm:$0xff]  ;;  %v9779_v3 = vcombine.high %v16097_v32, %v16097_v32 }
 0x8aa   :  { %v16134_v30 = vadd.f32 %v16081_v57, %v9394_v28  ;;  %v9398_v41 = vpop.f32.mrb[55].mxu1  ;;  %9699 = vmatprep.subr.bf16.mxu1 %v8817_v53  ;;  %v9603_v61 = vpop.f32.mrb[59].mxu0  ;;  %v8818_v57 = vld [vmem:[#allocation3 + $0xf70] sm:$0xff]  ;;  %v9788_v14 = vrot.slane %v16143_v0, %v15761_v20  ;;  %v9037_v53 = vcombine.high %v16072_v18, %v16072_v18  ;;  %v11884_v28 = vld [vmem:[#allocation3 + $0x4e0] sm:$0xff]  ;;  %v11886_v19 = vld [vmem:[#allocation3 + $0x108] sm:$0xff] }
 0x8ab   :  { %v16139_v56 = vadd.f32 %v16086_v13, %v9396_v42  ;;  %v8820_v13 = vld [vmem:[#allocation3 + $0xf80] sm:$0xff]  ;;  %10151 = vmatpush1.bf16.msra.mxu0 %v11882_v55  ;;  %v11887_v41 = vld [vmem:[#allocation3 + $0x4f0] sm:$0xff]  ;;  %v11890_v32 = vld [vmem:[#allocation3 + $0x608] sm:$0xff] }
 0x8ac   :  { %10152 = vmatprep.subr.bf16.mxu0 %v11883_v33  ;;  %v9796_v42 = vcombine.high %v9788_v14, %v9788_v14  ;;  %v11888_v18 = vld [vmem:[#allocation3 + $0x100] sm:$0xff]  ;;  %v11892_v2 = vld [vmem:[#allocation3 + $0x110] sm:$0xff]  ;;  %v11894_v61 = vld [vmem:[#allocation3 + $0x128] sm:$0xff] }
 0x8ad   :  { %9700 = vmatpush1.bf16.msra.mxu1 %v8816_v4  ;;  %v16155_v4 = vrot.slane %v9788_v14, %v15761_v20  ;;  %v11916_v55 = vld [vmem:[#allocation3 + $0x170] sm:$0xff]  ;;  %v11917_v33 = vld [vmem:[#allocation3 + $0x678] sm:$0xff]  ;;  %v11920_v14 = vld [vmem:[#allocation3 + $0x180] sm:$0xff] }
 0x8ae   :  { %9701 = vmatprep.subr.bf16.mxu1 %v8819_v1  ;;  %v16152_v54 = vrot.slane %v9796_v42, %v15761_v20  ;;  %v11889_v1 = vld [vmem:[#allocation3 + $0x118] sm:$0xff] }
 0x8af   :  { %10153 = vmatpush1.bf16.msra.mxu0 %v11884_v28  ;;  %v11922_v28 = vld [vmem:[#allocation3 + $0x198] sm:$0xff] }
 0x8b0   :  { %10154 = vmatprep.subr.bf16.mxu0 %v11885_v9  ;;  %10156 = vmatprep.mubr.bf16.mxu0 %v16152_v54  ;;  %v11924_v9 = vld [vmem:[#allocation3 + $0x190] sm:$0xff]  ;;  %v11925_v42 = vld [vmem:[#allocation3 + $0x698] sm:$0xff] }
 0x8b1   :  { %9702 = vmatpush1.bf16.msra.mxu1 %v8818_v57  ;;  %v11895_v57 = vld [vmem:[#allocation3 + $0x610] sm:$0xff] }
 0x8b2   :  { %9703 = vmatprep.subr.bf16.mxu1 %v8821_v47  ;;  %v11896_v47 = vld [vmem:[#allocation3 + $0x120] sm:$0xff] }
 0x8b3   :  { %10155 = vmatpush1.bf16.msra.mxu0 %v11887_v41  ;;  %v11927_v41 = vld [vmem:[#allocation3 + $0x690] sm:$0xff] }
 0x8b4   :  { %10206 = vmatprep.subr.bf16.mxu0 %v11890_v32  ;;  %v11930_v32 = vld [vmem:[#allocation3 + $0x1b8] sm:$0xff] }
 0x8b5   :  { %9704 = vmatpush1.bf16.msra.mxu1 %v8820_v13  ;;  %v11899_v13 = vld [vmem:[#allocation3 + $0x620] sm:$0xff] }
 0x8b6   :  { %9705 = vmatprep.subr.bf16.mxu1 %v8823_v7  ;;  %10157 = vmatmul.mubr.bf16.vlgmr.msra.gmra.mrb[72].mxu0 %v16155_v4  ;;  %v11900_v7 = vld [vmem:[#allocation3 + $0x130] sm:$0xff] }
 0x8b7   :  { %10207 = vmatpush1.bf16.msra.mxu0 %v11891_v26  ;;  %v11931_v26 = vld [vmem:[#allocation3 + $0x6a0] sm:$0xff] }
 0x8b8   :  { %10208 = vmatprep.subr.bf16.mxu0 %v11893_v62  ;;  %v11933_v62 = vld [vmem:[#allocation3 + $0x6b8] sm:$0xff] }
 0x8b9   :  { %9706 = vmatpush1.bf16.msra.mxu1 %v8822_v63  ;;  %v11903_v63 = vld [vmem:[#allocation3 + $0x630] sm:$0xff] }
 0x8ba   :  { %9707 = vmatprep.subr.bf16.mxu1 %v8825_v40  ;;  %v11904_v40 = vld [vmem:[#allocation3 + $0x140] sm:$0xff] }
 0x8bb   :  { %10209 = vmatpush1.bf16.msra.mxu0 %v11895_v57  ;;  %v11935_v57 = vld [vmem:[#allocation3 + $0x6b0] sm:$0xff] }
 0x8bc   :  { %10210 = vmatprep.subr.bf16.mxu0 %v11897_v38  ;;  %v11937_v38 = vld [vmem:[#allocation3 + $0x6c8] sm:$0xff] }
 0x8bd   :  { %9708 = vmatpush1.bf16.msra.mxu1 %v8824_v29 }
 0x8be   :  { %9709 = vmatprep.subr.bf16.mxu1 %v8827_v5 }
 0x8bf   :  { %10211 = vmatpush1.bf16.msra.mxu0 %v11899_v13  ;;  %v11939_v13 = vld [vmem:[#allocation3 + $0x6c0] sm:$0xff] }
 0x8c0   :  { %10212 = vmatprep.subr.bf16.mxu0 %v11901_v37  ;;  %v11941_v37 = vld [vmem:[#allocation3 + $0x6d8] sm:$0xff] }
 0x8c1   :  { %9710 = vmatpush1.bf16.msra.mxu1 %v8826_v21 }
 0x8c2   :  { %9711 = vmatprep.subr.bf16.mxu1 %v8829_v24 }
 0x8c3   :  { %10213 = vmatpush1.bf16.msra.mxu0 %v11903_v63  ;;  %v11943_v63 = vld [vmem:[#allocation3 + $0x6d0] sm:$0xff] }
 0x8c4   :  { %10214 = vmatprep.subr.bf16.mxu0 %v11905_v16  ;;  %v11945_v16 = vld [vmem:[#allocation3 + $0x6e8] sm:$0xff] }
 0x8c5   :  { %9712 = vmatpush1.bf16.msra.mxu1 %v8828_v43  ;;  %v16164_v8 = vpop.f32.mrb[60].mxu0 }
 0x8c6   :  { %9713 = vmatprep.subr.bf16.mxu1 %v8831_v35 }
 0x8c7   :  { %10215 = vmatpush1.bf16.msra.mxu0 %v11907_v39  ;;  %v11947_v39 = vld [vmem:[#allocation3 + $0x6e0] sm:$0xff] }
 0x8c8   :  { %10216 = vmatprep.subr.bf16.mxu0 %v11909_v49 }
 0x8c9   :  { %9714 = vmatpush1.bf16.msra.mxu1 %v8830_v22  ;;  %v16169_v22 = vpop.f32.mrb[61].mxu0 }
 0x8ca   :  { %9715 = vmatprep.subr.bf16.mxu1 %v8833_v51  ;;  %v11911_v51 = vld [vmem:[#allocation3 + $0x650] sm:$0xff] }
 0x8cb   :  { %10217 = vmatpush1.bf16.msra.mxu0 %v11911_v51  ;;  %v11952_v51 = vld [vmem:[#allocation3 + $0x300] sm:$0xff] }
 0x8cc   :  { %10218 = vmatprep.subr.bf16.mxu0 %v11913_v31  ;;  %v11956_v31 = vld [vmem:[#allocation3 + $0x310] sm:$0xff] }
 0x8cd   :  { %9716 = vmatpush1.bf16.msra.mxu1 %v8832_v46 }
 0x8ce   :  { %9717 = vmatprep.subr.bf16.mxu1 %v8835_v17  ;;  %v11915_v17 = vld [vmem:[#allocation3 + $0x660] sm:$0xff] }
 0x8cf   :  { %10219 = vmatpush1.bf16.msra.mxu0 %v11915_v17  ;;  %v11959_v17 = vld [vmem:[#allocation3 + $0x810] sm:$0xff] }
 0x8d0   :  { %10220 = vmatprep.subr.bf16.mxu0 %v11917_v33  ;;  %v11961_v33 = vld [vmem:[#allocation3 + $0x828] sm:$0xff] }
 0x8d1   :  { %9718 = vmatpush1.bf16.msra.mxu1 %v8834_v44  ;;  %v11919_v44 = vld [vmem:[#allocation3 + $0x670] sm:$0xff] }
 0x8d2   :  { %10001 = vmatprep.subr.bf16.mxu1 %v11886_v19  ;;  %v11926_v19 = vld [vmem:[#allocation3 + $0x1a8] sm:$0xff] }
 0x8d3   :  { %10221 = vmatpush1.bf16.msra.mxu0 %v11919_v44  ;;  %v11963_v44 = vld [vmem:[#allocation3 + $0x820] sm:$0xff] }
 0x8d4   :  { %9720 = vmatmul.mubr.bf16.vlgmr.msra.gmra.mrb[68].mxu1 %v9037_v53  ;;  %v11921_v53 = vld [vmem:[#allocation3 + $0x688] sm:$0xff] }
 0x8d5   :  { %10002 = vmatpush1.bf16.msra.mxu1 %v11888_v18  ;;  %10033 = vmatprep.mubr.bf16.mxu1 %v9779_v3  ;;  %v11923_v3 = vld [vmem:[#allocation3 + $0x680] sm:$0xff] }
 0x8d6   :  { %10003 = vmatprep.subr.bf16.mxu1 %v11889_v1  ;;  %10222 = vmatprep.subr.bf16.mxu0 %v11921_v53  ;;  %v11928_v18 = vld [vmem:[#allocation3 + $0x1a0] sm:$0xff]  ;;  %v11929_v1 = vld [vmem:[#allocation3 + $0x6a8] sm:$0xff]  ;;  %v11965_v53 = vld [vmem:[#allocation3 + $0x838] sm:$0xff] }
 0x8d7   :  { %10223 = vmatpush1.bf16.msra.mxu0 %v11923_v3  ;;  %v11967_v3 = vld [vmem:[#allocation3 + $0x830] sm:$0xff] }
 0x8d8   :  { %10224 = vmatprep.subr.bf16.mxu0 %v11925_v42  ;;  %v11969_v42 = vld [vmem:[#allocation3 + $0x848] sm:$0xff] }
 0x8d9   :  { %10004 = vmatpush1.bf16.msra.mxu1 %v11892_v2  ;;  %v11932_v2 = vld [vmem:[#allocation3 + $0x1b0] sm:$0xff] }
 0x8da   :  { %10005 = vmatprep.subr.bf16.mxu1 %v11894_v61  ;;  %v11934_v61 = vld [vmem:[#allocation3 + $0x1c8] sm:$0xff] }
 0x8db   :  { %10225 = vmatpush1.bf16.msra.mxu0 %v11927_v41 }
 0x8dc   :  { %10226 = vmatprep.subr.bf16.mxu0 %v11929_v1 }
 0x8dd   :  { %10006 = vmatpush1.bf16.msra.mxu1 %v11896_v47  ;;  %v11936_v47 = vld [vmem:[#allocation3 + $0x1c0] sm:$0xff] }
 0x8de   :  { %10007 = vmatprep.subr.bf16.mxu1 %v11898_v27  ;;  %v11938_v27 = vld [vmem:[#allocation3 + $0x1d8] sm:$0xff] }
 0x8df   :  { %10227 = vmatpush1.bf16.msra.mxu0 %v11931_v26 }
 0x8e0   :  { %10228 = vmatprep.subr.bf16.mxu0 %v11933_v62  ;;  %v11972_v62 = vld [vmem:[#allocation3 + $0x350] sm:$0xff] }
 0x8e1   :  { %10008 = vmatpush1.bf16.msra.mxu1 %v11900_v7  ;;  %v11940_v7 = vld [vmem:[#allocation3 + $0x1d0] sm:$0xff] }
 0x8e2   :  { %10009 = vmatprep.subr.bf16.mxu1 %v11902_v12  ;;  %v11942_v12 = vld [vmem:[#allocation3 + $0x1e8] sm:$0xff] }
 0x8e3   :  { %10229 = vmatpush1.bf16.msra.mxu0 %v11935_v57 }
 0x8e4   :  { %10230 = vmatprep.subr.bf16.mxu0 %v11937_v38  ;;  %v11974_v38 = vld [vmem:[#allocation3 + $0x368] sm:$0xff] }
 0x8e5   :  { %10010 = vmatpush1.bf16.msra.mxu1 %v11904_v40  ;;  %v11944_v40 = vld [vmem:[#allocation3 + $0x1e0] sm:$0xff] }
 0x8e6   :  { %10011 = vmatprep.subr.bf16.mxu1 %v11906_v10  ;;  %v9781_v10 = vcombine.high %v16143_v0, %v16143_v0 }
 0x8e7   :  { %v9475_v29 = vpop.f32.mrb[56].mxu1  ;;  %10231 = vmatpush1.bf16.msra.mxu0 %v11939_v13 }
 0x8e8   :  { %v9476_v5 = vadd.f32 %v9475_v29, %v16134_v30  ;;  %v9477_v58 = vpop.f32.mrb[57].mxu1  ;;  %10232 = vmatprep.subr.bf16.mxu0 %v11941_v37  ;;  %v11946_v29 = vld [vmem:[#allocation3 + $0x1f8] sm:$0xff]  ;;  %v11976_v37 = vld [vmem:[#allocation3 + $0x360] sm:$0xff] }
 0x8e9   :  { %v9478_v21 = vadd.f32 %v9477_v58, %v16139_v56  ;;  %v9479_v24 = vpop.f32.mrb[58].mxu1  ;;  %10012 = vmatpush1.bf16.msra.mxu1 %v11908_v45  ;;  %v9684_v56 = vpop.f32.mrb[62].mxu0  ;;  %v9777_v58 = vcombine.high %v16100_v59, %v16100_v59  ;;  %v11949_v45 = vld [vmem:[#allocation3 + $0x6f8] sm:$0xff] }
 0x8ea   :  { %v16162_v43 = vadd.f32 %v16109_v6, %v9476_v5  ;;  %v9480_v35 = vpop.f32.mrb[59].mxu1  ;;  %10013 = vmatprep.subr.bf16.mxu1 %v11910_v34  ;;  %v9685_v46 = vpop.f32.mrb[63].mxu0  ;;  %v11914_v6 = vld [vmem:[#allocation3 + $0x178] sm:$0xff]  ;;  %v9795_v5 = vrot.slane %v9781_v10, %v15761_v20  ;;  %v9780_v24 = vcombine.high %v16124_v23, %v16124_v23  ;;  %v11951_v34 = vld [vmem:[#allocation3 + $0x6f0] sm:$0xff]  ;;  %v11954_v23 = vld [vmem:[#allocation3 + $0x808] sm:$0xff] }
 0x8eb   :  { %v16167_v30 = vadd.f32 %v16114_v25, %v9478_v21  ;;  %v11918_v25 = vld [vmem:[#allocation3 + $0x188] sm:$0xff]  ;;  %10233 = vmatpush1.bf16.msra.mxu0 %v11943_v63  ;;  %v11948_v21 = vld [vmem:[#allocation3 + $0x1f0] sm:$0xff]  ;;  %v11953_v56 = vld [vmem:[#allocation3 + $0x318] sm:$0xff] }
 0x8ec   :  { %10234 = vmatprep.subr.bf16.mxu0 %v11945_v16  ;;  %v9797_v49 = vcombine.high %v9795_v5, %v9795_v5  ;;  %v11950_v35 = vld [vmem:[#allocation3 + $0x308] sm:$0xff]  ;;  %v16182_v59 = vrot.slane %v9795_v5, %v15761_v20  ;;  %v11957_v46 = vld [vmem:[#allocation3 + $0x818] sm:$0xff]  ;;  %v11980_v16 = vld [vmem:[#allocation3 + $0x370] sm:$0xff] }
 0x8ed   :  { %10014 = vmatpush1.bf16.msra.mxu1 %v11912_v11  ;;  %v11955_v11 = vld [vmem:[#allocation3 + $0x800] sm:$0xff]  ;;  %v11981_v10 = vld [vmem:[#allocation3 + $0x878] sm:$0xff] }
 0x8ee   :  { %10015 = vmatprep.subr.bf16.mxu1 %v11914_v6  ;;  %v16179_v0 = vrot.slane %v9797_v49, %v15761_v20  ;;  %v11958_v6 = vld [vmem:[#allocation3 + $0x328] sm:$0xff]  ;;  %v11984_v5 = vld [vmem:[#allocation3 + $0x380] sm:$0xff] }
 0x8ef   :  { %10235 = vmatpush1.bf16.msra.mxu0 %v11947_v39  ;;  %v11986_v39 = vld [vmem:[#allocation3 + $0x398] sm:$0xff]  ;;  %v11990_v49 = vld [vmem:[#allocation3 + $0x3a8] sm:$0xff] }
 0x8f0   :  { %10236 = vmatprep.subr.bf16.mxu0 %v11949_v45  ;;  %10238 = vmatprep.mubr.bf16.mxu0 %v16179_v0  ;;  %v11989_v45 = vld [vmem:[#allocation3 + $0x898] sm:$0xff] }
 0x8f1   :  { %10016 = vmatpush1.bf16.msra.mxu1 %v11916_v55  ;;  %v11960_v55 = vld [vmem:[#allocation3 + $0x320] sm:$0xff] }
 0x8f2   :  { %10017 = vmatprep.subr.bf16.mxu1 %v11918_v25  ;;  %v11962_v25 = vld [vmem:[#allocation3 + $0x338] sm:$0xff] }
 0x8f3   :  { %10237 = vmatpush1.bf16.msra.mxu0 %v11951_v34  ;;  %v11992_v34 = vld [vmem:[#allocation3 + $0x3a0] sm:$0xff] }
 0x8f4   :  { %10288 = vmatprep.subr.bf16.mxu0 %v11954_v23  ;;  %v11995_v23 = vld [vmem:[#allocation3 + $0x8a0] sm:$0xff] }
 0x8f5   :  { %10018 = vmatpush1.bf16.msra.mxu1 %v11920_v14  ;;  %v11964_v14 = vld [vmem:[#allocation3 + $0x330] sm:$0xff] }
 0x8f6   :  { %10019 = vmatprep.subr.bf16.mxu1 %v11922_v28  ;;  %10239 = vmatmul.mubr.bf16.vlgmr.msra.gmra.mrb[76].mxu0 %v16182_v59  ;;  %v11966_v28 = vld [vmem:[#allocation3 + $0x348] sm:$0xff] }
 0x8f7   :  { %10289 = vmatpush1.bf16.msra.mxu0 %v11955_v11  ;;  %v11996_v11 = vld [vmem:[#allocation3 + $0x3b0] sm:$0xff] }
 0x8f8   :  { %10290 = vmatprep.subr.bf16.mxu0 %v11957_v46  ;;  %v11998_v46 = vld [vmem:[#allocation3 + $0x3c8] sm:$0xff] }
 0x8f9   :  { %10020 = vmatpush1.bf16.msra.mxu1 %v11924_v9  ;;  %v11968_v9 = vld [vmem:[#allocation3 + $0x340] sm:$0xff] }
 0x8fa   :  { %10021 = vmatprep.subr.bf16.mxu1 %v11926_v19  ;;  %v11970_v19 = vld [vmem:[#allocation3 + $0x358] sm:$0xff] }
 0x8fb   :  { %10291 = vmatpush1.bf16.msra.mxu0 %v11959_v17  ;;  %v12000_v17 = vld [vmem:[#allocation3 + $0x3c0] sm:$0xff] }
 0x8fc   :  { %10292 = vmatprep.subr.bf16.mxu0 %v11961_v33  ;;  %v12002_v33 = vld [vmem:[#allocation3 + $0x3d8] sm:$0xff] }
 0x8fd   :  { %10022 = vmatpush1.bf16.msra.mxu1 %v11928_v18 }
 0x8fe   :  { %10023 = vmatprep.subr.bf16.mxu1 %v11930_v32  ;;  %v11971_v32 = vld [vmem:[#allocation3 + $0x840] sm:$0xff] }
 0x8ff   :  { %10293 = vmatpush1.bf16.msra.mxu0 %v11963_v44  ;;  %v12004_v44 = vld [vmem:[#allocation3 + $0x3d0] sm:$0xff] }
 0x900   :  { %10294 = vmatprep.subr.bf16.mxu0 %v11965_v53  ;;  %v12006_v53 = vld [vmem:[#allocation3 + $0x3e8] sm:$0xff] }
 0x901   :  { %10024 = vmatpush1.bf16.msra.mxu1 %v11932_v2 }
 0x902   :  { %10025 = vmatprep.subr.bf16.mxu1 %v11934_v61  ;;  %v11973_v61 = vld [vmem:[#allocation3 + $0x858] sm:$0xff] }
 0x903   :  { %10295 = vmatpush1.bf16.msra.mxu0 %v11967_v3  ;;  %v12008_v3 = vld [vmem:[#allocation3 + $0x3e0] sm:$0xff] }
 0x904   :  { %10296 = vmatprep.subr.bf16.mxu0 %v11969_v42  ;;  %v12010_v42 = vld [vmem:[#allocation3 + $0x3f8] sm:$0xff] }
 0x905   :  { %10026 = vmatpush1.bf16.msra.mxu1 %v11936_v47 }
 0x906   :  { %10027 = vmatprep.subr.bf16.mxu1 %v11938_v27 }
 0x907   :  { %10297 = vmatpush1.bf16.msra.mxu0 %v11971_v32  ;;  %v12012_v32 = vld [vmem:[#allocation3 + $0x3f0] sm:$0xff] }
 0x908   :  { %10298 = vmatprep.subr.bf16.mxu0 %v11973_v61  ;;  %v16191_v27 = vpop.f32.mrb[64].mxu0  ;;  %v12014_v61 = vld [vmem:[#allocation3 + $0x508] sm:$0xff] }
 0x909   :  { %10028 = vmatpush1.bf16.msra.mxu1 %v11940_v7  ;;  %v16196_v13 = vpop.f32.mrb[65].mxu0  ;;  %v11975_v7 = vld [vmem:[#allocation3 + $0x850] sm:$0xff] }
 0x90a   :  { %10029 = vmatprep.subr.bf16.mxu1 %v11942_v12  ;;  %v11977_v12 = vld [vmem:[#allocation3 + $0x868] sm:$0xff] }
 0x90b   :  { %10299 = vmatpush1.bf16.msra.mxu0 %v11975_v7  ;;  %v12016_v7 = vld [vmem:[#allocation3 + $0x500] sm:$0xff] }
 0x90c   :  { %10300 = vmatprep.subr.bf16.mxu0 %v11977_v12  ;;  %v12020_v12 = vld [vmem:[#allocation3 + $0x510] sm:$0xff] }
 0x90d   :  { %10030 = vmatpush1.bf16.msra.mxu1 %v11944_v40  ;;  %v11979_v40 = vld [vmem:[#allocation3 + $0x860] sm:$0xff] }
 0x90e   :  { %10031 = vmatprep.subr.bf16.mxu1 %v11946_v29  ;;  %v11983_v29 = vld [vmem:[#allocation3 + $0x870] sm:$0xff] }
 0x90f   :  { %10301 = vmatpush1.bf16.msra.mxu0 %v11979_v40  ;;  %v12023_v40 = vld [vmem:[#allocation3 + $0xa10] sm:$0xff] }
 0x910   :  { %10302 = vmatprep.subr.bf16.mxu0 %v11981_v10  ;;  %v12025_v10 = vld [vmem:[#allocation3 + $0xa28] sm:$0xff] }
 0x911   :  { %10032 = vmatpush1.bf16.msra.mxu1 %v11948_v21  ;;  %v11987_v21 = vld [vmem:[#allocation3 + $0x880] sm:$0xff] }
 0x912   :  { %10083 = vmatprep.subr.bf16.mxu1 %v11950_v35  ;;  %v11991_v35 = vld [vmem:[#allocation3 + $0x890] sm:$0xff] }
 0x913   :  { %10303 = vmatpush1.bf16.msra.mxu0 %v11983_v29  ;;  %v12027_v29 = vld [vmem:[#allocation3 + $0xa20] sm:$0xff] }
 0x914   :  { %10034 = vmatmul.mubr.bf16.vlgmr.msra.gmra.mrb[72].mxu1 %v9777_v58  ;;  %v11985_v58 = vld [vmem:[#allocation3 + $0x888] sm:$0xff] }
 0x915   :  { %10084 = vmatpush1.bf16.msra.mxu1 %v11952_v51  ;;  %10115 = vmatprep.mubr.bf16.mxu1 %v9780_v24  ;;  %v11988_v24 = vld [vmem:[#allocation3 + $0x390] sm:$0xff]  ;;  %v11993_v51 = vld [vmem:[#allocation3 + $0x8a8] sm:$0xff] }
 0x916   :  { %10085 = vmatprep.subr.bf16.mxu1 %v11953_v56  ;;  %10304 = vmatprep.subr.bf16.mxu0 %v11985_v58  ;;  %v11994_v56 = vld [vmem:[#allocation3 + $0x3b8] sm:$0xff] }
 0x917   :  { %10305 = vmatpush1.bf16.msra.mxu0 %v11987_v21  ;;  %v12029_v58 = vld [vmem:[#allocation3 + $0xa38] sm:$0xff]  ;;  %v12031_v21 = vld [vmem:[#allocation3 + $0xa30] sm:$0xff] }
 0x918   :  { %10306 = vmatprep.subr.bf16.mxu0 %v11989_v45  ;;  %v12033_v45 = vld [vmem:[#allocation3 + $0xa48] sm:$0xff] }
 0x919   :  { %10086 = vmatpush1.bf16.msra.mxu1 %v11956_v31  ;;  %v11997_v31 = vld [vmem:[#allocation3 + $0x8b8] sm:$0xff] }
 0x91a   :  { %10087 = vmatprep.subr.bf16.mxu1 %v11958_v6  ;;  %v11999_v6 = vld [vmem:[#allocation3 + $0x8b0] sm:$0xff] }
 0x91b   :  { %10307 = vmatpush1.bf16.msra.mxu0 %v11991_v35 }
 0x91c   :  { %10308 = vmatprep.subr.bf16.mxu0 %v11993_v51 }
 0x91d   :  { %10088 = vmatpush1.bf16.msra.mxu1 %v11960_v55  ;;  %v12001_v55 = vld [vmem:[#allocation3 + $0x8c8] sm:$0xff] }
 0x91e   :  { %10089 = vmatprep.subr.bf16.mxu1 %v11962_v25  ;;  %v12003_v25 = vld [vmem:[#allocation3 + $0x8c0] sm:$0xff] }
 0x91f   :  { %10309 = vmatpush1.bf16.msra.mxu0 %v11995_v23 }
 0x920   :  { %10310 = vmatprep.subr.bf16.mxu0 %v11997_v31  ;;  %v12036_v31 = vld [vmem:[#allocation3 + $0x550] sm:$0xff] }
 0x921   :  { %10090 = vmatpush1.bf16.msra.mxu1 %v11964_v14  ;;  %v12005_v14 = vld [vmem:[#allocation3 + $0x8d8] sm:$0xff] }
 0x922   :  { %10091 = vmatprep.subr.bf16.mxu1 %v11966_v28  ;;  %v12007_v28 = vld [vmem:[#allocation3 + $0x8d0] sm:$0xff] }
 0x923   :  { %10311 = vmatpush1.bf16.msra.mxu0 %v11999_v6 }
 0x924   :  { %10312 = vmatprep.subr.bf16.mxu0 %v12001_v55  ;;  %v12038_v55 = vld [vmem:[#allocation3 + $0x568] sm:$0xff] }
 0x925   :  { %10092 = vmatpush1.bf16.msra.mxu1 %v11968_v9  ;;  %v12009_v9 = vld [vmem:[#allocation3 + $0x8e8] sm:$0xff] }
 0x926   :  { %10093 = vmatprep.subr.bf16.mxu1 %v11970_v19  ;;  %v16198_v19 = vld [vmem:[#allocation8 + $0x10] sm:$0xff] }
 0x927   :  { %v9557_v41 = vpop.f32.mrb[60].mxu1  ;;  %10313 = vmatpush1.bf16.msra.mxu0 %v12003_v25 }
 0x928   :  { %v9558_v18 = vadd.f32 %v9557_v41, %v16162_v43  ;;  %v9559_v1 = vpop.f32.mrb[61].mxu1  ;;  %10314 = vmatprep.subr.bf16.mxu0 %v12005_v14  ;;  %v9837_v41 = vrot.slane %v16198_v19, %v15761_v20  ;;  %v12040_v14 = vld [vmem:[#allocation3 + $0x560] sm:$0xff] }
 0x929   :  { %v9560_v26 = vadd.f32 %v9559_v1, %v16167_v30  ;;  %v9561_v2 = vpop.f32.mrb[62].mxu1  ;;  %10094 = vmatpush1.bf16.msra.mxu1 %v11972_v62  ;;  %v9998_v30 = vpop.f32.mrb[66].mxu0  ;;  %v12011_v1 = vld [vmem:[#allocation3 + $0x8e0] sm:$0xff] }
 0x92a   :  { %v16189_v57 = vadd.f32 %v16136_v52, %v9558_v18  ;;  %v9562_v47 = vpop.f32.mrb[63].mxu1  ;;  %10095 = vmatprep.subr.bf16.mxu1 %v11974_v38  ;;  %v9999_v63 = vpop.f32.mrb[67].mxu0  ;;  %v11978_v52 = vld [vmem:[#allocation3 + $0x378] sm:$0xff]  ;;  %v9778_v18 = vcombine.high %v16127_v48, %v16127_v48  ;;  %v9845_v62 = vcombine.high %v9837_v41, %v9837_v41  ;;  %v12015_v38 = vld [vmem:[#allocation3 + $0x8f0] sm:$0xff]  ;;  %v16210_v48 = vrot.slane %v9837_v41, %v15761_v20 }
 0x92b   :  { %v16194_v43 = vadd.f32 %v16141_v60, %v9560_v26  ;;  %v11982_v60 = vld [vmem:[#allocation3 + $0x388] sm:$0xff]  ;;  %10315 = vmatpush1.bf16.msra.mxu0 %v12007_v28  ;;  %v9828_v26 = vcombine.high %v16152_v54, %v16152_v54  ;;  %v12013_v2 = vld [vmem:[#allocation3 + $0x8f8] sm:$0xff]  ;;  %v12047_v41 = vld [vmem:[#allocation3 + $0xa70] sm:$0xff] }
 0x92c   :  { %10316 = vmatprep.subr.bf16.mxu0 %v12009_v9  ;;  %v16207_v47 = vrot.slane %v9845_v62, %v15761_v20  ;;  %v12017_v30 = vld [vmem:[#allocation3 + $0x518] sm:$0xff]  ;;  %v12018_v54 = vld [vmem:[#allocation3 + $0xa08] sm:$0xff]  ;;  %v12044_v9 = vld [vmem:[#allocation3 + $0x570] sm:$0xff] }
 0x92d   :  { %10096 = vmatpush1.bf16.msra.mxu1 %v11976_v37  ;;  %v12019_v37 = vld [vmem:[#allocation3 + $0xa00] sm:$0xff]  ;;  %v12021_v63 = vld [vmem:[#allocation3 + $0xa18] sm:$0xff] }
 0x92e   :  { %10097 = vmatprep.subr.bf16.mxu1 %v11978_v52  ;;  %10320 = vmatprep.mubr.bf16.mxu0 %v16207_v47  ;;  %v12022_v52 = vld [vmem:[#allocation3 + $0x528] sm:$0xff]  ;;  %v12053_v62 = vld [vmem:[#allocation3 + $0xa98] sm:$0xff] }
 0x92f   :  { %10317 = vmatpush1.bf16.msra.mxu0 %v12011_v1  ;;  %v12049_v1 = vld [vmem:[#allocation3 + $0xa88] sm:$0xff] }
 0x930   :  { %10318 = vmatprep.subr.bf16.mxu0 %v12013_v2  ;;  %v12052_v2 = vld [vmem:[#allocation3 + $0x590] sm:$0xff] }
 0x931   :  { %10098 = vmatpush1.bf16.msra.mxu1 %v11980_v16  ;;  %v12024_v16 = vld [vmem:[#allocation3 + $0x520] sm:$0xff] }
 0x932   :  { %10099 = vmatprep.subr.bf16.mxu1 %v11982_v60  ;;  %v12026_v60 = vld [vmem:[#allocation3 + $0x538] sm:$0xff] }
 0x933   :  { %10319 = vmatpush1.bf16.msra.mxu0 %v12015_v38  ;;  %v12055_v38 = vld [vmem:[#allocation3 + $0xa90] sm:$0xff] }
 0x934   :  { %10370 = vmatprep.subr.bf16.mxu0 %v12018_v54  ;;  %v12058_v54 = vld [vmem:[#allocation3 + $0x5b8] sm:$0xff] }
 0x935   :  { %10100 = vmatpush1.bf16.msra.mxu1 %v11984_v5  ;;  %v12028_v5 = vld [vmem:[#allocation3 + $0x530] sm:$0xff] }
 0x936   :  { %10101 = vmatprep.subr.bf16.mxu1 %v11986_v39  ;;  %10321 = vmatmul.mubr.bf16.vlgmr.msra.gmra.mrb[80].mxu0 %v16210_v48  ;;  %v12030_v39 = vld [vmem:[#allocation3 + $0x548] sm:$0xff] }
 0x937   :  { %10371 = vmatpush1.bf16.msra.mxu0 %v12019_v37  ;;  %v12059_v37 = vld [vmem:[#allocation3 + $0xaa0] sm:$0xff] }
 0x938   :  { %10372 = vmatprep.subr.bf16.mxu0 %v12021_v63  ;;  %v12061_v63 = vld [vmem:[#allocation3 + $0xab8] sm:$0xff] }
 0x939   :  { %10102 = vmatpush1.bf16.msra.mxu1 %v11988_v24  ;;  %v12032_v24 = vld [vmem:[#allocation3 + $0x540] sm:$0xff] }
 0x93a   :  { %10103 = vmatprep.subr.bf16.mxu1 %v11990_v49  ;;  %v12034_v49 = vld [vmem:[#allocation3 + $0x558] sm:$0xff] }
 0x93b   :  { %10373 = vmatpush1.bf16.msra.mxu0 %v12023_v40  ;;  %v12063_v40 = vld [vmem:[#allocation3 + $0xab0] sm:$0xff] }
 0x93c   :  { %10374 = vmatprep.subr.bf16.mxu0 %v12025_v10  ;;  %v12065_v10 = vld [vmem:[#allocation3 + $0xac8] sm:$0xff] }
 0x93d   :  { %10104 = vmatpush1.bf16.msra.mxu1 %v11992_v34 }
 0x93e   :  { %10105 = vmatprep.subr.bf16.mxu1 %v11994_v56  ;;  %v12035_v56 = vld [vmem:[#allocation3 + $0xa40] sm:$0xff] }
 0x93f   :  { %10375 = vmatpush1.bf16.msra.mxu0 %v12027_v29  ;;  %v12067_v29 = vld [vmem:[#allocation3 + $0xac0] sm:$0xff] }
 0x940   :  { %10376 = vmatprep.subr.bf16.mxu0 %v12029_v58  ;;  %v12069_v58 = vld [vmem:[#allocation3 + $0xad8] sm:$0xff] }
 0x941   :  { %10106 = vmatpush1.bf16.msra.mxu1 %v11996_v11 }
 0x942   :  { %10107 = vmatprep.subr.bf16.mxu1 %v11998_v46  ;;  %v12037_v46 = vld [vmem:[#allocation3 + $0xa58] sm:$0xff] }
 0x943   :  { %10377 = vmatpush1.bf16.msra.mxu0 %v12031_v21  ;;  %v12071_v21 = vld [vmem:[#allocation3 + $0xad0] sm:$0xff] }
 0x944   :  { %10378 = vmatprep.subr.bf16.mxu0 %v12033_v45  ;;  %v12073_v45 = vld [vmem:[#allocation3 + $0xae8] sm:$0xff] }
 0x945   :  { %10108 = vmatpush1.bf16.msra.mxu1 %v12000_v17 }
 0x946   :  { %10109 = vmatprep.subr.bf16.mxu1 %v12002_v33 }
 0x947   :  { %10379 = vmatpush1.bf16.msra.mxu0 %v12035_v56  ;;  %v12075_v56 = vld [vmem:[#allocation3 + $0xae0] sm:$0xff] }
 0x948   :  { %10380 = vmatprep.subr.bf16.mxu0 %v12037_v46 }
 0x949   :  { %10110 = vmatpush1.bf16.msra.mxu1 %v12004_v44  ;;  %v16219_v33 = vpop.f32.mrb[68].mxu0  ;;  %v12039_v44 = vld [vmem:[#allocation3 + $0xa50] sm:$0xff] }
 0x94a   :  { %10111 = vmatprep.subr.bf16.mxu1 %v12006_v53  ;;  %v16224_v25 = vpop.f32.mrb[69].mxu0  ;;  %v12041_v53 = vld [vmem:[#allocation3 + $0xa68] sm:$0xff] }
 0x94b   :  { %10381 = vmatpush1.bf16.msra.mxu0 %v12039_v44  ;;  %v12080_v44 = vld [vmem:[#allocation3 + $0x700] sm:$0xff] }
 0x94c   :  { %10382 = vmatprep.subr.bf16.mxu0 %v12041_v53  ;;  %v12084_v53 = vld [vmem:[#allocation3 + $0x710] sm:$0xff] }
 0x94d   :  { %10112 = vmatpush1.bf16.msra.mxu1 %v12008_v3  ;;  %v12043_v3 = vld [vmem:[#allocation3 + $0xa60] sm:$0xff] }
 0x94e   :  { %10113 = vmatprep.subr.bf16.mxu1 %v12010_v42  ;;  %v12045_v42 = vld [vmem:[#allocation3 + $0xa78] sm:$0xff] }
 0x94f   :  { %10383 = vmatpush1.bf16.msra.mxu0 %v12043_v3  ;;  %v12087_v3 = vld [vmem:[#allocation3 + $0xc10] sm:$0xff] }
 0x950   :  { %10384 = vmatprep.subr.bf16.mxu0 %v12045_v42  ;;  %v12089_v42 = vld [vmem:[#allocation3 + $0xc28] sm:$0xff] }
 0x951   :  { %10114 = vmatpush1.bf16.msra.mxu1 %v12012_v32  ;;  %v12050_v32 = vld [vmem:[#allocation3 + $0x598] sm:$0xff] }
 0x952   :  { %10165 = vmatprep.subr.bf16.mxu1 %v12014_v61  ;;  %v12054_v61 = vld [vmem:[#allocation3 + $0x5a8] sm:$0xff] }
 0x953   :  { %10385 = vmatpush1.bf16.msra.mxu0 %v12047_v41  ;;  %v12091_v41 = vld [vmem:[#allocation3 + $0xc20] sm:$0xff] }
 0x954   :  { %10116 = vmatmul.mubr.bf16.vlgmr.msra.gmra.mrb[76].mxu1 %v9778_v18  ;;  %v12048_v18 = vld [vmem:[#allocation3 + $0x580] sm:$0xff]  ;;  %10386 = vmatprep.subr.bf16.mxu0 %v12049_v1  ;;  %v12093_v1 = vld [vmem:[#allocation3 + $0xc38] sm:$0xff] }
 0x955   :  { %10166 = vmatpush1.bf16.msra.mxu1 %v12016_v7  ;;  %10197 = vmatprep.mubr.bf16.mxu1 %v9828_v26  ;;  %v12051_v26 = vld [vmem:[#allocation3 + $0xa80] sm:$0xff] }
 0x956   :  { %10167 = vmatprep.subr.bf16.mxu1 %v12017_v30  ;;  %v12056_v7 = vld [vmem:[#allocation3 + $0x5a0] sm:$0xff]  ;;  %v12057_v30 = vld [vmem:[#allocation3 + $0xaa8] sm:$0xff] }
 0x957   :  { %10387 = vmatpush1.bf16.msra.mxu0 %v12051_v26  ;;  %v12095_v26 = vld [vmem:[#allocation3 + $0xc30] sm:$0xff] }
 0x958   :  { %10388 = vmatprep.subr.bf16.mxu0 %v12053_v62  ;;  %v12097_v62 = vld [vmem:[#allocation3 + $0xc48] sm:$0xff] }
 0x959   :  { %10168 = vmatpush1.bf16.msra.mxu1 %v12020_v12  ;;  %v12060_v12 = vld [vmem:[#allocation3 + $0x5b0] sm:$0xff] }
 0x95a   :  { %10169 = vmatprep.subr.bf16.mxu1 %v12022_v52  ;;  %v12062_v52 = vld [vmem:[#allocation3 + $0x5c8] sm:$0xff] }
 0x95b   :  { %10389 = vmatpush1.bf16.msra.mxu0 %v12055_v38 }
 0x95c   :  { %10390 = vmatprep.subr.bf16.mxu0 %v12057_v30 }
 0x95d   :  { %10170 = vmatpush1.bf16.msra.mxu1 %v12024_v16  ;;  %v12064_v16 = vld [vmem:[#allocation3 + $0x5c0] sm:$0xff] }
 0x95e   :  { %10171 = vmatprep.subr.bf16.mxu1 %v12026_v60  ;;  %v12066_v60 = vld [vmem:[#allocation3 + $0x5d8] sm:$0xff] }
 0x95f   :  { %10391 = vmatpush1.bf16.msra.mxu0 %v12059_v37 }
 0x960   :  { %10392 = vmatprep.subr.bf16.mxu0 %v12061_v63  ;;  %v12100_v63 = vld [vmem:[#allocation3 + $0x750] sm:$0xff] }
 0x961   :  { %10172 = vmatpush1.bf16.msra.mxu1 %v12028_v5  ;;  %v12068_v5 = vld [vmem:[#allocation3 + $0x5d0] sm:$0xff] }
 0x962   :  { %10173 = vmatprep.subr.bf16.mxu1 %v12030_v39  ;;  %v12070_v39 = vld [vmem:[#allocation3 + $0x5e8] sm:$0xff] }
 0x963   :  { %10393 = vmatpush1.bf16.msra.mxu0 %v12063_v40 }
 0x964   :  { %10394 = vmatprep.subr.bf16.mxu0 %v12065_v10  ;;  %v12102_v10 = vld [vmem:[#allocation3 + $0x768] sm:$0xff] }
 0x965   :  { %10174 = vmatpush1.bf16.msra.mxu1 %v12032_v24  ;;  %v12072_v24 = vld [vmem:[#allocation3 + $0x5e0] sm:$0xff] }
 0x966   :  { %10175 = vmatprep.subr.bf16.mxu1 %v12034_v49  ;;  %v9830_v49 = vcombine.high %v16198_v19, %v16198_v19 }
 0x967   :  { %v9639_v35 = vpop.f32.mrb[64].mxu1  ;;  %10395 = vmatpush1.bf16.msra.mxu0 %v12067_v29 }
 0x968   :  { %v9640_v34 = vadd.f32 %v9639_v35, %v16189_v57  ;;  %v9641_v51 = vpop.f32.mrb[65].mxu1  ;;  %10396 = vmatprep.subr.bf16.mxu0 %v12069_v58  ;;  %v12074_v35 = vld [vmem:[#allocation3 + $0x5f8] sm:$0xff]  ;;  %v12104_v58 = vld [vmem:[#allocation3 + $0x760] sm:$0xff] }
 0x969   :  { %v9642_v23 = vadd.f32 %v9641_v51, %v16194_v43  ;;  %v9643_v11 = vpop.f32.mrb[66].mxu1  ;;  %10176 = vmatpush1.bf16.msra.mxu1 %v12036_v31  ;;  %v10080_v43 = vpop.f32.mrb[70].mxu0  ;;  %v9826_v51 = vcombine.high %v16155_v4, %v16155_v4  ;;  %v12077_v31 = vld [vmem:[#allocation3 + $0xaf8] sm:$0xff] }
 0x96a   :  { %v16217_v6 = vadd.f32 %v16164_v8, %v9640_v34  ;;  %v9644_v17 = vpop.f32.mrb[67].mxu1  ;;  %10177 = vmatprep.subr.bf16.mxu1 %v12038_v55  ;;  %v10081_v28 = vpop.f32.mrb[71].mxu0  ;;  %v12042_v8 = vld [vmem:[#allocation3 + $0x578] sm:$0xff]  ;;  %v9844_v34 = vrot.slane %v9830_v49, %v15761_v20  ;;  %v9829_v11 = vcombine.high %v16179_v0, %v16179_v0  ;;  %v12079_v55 = vld [vmem:[#allocation3 + $0xaf0] sm:$0xff]  ;;  %v12082_v0 = vld [vmem:[#allocation3 + $0xc08] sm:$0xff] }
 0x96b   :  { %v16222_v57 = vadd.f32 %v16169_v22, %v9642_v23  ;;  %v12046_v22 = vld [vmem:[#allocation3 + $0x588] sm:$0xff]  ;;  %10397 = vmatpush1.bf16.msra.mxu0 %v12071_v21  ;;  %v12076_v23 = vld [vmem:[#allocation3 + $0x5f0] sm:$0xff]  ;;  %v12081_v43 = vld [vmem:[#allocation3 + $0x718] sm:$0xff] }
 0x96c   :  { %10398 = vmatprep.subr.bf16.mxu0 %v12073_v45  ;;  %v9846_v46 = vcombine.high %v9844_v34, %v9844_v34  ;;  %v12078_v17 = vld [vmem:[#allocation3 + $0x708] sm:$0xff]  ;;  %v16237_v4 = vrot.slane %v9844_v34, %v15761_v20  ;;  %v12085_v28 = vld [vmem:[#allocation3 + $0xc18] sm:$0xff]  ;;  %v12108_v45 = vld [vmem:[#allocation3 + $0x770] sm:$0xff] }
 0x96d   :  { %10178 = vmatpush1.bf16.msra.mxu1 %v12040_v14  ;;  %v12083_v14 = vld [vmem:[#allocation3 + $0xc00] sm:$0xff]  ;;  %v12109_v49 = vld [vmem:[#allocation3 + $0xc78] sm:$0xff] }
 0x96e   :  { %10179 = vmatprep.subr.bf16.mxu1 %v12042_v8  ;;  %v16234_v19 = vrot.slane %v9846_v46, %v15761_v20  ;;  %v12086_v8 = vld [vmem:[#allocation3 + $0x728] sm:$0xff]  ;;  %v12112_v34 = vld [vmem:[#allocation3 + $0x780] sm:$0xff] }
 0x96f   :  { %10399 = vmatpush1.bf16.msra.mxu0 %v12075_v56  ;;  %v12114_v56 = vld [vmem:[#allocation3 + $0x798] sm:$0xff]  ;;  %v12118_v46 = vld [vmem:[#allocation3 + $0x7a8] sm:$0xff] }
 0x970   :  { %10400 = vmatprep.subr.bf16.mxu0 %v12077_v31  ;;  %10402 = vmatprep.mubr.bf16.mxu0 %v16234_v19  ;;  %v12117_v31 = vld [vmem:[#allocation3 + $0xc98] sm:$0xff] }
 0x971   :  { %10180 = vmatpush1.bf16.msra.mxu1 %v12044_v9  ;;  %v12088_v9 = vld [vmem:[#allocation3 + $0x720] sm:$0xff] }
 0x972   :  { %10181 = vmatprep.subr.bf16.mxu1 %v12046_v22  ;;  %v12090_v22 = vld [vmem:[#allocation3 + $0x738] sm:$0xff] }
 0x973   :  { %10401 = vmatpush1.bf16.msra.mxu0 %v12079_v55  ;;  %v12120_v55 = vld [vmem:[#allocation3 + $0x7a0] sm:$0xff] }
 0x974   :  { %10452 = vmatprep.subr.bf16.mxu0 %v12082_v0  ;;  %v12123_v0 = vld [vmem:[#allocation3 + $0xca0] sm:$0xff] }
 0x975   :  { %10182 = vmatpush1.bf16.msra.mxu1 %v12048_v18  ;;  %v12092_v18 = vld [vmem:[#allocation3 + $0x730] sm:$0xff] }
 0x976   :  { %10183 = vmatprep.subr.bf16.mxu1 %v12050_v32  ;;  %10403 = vmatmul.mubr.bf16.vlgmr.msra.gmra.mrb[84].mxu0 %v16237_v4  ;;  %v12094_v32 = vld [vmem:[#allocation3 + $0x748] sm:$0xff] }
 0x977   :  { %10453 = vmatpush1.bf16.msra.mxu0 %v12083_v14  ;;  %v12124_v14 = vld [vmem:[#allocation3 + $0x7b0] sm:$0xff] }
 0x978   :  { %10454 = vmatprep.subr.bf16.mxu0 %v12085_v28  ;;  %v12126_v28 = vld [vmem:[#allocation3 + $0x7c8] sm:$0xff] }
 0x979   :  { %10184 = vmatpush1.bf16.msra.mxu1 %v12052_v2  ;;  %v12096_v2 = vld [vmem:[#allocation3 + $0x740] sm:$0xff] }
 0x97a   :  { %10185 = vmatprep.subr.bf16.mxu1 %v12054_v61  ;;  %v12098_v61 = vld [vmem:[#allocation3 + $0x758] sm:$0xff] }
 0x97b   :  { %10455 = vmatpush1.bf16.msra.mxu0 %v12087_v3  ;;  %v12128_v3 = vld [vmem:[#allocation3 + $0x7c0] sm:$0xff] }
 0x97c   :  { %10456 = vmatprep.subr.bf16.mxu0 %v12089_v42  ;;  %v12130_v42 = vld [vmem:[#allocation3 + $0x7d8] sm:$0xff] }
 0x97d   :  { %10186 = vmatpush1.bf16.msra.mxu1 %v12056_v7 }
 0x97e   :  { %10187 = vmatprep.subr.bf16.mxu1 %v12058_v54  ;;  %v12099_v54 = vld [vmem:[#allocation3 + $0xc40] sm:$0xff] }
 0x97f   :  { %10457 = vmatpush1.bf16.msra.mxu0 %v12091_v41  ;;  %v12132_v41 = vld [vmem:[#allocation3 + $0x7d0] sm:$0xff] }
 0x980   :  { %10458 = vmatprep.subr.bf16.mxu0 %v12093_v1  ;;  %v12134_v1 = vld [vmem:[#allocation3 + $0x7e8] sm:$0xff] }
 0x981   :  { %10188 = vmatpush1.bf16.msra.mxu1 %v12060_v12 }
 0x982   :  { %10189 = vmatprep.subr.bf16.mxu1 %v12062_v52  ;;  %v12101_v52 = vld [vmem:[#allocation3 + $0xc58] sm:$0xff] }
 0x983   :  { %10459 = vmatpush1.bf16.msra.mxu0 %v12095_v26  ;;  %v12136_v26 = vld [vmem:[#allocation3 + $0x7e0] sm:$0xff] }
 0x984   :  { %10460 = vmatprep.subr.bf16.mxu0 %v12097_v62  ;;  %v12138_v62 = vld [vmem:[#allocation3 + $0x7f8] sm:$0xff] }
 0x985   :  { %10190 = vmatpush1.bf16.msra.mxu1 %v12064_v16 }
 0x986   :  { %10191 = vmatprep.subr.bf16.mxu1 %v12066_v60 }
 0x987   :  { %10461 = vmatpush1.bf16.msra.mxu0 %v12099_v54  ;;  %v12140_v54 = vld [vmem:[#allocation3 + $0x7f0] sm:$0xff] }
 0x988   :  { %10462 = vmatprep.subr.bf16.mxu0 %v12101_v52  ;;  %v12142_v52 = vld [vmem:[#allocation3 + $0x908] sm:$0xff] }
 0x989   :  { %10192 = vmatpush1.bf16.msra.mxu1 %v12068_v5  ;;  %v16246_v60 = vpop.f32.mrb[72].mxu0  ;;  %v12103_v5 = vld [vmem:[#allocation3 + $0xc50] sm:$0xff] }
 0x98a   :  { %10193 = vmatprep.subr.bf16.mxu1 %v12070_v39  ;;  %v16251_v29 = vpop.f32.mrb[73].mxu0  ;;  %v12105_v39 = vld [vmem:[#allocation3 + $0xc68] sm:$0xff] }
 0x98b   :  { %10463 = vmatpush1.bf16.msra.mxu0 %v12103_v5  ;;  %v12144_v5 = vld [vmem:[#allocation3 + $0x900] sm:$0xff] }
 0x98c   :  { %10464 = vmatprep.subr.bf16.mxu0 %v12105_v39  ;;  %v12148_v39 = vld [vmem:[#allocation3 + $0x910] sm:$0xff] }
 0x98d   :  { %10194 = vmatpush1.bf16.msra.mxu1 %v12072_v24  ;;  %v12107_v24 = vld [vmem:[#allocation3 + $0xc60] sm:$0xff] }
 0x98e   :  { %10195 = vmatprep.subr.bf16.mxu1 %v12074_v35  ;;  %v12111_v35 = vld [vmem:[#allocation3 + $0xc70] sm:$0xff] }
 0x98f   :  { %10465 = vmatpush1.bf16.msra.mxu0 %v12107_v24  ;;  %v12151_v24 = vld [vmem:[#allocation3 + $0xe10] sm:$0xff] }
 0x990   :  { %10466 = vmatprep.subr.bf16.mxu0 %v12109_v49  ;;  %v12153_v49 = vld [vmem:[#allocation3 + $0xe28] sm:$0xff] }
 0x991   :  { %10196 = vmatpush1.bf16.msra.mxu1 %v12076_v23  ;;  %v12115_v23 = vld [vmem:[#allocation3 + $0xc80] sm:$0xff] }
 0x992   :  { %10247 = vmatprep.subr.bf16.mxu1 %v12078_v17  ;;  %v12119_v17 = vld [vmem:[#allocation3 + $0xc90] sm:$0xff] }
 0x993   :  { %10467 = vmatpush1.bf16.msra.mxu0 %v12111_v35  ;;  %v12155_v35 = vld [vmem:[#allocation3 + $0xe20] sm:$0xff] }
 0x994   :  { %10198 = vmatmul.mubr.bf16.vlgmr.msra.gmra.mrb[80].mxu1 %v9826_v51  ;;  %v12113_v51 = vld [vmem:[#allocation3 + $0xc88] sm:$0xff] }
 0x995   :  { %10248 = vmatpush1.bf16.msra.mxu1 %v12080_v44  ;;  %10279 = vmatprep.mubr.bf16.mxu1 %v9829_v11  ;;  %v12116_v11 = vld [vmem:[#allocation3 + $0x790] sm:$0xff]  ;;  %v12121_v44 = vld [vmem:[#allocation3 + $0xca8] sm:$0xff] }
 0x996   :  { %10249 = vmatprep.subr.bf16.mxu1 %v12081_v43  ;;  %10468 = vmatprep.subr.bf16.mxu0 %v12113_v51  ;;  %v12122_v43 = vld [vmem:[#allocation3 + $0x7b8] sm:$0xff] }
 0x997   :  { %10469 = vmatpush1.bf16.msra.mxu0 %v12115_v23  ;;  %v12157_v51 = vld [vmem:[#allocation3 + $0xe38] sm:$0xff]  ;;  %v12159_v23 = vld [vmem:[#allocation3 + $0xe30] sm:$0xff] }
 0x998   :  { %10470 = vmatprep.subr.bf16.mxu0 %v12117_v31  ;;  %v12161_v31 = vld [vmem:[#allocation3 + $0xe48] sm:$0xff] }
 0x999   :  { %10250 = vmatpush1.bf16.msra.mxu1 %v12084_v53  ;;  %v12125_v53 = vld [vmem:[#allocation3 + $0xcb8] sm:$0xff] }
 0x99a   :  { %10251 = vmatprep.subr.bf16.mxu1 %v12086_v8  ;;  %v12127_v8 = vld [vmem:[#allocation3 + $0xcb0] sm:$0xff] }
 0x99b   :  { %10471 = vmatpush1.bf16.msra.mxu0 %v12119_v17 }
 0x99c   :  { %10472 = vmatprep.subr.bf16.mxu0 %v12121_v44 }
 0x99d   :  { %10252 = vmatpush1.bf16.msra.mxu1 %v12088_v9  ;;  %v12129_v9 = vld [vmem:[#allocation3 + $0xcc8] sm:$0xff] }
 0x99e   :  { %10253 = vmatprep.subr.bf16.mxu1 %v12090_v22  ;;  %v12131_v22 = vld [vmem:[#allocation3 + $0xcc0] sm:$0xff] }
 0x99f   :  { %10473 = vmatpush1.bf16.msra.mxu0 %v12123_v0 }
 0x9a0   :  { %10474 = vmatprep.subr.bf16.mxu0 %v12125_v53  ;;  %v12164_v53 = vld [vmem:[#allocation3 + $0x950] sm:$0xff] }
 0x9a1   :  { %10254 = vmatpush1.bf16.msra.mxu1 %v12092_v18  ;;  %v12133_v18 = vld [vmem:[#allocation3 + $0xcd8] sm:$0xff] }
 0x9a2   :  { %10255 = vmatprep.subr.bf16.mxu1 %v12094_v32  ;;  %v12135_v32 = vld [vmem:[#allocation3 + $0xcd0] sm:$0xff] }
 0x9a3   :  { %10475 = vmatpush1.bf16.msra.mxu0 %v12127_v8 }
 0x9a4   :  { %10476 = vmatprep.subr.bf16.mxu0 %v12129_v9  ;;  %v12166_v9 = vld [vmem:[#allocation3 + $0x968] sm:$0xff] }
 0x9a5   :  { %10256 = vmatpush1.bf16.msra.mxu1 %v12096_v2  ;;  %v12137_v2 = vld [vmem:[#allocation3 + $0xce8] sm:$0xff] }
 0x9a6   :  { %10257 = vmatprep.subr.bf16.mxu1 %v12098_v61  ;;  %v16253_v61 = vld [vmem:[#allocation8 + $0x18] sm:$0xff] }
 0x9a7   :  { %v9721_v38 = vpop.f32.mrb[68].mxu1  ;;  %10477 = vmatpush1.bf16.msra.mxu0 %v12131_v22 }
 0x9a8   :  { %v9722_v7 = vadd.f32 %v9721_v38, %v16217_v6  ;;  %v9723_v30 = vpop.f32.mrb[69].mxu1  ;;  %10478 = vmatprep.subr.bf16.mxu0 %v12133_v18  ;;  %v9886_v38 = vrot.slane %v16253_v61, %v15761_v20  ;;  %v12168_v18 = vld [vmem:[#allocation3 + $0x960] sm:$0xff] }
 0x9a9   :  { %v9724_v37 = vadd.f32 %v9723_v30, %v16222_v57  ;;  %v9725_v12 = vpop.f32.mrb[70].mxu1  ;;  %10258 = vmatpush1.bf16.msra.mxu1 %v12100_v63  ;;  %v10162_v57 = vpop.f32.mrb[74].mxu0  ;;  %v12139_v30 = vld [vmem:[#allocation3 + $0xce0] sm:$0xff] }
 0x9aa   :  { %v16244_v40 = vadd.f32 %v16191_v27, %v9722_v7  ;;  %v9726_v16 = vpop.f32.mrb[71].mxu1  ;;  %10259 = vmatprep.subr.bf16.mxu1 %v12102_v10  ;;  %v10163_v21 = vpop.f32.mrb[75].mxu0  ;;  %v12106_v27 = vld [vmem:[#allocation3 + $0x778] sm:$0xff]  ;;  %v9827_v7 = vcombine.high %v16182_v59, %v16182_v59  ;;  %v9894_v63 = vcombine.high %v9886_v38, %v9886_v38  ;;  %v12143_v10 = vld [vmem:[#allocation3 + $0xcf0] sm:$0xff]  ;;  %v16265_v59 = vrot.slane %v9886_v38, %v15761_v20 }
 0x9ab   :  { %v16249_v6 = vadd.f32 %v16196_v13, %v9724_v37  ;;  %v12110_v13 = vld [vmem:[#allocation3 + $0x788] sm:$0xff]  ;;  %10479 = vmatpush1.bf16.msra.mxu0 %v12135_v32  ;;  %v9877_v37 = vcombine.high %v16207_v47, %v16207_v47  ;;  %v12141_v12 = vld [vmem:[#allocation3 + $0xcf8] sm:$0xff]  ;;  %v12175_v38 = vld [vmem:[#allocation3 + $0xe70] sm:$0xff] }
 0x9ac   :  { %10480 = vmatprep.subr.bf16.mxu0 %v12137_v2  ;;  %v16262_v16 = vrot.slane %v9894_v63, %v15761_v20  ;;  %v12145_v57 = vld [vmem:[#allocation3 + $0x918] sm:$0xff]  ;;  %v12146_v47 = vld [vmem:[#allocation3 + $0xe08] sm:$0xff]  ;;  %v12172_v2 = vld [vmem:[#allocation3 + $0x970] sm:$0xff] }
 0x9ad   :  { %10260 = vmatpush1.bf16.msra.mxu1 %v12104_v58  ;;  %v12147_v58 = vld [vmem:[#allocation3 + $0xe00] sm:$0xff]  ;;  %v12149_v21 = vld [vmem:[#allocation3 + $0xe18] sm:$0xff] }
 0x9ae   :  { %10261 = vmatprep.subr.bf16.mxu1 %v12106_v27  ;;  %10484 = vmatprep.mubr.bf16.mxu0 %v16262_v16  ;;  %v12150_v27 = vld [vmem:[#allocation3 + $0x928] sm:$0xff]  ;;  %v12181_v63 = vld [vmem:[#allocation3 + $0xe98] sm:$0xff] }
 0x9af   :  { %10481 = vmatpush1.bf16.msra.mxu0 %v12139_v30  ;;  %v12177_v30 = vld [vmem:[#allocation3 + $0xe88] sm:$0xff] }
 0x9b0   :  { %10482 = vmatprep.subr.bf16.mxu0 %v12141_v12  ;;  %v12180_v12 = vld [vmem:[#allocation3 + $0x990] sm:$0xff] }
 0x9b1   :  { %10262 = vmatpush1.bf16.msra.mxu1 %v12108_v45  ;;  %v12152_v45 = vld [vmem:[#allocation3 + $0x920] sm:$0xff] }
 0x9b2   :  { %10263 = vmatprep.subr.bf16.mxu1 %v12110_v13  ;;  %v12154_v13 = vld [vmem:[#allocation3 + $0x938] sm:$0xff] }
 0x9b3   :  { %10483 = vmatpush1.bf16.msra.mxu0 %v12143_v10  ;;  %v12183_v10 = vld [vmem:[#allocation3 + $0xe90] sm:$0xff] }
 0x9b4   :  { %10534 = vmatprep.subr.bf16.mxu0 %v12146_v47  ;;  %v12186_v47 = vld [vmem:[#allocation3 + $0x9b8] sm:$0xff] }
 0x9b5   :  { %10264 = vmatpush1.bf16.msra.mxu1 %v12112_v34  ;;  %v12156_v34 = vld [vmem:[#allocation3 + $0x930] sm:$0xff] }
 0x9b6   :  { %10265 = vmatprep.subr.bf16.mxu1 %v12114_v56  ;;  %10485 = vmatmul.mubr.bf16.vlgmr.msra.gmra.mrb[88].mxu0 %v16265_v59  ;;  %v12158_v56 = vld [vmem:[#allocation3 + $0x948] sm:$0xff] }
 0x9b7   :  { %10535 = vmatpush1.bf16.msra.mxu0 %v12147_v58  ;;  %v12187_v58 = vld [vmem:[#allocation3 + $0xea0] sm:$0xff] }
 0x9b8   :  { %10536 = vmatprep.subr.bf16.mxu0 %v12149_v21  ;;  %v12189_v21 = vld [vmem:[#allocation3 + $0xeb8] sm:$0xff] }
 0x9b9   :  { %10266 = vmatpush1.bf16.msra.mxu1 %v12116_v11  ;;  %v12160_v11 = vld [vmem:[#allocation3 + $0x940] sm:$0xff] }
 0x9ba   :  { %10267 = vmatprep.subr.bf16.mxu1 %v12118_v46  ;;  %v12162_v46 = vld [vmem:[#allocation3 + $0x958] sm:$0xff] }
 0x9bb   :  { %10537 = vmatpush1.bf16.msra.mxu0 %v12151_v24  ;;  %v12191_v24 = vld [vmem:[#allocation3 + $0xeb0] sm:$0xff] }
 0x9bc   :  { %10538 = vmatprep.subr.bf16.mxu0 %v12153_v49  ;;  %v12193_v49 = vld [vmem:[#allocation3 + $0xec8] sm:$0xff] }
 0x9bd   :  { %10268 = vmatpush1.bf16.msra.mxu1 %v12120_v55 }
 0x9be   :  { %10269 = vmatprep.subr.bf16.mxu1 %v12122_v43  ;;  %v12163_v43 = vld [vmem:[#allocation3 + $0xe40] sm:$0xff] }
 0x9bf   :  { %10539 = vmatpush1.bf16.msra.mxu0 %v12155_v35  ;;  %v12195_v35 = vld [vmem:[#allocation3 + $0xec0] sm:$0xff] }
 0x9c0   :  { %10540 = vmatprep.subr.bf16.mxu0 %v12157_v51  ;;  %v12197_v51 = vld [vmem:[#allocation3 + $0xed8] sm:$0xff] }
 0x9c1   :  { %10270 = vmatpush1.bf16.msra.mxu1 %v12124_v14 }
 0x9c2   :  { %10271 = vmatprep.subr.bf16.mxu1 %v12126_v28  ;;  %v12165_v28 = vld [vmem:[#allocation3 + $0xe58] sm:$0xff] }
 0x9c3   :  { %10541 = vmatpush1.bf16.msra.mxu0 %v12159_v23  ;;  %v12199_v23 = vld [vmem:[#allocation3 + $0xed0] sm:$0xff] }
 0x9c4   :  { %10542 = vmatprep.subr.bf16.mxu0 %v12161_v31  ;;  %v12201_v31 = vld [vmem:[#allocation3 + $0xee8] sm:$0xff] }
 0x9c5   :  { %10272 = vmatpush1.bf16.msra.mxu1 %v12128_v3 }
 0x9c6   :  { %10273 = vmatprep.subr.bf16.mxu1 %v12130_v42 }
 0x9c7   :  { %10543 = vmatpush1.bf16.msra.mxu0 %v12163_v43  ;;  %v12203_v43 = vld [vmem:[#allocation3 + $0xee0] sm:$0xff] }
 0x9c8   :  { %10544 = vmatprep.subr.bf16.mxu0 %v12165_v28 }
 0x9c9   :  { %10274 = vmatpush1.bf16.msra.mxu1 %v12132_v41  ;;  %v16274_v42 = vpop.f32.mrb[76].mxu0  ;;  %v12167_v41 = vld [vmem:[#allocation3 + $0xe50] sm:$0xff] }
 0x9ca   :  { %10275 = vmatprep.subr.bf16.mxu1 %v12134_v1  ;;  %v16279_v22 = vpop.f32.mrb[77].mxu0  ;;  %v12169_v1 = vld [vmem:[#allocation3 + $0xe68] sm:$0xff] }
 0x9cb   :  { %10545 = vmatpush1.bf16.msra.mxu0 %v12167_v41  ;;  %v12208_v41 = vld [vmem:[#allocation3 + $0xb00] sm:$0xff] }
 0x9cc   :  { %10546 = vmatprep.subr.bf16.mxu0 %v12169_v1  ;;  %v12212_v1 = vld [vmem:[#allocation3 + $0xb20] sm:$0xff] }
 0x9cd   :  { %10276 = vmatpush1.bf16.msra.mxu1 %v12136_v26  ;;  %v12171_v26 = vld [vmem:[#allocation3 + $0xe60] sm:$0xff] }
 0x9ce   :  { %10277 = vmatprep.subr.bf16.mxu1 %v12138_v62  ;;  %v12173_v62 = vld [vmem:[#allocation3 + $0xe78] sm:$0xff] }
 0x9cf   :  { %10547 = vmatpush1.bf16.msra.mxu0 %v12171_v26  ;;  %v12216_v26 = vld [vmem:[#allocation3 + $0xb40] sm:$0xff] }
 0x9d0   :  { %10548 = vmatprep.subr.bf16.mxu0 %v12173_v62 }
 0x9d1   :  { %10278 = vmatpush1.bf16.msra.mxu1 %v12140_v54  ;;  %v12178_v54 = vld [vmem:[#allocation3 + $0x998] sm:$0xff] }
 0x9d2   :  { %10329 = vmatprep.subr.bf16.mxu1 %v12142_v52  ;;  %v12182_v52 = vld [vmem:[#allocation3 + $0x9a8] sm:$0xff] }
 0x9d3   :  { %10549 = vmatpush1.bf16.msra.mxu0 %v12175_v38 }
 0x9d4   :  { %10280 = vmatmul.mubr.bf16.vlgmr.msra.gmra.mrb[84].mxu1 %v9827_v7  ;;  %v12176_v7 = vld [vmem:[#allocation3 + $0x980] sm:$0xff]  ;;  %10550 = vmatprep.subr.bf16.mxu0 %v12177_v30 }
 0x9d5   :  { %10330 = vmatpush1.bf16.msra.mxu1 %v12144_v5  ;;  %10361 = vmatprep.mubr.bf16.mxu1 %v9877_v37  ;;  %v12179_v37 = vld [vmem:[#allocation3 + $0xe80] sm:$0xff] }
 0x9d6   :  { %10331 = vmatprep.subr.bf16.mxu1 %v12145_v57  ;;  %v12184_v5 = vld [vmem:[#allocation3 + $0x9a0] sm:$0xff]  ;;  %v12185_v57 = vld [vmem:[#allocation3 + $0xea8] sm:$0xff] }
 0x9d7   :  { %10551 = vmatpush1.bf16.msra.mxu0 %v12179_v37 }
 0x9d8   :  { %10552 = vmatprep.subr.bf16.mxu0 %v12181_v63  ;;  %v12219_v63 = vld [vmem:[#allocation3 + $0xb68] sm:$0xff] }
 0x9d9   :  { %10332 = vmatpush1.bf16.msra.mxu1 %v12148_v39  ;;  %v12188_v39 = vld [vmem:[#allocation3 + $0x9b0] sm:$0xff] }
 0x9da   :  { %10333 = vmatprep.subr.bf16.mxu1 %v12150_v27  ;;  %v12190_v27 = vld [vmem:[#allocation3 + $0x9c8] sm:$0xff] }
 0x9db   :  { %10553 = vmatpush1.bf16.msra.mxu0 %v12183_v10 }
 0x9dc   :  { %10554 = vmatprep.subr.bf16.mxu0 %v12185_v57  ;;  %v12220_v57 = vld [vmem:[#allocation3 + $0xb60] sm:$0xff] }
 0x9dd   :  { %10334 = vmatpush1.bf16.msra.mxu1 %v12152_v45  ;;  %v12192_v45 = vld [vmem:[#allocation3 + $0x9c0] sm:$0xff] }
 0x9de   :  { %10335 = vmatprep.subr.bf16.mxu1 %v12154_v13  ;;  %v12194_v13 = vld [vmem:[#allocation3 + $0x9d8] sm:$0xff] }
 0x9df   :  { %10555 = vmatpush1.bf16.msra.mxu0 %v12187_v58  ;;  %v12222_v58 = vld [vmem:[#allocation3 + $0xb70] sm:$0xff] }
 0x9e0   :  { %10556 = vmatprep.subr.bf16.mxu0 %v12189_v21  ;;  %v12225_v21 = vld [vmem:[#allocation3 + $0xb98] sm:$0xff] }
 0x9e1   :  { %10336 = vmatpush1.bf16.msra.mxu1 %v12156_v34  ;;  %v12196_v34 = vld [vmem:[#allocation3 + $0x9d0] sm:$0xff] }
 0x9e2   :  { %10337 = vmatprep.subr.bf16.mxu1 %v12158_v56  ;;  %v12198_v56 = vld [vmem:[#allocation3 + $0x9e8] sm:$0xff] }
 0x9e3   :  { %10557 = vmatpush1.bf16.msra.mxu0 %v12191_v24  ;;  %v12228_v24 = vld [vmem:[#allocation3 + $0xba0] sm:$0xff] }
 0x9e4   :  { %10558 = vmatprep.subr.bf16.mxu0 %v12193_v49  ;;  %v12230_v49 = vld [vmem:[#allocation3 + $0xbb0] sm:$0xff] }
 0x9e5   :  { %10338 = vmatpush1.bf16.msra.mxu1 %v12160_v11  ;;  %v12200_v11 = vld [vmem:[#allocation3 + $0x9e0] sm:$0xff] }
 0x9e6   :  { %10339 = vmatprep.subr.bf16.mxu1 %v12162_v46  ;;  %v9879_v46 = vcombine.high %v16253_v61, %v16253_v61 }
 0x9e7   :  { %v10035_v17 = vpop.f32.mrb[72].mxu1  ;;  %10559 = vmatpush1.bf16.msra.mxu0 %v12195_v35  ;;  %v12232_v35 = vld [vmem:[#allocation3 + $0xbc0] sm:$0xff] }
 0x9e8   :  { %v10036_v55 = vadd.f32 %v10035_v17, %v16244_v40  ;;  %v10037_v44 = vpop.f32.mrb[73].mxu1  ;;  %10560 = vmatprep.subr.bf16.mxu0 %v12197_v51  ;;  %v12202_v17 = vld [vmem:[#allocation3 + $0x9f8] sm:$0xff]  ;;  %v12234_v51 = vld [vmem:[#allocation3 + $0xbd0] sm:$0xff] }
 0x9e9   :  { %v10038_v0 = vadd.f32 %v10037_v44, %v16249_v6  ;;  %v10039_v14 = vpop.f32.mrb[74].mxu1  ;;  %10340 = vmatpush1.bf16.msra.mxu1 %v12164_v53  ;;  %v10244_v6 = vpop.f32.mrb[78].mxu0  ;;  %v9875_v44 = vcombine.high %v16210_v48, %v16210_v48  ;;  %v12205_v53 = vld [vmem:[#allocation3 + $0xef8] sm:$0xff] }
 0x9ea   :  { %v16272_v8 = vadd.f32 %v16219_v33, %v10036_v55  ;;  %v10040_v3 = vpop.f32.mrb[75].mxu1  ;;  %10341 = vmatprep.subr.bf16.mxu1 %v12166_v9  ;;  %v10245_v32 = vpop.f32.mrb[79].mxu0  ;;  %v12170_v33 = vld [vmem:[#allocation3 + $0x978] sm:$0xff]  ;;  %v9893_v55 = vrot.slane %v9879_v46, %v15761_v20  ;;  %v9878_v14 = vcombine.high %v16234_v19, %v16234_v19  ;;  %v12207_v9 = vld [vmem:[#allocation3 + $0xef0] sm:$0xff] }
 0x9eb   :  { %v16277_v40 = vadd.f32 %v16224_v25, %v10038_v0  ;;  %v12174_v25 = vld [vmem:[#allocation3 + $0x988] sm:$0xff]  ;;  %10561 = vmatpush1.bf16.msra.mxu0 %v12199_v23  ;;  %v12204_v0 = vld [vmem:[#allocation3 + $0x9f0] sm:$0xff]  ;;  %v12209_v6 = vld [vmem:[#allocation3 + $0xb18] sm:$0xff] }
 0x9ec   :  { %10562 = vmatprep.subr.bf16.mxu0 %v12201_v31  ;;  %v9895_v28 = vcombine.high %v9893_v55, %v9893_v55  ;;  %v12206_v3 = vld [vmem:[#allocation3 + $0xb08] sm:$0xff]  ;;  %v16292_v48 = vrot.slane %v9893_v55, %v15761_v20  ;;  %v12210_v19 = vld [vmem:[#allocation3 + $0xb10] sm:$0xff]  ;;  %v12213_v32 = vld [vmem:[#allocation3 + $0xb38] sm:$0xff]  ;;  %v9876_v31 = vcombine.high %v16237_v4, %v16237_v4 }
 0x9ed   :  { %10342 = vmatpush1.bf16.msra.mxu1 %v12168_v18  ;;  %v12211_v18 = vld [vmem:[#allocation3 + $0xb28] sm:$0xff]  ;;  %v12236_v23 = vld [vmem:[#allocation3 + $0xbe0] sm:$0xff]  ;;  %v12238_v46 = vld [vmem:[#allocation3 + $0xbf0] sm:$0xff] }
 0x9ee   :  { %10343 = vmatprep.subr.bf16.mxu1 %v12170_v33  ;;  %v16289_v61 = vrot.slane %v9895_v28, %v15761_v20  ;;  %v12214_v33 = vld [vmem:[#allocation3 + $0xb30] sm:$0xff]  ;;  %v12215_v20 = vld [vmem:[#allocation3 + $0xb48] sm:$0xff]  ;;  %v12245_v4 = vld [vmem:[#allocation3 + $0xd38] sm:$0xff] }
 0x9ef   :  { %10563 = vmatpush1.bf16.msra.mxu0 %v12203_v43  ;;  %v12239_v55 = vld [vmem:[#allocation3 + $0xd08] sm:$0xff]  ;;  %v12241_v43 = vld [vmem:[#allocation3 + $0xd18] sm:$0xff]  ;;  %v12246_v28 = vld [vmem:[#allocation3 + $0xd30] sm:$0xff] }
 0x9f0   :  { %10564 = vmatprep.subr.bf16.mxu0 %v12205_v53  ;;  %10566 = vmatprep.mubr.bf16.mxu0 %v16289_v61  ;;  %v12244_v53 = vld [vmem:[#allocation3 + $0xd20] sm:$0xff] }
 0x9f1   :  { %10344 = vmatpush1.bf16.msra.mxu1 %v12172_v2  ;;  %v12217_v2 = vld [vmem:[#allocation3 + $0xb58] sm:$0xff] }
 0x9f2   :  { %10345 = vmatprep.subr.bf16.mxu1 %v12174_v25 }
 0x9f3   :  { %10565 = vmatpush1.bf16.msra.mxu0 %v12207_v9  ;;  %v12249_v9 = vld [vmem:[#allocation3 + $0xd58] sm:$0xff] }
 0x9f5   :  { %10346 = vmatpush1.bf16.msra.mxu1 %v12176_v7 }
 0x9f6   :  { %10347 = vmatprep.subr.bf16.mxu1 %v12178_v54  ;;  %10567 = vmatmul.mubr.bf16.vlgmr.msra.gmra.mrb[92].mxu0 %v16292_v48  ;;  %v12218_v54 = vld [vmem:[#allocation3 + $0xb50] sm:$0xff] }
 0x9f9   :  { %10348 = vmatpush1.bf16.msra.mxu1 %v12180_v12 }
 0x9fa   :  { %10349 = vmatprep.subr.bf16.mxu1 %v12182_v52 }
 0x9fd   :  { %10350 = vmatpush1.bf16.msra.mxu1 %v12184_v5 }
 0x9fe   :  { %10351 = vmatprep.subr.bf16.mxu1 %v12186_v47  ;;  %v12221_v47 = vld [vmem:[#allocation3 + $0xb78] sm:$0xff] }
 0xa01   :  { %10352 = vmatpush1.bf16.msra.mxu1 %v12188_v39  ;;  %v12224_v39 = vld [vmem:[#allocation3 + $0xb80] sm:$0xff] }
 0xa02   :  { %10353 = vmatprep.subr.bf16.mxu1 %v12190_v27  ;;  %v12226_v27 = vld [vmem:[#allocation3 + $0xb90] sm:$0xff] }
 0xa05   :  { %10354 = vmatpush1.bf16.msra.mxu1 %v12192_v45  ;;  %v12229_v45 = vld [vmem:[#allocation3 + $0xbb8] sm:$0xff] }
 0xa06   :  { %10355 = vmatprep.subr.bf16.mxu1 %v12194_v13  ;;  %v12231_v13 = vld [vmem:[#allocation3 + $0xbc8] sm:$0xff] }
 0xa09   :  { %10356 = vmatpush1.bf16.msra.mxu1 %v12196_v34  ;;  %v16301_v52 = vpop.f32.mrb[80].mxu0  ;;  %v12233_v34 = vld [vmem:[#allocation3 + $0xbd8] sm:$0xff] }
 0xa0a   :  { %10357 = vmatprep.subr.bf16.mxu1 %v12198_v56  ;;  %v16306_v5 = vpop.f32.mrb[81].mxu0  ;;  %v12235_v56 = vld [vmem:[#allocation3 + $0xbe8] sm:$0xff] }
 0xa0d   :  { %10358 = vmatpush1.bf16.msra.mxu1 %v12200_v11  ;;  %v12237_v11 = vld [vmem:[#allocation3 + $0xbf8] sm:$0xff] }
 0xa0e   :  { %10359 = vmatprep.subr.bf16.mxu1 %v12202_v17  ;;  %v9926_v17 = vcombine.high %v16262_v16, %v16262_v16  ;;  %v12248_v16 = vld [vmem:[#allocation3 + $0xd40] sm:$0xff] }
 0xa11   :  { %10360 = vmatpush1.bf16.msra.mxu1 %v12204_v0  ;;  %v12242_v0 = vld [vmem:[#allocation3 + $0xd10] sm:$0xff] }
 0xa12   :  { %10411 = vmatprep.subr.bf16.mxu1 %v12206_v3  ;;  %v12247_v3 = vld [vmem:[#allocation3 + $0xd48] sm:$0xff] }
 0xa14   :  { %10362 = vmatmul.mubr.bf16.vlgmr.msra.gmra.mrb[88].mxu1 %v9875_v44  ;;  %v12240_v44 = vld [vmem:[#allocation3 + $0xd00] sm:$0xff] }
 0xa15   :  { %10412 = vmatpush1.bf16.msra.mxu1 %v12208_v41  ;;  %10443 = vmatprep.mubr.bf16.mxu1 %v9878_v14  ;;  %v12243_v14 = vld [vmem:[#allocation3 + $0xd28] sm:$0xff] }
 0xa16   :  { %10413 = vmatprep.subr.bf16.mxu1 %v12209_v6 }
 0xa19   :  { %10414 = vmatpush1.bf16.msra.mxu1 %v12210_v19 }
 0xa1a   :  { %10415 = vmatprep.subr.bf16.mxu1 %v12211_v18 }
 0xa1d   :  { %10416 = vmatpush1.bf16.msra.mxu1 %v12212_v1 }
 0xa1e   :  { %10417 = vmatprep.subr.bf16.mxu1 %v12213_v32  ;;  %v12250_v32 = vld [vmem:[#allocation3 + $0xd50] sm:$0xff] }
 0xa21   :  { %10418 = vmatpush1.bf16.msra.mxu1 %v12214_v33 }
 0xa22   :  { %10419 = vmatprep.subr.bf16.mxu1 %v12215_v20 }
 0xa25   :  { %10420 = vmatpush1.bf16.msra.mxu1 %v12216_v26  ;;  %v12251_v26 = vld [vmem:[#allocation3 + $0xd68] sm:$0xff] }
 0xa26   :  { %10421 = vmatprep.subr.bf16.mxu1 %v12217_v2 }
 0xa27   :  { %v10117_v62 = vpop.f32.mrb[76].mxu1 }
 0xa28   :  { %v10118_v25 = vadd.f32 %v10117_v62, %v16272_v8  ;;  %v10119_v38 = vpop.f32.mrb[77].mxu1  ;;  %v10326_v8 = vpop.f32.mrb[82].mxu0 }
 0xa29   :  { %v10120_v7 = vadd.f32 %v10119_v38, %v16277_v40  ;;  %v10121_v30 = vpop.f32.mrb[78].mxu1  ;;  %10422 = vmatpush1.bf16.msra.mxu1 %v12218_v54  ;;  %v10327_v40 = vpop.f32.mrb[83].mxu0  ;;  %v12253_v54 = vld [vmem:[#allocation3 + $0xd78] sm:$0xff]  ;;  %v12260_v8 = vld [vmem:[#allocation3 + $0xda0] sm:$0xff] }
 0xa2a   :  { %v16299_v37 = vadd.f32 %v16246_v60, %v10118_v25  ;;  %v10122_v12 = vpop.f32.mrb[79].mxu1  ;;  %10423 = vmatprep.subr.bf16.mxu1 %v12219_v63  ;;  %v12223_v60 = vld [vmem:[#allocation3 + $0xb88] sm:$0xff]  ;;  %v12257_v63 = vld [vmem:[#allocation3 + $0xd98] sm:$0xff]  ;;  %v12262_v40 = vld [vmem:[#allocation3 + $0xdb0] sm:$0xff] }
 0xa2b   :  { %v16304_v10 = vadd.f32 %v16251_v29, %v10120_v7  ;;  %v12227_v29 = vld [vmem:[#allocation3 + $0xba8] sm:$0xff]  ;;  %v12252_v7 = vld [vmem:[#allocation3 + $0xd60] sm:$0xff] }
 0xa2c   :  { %v12256_v12 = vld [vmem:[#allocation3 + $0xd80] sm:$0xff] }
 0xa2d   :  { %10424 = vmatpush1.bf16.msra.mxu1 %v12220_v57  ;;  %v12261_v57 = vld [vmem:[#allocation3 + $0xdb8] sm:$0xff] }
 0xa2e   :  { %10425 = vmatprep.subr.bf16.mxu1 %v12221_v47  ;;  %v12263_v47 = vld [vmem:[#allocation3 + $0xdc8] sm:$0xff] }
 0xa31   :  { %10426 = vmatpush1.bf16.msra.mxu1 %v12222_v58  ;;  %v12264_v58 = vld [vmem:[#allocation3 + $0xdc0] sm:$0xff] }
 0xa32   :  { %10427 = vmatprep.subr.bf16.mxu1 %v12223_v60  ;;  %v12265_v60 = vld [vmem:[#allocation3 + $0xdd8] sm:$0xff] }
 0xa35   :  { %10428 = vmatpush1.bf16.msra.mxu1 %v12224_v39  ;;  %v12266_v39 = vld [vmem:[#allocation3 + $0xdd0] sm:$0xff] }
 0xa36   :  { %10429 = vmatprep.subr.bf16.mxu1 %v12225_v21  ;;  %v12267_v21 = vld [vmem:[#allocation3 + $0xde8] sm:$0xff] }
 0xa39   :  { %10430 = vmatpush1.bf16.msra.mxu1 %v12226_v27  ;;  %v12268_v27 = vld [vmem:[#allocation3 + $0xde0] sm:$0xff] }
 0xa3a   :  { %10431 = vmatprep.subr.bf16.mxu1 %v12227_v29  ;;  %v12269_v29 = vld [vmem:[#allocation3 + $0xdf8] sm:$0xff] }
 0xa3d   :  { %10432 = vmatpush1.bf16.msra.mxu1 %v12228_v24  ;;  %v9924_v24 = vcombine.high %v16265_v59, %v16265_v59  ;;  %v12277_v59 = vld [vmem:[#allocation3 + $0xf38] sm:$0xff] }
 0xa3e   :  { %10433 = vmatprep.subr.bf16.mxu1 %v12229_v45  ;;  %v12270_v45 = vld [vmem:[#allocation3 + $0xdf0] sm:$0xff] }
 0xa41   :  { %10434 = vmatpush1.bf16.msra.mxu1 %v12230_v49  ;;  %v9927_v49 = vcombine.high %v16289_v61, %v16289_v61  ;;  %v12280_v61 = vld [vmem:[#allocation3 + $0xf40] sm:$0xff] }
 0xa42   :  { %10435 = vmatprep.subr.bf16.mxu1 %v12231_v13  ;;  %v12271_v13 = vld [vmem:[#allocation3 + $0xf08] sm:$0xff] }
 0xa45   :  { %10436 = vmatpush1.bf16.msra.mxu1 %v12232_v35  ;;  %v12272_v35 = vld [vmem:[#allocation3 + $0xf00] sm:$0xff] }
 0xa46   :  { %10437 = vmatprep.subr.bf16.mxu1 %v12233_v34  ;;  %v12273_v34 = vld [vmem:[#allocation3 + $0xf18] sm:$0xff] }
 0xa49   :  { %10438 = vmatpush1.bf16.msra.mxu1 %v12234_v51  ;;  %v16317_v2 = vpop.f32.mrb[84].mxu0  ;;  %v12274_v51 = vld [vmem:[#allocation3 + $0xf10] sm:$0xff] }
 0xa4a   :  { %10439 = vmatprep.subr.bf16.mxu1 %v12235_v56  ;;  %v16322_v25 = vpop.f32.mrb[85].mxu0  ;;  %v12275_v56 = vld [vmem:[#allocation3 + $0xf28] sm:$0xff] }
 0xa4b   :  { %v10408_v38 = vpop.f32.mrb[86].mxu0 }
 0xa4c   :  { %v10409_v30 = vpop.f32.mrb[87].mxu0  ;;  %v12294_v38 = vld [vmem:[#allocation3 + $0xfb0] sm:$0xff] }
 0xa4d   :  { %10440 = vmatpush1.bf16.msra.mxu1 %v12236_v23  ;;  %v12276_v23 = vld [vmem:[#allocation3 + $0xf20] sm:$0xff] }
 0xa4e   :  { %10441 = vmatprep.subr.bf16.mxu1 %v12237_v11  ;;  %v12278_v11 = vld [vmem:[#allocation3 + $0xf30] sm:$0xff]  ;;  %v12296_v30 = vld [vmem:[#allocation3 + $0xfc0] sm:$0xff] }
 0xa51   :  { %10442 = vmatpush1.bf16.msra.mxu1 %v12238_v46  ;;  %v12281_v46 = vld [vmem:[#allocation3 + $0xf58] sm:$0xff] }
 0xa52   :  { %10493 = vmatprep.subr.bf16.mxu1 %v12239_v55 }
 0xa54   :  { %10444 = vmatmul.mubr.bf16.vlgmr.msra.gmra.mrb[92].mxu1 %v9876_v31  ;;  %v12279_v31 = vld [vmem:[#allocation3 + $0xf48] sm:$0xff] }
 0xa55   :  { %10494 = vmatpush1.bf16.msra.mxu1 %v12240_v44  ;;  %10525 = vmatprep.mubr.bf16.mxu1 %v9926_v17 }
 0xa56   :  { %10495 = vmatprep.subr.bf16.mxu1 %v12241_v43 }
 0xa59   :  { %10496 = vmatpush1.bf16.msra.mxu1 %v12242_v0 }
 0xa5a   :  { %10497 = vmatprep.subr.bf16.mxu1 %v12243_v14  ;;  %v12282_v14 = vld [vmem:[#allocation3 + $0xf50] sm:$0xff] }
 0xa5d   :  { %10498 = vmatpush1.bf16.msra.mxu1 %v12244_v53 }
 0xa5e   :  { %10499 = vmatprep.subr.bf16.mxu1 %v12245_v4 }
 0xa61   :  { %10500 = vmatpush1.bf16.msra.mxu1 %v12246_v28  ;;  %v12283_v28 = vld [vmem:[#allocation3 + $0xf68] sm:$0xff] }
 0xa62   :  { %10501 = vmatprep.subr.bf16.mxu1 %v12247_v3 }
 0xa65   :  { %10502 = vmatpush1.bf16.msra.mxu1 %v12248_v16 }
 0xa66   :  { %10503 = vmatprep.subr.bf16.mxu1 %v12249_v9 }
 0xa67   :  { %v10199_v41 = vpop.f32.mrb[80].mxu1 }
 0xa68   :  { %v10200_v6 = vadd.f32 %v10199_v41, %v16299_v37  ;;  %v10201_v19 = vpop.f32.mrb[81].mxu1  ;;  %v12254_v37 = vld [vmem:[#allocation3 + $0xd70] sm:$0xff] }
 0xa69   :  { %v10202_v18 = vadd.f32 %v10201_v19, %v16304_v10  ;;  %v10203_v1 = vpop.f32.mrb[82].mxu1  ;;  %10504 = vmatpush1.bf16.msra.mxu1 %v12250_v32  ;;  %v12258_v10 = vld [vmem:[#allocation3 + $0xd90] sm:$0xff]  ;;  %v12287_v32 = vld [vmem:[#allocation3 + $0xf88] sm:$0xff] }
 0xa6a   :  { %v16315_v33 = vadd.f32 %v16274_v42, %v10200_v6  ;;  %v10204_v20 = vpop.f32.mrb[83].mxu1  ;;  %10505 = vmatprep.subr.bf16.mxu1 %v12251_v26  ;;  %v12255_v42 = vld [vmem:[#allocation3 + $0xd88] sm:$0xff]  ;;  %v12284_v6 = vld [vmem:[#allocation3 + $0xf60] sm:$0xff]  ;;  %v12286_v1 = vld [vmem:[#allocation3 + $0xf70] sm:$0xff] }
 0xa6b   :  { %v16320_v62 = vadd.f32 %v16279_v22, %v10202_v18  ;;  %v12259_v22 = vld [vmem:[#allocation3 + $0xda8] sm:$0xff]  ;;  %v12285_v18 = vld [vmem:[#allocation3 + $0xf78] sm:$0xff]  ;;  %v12290_v20 = vld [vmem:[#allocation3 + $0xf90] sm:$0xff] }
 0xa6c   :  { %v12291_v26 = vld [vmem:[#allocation3 + $0xfa8] sm:$0xff] }
 0xa6d   :  { %10506 = vmatpush1.bf16.msra.mxu1 %v12252_v7  ;;  %v12295_v7 = vld [vmem:[#allocation3 + $0xfc8] sm:$0xff] }
 0xa6e   :  { %10507 = vmatprep.subr.bf16.mxu1 %v12253_v54  ;;  %v12297_v54 = vld [vmem:[#allocation3 + $0xfd8] sm:$0xff] }
 0xa71   :  { %10508 = vmatpush1.bf16.msra.mxu1 %v12254_v37  ;;  %v12298_v37 = vld [vmem:[#allocation3 + $0xfd0] sm:$0xff] }
 0xa72   :  { %10509 = vmatprep.subr.bf16.mxu1 %v12255_v42  ;;  %v12299_v42 = vld [vmem:[#allocation3 + $0xfe8] sm:$0xff] }
 0xa75   :  { %10510 = vmatpush1.bf16.msra.mxu1 %v12256_v12  ;;  %v12300_v12 = vld [vmem:[#allocation3 + $0xfe0] sm:$0xff] }
 0xa76   :  { %10511 = vmatprep.subr.bf16.mxu1 %v12257_v63  ;;  %v12301_v63 = vld [vmem:[#allocation3 + $0xff8] sm:$0xff] }
 0xa79   :  { %10512 = vmatpush1.bf16.msra.mxu1 %v12258_v10  ;;  %v9925_v10 = vcombine.high %v16292_v48, %v16292_v48 }
 0xa7a   :  { %10513 = vmatprep.subr.bf16.mxu1 %v12259_v22  ;;  %v12302_v22 = vld [vmem:[#allocation3 + $0xff0] sm:$0xff] }
 0xa7d   :  { %10514 = vmatpush1.bf16.msra.mxu1 %v12260_v8 }
 0xa7e   :  { %10515 = vmatprep.subr.bf16.mxu1 %v12261_v57 }
 0xa81   :  { %10516 = vmatpush1.bf16.msra.mxu1 %v12262_v40 }
 0xa82   :  { %10517 = vmatprep.subr.bf16.mxu1 %v12263_v47 }
 0xa85   :  { %10518 = vmatpush1.bf16.msra.mxu1 %v12264_v58 }
 0xa86   :  { %10519 = vmatprep.subr.bf16.mxu1 %v12265_v60 }
 0xa89   :  { %10520 = vmatpush1.bf16.msra.mxu1 %v12266_v39  ;;  %v10486_v3 = vpop.f32.mrb[88].mxu0 }
 0xa8a   :  { %10521 = vmatprep.subr.bf16.mxu1 %v12267_v21  ;;  %v10488_v9 = vpop.f32.mrb[89].mxu0 }
 0xa8b   :  { %v10490_v41 = vpop.f32.mrb[90].mxu0 }
 0xa8c   :  { %v10491_v19 = vpop.f32.mrb[91].mxu0 }
 0xa8d   :  { %10522 = vmatpush1.bf16.msra.mxu1 %v12268_v27 }
 0xa8e   :  { %10523 = vmatprep.subr.bf16.mxu1 %v12269_v29 }
 0xa91   :  { %10524 = vmatpush1.bf16.msra.mxu1 %v12270_v45 }
 0xa92   :  { %10575 = vmatprep.subr.bf16.mxu1 %v12271_v13 }
 0xa94   :  { %10526 = vmatmul.mubr.bf16.vlgmr.msra.gmra.mrb[96].mxu1 %v9924_v24 }
 0xa95   :  { %10576 = vmatpush1.bf16.msra.mxu1 %v12272_v35  ;;  %10607 = vmatprep.mubr.bf16.mxu1 %v9927_v49 }
 0xa96   :  { %10577 = vmatprep.subr.bf16.mxu1 %v12273_v34 }
 0xa99   :  { %10578 = vmatpush1.bf16.msra.mxu1 %v12274_v51 }
 0xa9a   :  { %10579 = vmatprep.subr.bf16.mxu1 %v12275_v56 }
 0xa9d   :  { %10580 = vmatpush1.bf16.msra.mxu1 %v12276_v23 }
 0xa9e   :  { %10581 = vmatprep.subr.bf16.mxu1 %v12277_v59 }
 0xaa1   :  { %10582 = vmatpush1.bf16.msra.mxu1 %v12278_v11 }
 0xaa2   :  { %10583 = vmatprep.subr.bf16.mxu1 %v12279_v31 }
 0xaa5   :  { %10584 = vmatpush1.bf16.msra.mxu1 %v12280_v61 }
 0xaa6   :  { %10585 = vmatprep.subr.bf16.mxu1 %v12281_v46 }
 0xaa7   :  { %v10281_v17 = vpop.f32.mrb[84].mxu1 }
 0xaa8   :  { %v10282_v55 = vadd.f32 %v10281_v17, %v16315_v33  ;;  %v10283_v44 = vpop.f32.mrb[85].mxu1  ;;  %v12288_v33 = vld [vmem:[#allocation3 + $0xf80] sm:$0xff] }
 0xaa9   :  { %v10284_v43 = vadd.f32 %v10283_v44, %v16320_v62  ;;  %v10285_v0 = vpop.f32.mrb[86].mxu1  ;;  %10586 = vmatpush1.bf16.msra.mxu1 %v12282_v14  ;;  %v12293_v62 = vld [vmem:[#allocation3 + $0xfb8] sm:$0xff] }
 0xaaa   :  { %v10323_v53 = vadd.f32 %v16301_v52, %v10282_v55  ;;  %v10286_v4 = vpop.f32.mrb[87].mxu1  ;;  %10587 = vmatprep.subr.bf16.mxu1 %v12283_v28  ;;  %v12289_v52 = vld [vmem:[#allocation3 + $0xf98] sm:$0xff] }
 0xaab   :  { %v10325_v16 = vadd.f32 %v16306_v5, %v10284_v43  ;;  %v12292_v5 = vld [vmem:[#allocation3 + $0xfa0] sm:$0xff] }
 0xaad   :  { %10588 = vmatpush1.bf16.msra.mxu1 %v12284_v6 }
 0xaae   :  { %10589 = vmatprep.subr.bf16.mxu1 %v12285_v18 }
 0xab1   :  { %10590 = vmatpush1.bf16.msra.mxu1 %v12286_v1 }
 0xab2   :  { %10591 = vmatprep.subr.bf16.mxu1 %v12287_v32 }
 0xab5   :  { %10592 = vmatpush1.bf16.msra.mxu1 %v12288_v33 }
 0xab6   :  { %10593 = vmatprep.subr.bf16.mxu1 %v12289_v52 }
 0xab9   :  { %10594 = vmatpush1.bf16.msra.mxu1 %v12290_v20 }
 0xaba   :  { %10595 = vmatprep.subr.bf16.mxu1 %v12291_v26 }
 0xabd   :  { %10596 = vmatpush1.bf16.msra.mxu1 %v12292_v5 }
 0xabe   :  { %10597 = vmatprep.subr.bf16.mxu1 %v12293_v62 }
 0xac1   :  { %10598 = vmatpush1.bf16.msra.mxu1 %v12294_v38 }
 0xac2   :  { %10599 = vmatprep.subr.bf16.mxu1 %v12295_v7 }
 0xac5   :  { %10600 = vmatpush1.bf16.msra.mxu1 %v12296_v30 }
 0xac6   :  { %10601 = vmatprep.subr.bf16.mxu1 %v12297_v54 }
 0xac9   :  { %10602 = vmatpush1.bf16.msra.mxu1 %v12298_v37  ;;  %v10568_v21 = vpop.f32.mrb[92].mxu0 }
 0xaca   :  { %10603 = vmatprep.subr.bf16.mxu1 %v12299_v42  ;;  %v10570_v29 = vpop.f32.mrb[93].mxu0 }
 0xacb   :  { %v10572_v24 = vpop.f32.mrb[94].mxu0 }
 0xacc   :  { %v10573_v45 = vpop.f32.mrb[95].mxu0 }
 0xacd   :  { %10604 = vmatpush1.bf16.msra.mxu1 %v12300_v12 }
 0xace   :  { %10605 = vmatprep.subr.bf16.mxu1 %v12301_v63 }
 0xad1   :  { %10606 = vmatpush1.bf16.msra.mxu1 %v12302_v22 }
 0xad4   :  { %10608 = vmatmul.mubr.bf16.vlgmr.msra.gmra.mrb[100].mxu1 %v9925_v10 }
 0xae7   :  { %v10363_v8 = vpop.f32.mrb[88].mxu1 }
 0xae8   :  { %v10364_v57 = vadd.f32 %v10363_v8, %v10323_v53  ;;  %v10365_v40 = vpop.f32.mrb[89].mxu1 }
 0xae9   :  { %v10366_v47 = vadd.f32 %v10365_v40, %v10325_v16  ;;  %v10367_v58 = vpop.f32.mrb[90].mxu1 }
 0xaea   :  { %v10405_v60 = vadd.f32 %v16317_v2, %v10364_v57  ;;  %v10368_v39 = vpop.f32.mrb[91].mxu1 }
 0xaeb   :  { %v10407_v27 = vadd.f32 %v16322_v25, %v10366_v47  ;;  %v10616_v25 = vld [vmem:[%s16495_s8] sm:$0x3] }
 0xaec   :  { %v10621_v44 = vrot.slane %v10616_v25, %v16651_v50  ;;  %v10625_v0 = vrot.slane %v10616_v25, %v16652_v15 }
 0xb27   :  { %v10445_v49 = vpop.f32.mrb[92].mxu1 }
 0xb28   :  { %v10446_v13 = vadd.f32 %v10445_v49, %v10405_v60  ;;  %v10447_v48 = vpop.f32.mrb[93].mxu1 }
 0xb29   :  { %v10448_v35 = vadd.f32 %v10447_v48, %v10407_v27  ;;  %v10449_v34 = vpop.f32.mrb[94].mxu1 }
 0xb2a   :  { %v10487_v51 = vadd.f32 %v10486_v3, %v10446_v13  ;;  %v10450_v56 = vpop.f32.mrb[95].mxu1 }
 0xb2b   :  { %v10489_v23 = vadd.f32 %v10488_v9, %v10448_v35  ;;  %v10674_v56 = vld [vmem:[%s16496_s9] sm:$0x3] }
 0xb67   :  { %v10527_v59 = vpop.f32.mrb[96].mxu1 }
 0xb68   :  { %v10528_v11 = vadd.f32 %v10527_v59, %v10487_v51  ;;  %v10529_v31 = vpop.f32.mrb[97].mxu1  ;;  %v10683_v59 = vrot.slane %v10674_v56, %v16652_v15 }
 0xb69   :  { %v10530_v61 = vadd.f32 %v10529_v31, %v10489_v23  ;;  %v10531_v2 = vpop.f32.mrb[98].mxu1  ;;  %v10679_v23 = vrot.slane %v10674_v56, %v16651_v50  ;;  %v10698_v31 = vld [vmem:[%s16497_s10] sm:$0x3] }
 0xb6a   :  { %v10569_v46 = vadd.f32 %v10568_v21, %v10528_v11  ;;  %v10532_v17 = vpop.f32.mrb[99].mxu1 }
 0xb6b   :  { %v10571_v55 = vadd.f32 %v10570_v29, %v10530_v61 }
 0xba7   :  { %v10609_v43 = vpop.f32.mrb[100].mxu1 }
 0xba8   :  { %v10610_v14 = vadd.f32 %v10609_v43, %v10569_v46  ;;  %v10611_v53 = vpop.f32.mrb[101].mxu1 }
 0xba9   :  { %v10612_v4 = vadd.f32 %v10611_v53, %v10571_v55  ;;  %v10613_v28 = vpop.f32.mrb[102].mxu1  ;;  %v10703_v55 = vrot.slane %v10698_v31, %v16651_v50 }
 0xbaa   :  { %v10628_v3 = vadd.f32 %v10621_v44, %v10610_v14  ;;  %v10614_v16 = vpop.f32.mrb[103].mxu1  ;;  %v10707_v44 = vrot.slane %v10698_v31, %v16652_v15 }
 0xbab   :  { %v10629_v9 = vadd.f32 %v10625_v0, %v10612_v4 }
 0xbac   :  { %v10630_v41 = vmax.f32 %v10628_v3, 0.0 }
 0xbad   :  { %v10631_v6 = vmax.f32 %v10629_v9, 0.0 }
 0xbae   :  { %v10633_v19 = vsel %vm10632_vm1, %v10630_v41, 0.0 }
 0xbaf   :  { %v10634_v18 = vrot.slane %v10633_v19, 4  ;;  %v10640_v1 = vsel %vm10632_vm1, %v10631_v6, 0.0 }
 0xbb0   :  { %v10641_v32 = vrot.slane %v10640_v1, 4 }
 0xbb1   :  { %v10635_v33 = vadd.f32 %v10634_v18, %v10633_v19 }
 0xbb2   :  { %v10642_v52 = vadd.f32 %v10641_v32, %v10640_v1 }
 0xbb3   :  { %v10636_v20 = vrot.slane %v10635_v33, 2 }
 0xbb4   :  { %v10643_v26 = vrot.slane %v10642_v52, 2 }
 0xbb5   :  { %v10637_v5 = vadd.f32 %v10636_v20, %v10635_v33 }
 0xbb6   :  { %v10644_v62 = vadd.f32 %v10643_v26, %v10642_v52 }
 0xbb7   :  { %v10638_v38 = vrot.slane %v10637_v5, 1 }
 0xbb8   :  { %v10645_v7 = vrot.slane %v10644_v62, 1 }
 0xbb9   :  { %v10639_v30 = vadd.f32 %v10638_v38, %v10637_v5 }
 0xbba   :  { %v10646_v54 = vadd.f32 %v10645_v7, %v10644_v62 }
 0xbbb   :  { %v10648_v37 = vmul.f32 0.5, %v10639_v30 }
 0xbbc   :  { %v10649_v42 = vmul.f32 0.5, %v10646_v54 }
 0xbbd   :  { %v10650_v12 = vsub.f32 %v10630_v41, %v10648_v37 }
 0xbbe   :  { %v10651_v63 = vsub.f32 %v10631_v6, %v10649_v42 }
 0xbbf   :  { %v10652_v10 = vmul.f32 %v10650_v12, %v10650_v12 }
 0xbc0   :  { %v10653_v22 = vmul.f32 %v10651_v63, %v10651_v63 }
 0xbc1   :  { %v10654_v8 = vsel %vm10632_vm1, %v10652_v10, 0.0 }
 0xbc2   :  { %v10655_v57 = vrot.slane %v10654_v8, 4  ;;  %v10661_v40 = vsel %vm10632_vm1, %v10653_v22, 0.0 }
 0xbc3   :  { %v10662_v47 = vrot.slane %v10661_v40, 4 }
 0xbc4   :  { %v10656_v58 = vadd.f32 %v10655_v57, %v10654_v8 }
 0xbc5   :  { %v10663_v60 = vadd.f32 %v10662_v47, %v10661_v40 }
 0xbc6   :  { %v10657_v39 = vrot.slane %v10656_v58, 2 }
 0xbc7   :  { %v10664_v21 = vrot.slane %v10663_v60, 2 }
 0xbc8   :  { %v10658_v27 = vadd.f32 %v10657_v39, %v10656_v58 }
 0xbc9   :  { %v10665_v29 = vadd.f32 %v10664_v21, %v10663_v60 }
 0xbca   :  { %v10659_v24 = vrot.slane %v10658_v27, 1 }
 0xbcb   :  { %v10666_v45 = vrot.slane %v10665_v29, 1 }
 0xbcc   :  { %v10660_v49 = vadd.f32 %v10659_v24, %v10658_v27 }
 0xbcd   :  { %v10667_v13 = vadd.f32 %v10666_v45, %v10665_v29 }
 0xbce   :  { %v10668_v48 = vmul.f32 0.5, %v10660_v49 }
 0xbcf   :  { %v10669_v35 = vmul.f32 0.5, %v10667_v13 }
 0xbd0   :  { %v10670_v34 = vadd.f32 1e-05, %v10668_v48 }
 0xbd1   :  { %v10671_v51 = vadd.f32 1e-05, %v10669_v35 }
 0xbd2   :  { %11787 = vrsqrt.f32 %v10670_v34 }
 0xbd3   :  { %11789 = vrsqrt.f32 %v10671_v51 }
 0xbdc   :  { %v11788_v11 = vpop.eup %11787 }
 0xbdd   :  { %v11790_v61 = vpop.eup %11789  ;;  %v10686_v2 = vmul.f32 %v11788_v11, %v10679_v23 }
 0xbde   :  { %v10687_v46 = vmul.f32 %v11790_v61, %v10683_v59 }
 0xbdf   :  { %v10691_v17 = vrot.slane %v10686_v2, %v16651_v50 }
 0xbe0   :  { %v10695_v25 = vrot.slane %v10687_v46, %v16651_v50 }
 0xbe1   :  { %v10696_v43 = vmul.f32 %v10691_v17, %v10650_v12 }
 0xbe2   :  { %v10697_v0 = vmul.f32 %v10695_v25, %v10651_v63 }
 0xbe3   :  { %v16357_v14 = vadd.f32 %v10703_v55, %v10696_v43 }
 0xbe4   :  { %v10711_v53 = vadd.f32 %v10707_v44, %v10697_v0 }
 0xbe5   :  { %12345 = dma.done.wait [#allocation6 + $0x2], 16384 }
 0xbe6   :  { %12346 = vsyncadd [#allocation6 + $0x2], 4294950912  ;;  %v16359_v4 = vpack.c.bf16 %v10711_v53, %v10711_v53  ;;  %v10719_v28 = vld [vmem:[#allocation4 + $0x8] sm:$0xff]  ;;  %v10721_v3 = vld [vmem:[#allocation4 + $0x18] sm:$0xff] }
 0xbe7   :  { %v10718_v16 = vld [vmem:[#allocation4] sm:$0xff]  ;;  %10888 = vmatprep.subr.bf16.mxu0 %v10719_v28  ;;  %10929 = vmatprep.subr.bf16.mxu1 %v10721_v3  ;;  %v10720_v9 = vld [vmem:[#allocation4 + $0x10] sm:$0xff]  ;;  %v10727_v41 = vld [vmem:[#allocation4 + $0x48] sm:$0xff] }
 0xbe8   :  { %10920 = vmatprep.mubr.bf16.mxu0 %v16359_v4  ;;  %10961 = vmatprep.mubr.bf16.mxu1 %v16359_v4  ;;  %v10729_v6 = vld [vmem:[#allocation4 + $0x58] sm:$0xff]  ;;  %v10726_v19 = vld [vmem:[#allocation4 + $0x40] sm:$0xff]  ;;  %v10728_v18 = vld [vmem:[#allocation4 + $0x50] sm:$0xff] }
 0xbe9   :  { %10889 = vmatpush1.bf16.msra.mxu0 %v10718_v16  ;;  %10930 = vmatpush1.bf16.msra.mxu1 %v10720_v9  ;;  %v10735_v1 = vld [vmem:[#allocation4 + $0x88] sm:$0xff]  ;;  %v10737_v32 = vld [vmem:[#allocation4 + $0x98] sm:$0xff]  ;;  %v10734_v33 = vld [vmem:[#allocation4 + $0x80] sm:$0xff] }
 0xbea   :  { %10890 = vmatprep.subr.bf16.mxu0 %v10727_v41  ;;  %10931 = vmatprep.subr.bf16.mxu1 %v10729_v6  ;;  %v10736_v52 = vld [vmem:[#allocation4 + $0x90] sm:$0xff]  ;;  %v10743_v20 = vld [vmem:[#allocation4 + $0xc8] sm:$0xff]  ;;  %v10745_v26 = vld [vmem:[#allocation4 + $0xd8] sm:$0xff] }
 0xbeb   :  { %v10742_v5 = vld [vmem:[#allocation4 + $0xc0] sm:$0xff]  ;;  %v10744_v62 = vld [vmem:[#allocation4 + $0xd0] sm:$0xff]  ;;  %v10751_v38 = vld [vmem:[#allocation4 + $0x108] sm:$0xff] }
 0xbec   :  { %v10753_v7 = vld [vmem:[#allocation4 + $0x118] sm:$0xff]  ;;  %v10750_v30 = vld [vmem:[#allocation4 + $0x100] sm:$0xff]  ;;  %v10752_v54 = vld [vmem:[#allocation4 + $0x110] sm:$0xff] }
 0xbed   :  { %10891 = vmatpush1.bf16.msra.mxu0 %v10726_v19  ;;  %10932 = vmatpush1.bf16.msra.mxu1 %v10728_v18  ;;  %v10759_v37 = vld [vmem:[#allocation4 + $0x148] sm:$0xff]  ;;  %v10761_v42 = vld [vmem:[#allocation4 + $0x158] sm:$0xff]  ;;  %v10758_v12 = vld [vmem:[#allocation4 + $0x140] sm:$0xff]  ;;  %v16365_v18 = vpack.c.bf16 %v16357_v14, %v16357_v14 }
 0xbee   :  { %10892 = vmatprep.subr.bf16.mxu0 %v10735_v1  ;;  %10933 = vmatprep.subr.bf16.mxu1 %v10737_v32  ;;  %v10760_v63 = vld [vmem:[#allocation4 + $0x150] sm:$0xff]  ;;  %v10767_v10 = vld [vmem:[#allocation4 + $0x188] sm:$0xff]  ;;  %v10769_v22 = vld [vmem:[#allocation4 + $0x198] sm:$0xff] }
 0xbef   :  { %v10766_v8 = vld [vmem:[#allocation4 + $0x180] sm:$0xff]  ;;  %v10768_v57 = vld [vmem:[#allocation4 + $0x190] sm:$0xff]  ;;  %v10775_v40 = vld [vmem:[#allocation4 + $0x1c8] sm:$0xff] }
 0xbf0   :  { %v10777_v47 = vld [vmem:[#allocation4 + $0x1d8] sm:$0xff]  ;;  %v10774_v58 = vld [vmem:[#allocation4 + $0x1c0] sm:$0xff]  ;;  %v10776_v60 = vld [vmem:[#allocation4 + $0x1d0] sm:$0xff] }
 0xbf1   :  { %10893 = vmatpush1.bf16.msra.mxu0 %v10734_v33  ;;  %10934 = vmatpush1.bf16.msra.mxu1 %v10736_v52  ;;  %v10783_v39 = vld [vmem:[#allocation4 + $0x208] sm:$0xff]  ;;  %v10785_v21 = vld [vmem:[#allocation4 + $0x218] sm:$0xff]  ;;  %v10782_v27 = vld [vmem:[#allocation4 + $0x200] sm:$0xff] }
 0xbf2   :  { %10894 = vmatprep.subr.bf16.mxu0 %v10743_v20  ;;  %10935 = vmatprep.subr.bf16.mxu1 %v10745_v26  ;;  %v10784_v29 = vld [vmem:[#allocation4 + $0x210] sm:$0xff]  ;;  %v10791_v24 = vld [vmem:[#allocation4 + $0x248] sm:$0xff]  ;;  %v10793_v45 = vld [vmem:[#allocation4 + $0x258] sm:$0xff] }
 0xbf3   :  { %v10790_v49 = vld [vmem:[#allocation4 + $0x240] sm:$0xff]  ;;  %v10792_v13 = vld [vmem:[#allocation4 + $0x250] sm:$0xff]  ;;  %v10799_v48 = vld [vmem:[#allocation4 + $0x288] sm:$0xff] }
 0xbf4   :  { %v10801_v35 = vld [vmem:[#allocation4 + $0x298] sm:$0xff]  ;;  %v10798_v34 = vld [vmem:[#allocation4 + $0x280] sm:$0xff]  ;;  %v10800_v51 = vld [vmem:[#allocation4 + $0x290] sm:$0xff] }
 0xbf5   :  { %10895 = vmatpush1.bf16.msra.mxu0 %v10742_v5  ;;  %10936 = vmatpush1.bf16.msra.mxu1 %v10744_v62  ;;  %v10807_v56 = vld [vmem:[#allocation4 + $0x2c8] sm:$0xff]  ;;  %v10809_v23 = vld [vmem:[#allocation4 + $0x2d8] sm:$0xff]  ;;  %v10806_v59 = vld [vmem:[#allocation4 + $0x2c0] sm:$0xff] }
 0xbf6   :  { %10896 = vmatprep.subr.bf16.mxu0 %v10751_v38  ;;  %10937 = vmatprep.subr.bf16.mxu1 %v10753_v7  ;;  %v10808_v11 = vld [vmem:[#allocation4 + $0x2d0] sm:$0xff]  ;;  %v10815_v31 = vld [vmem:[#allocation4 + $0x308] sm:$0xff]  ;;  %v10817_v61 = vld [vmem:[#allocation4 + $0x318] sm:$0xff] }
 0xbf7   :  { %v10814_v2 = vld [vmem:[#allocation4 + $0x300] sm:$0xff]  ;;  %v10816_v46 = vld [vmem:[#allocation4 + $0x310] sm:$0xff]  ;;  %v10823_v17 = vld [vmem:[#allocation4 + $0x348] sm:$0xff] }
 0xbf8   :  { %v10825_v55 = vld [vmem:[#allocation4 + $0x358] sm:$0xff]  ;;  %v10822_v25 = vld [vmem:[#allocation4 + $0x340] sm:$0xff]  ;;  %v10824_v44 = vld [vmem:[#allocation4 + $0x350] sm:$0xff] }
 0xbf9   :  { %10897 = vmatpush1.bf16.msra.mxu0 %v10750_v30  ;;  %10938 = vmatpush1.bf16.msra.mxu1 %v10752_v54  ;;  %v10831_v43 = vld [vmem:[#allocation4 + $0x388] sm:$0xff]  ;;  %v10833_v0 = vld [vmem:[#allocation4 + $0x398] sm:$0xff]  ;;  %v10830_v53 = vld [vmem:[#allocation4 + $0x380] sm:$0xff] }
 0xbfa   :  { %10898 = vmatprep.subr.bf16.mxu0 %v10759_v37  ;;  %10939 = vmatprep.subr.bf16.mxu1 %v10761_v42  ;;  %v10832_v28 = vld [vmem:[#allocation4 + $0x390] sm:$0xff]  ;;  %v10839_v3 = vld [vmem:[#allocation4 + $0x3c8] sm:$0xff]  ;;  %v10841_v16 = vld [vmem:[#allocation4 + $0x3d8] sm:$0xff] }
 0xbfb   :  { %v10838_v9 = vld [vmem:[#allocation4 + $0x3c0] sm:$0xff]  ;;  %v10840_v41 = vld [vmem:[#allocation4 + $0x3d0] sm:$0xff]  ;;  %v10723_v6 = vld [vmem:[#allocation4 + $0x28] sm:$0xff] }
 0xbfc   :  { %v10725_v19 = vld [vmem:[#allocation4 + $0x38] sm:$0xff]  ;;  %v10722_v1 = vld [vmem:[#allocation4 + $0x20] sm:$0xff]  ;;  %v10724_v32 = vld [vmem:[#allocation4 + $0x30] sm:$0xff] }
 0xbfd   :  { %10899 = vmatpush1.bf16.msra.mxu0 %v10758_v12  ;;  %10940 = vmatpush1.bf16.msra.mxu1 %v10760_v63  ;;  %v10731_v33 = vld [vmem:[#allocation4 + $0x68] sm:$0xff]  ;;  %v10733_v52 = vld [vmem:[#allocation4 + $0x78] sm:$0xff]  ;;  %v10730_v20 = vld [vmem:[#allocation4 + $0x60] sm:$0xff] }
 0xbfe   :  { %10900 = vmatprep.subr.bf16.mxu0 %v10767_v10  ;;  %10941 = vmatprep.subr.bf16.mxu1 %v10769_v22  ;;  %v10732_v26 = vld [vmem:[#allocation4 + $0x70] sm:$0xff]  ;;  %v10739_v14 = vld [vmem:[#allocation4 + $0xa8] sm:$0xff]  ;;  %v10741_v5 = vld [vmem:[#allocation4 + $0xb8] sm:$0xff] }
 0xbff   :  { %v10738_v62 = vld [vmem:[#allocation4 + $0xa0] sm:$0xff]  ;;  %v10740_v38 = vld [vmem:[#allocation4 + $0xb0] sm:$0xff]  ;;  %v10747_v7 = vld [vmem:[#allocation4 + $0xe8] sm:$0xff] }
 0xc00   :  { %v10749_v30 = vld [vmem:[#allocation4 + $0xf8] sm:$0xff]  ;;  %v10746_v54 = vld [vmem:[#allocation4 + $0xe0] sm:$0xff]  ;;  %v10748_v37 = vld [vmem:[#allocation4 + $0xf0] sm:$0xff] }
 0xc01   :  { %10901 = vmatpush1.bf16.msra.mxu0 %v10766_v8  ;;  %10942 = vmatpush1.bf16.msra.mxu1 %v10768_v57  ;;  %v10755_v42 = vld [vmem:[#allocation4 + $0x128] sm:$0xff]  ;;  %v10757_v12 = vld [vmem:[#allocation4 + $0x138] sm:$0xff]  ;;  %v10756_v63 = vld [vmem:[#allocation4 + $0x130] sm:$0xff] }
 0xc02   :  { %10902 = vmatprep.subr.bf16.mxu0 %v10775_v40  ;;  %10943 = vmatprep.subr.bf16.mxu1 %v10777_v47  ;;  %v10763_v10 = vld [vmem:[#allocation4 + $0x168] sm:$0xff]  ;;  %v10765_v22 = vld [vmem:[#allocation4 + $0x178] sm:$0xff]  ;;  %v10762_v8 = vld [vmem:[#allocation4 + $0x160] sm:$0xff] }
 0xc03   :  { %v10764_v57 = vld [vmem:[#allocation4 + $0x170] sm:$0xff]  ;;  %v10771_v40 = vld [vmem:[#allocation4 + $0x1a8] sm:$0xff]  ;;  %v10773_v47 = vld [vmem:[#allocation4 + $0x1b8] sm:$0xff] }
 0xc05   :  { %10903 = vmatpush1.bf16.msra.mxu0 %v10774_v58  ;;  %10944 = vmatpush1.bf16.msra.mxu1 %v10776_v60  ;;  %v10770_v58 = vld [vmem:[#allocation4 + $0x1a0] sm:$0xff]  ;;  %v10772_v60 = vld [vmem:[#allocation4 + $0x1b0] sm:$0xff] }
 0xc06   :  { %10904 = vmatprep.subr.bf16.mxu0 %v10783_v39  ;;  %10945 = vmatprep.subr.bf16.mxu1 %v10785_v21  ;;  %v10779_v39 = vld [vmem:[#allocation4 + $0x1e8] sm:$0xff]  ;;  %v10781_v21 = vld [vmem:[#allocation4 + $0x1f8] sm:$0xff] }
 0xc09   :  { %10905 = vmatpush1.bf16.msra.mxu0 %v10782_v27  ;;  %10946 = vmatpush1.bf16.msra.mxu1 %v10784_v29  ;;  %v10778_v27 = vld [vmem:[#allocation4 + $0x1e0] sm:$0xff]  ;;  %v10780_v29 = vld [vmem:[#allocation4 + $0x1f0] sm:$0xff] }
 0xc0a   :  { %10906 = vmatprep.subr.bf16.mxu0 %v10791_v24  ;;  %10947 = vmatprep.subr.bf16.mxu1 %v10793_v45  ;;  %v10787_v24 = vld [vmem:[#allocation4 + $0x228] sm:$0xff]  ;;  %v10789_v45 = vld [vmem:[#allocation4 + $0x238] sm:$0xff] }
 0xc0d   :  { %10907 = vmatpush1.bf16.msra.mxu0 %v10790_v49  ;;  %10948 = vmatpush1.bf16.msra.mxu1 %v10792_v13  ;;  %v10786_v49 = vld [vmem:[#allocation4 + $0x220] sm:$0xff]  ;;  %v10788_v13 = vld [vmem:[#allocation4 + $0x230] sm:$0xff] }
 0xc0e   :  { %10908 = vmatprep.subr.bf16.mxu0 %v10799_v48  ;;  %10949 = vmatprep.subr.bf16.mxu1 %v10801_v35  ;;  %v10795_v48 = vld [vmem:[#allocation4 + $0x268] sm:$0xff]  ;;  %v10797_v35 = vld [vmem:[#allocation4 + $0x278] sm:$0xff] }
 0xc11   :  { %10909 = vmatpush1.bf16.msra.mxu0 %v10798_v34  ;;  %10950 = vmatpush1.bf16.msra.mxu1 %v10800_v51  ;;  %v10794_v34 = vld [vmem:[#allocation4 + $0x260] sm:$0xff]  ;;  %v10796_v51 = vld [vmem:[#allocation4 + $0x270] sm:$0xff] }
 0xc12   :  { %10910 = vmatprep.subr.bf16.mxu0 %v10807_v56  ;;  %10951 = vmatprep.subr.bf16.mxu1 %v10809_v23  ;;  %v10803_v56 = vld [vmem:[#allocation4 + $0x2a8] sm:$0xff]  ;;  %v10805_v23 = vld [vmem:[#allocation4 + $0x2b8] sm:$0xff] }
 0xc15   :  { %10911 = vmatpush1.bf16.msra.mxu0 %v10806_v59  ;;  %10952 = vmatpush1.bf16.msra.mxu1 %v10808_v11  ;;  %v10802_v59 = vld [vmem:[#allocation4 + $0x2a0] sm:$0xff]  ;;  %v10804_v11 = vld [vmem:[#allocation4 + $0x2b0] sm:$0xff] }
 0xc16   :  { %10912 = vmatprep.subr.bf16.mxu0 %v10815_v31  ;;  %10953 = vmatprep.subr.bf16.mxu1 %v10817_v61  ;;  %v10811_v31 = vld [vmem:[#allocation4 + $0x2e8] sm:$0xff]  ;;  %v10813_v61 = vld [vmem:[#allocation4 + $0x2f8] sm:$0xff] }
 0xc19   :  { %10913 = vmatpush1.bf16.msra.mxu0 %v10814_v2  ;;  %10954 = vmatpush1.bf16.msra.mxu1 %v10816_v46  ;;  %v10810_v2 = vld [vmem:[#allocation4 + $0x2e0] sm:$0xff]  ;;  %v10812_v46 = vld [vmem:[#allocation4 + $0x2f0] sm:$0xff] }
 0xc1a   :  { %10914 = vmatprep.subr.bf16.mxu0 %v10823_v17  ;;  %10955 = vmatprep.subr.bf16.mxu1 %v10825_v55  ;;  %v10819_v17 = vld [vmem:[#allocation4 + $0x328] sm:$0xff]  ;;  %v10821_v55 = vld [vmem:[#allocation4 + $0x338] sm:$0xff] }
 0xc1d   :  { %10915 = vmatpush1.bf16.msra.mxu0 %v10822_v25  ;;  %10956 = vmatpush1.bf16.msra.mxu1 %v10824_v44  ;;  %v10818_v25 = vld [vmem:[#allocation4 + $0x320] sm:$0xff]  ;;  %v10820_v44 = vld [vmem:[#allocation4 + $0x330] sm:$0xff] }
 0xc1e   :  { %10916 = vmatprep.subr.bf16.mxu0 %v10831_v43  ;;  %10957 = vmatprep.subr.bf16.mxu1 %v10833_v0  ;;  %v10827_v43 = vld [vmem:[#allocation4 + $0x368] sm:$0xff]  ;;  %v10829_v0 = vld [vmem:[#allocation4 + $0x378] sm:$0xff] }
 0xc21   :  { %10917 = vmatpush1.bf16.msra.mxu0 %v10830_v53  ;;  %10958 = vmatpush1.bf16.msra.mxu1 %v10832_v28  ;;  %v10826_v53 = vld [vmem:[#allocation4 + $0x360] sm:$0xff]  ;;  %v10828_v28 = vld [vmem:[#allocation4 + $0x370] sm:$0xff] }
 0xc22   :  { %10918 = vmatprep.subr.bf16.mxu0 %v10839_v3  ;;  %10959 = vmatprep.subr.bf16.mxu1 %v10841_v16  ;;  %v10835_v3 = vld [vmem:[#allocation4 + $0x3a8] sm:$0xff]  ;;  %v10837_v16 = vld [vmem:[#allocation4 + $0x3b8] sm:$0xff] }
 0xc25   :  { %10919 = vmatpush1.bf16.msra.mxu0 %v10838_v9  ;;  %10960 = vmatpush1.bf16.msra.mxu1 %v10840_v41  ;;  %v10834_v9 = vld [vmem:[#allocation4 + $0x3a0] sm:$0xff]  ;;  %v10836_v41 = vld [vmem:[#allocation4 + $0x3b0] sm:$0xff] }
 0xc26   :  { %10970 = vmatprep.subr.bf16.mxu0 %v10723_v6  ;;  %11011 = vmatprep.subr.bf16.mxu1 %v10725_v19  ;;  %v10843_v6 = vld [vmem:[#allocation4 + $0x3e8] sm:$0xff]  ;;  %v10845_v19 = vld [vmem:[#allocation4 + $0x3f8] sm:$0xff] }
 0xc28   :  { %10921 = vmatmul.mubr.bf16.vlgmr.msra.gmra.mrb[96].mxu0 %v16365_v18  ;;  %10962 = vmatmul.mubr.bf16.vlgmr.msra.gmra.mrb[104].mxu1 %v16365_v18 }
 0xc29   :  { %10971 = vmatpush1.bf16.msra.mxu0 %v10722_v1  ;;  %11012 = vmatpush1.bf16.msra.mxu1 %v10724_v32  ;;  %v10842_v1 = vld [vmem:[#allocation4 + $0x3e0] sm:$0xff]  ;;  %v10844_v32 = vld [vmem:[#allocation4 + $0x3f0] sm:$0xff] }
 0xc2a   :  { %10972 = vmatprep.subr.bf16.mxu0 %v10731_v33  ;;  %11013 = vmatprep.subr.bf16.mxu1 %v10733_v52  ;;  %v10846_v33 = vld [vmem:[%s16498_s11] sm:$0xff] }
 0xc2b   :  { %11002 = vmatprep.mubr.bf16.mxu0 %v16359_v4  ;;  %11043 = vmatprep.mubr.bf16.mxu1 %v16359_v4  ;;  %v10754_v4 = vld [vmem:[#allocation4 + $0x120] sm:$0xff]  ;;  %v10851_v52 = vrot.slane %v10846_v33, %v16651_v50 }
 0xc2d   :  { %10973 = vmatpush1.bf16.msra.mxu0 %v10730_v20  ;;  %11014 = vmatpush1.bf16.msra.mxu1 %v10732_v26  ;;  %v16667_v20 = vld [vmem:[#allocation87_spill] sm:$0xff] }
 0xc2e   :  { %10974 = vmatprep.subr.bf16.mxu0 %v10739_v14  ;;  %11015 = vmatprep.subr.bf16.mxu1 %v10741_v5  ;;  %v10859_v26 = vrot.slane %v10846_v33, %v16667_v20  ;;  %v10855_v14 = vrot.slane %v10846_v33, %v16652_v15  ;;  %v16668_v5 = vld [vmem:[#allocation89_spill] sm:$0xff] }
 0xc31   :  { %10975 = vmatpush1.bf16.msra.mxu0 %v10738_v62  ;;  %11016 = vmatpush1.bf16.msra.mxu1 %v10740_v38  ;;  %v10863_v62 = vrot.slane %v10846_v33, %v16668_v5 }
 0xc32   :  { %10976 = vmatprep.subr.bf16.mxu0 %v10747_v7  ;;  %11017 = vmatprep.subr.bf16.mxu1 %v10749_v30 }
 0xc35   :  { %10977 = vmatpush1.bf16.msra.mxu0 %v10746_v54  ;;  %11018 = vmatpush1.bf16.msra.mxu1 %v10748_v37 }
 0xc36   :  { %10978 = vmatprep.subr.bf16.mxu0 %v10755_v42  ;;  %11019 = vmatprep.subr.bf16.mxu1 %v10757_v12 }
 0xc39   :  { %10979 = vmatpush1.bf16.msra.mxu0 %v10754_v4  ;;  %11020 = vmatpush1.bf16.msra.mxu1 %v10756_v63 }
 0xc3a   :  { %10980 = vmatprep.subr.bf16.mxu0 %v10763_v10  ;;  %11021 = vmatprep.subr.bf16.mxu1 %v10765_v22 }
 0xc3d   :  { %10981 = vmatpush1.bf16.msra.mxu0 %v10762_v8  ;;  %11022 = vmatpush1.bf16.msra.mxu1 %v10764_v57 }
 0xc3e   :  { %10982 = vmatprep.subr.bf16.mxu0 %v10771_v40  ;;  %11023 = vmatprep.subr.bf16.mxu1 %v10773_v47  ;;  %v10866_v40 = vsub.s32 4, %v16653_v36  ;;  %v10874_v47 = vsub.s32 6, %v16653_v36 }
 0xc41   :  { %10983 = vmatpush1.bf16.msra.mxu0 %v10770_v58  ;;  %11024 = vmatpush1.bf16.msra.mxu1 %v10772_v60  ;;  %v10870_v58 = vsub.s32 5, %v16653_v36  ;;  %v10878_v60 = vsub.s32 7, %v16653_v36 }
 0xc42   :  { %10984 = vmatprep.subr.bf16.mxu0 %v10779_v39  ;;  %11025 = vmatprep.subr.bf16.mxu1 %v10781_v21  ;;  %v10867_v39 = vrot.slane %v10846_v33, %v10866_v40  ;;  %v10875_v21 = vrot.slane %v10846_v33, %v10874_v47 }
 0xc45   :  { %10985 = vmatpush1.bf16.msra.mxu0 %v10778_v27  ;;  %11026 = vmatpush1.bf16.msra.mxu1 %v10780_v29  ;;  %v10871_v27 = vrot.slane %v10846_v33, %v10870_v58  ;;  %v10879_v29 = vrot.slane %v10846_v33, %v10878_v60 }
 0xc46   :  { %10986 = vmatprep.subr.bf16.mxu0 %v10787_v24  ;;  %11027 = vmatprep.subr.bf16.mxu1 %v10789_v45 }
 0xc49   :  { %10987 = vmatpush1.bf16.msra.mxu0 %v10786_v49  ;;  %11028 = vmatpush1.bf16.msra.mxu1 %v10788_v13 }
 0xc4a   :  { %10988 = vmatprep.subr.bf16.mxu0 %v10795_v48  ;;  %11029 = vmatprep.subr.bf16.mxu1 %v10797_v35 }
 0xc4d   :  { %10989 = vmatpush1.bf16.msra.mxu0 %v10794_v34  ;;  %11030 = vmatpush1.bf16.msra.mxu1 %v10796_v51 }
 0xc4e   :  { %10990 = vmatprep.subr.bf16.mxu0 %v10803_v56  ;;  %11031 = vmatprep.subr.bf16.mxu1 %v10805_v23 }
 0xc51   :  { %10991 = vmatpush1.bf16.msra.mxu0 %v10802_v59  ;;  %11032 = vmatpush1.bf16.msra.mxu1 %v10804_v11 }
 0xc52   :  { %10992 = vmatprep.subr.bf16.mxu0 %v10811_v31  ;;  %11033 = vmatprep.subr.bf16.mxu1 %v10813_v61 }
 0xc55   :  { %10993 = vmatpush1.bf16.msra.mxu0 %v10810_v2  ;;  %11034 = vmatpush1.bf16.msra.mxu1 %v10812_v46  ;;  %v16669_v46 = vld [vmem:[#allocation29_spill] sm:$0xff] }
 0xc56   :  { %10994 = vmatprep.subr.bf16.mxu0 %v10819_v17  ;;  %11035 = vmatprep.subr.bf16.mxu1 %v10821_v55  ;;  %v16670_v17 = vld [vmem:[#allocation45_spill] sm:$0xff] }
 0xc59   :  { %10995 = vmatpush1.bf16.msra.mxu0 %v10818_v25  ;;  %11036 = vmatpush1.bf16.msra.mxu1 %v10820_v44 }
 0xc5a   :  { %10996 = vmatprep.subr.bf16.mxu0 %v10827_v43  ;;  %11037 = vmatprep.subr.bf16.mxu1 %v10829_v0 }
 0xc5d   :  { %10997 = vmatpush1.bf16.msra.mxu0 %v10826_v53  ;;  %11038 = vmatpush1.bf16.msra.mxu1 %v10828_v28 }
 0xc5e   :  { %10998 = vmatprep.subr.bf16.mxu0 %v10835_v3  ;;  %11039 = vmatprep.subr.bf16.mxu1 %v10837_v16 }
 0xc61   :  { %10999 = vmatpush1.bf16.msra.mxu0 %v10834_v9  ;;  %11040 = vmatpush1.bf16.msra.mxu1 %v10836_v41 }
 0xc62   :  { %11000 = vmatprep.subr.bf16.mxu0 %v10843_v6  ;;  %11041 = vmatprep.subr.bf16.mxu1 %v10845_v19 }
 0xc65   :  { %11001 = vmatpush1.bf16.msra.mxu0 %v10842_v1  ;;  %11042 = vmatpush1.bf16.msra.mxu1 %v10844_v32 }
 0xc66   :  { %11582 = vmatprep.subr.bf16.mxu0 %v16669_v46  ;;  %11604 = vmatprep.subr.bf16.mxu1 %v16670_v17 }
 0xc68   :  { %11003 = vmatmul.mubr.bf16.vlgmr.msra.gmra.mrb[100].mxu0 %v16365_v18  ;;  %11044 = vmatmul.mubr.bf16.vlgmr.msra.gmra.mrb[108].mxu1 %v16365_v18 }
 0xcfb   :  { %v10922_v38 = vpop.f32.mrb[96].mxu0  ;;  %v10963_v7 = vpop.f32.mrb[104].mxu1 }
 0xcfc   :  { %v16380_v30 = vadd.f32 %v10922_v38, %v10851_v52  ;;  %v16382_v54 = vadd.f32 %v10963_v7, %v10859_v26  ;;  %v10924_v37 = vpop.f32.mrb[97].mxu0  ;;  %v10965_v18 = vpop.f32.mrb[105].mxu1 }
 0xcfd   :  { %v10925_v42 = vadd.f32 %v10924_v37, %v10855_v14  ;;  %v10966_v12 = vadd.f32 %v10965_v18, %v10863_v62  ;;  %v10926_v4 = vpop.f32.mrb[98].mxu0  ;;  %v10967_v63 = vpop.f32.mrb[106].mxu1 }
 0xcfe   :  { %v11052_v50 = vmax.f32 %v16380_v30, 0.0  ;;  %v11054_v10 = vmax.f32 %v16382_v54, 0.0  ;;  %v10927_v22 = vpop.f32.mrb[99].mxu0  ;;  %v10968_v15 = vpop.f32.mrb[107].mxu1 }
 0xcff   :  { %v11053_v8 = vmax.f32 %v10925_v42, 0.0  ;;  %v11055_v57 = vmax.f32 %v10966_v12, 0.0 }
 0xd01   :  { %v11065_v55 = vpack.c.bf16 %v11053_v8, %v11053_v8  ;;  %v11067_v25 = vpack.c.bf16 %v11055_v57, %v11055_v57 }
 0xd3b   :  { %v11004_v24 = vpop.f32.mrb[100].mxu0  ;;  %v11045_v45 = vpop.f32.mrb[108].mxu1 }
 0xd3c   :  { %v16390_v49 = vadd.f32 %v11004_v24, %v10867_v39  ;;  %v16392_v13 = vadd.f32 %v11045_v45, %v10875_v21  ;;  %v11006_v48 = vpop.f32.mrb[101].mxu0  ;;  %v11047_v35 = vpop.f32.mrb[109].mxu1 }
 0xd3d   :  { %v11007_v34 = vadd.f32 %v11006_v48, %v10871_v27  ;;  %v11048_v51 = vadd.f32 %v11047_v35, %v10879_v29  ;;  %v11008_v56 = vpop.f32.mrb[102].mxu0  ;;  %v11049_v23 = vpop.f32.mrb[110].mxu1 }
 0xd3e   :  { %v11056_v59 = vmax.f32 %v16390_v49, 0.0  ;;  %v11058_v36 = vmax.f32 %v16392_v13, 0.0  ;;  %v11009_v11 = vpop.f32.mrb[103].mxu0  ;;  %v11050_v31 = vpop.f32.mrb[111].mxu1 }
 0xd3f   :  { %v11057_v61 = vmax.f32 %v11007_v34, 0.0  ;;  %v11059_v2 = vmax.f32 %v11048_v51, 0.0 }
 0xd40   :  { %12347 = dma.done.wait [#allocation6 + $0x3], 8192 }
 0xd41   :  { %12348 = vsyncadd [#allocation6 + $0x3], 4294959104  ;;  %v16671_v44 = vld [vmem:[#allocation21_spill] sm:$0xff]  ;;  %v16673_v0 = vld [vmem:[#allocation30_spill] sm:$0xff]  ;;  %11175 = vmatprep.mubr.bf16.mxu0 %v11065_v55  ;;  %11215 = vmatprep.mubr.bf16.mxu1 %v11067_v25  ;;  %v11064_v22 = vpack.c.bf16 %v11052_v50, %v11052_v50  ;;  %v11066_v15 = vpack.c.bf16 %v11054_v10, %v11054_v10  ;;  %v11069_v58 = vpack.c.bf16 %v11057_v61, %v11057_v61 }
 0xd42   :  { %11583 = vmatpush3.bf16.msra.mxu0 %v16671_v44  ;;  %v16672_v43 = vld [vmem:[#allocation37_spill] sm:$0xff]  ;;  %v16674_v53 = vld [vmem:[#allocation46_spill] sm:$0xff]  ;;  %v16677_v16 = vld [vmem:[#allocation31_spill] sm:$0xff]  ;;  %v11071_v60 = vpack.c.bf16 %v11059_v2, %v11059_v2 }
 0xd43   :  { %11605 = vmatpush3.bf16.msra.mxu1 %v16672_v43  ;;  %11584 = vmatprep.subr.bf16.mxu0 %v16673_v0  ;;  %v16675_v28 = vld [vmem:[#allocation22_spill] sm:$0xff]  ;;  %v16678_v9 = vld [vmem:[#allocation47_spill] sm:$0xff]  ;;  %v16681_v19 = vld [vmem:[#allocation32_spill] sm:$0xff] }
 0xd44   :  { %11606 = vmatprep.subr.bf16.mxu1 %v16674_v53  ;;  %v16676_v3 = vld [vmem:[#allocation38_spill] sm:$0xff]  ;;  %v16679_v41 = vld [vmem:[#allocation23_spill] sm:$0xff]  ;;  %v16682_v1 = vld [vmem:[#allocation48_spill] sm:$0xff] }
 0xd45   :  { %v16680_v6 = vld [vmem:[#allocation39_spill] sm:$0xff]  ;;  %v16683_v32 = vld [vmem:[#allocation24_spill] sm:$0xff]  ;;  %v16685_v52 = vld [vmem:[#allocation33_spill] sm:$0xff] }
 0xd46   :  { %11585 = vmatpush3.bf16.msra.mxu0 %v16675_v28  ;;  %v16684_v33 = vld [vmem:[#allocation40_spill] sm:$0xff]  ;;  %v16686_v20 = vld [vmem:[#allocation49_spill] sm:$0xff]  ;;  %v16689_v5 = vld [vmem:[#allocation34_spill] sm:$0xff]  ;;  %v11068_v28 = vpack.c.bf16 %v11056_v59, %v11056_v59 }
 0xd47   :  { %11607 = vmatpush3.bf16.msra.mxu1 %v16676_v3  ;;  %11586 = vmatprep.subr.bf16.mxu0 %v16677_v16  ;;  %v16687_v26 = vld [vmem:[#allocation25_spill] sm:$0xff]  ;;  %v16690_v62 = vld [vmem:[#allocation50_spill] sm:$0xff]  ;;  %v16693_v37 = vld [vmem:[#allocation35_spill] sm:$0xff]  ;;  %v11070_v3 = vpack.c.bf16 %v11058_v36, %v11058_v36 }
 0xd48   :  { %11608 = vmatprep.subr.bf16.mxu1 %v16678_v9  ;;  %v16688_v14 = vld [vmem:[#allocation41_spill] sm:$0xff]  ;;  %v16691_v38 = vld [vmem:[#allocation26_spill] sm:$0xff]  ;;  %v16694_v18 = vld [vmem:[#allocation51_spill] sm:$0xff] }
 0xd49   :  { %v16692_v7 = vld [vmem:[#allocation42_spill] sm:$0xff]  ;;  %v16695_v42 = vld [vmem:[#allocation27_spill] sm:$0xff]  ;;  %v16697_v4 = vld [vmem:[#allocation36_spill] sm:$0xff] }
 0xd4a   :  { %11587 = vmatpush3.bf16.msra.mxu0 %v16679_v41  ;;  %v16696_v12 = vld [vmem:[#allocation43_spill] sm:$0xff]  ;;  %v16698_v63 = vld [vmem:[#allocation52_spill] sm:$0xff]  ;;  %v16701_v40 = vld [vmem:[#allocation61_spill] sm:$0xff] }
 0xd4b   :  { %11609 = vmatpush3.bf16.msra.mxu1 %v16680_v6  ;;  %11588 = vmatprep.subr.bf16.mxu0 %v16681_v19  ;;  %v16699_v8 = vld [vmem:[#allocation28_spill] sm:$0xff]  ;;  %v16702_v47 = vld [vmem:[#allocation77_spill] sm:$0xff]  ;;  %v16705_v50 = vld [vmem:[#allocation62_spill] sm:$0xff] }
 0xd4c   :  { %11610 = vmatprep.subr.bf16.mxu1 %v16682_v1  ;;  %v16700_v57 = vld [vmem:[#allocation44_spill] sm:$0xff]  ;;  %v16703_v39 = vld [vmem:[#allocation53_spill] sm:$0xff]  ;;  %v16706_v54 = vld [vmem:[#allocation78_spill] sm:$0xff] }
 0xd4d   :  { %v16704_v30 = vld [vmem:[#allocation69_spill] sm:$0xff]  ;;  %v16707_v10 = vld [vmem:[#allocation54_spill] sm:$0xff]  ;;  %v16709_v27 = vld [vmem:[#allocation63_spill] sm:$0xff] }
 0xd4e   :  { %11589 = vmatpush3.bf16.msra.mxu0 %v16683_v32  ;;  %v16708_v21 = vld [vmem:[#allocation70_spill] sm:$0xff]  ;;  %v16710_v29 = vld [vmem:[#allocation79_spill] sm:$0xff]  ;;  %v16713_v48 = vld [vmem:[#allocation64_spill] sm:$0xff] }
 0xd4f   :  { %11611 = vmatpush3.bf16.msra.mxu1 %v16684_v33  ;;  %11590 = vmatprep.subr.bf16.mxu0 %v16685_v52  ;;  %v16711_v24 = vld [vmem:[#allocation55_spill] sm:$0xff]  ;;  %v16714_v35 = vld [vmem:[#allocation80_spill] sm:$0xff]  ;;  %v16717_v56 = vld [vmem:[#allocation65_spill] sm:$0xff] }
 0xd50   :  { %11612 = vmatprep.subr.bf16.mxu1 %v16686_v20  ;;  %v16712_v45 = vld [vmem:[#allocation71_spill] sm:$0xff]  ;;  %v16715_v34 = vld [vmem:[#allocation56_spill] sm:$0xff]  ;;  %v16718_v23 = vld [vmem:[#allocation81_spill] sm:$0xff] }
 0xd51   :  { %v16716_v51 = vld [vmem:[#allocation72_spill] sm:$0xff]  ;;  %v16719_v11 = vld [vmem:[#allocation57_spill] sm:$0xff]  ;;  %v16721_v61 = vld [vmem:[#allocation66_spill] sm:$0xff] }
 0xd52   :  { %11591 = vmatpush3.bf16.msra.mxu0 %v16687_v26  ;;  %v16720_v31 = vld [vmem:[#allocation73_spill] sm:$0xff]  ;;  %v16722_v2 = vld [vmem:[#allocation82_spill] sm:$0xff]  ;;  %v16725_v55 = vld [vmem:[#allocation67_spill] sm:$0xff] }
 0xd53   :  { %11613 = vmatpush3.bf16.msra.mxu1 %v16688_v14  ;;  %11592 = vmatprep.subr.bf16.mxu0 %v16689_v5  ;;  %v16723_v46 = vld [vmem:[#allocation58_spill] sm:$0xff]  ;;  %v16726_v25 = vld [vmem:[#allocation83_spill] sm:$0xff]  ;;  %v16729_v0 = vld [vmem:[#allocation68_spill] sm:$0xff] }
 0xd54   :  { %11614 = vmatprep.subr.bf16.mxu1 %v16690_v62  ;;  %v16724_v17 = vld [vmem:[#allocation74_spill] sm:$0xff]  ;;  %v16727_v44 = vld [vmem:[#allocation59_spill] sm:$0xff]  ;;  %v16730_v53 = vld [vmem:[#allocation84_spill] sm:$0xff] }
 0xd55   :  { %v16728_v43 = vld [vmem:[#allocation75_spill] sm:$0xff]  ;;  %v16731_v16 = vld [vmem:[#allocation60_spill] sm:$0xff] }
 0xd56   :  { %11593 = vmatpush3.bf16.msra.mxu0 %v16691_v38  ;;  %v16732_v9 = vld [vmem:[#allocation76_spill] sm:$0xff] }
 0xd57   :  { %11615 = vmatpush3.bf16.msra.mxu1 %v16692_v7  ;;  %11594 = vmatprep.subr.bf16.mxu0 %v16693_v37  ;;  %v11577_v19 = vld [vmem:[%s16499_s12] ss:$0 sm:$0xff]  ;;  %s12369_s12 = smov [#allocation10]  }
 0xd58   :  { %11616 = vmatprep.subr.bf16.mxu1 %v16694_v18  ;;  %s11310_s27 = sshll.u32 %s12369_s12, 4  ;;  %s11311_s27 = int_to_ptr.vmem [resolvable:$true] %s11310_s27 }
 0xd59   :  { %s12303_s15 = scalar_lea.vmem %s11311_s27, 32  ;;  %p12308_p3 = scmp.lt.s32.totalorder %s11311_s27, %s11311_s27 }
 0xd5a   :  { %11595 = vmatpush3.bf16.msra.mxu0 %v16695_v42  ;;  %p12304_p2 = scmp.ne.s32.totalorder %s11311_s27, %s12303_s15  ;;  %p12309_p4 = scmp.lt.s32.totalorder %s12303_s15, %s12303_s15 }
 0xd5b   :  { %11617 = vmatpush3.bf16.msra.mxu1 %v16696_v12  ;;  %11596 = vmatprep.subr.bf16.mxu0 %v16697_v4 }
 0xd5c   :  { %11618 = vmatprep.subr.bf16.mxu1 %v16698_v63  ;;  %p12310_p5 = por %p12309_p4, %p12308_p3 }
 0xd5e   :  { %11597 = vmatpush3.bf16.msra.mxu0 %v16699_v8  ;;  %p12311_p6 = pnand %p12310_p5, %p12304_p2 }
 0xd5f   :  { %11619 = vmatpush3.bf16.msra.mxu1 %v16700_v57  ;;  %11626 = vmatprep.subr.bf16.mxu0 %v16701_v40 }
 0xd60   :  { %11648 = vmatprep.subr.bf16.mxu1 %v16702_v47 }
 0xd61   :  { %11176 = vmatmul.mubr.bf16.vlgmr.msra.gmra.mrb[104].mxu0 %v11064_v22 }
 0xd62   :  { %11216 = vmatmul.mubr.bf16.vlgmr.msra.gmra.mrb[112].mxu1 %v11066_v15  ;;  %11627 = vmatpush3.bf16.msra.mxu0 %v16703_v39 }
 0xd63   :  { %11649 = vmatpush3.bf16.msra.mxu1 %v16704_v30  ;;  %11628 = vmatprep.subr.bf16.mxu0 %v16705_v50 }
 0xd64   :  { %11650 = vmatprep.subr.bf16.mxu1 %v16706_v54  ;;  %11255 = vmatprep.mubr.bf16.mxu0 %v11069_v58 }
 0xd65   :  { %11295 = vmatprep.mubr.bf16.mxu1 %v11071_v60 }
 0xd66   :  { %11629 = vmatpush3.bf16.msra.mxu0 %v16707_v10 }
 0xd67   :  { %11651 = vmatpush3.bf16.msra.mxu1 %v16708_v21  ;;  %11630 = vmatprep.subr.bf16.mxu0 %v16709_v27 }
 0xd68   :  { %11652 = vmatprep.subr.bf16.mxu1 %v16710_v29 }
 0xd6a   :  { %11631 = vmatpush3.bf16.msra.mxu0 %v16711_v24 }
 0xd6b   :  { %11653 = vmatpush3.bf16.msra.mxu1 %v16712_v45  ;;  %11632 = vmatprep.subr.bf16.mxu0 %v16713_v48 }
 0xd6c   :  { %11654 = vmatprep.subr.bf16.mxu1 %v16714_v35 }
 0xd6e   :  { %11633 = vmatpush3.bf16.msra.mxu0 %v16715_v34 }
 0xd6f   :  { %11655 = vmatpush3.bf16.msra.mxu1 %v16716_v51  ;;  %11634 = vmatprep.subr.bf16.mxu0 %v16717_v56 }
 0xd70   :  { %11656 = vmatprep.subr.bf16.mxu1 %v16718_v23 }
 0xd72   :  { %11635 = vmatpush3.bf16.msra.mxu0 %v16719_v11 }
 0xd73   :  { %11657 = vmatpush3.bf16.msra.mxu1 %v16720_v31  ;;  %11636 = vmatprep.subr.bf16.mxu0 %v16721_v61 }
 0xd74   :  { %11658 = vmatprep.subr.bf16.mxu1 %v16722_v2 }
 0xd76   :  { %11637 = vmatpush3.bf16.msra.mxu0 %v16723_v46 }
 0xd77   :  { %11659 = vmatpush3.bf16.msra.mxu1 %v16724_v17  ;;  %11638 = vmatprep.subr.bf16.mxu0 %v16725_v55 }
 0xd78   :  { %11660 = vmatprep.subr.bf16.mxu1 %v16726_v25 }
 0xd7a   :  { %11639 = vmatpush3.bf16.msra.mxu0 %v16727_v44 }
 0xd7b   :  { %11661 = vmatpush3.bf16.msra.mxu1 %v16728_v43  ;;  %11640 = vmatprep.subr.bf16.mxu0 %v16729_v0 }
 0xd7c   :  { %11662 = vmatprep.subr.bf16.mxu1 %v16730_v53 }
 0xd7e   :  { %11641 = vmatpush3.bf16.msra.mxu0 %v16731_v16 }
 0xd7f   :  { %11663 = vmatpush3.bf16.msra.mxu1 %v16732_v9 }
 0xd81   :  { %11256 = vmatmul.mubr.bf16.vlgmr.msra.gmra.mrb[108].mxu0 %v11068_v28 }
 0xd82   :  { %11296 = vmatmul.mubr.bf16.vlgmr.msra.gmra.mrb[116].mxu1 %v11070_v3 }
 0xe34   :  { %v11598_v41 = vpop.f32.mrb[104].mxu0 }
 0xe35   :  { %v11620_v6 = vpop.f32.mrb[112].mxu1  ;;  %v11599_v1 = vpop.f32.mrb[105].mxu0 }
 0xe36   :  { %v11621_v49 = vpop.f32.mrb[113].mxu1  ;;  %v11600_v32 = vadd.f32 %v11599_v1, %v11598_v41  ;;  %v11601_v33 = vpop.f32.mrb[106].mxu0 }
 0xe37   :  { %v11622_v59 = vadd.f32 %v11621_v49, %v11620_v6  ;;  %v11623_v13 = vpop.f32.mrb[114].mxu1  ;;  %v11602_v52 = vpop.f32.mrb[107].mxu0 }
 0xe38   :  { %v11624_v36 = vpop.f32.mrb[115].mxu1  ;;  %v11178_v20 = vadd.f32 %v11600_v32, %v11577_v19 }
 0xe3a   :  { %v11218_v26 = vadd.f32 %v11622_v59, %v11178_v20 }
 0xe54   :  { %v11642_v14 = vpop.f32.mrb[108].mxu0 }
 0xe55   :  { %v11664_v5 = vpop.f32.mrb[116].mxu1  ;;  %v11643_v62 = vpop.f32.mrb[109].mxu0 }
 0xe56   :  { %v11665_v38 = vpop.f32.mrb[117].mxu1  ;;  %v11644_v7 = vadd.f32 %v11643_v62, %v11642_v14  ;;  %v11645_v18 = vpop.f32.mrb[110].mxu0 }
 0xe57   :  { %v11666_v37 = vadd.f32 %v11665_v38, %v11664_v5  ;;  %v11667_v42 = vpop.f32.mrb[118].mxu1  ;;  %v11646_v12 = vpop.f32.mrb[111].mxu0 }
 0xe58   :  { %v11668_v4 = vpop.f32.mrb[119].mxu1  ;;  %v11258_v63 = vadd.f32 %v11644_v7, %v11218_v26 }
 0xe5a   :  { %v11298_v22 = vadd.f32 %v11666_v37, %v11258_v63 }
 0xe5c   :  { %11303 = vst [vmem:[#allocation10] sm:$0x3] %v11298_v22 }
 0xe5d   :  { %12314 = shalt.err (!%p12311_p6)
}
 0xe5e   :  { %s12315_s0 = scalar_lea.hbm %s16504_s17, 32 }
 0xe5f   :  { %p12316_p7 = scmp.ne.s32.totalorder %s16504_s17, %s12315_s0  ;;  %p12319_p8 = scmp.lt.u32.totalorder %s12315_s0, %s16504_s17 }
 0xe61   :  { %p12321_p9 = pnand %p12319_p8, %p12316_p7 }
 0xe63   :  { %12324 = shalt.err (!%p12321_p9)
}
 0xe64   :  { %11313 = dma.vmem_to_hbm [thread:$0]  %s11311_s27, 32, %s16504_s17, [#allocation11]  }
 0xe65   :  { %12349 = dma.done.wait [#allocation11], 32  }
 0xe66   :  { %12350 = vsyncadd [#allocation11], 4294967264 }
 0xe67   :  { %11317 = vsyncpa [#allocation11], 1 }
 0xe68   :  { %11318 = vsyncmov [#allocation6] }
 0xe6b   :  { %s11319_s21 = vpop.sfrf %11318 }
 0xe6c   :  { %p11578_p10 = scmp.ne.s32.totalorder %s11319_s21, 0 }
 0xe6e   :  { %11323 = shalt.err (%p11578_p10)  }
 0xe6f   :  { %11325 = vsyncmov [#allocation6 + $0x1] }
 0xe72   :  { %s11326_s22 = vpop.sfrf %11325 }
 0xe73   :  { %p11579_p11 = scmp.ne.s32.totalorder %s11326_s22, 0 }
 0xe75   :  { %11330 = shalt.err (%p11579_p11)  }
 0xe76   :  { %11332 = vsyncmov [#allocation6 + $0x2] }
 0xe79   :  { %s11333_s3 = vpop.sfrf %11332 }
 0xe7a   :  { %p11580_p12 = scmp.ne.s32.totalorder %s11333_s3, 0 }
 0xe7c   :  { %11337 = shalt.err (%p11580_p12)  }
 0xe7d   :  { %11339 = vsyncmov [#allocation6 + $0x3] }
 0xe80   :  { %s11340_s4 = vpop.sfrf %11339 }
 0xe81   :  { %p11581_p13 = scmp.ne.s32.totalorder %s11340_s4, 0 }
 0xe83   :  { %11344 = shalt.err (%p11581_p13)  }

</bundles_post_ra>
